<compile_context>
chip_gen: v5e
topology: v5e:2x2
jax: 0.10.0
libtpu: 0.0.40
codegen_flags: <defaults>
</compile_context>

<pallas_src>
import math
from functools import partial

import jax
import jax.numpy as jnp
from jax import lax
from jax.experimental import pallas as pl
from jax.experimental.pallas import tpu as pltpu

_EPS = 1e-5


# ----------------------------------------------------------------------------
# helpers
# ----------------------------------------------------------------------------
def _vmem_limit_bytes():
    """Generation-aware scoped-VMEM budget (~7/8 of physical VMEM per core)."""
    cap = 64 << 20  # conservative fallback (v7x per-TC VMEM)
    try:
        info = pltpu.get_tpu_info()
        cap = int(getattr(info, "vmem_capacity_bytes", cap)) or cap
    except Exception:
        pass
    return max(32 << 20, (cap * 7) // 8)


def _pick_row_tile(H, W, cmax, budget_bytes=6 << 20, cap=128):
    """Largest multiple-of-8 divisor of H (<= cap) whose f32 in-kernel
    intermediates fit a VMEM budget."""
    cands = [d for d in range(8, min(H, cap) + 1, 8) if H % d == 0]
    if not cands:
        # TODO(synk): awkward H (no multiple-of-8 divisor) -> single full-height
        # tile instead of a cdiv grid with a masked tail.
        return H
    per_row = W * cmax * 4 * 6  # rough f32 footprint of window/acts/acc per tile row
    best = cands[0]
    for th in cands:
        if (th + 4) * per_row <= budget_bytes:
            best = th
    return best


def _const_spec(a):
    """Full-array VMEM block with a constant index map (fetched once)."""
    n = a.ndim
    return pl.BlockSpec(a.shape, lambda b, i: (0,) * n)


def _x_specs(H, W, Cin, TH, HB):
    """Center row tile + clamped 8-row top/bottom halo blocks of the input."""
    nHB = pl.cdiv(H, HB)
    nTB = max(TH // HB, 1)
    xc = pl.BlockSpec((1, TH, W, Cin), lambda b, i: (b, i, 0, 0))
    xt = pl.BlockSpec((1, HB, W, Cin),
                      lambda b, i: (b, jnp.maximum(i * nTB - 1, 0), 0, 0))
    xb = pl.BlockSpec((1, HB, W, Cin),
                      lambda b, i: (b, jnp.minimum((i + 1) * nTB, nHB - 1), 0, 0))
    return [xc, xt, xb]


def _shifted_taps(rows_f32, W, cdtype):
    """Column taps for a 3x3 conv with zero padding in W.

    rows_f32: (R, W, C) f32.  Returns (right, center, left) in `cdtype` where
    right[w] = x[w-1], center[w] = x[w], left[w] = x[w+1] (zero at the W edges).
    Shifts run on the XLU via pltpu.roll (static sublane rotation)."""
    col = lax.broadcasted_iota(jnp.int32, (1, W, 1), 1)
    right = jnp.where(col > 0, pltpu.roll(rows_f32, shift=1, axis=1), 0.0)
    left = jnp.where(col < W - 1, pltpu.roll(rows_f32, shift=W - 1, axis=1), 0.0)
    return right.astype(cdtype), rows_f32.astype(cdtype), left.astype(cdtype)


def _conv3x3_from_window(win_ref, R, W, C, Cout, w_ref, cdtype):
    """3x3 conv over an (R+2)-row, row-zero-padded f32 window held in VMEM scratch.

    win_ref: (R+2, W, C) f32 scratch; w_ref: (3, 3, C, Cout).
    Returns an (R*W, Cout) f32 accumulator."""
    acc = jnp.zeros((R * W, Cout), jnp.float32)
    lane_clean = (C % 128 == 0)
    for kh in range(3):
        rows = win_ref[kh:kh + R]                      # (R, W, C) f32, leading-dim slice
        right, center, left = _shifted_taps(rows, W, cdtype)
        if lane_clean:
            # lane-dense concat (pure re-label when C % 128 == 0): one K=3C matmul
            patch = jnp.concatenate([right, center, left], axis=-1).reshape(R * W, 3 * C)
            acc = acc + jnp.dot(patch, w_ref[kh].reshape(3 * C, Cout),
                                preferred_element_type=jnp.float32)
        else:
            # small-C fallback: 9 K=C matmuls, no lane concatenation
            acc = acc + jnp.dot(right.reshape(R * W, C), w_ref[kh, 0],
                                preferred_element_type=jnp.float32)
            acc = acc + jnp.dot(center.reshape(R * W, C), w_ref[kh, 1],
                                preferred_element_type=jnp.float32)
            acc = acc + jnp.dot(left.reshape(R * W, C), w_ref[kh, 2],
                                preferred_element_type=jnp.float32)
    return acc


# ----------------------------------------------------------------------------
# fused block kernels
# ----------------------------------------------------------------------------
def _make_bottleneck_kernel(TH, H, W, Cin, Cw, Cout, has_down, cdtype):
    def kernel(*refs):
        if has_down:
            (xc_ref, xt_ref, xb_ref, w1_ref, b1_ref, w2_ref, b2_ref,
             w3_ref, b3_ref, wd_ref, bd_ref, o_ref, a1win) = refs
        else:
            (xc_ref, xt_ref, xb_ref, w1_ref, b1_ref, w2_ref, b2_ref,
             w3_ref, b3_ref, o_ref, a1win) = refs
        i = pl.program_id(1)
        r0 = i * TH
        top_valid = r0 > 0
        bot_valid = r0 + TH < H
        HB = xt_ref.shape[1]

        # ---- conv1 (1x1, BN-folded) + relu into the (TH+2)-row VMEM window ----
        a1c = jnp.dot(xc_ref[0].reshape(TH * W, Cin).astype(cdtype), w1_ref[...],
                      preferred_element_type=jnp.float32)
        a1c = jnp.maximum(a1c + b1_ref[...], 0.0)
        a1win[pl.ds(1, TH)] = a1c.reshape(TH, W, Cw)

        # halo rows (1 each): zero when outside the image -> conv2's zero padding.
        xt = xt_ref[0, HB - 1:HB].reshape(W, Cin).astype(cdtype)      # row r0-1
        a1t = jnp.maximum(jnp.dot(xt, w1_ref[...],
                                  preferred_element_type=jnp.float32) + b1_ref[...], 0.0)
        a1win[pl.ds(0, 1)] = jnp.where(top_valid, a1t, 0.0).reshape(1, W, Cw)
        xb = xb_ref[0, 0:1].reshape(W, Cin).astype(cdtype)            # row r0+TH
        a1b = jnp.maximum(jnp.dot(xb, w1_ref[...],
                                  preferred_element_type=jnp.float32) + b1_ref[...], 0.0)
        a1win[pl.ds(TH + 1, 1)] = jnp.where(bot_valid, a1b, 0.0).reshape(1, W, Cw)

        # ---- conv2 (3x3, BN-folded) + relu ----
        a2 = _conv3x3_from_window(a1win, TH, W, Cw, Cw, w2_ref, cdtype)
        a2 = jnp.maximum(a2 + b2_ref[...], 0.0).astype(cdtype)

        # ---- conv3 (1x1, BN-folded) + residual + relu ----
        out = jnp.dot(a2, w3_ref[...], preferred_element_type=jnp.float32) + b3_ref[...]
        xcf = xc_ref[0].reshape(TH * W, Cin)
        if has_down:
            ident = jnp.dot(xcf.astype(cdtype), wd_ref[...],
                            preferred_element_type=jnp.float32) + bd_ref[...]
        else:
            ident = xcf.astype(jnp.float32)                            # Cin == Cout
        out = jnp.maximum(out + ident, 0.0)
        o_ref[...] = out.reshape(1, TH, W, Cout).astype(o_ref.dtype)

    return kernel


def _make_basic_kernel(TH, H, W, Cin, Cp, has_down, cdtype):
    def kernel(*refs):
        if has_down:
            (xc_ref, xt_ref, xb_ref, w1_ref, b1_ref, w2_ref, b2_ref,
             wd_ref, bd_ref, o_ref, xwin, a1win) = refs
        else:
            (xc_ref, xt_ref, xb_ref, w1_ref, b1_ref, w2_ref, b2_ref,
             o_ref, xwin, a1win) = refs
        i = pl.program_id(1)
        r0 = i * TH
        top_valid = r0 > 0
        bot_valid = r0 + TH < H
        HB = xt_ref.shape[1]

        # ---- assemble the (TH+4)-row x window in VMEM scratch (2-row halo) ----
        xwin[pl.ds(2, TH)] = xc_ref[0].astype(jnp.float32)
        xwin[pl.ds(0, 2)] = jnp.where(
            top_valid, xt_ref[0, HB - 2:HB].astype(jnp.float32), 0.0)
        xwin[pl.ds(TH + 2, 2)] = jnp.where(
            bot_valid, xb_ref[0, 0:2].astype(jnp.float32), 0.0)

        # ---- conv1 (3x3, BN-folded) + relu, with a 1-row halo for conv2 ----
        a1 = _conv3x3_from_window(xwin, TH + 2, W, Cin, Cp, w1_ref, cdtype)
        a1 = jnp.maximum(a1 + b1_ref[...], 0.0).reshape(TH + 2, W, Cp)
        # only the two halo rows need the out-of-image zero mask
        a1win[pl.ds(1, TH)] = a1[1:TH + 1]
        a1win[pl.ds(0, 1)] = jnp.where(top_valid, a1[0:1], 0.0)
        a1win[pl.ds(TH + 1, 1)] = jnp.where(bot_valid, a1[TH + 1:TH + 2], 0.0)

        # ---- conv2 (3x3, BN-folded) + residual + relu ----
        out = _conv3x3_from_window(a1win, TH, W, Cp, Cp, w2_ref, cdtype) + b2_ref[...]
        xcf = xwin[pl.ds(2, TH)].reshape(TH * W, Cin)      # residual from the window
        if has_down:
            ident = jnp.dot(xcf.astype(cdtype), wd_ref[...],
                            preferred_element_type=jnp.float32) + bd_ref[...]
        else:
            ident = xcf                                     # f32, Cin == Cp
        out = jnp.maximum(out + ident, 0.0)
        o_ref[...] = out.reshape(1, TH, W, Cp).astype(o_ref.dtype)

    return kernel


# ----------------------------------------------------------------------------
# block wrappers (one pallas_call per residual block)
# ----------------------------------------------------------------------------
def bottleneck_block_forward(x, p, *, compute_dtype=jnp.bfloat16):
    B, H, W, Cin = x.shape
    Cw = p['w1'].shape[-1]
    Cout = p['w3'].shape[-1]
    has_down = 'wd' in p
    if not has_down:
        assert Cin == Cout, (Cin, Cout)
    cd = jnp.dtype(compute_dtype)
    TH = _pick_row_tile(H, W, max(Cin, Cw, Cout))
    nH = pl.cdiv(H, TH)
    HB = min(8, H)

    # fold BN scale into conv weights (eval-mode affine)
    w1 = (p['w1'] * p['s1']).astype(cd)                # (Cin, Cw)
    w2 = (p['w2'] * p['s2']).astype(cd)                # (3, 3, Cw, Cw)
    w3 = (p['w3'] * p['s3']).astype(cd)                # (Cw, Cout)
    args = [x, x, x, w1, p['b1'], w2, p['b2'], w3, p['b3']]
    if has_down:
        args += [(p['wd'] * p['sd']).astype(cd), p['bd']]

    in_specs = _x_specs(H, W, Cin, TH, HB) + [_const_spec(a) for a in args[3:]]
    out_specs = pl.BlockSpec((1, TH, W, Cout), lambda b, i: (b, i, 0, 0))
    scratch = [pltpu.VMEM((TH + 2, W, Cw), jnp.float32)]

    flops = 2 * B * H * W * (Cin * Cw + 9 * Cw * Cw + Cw * Cout
                             + (Cin * Cout if has_down else 0))
    bytes_accessed = int(x.size * x.dtype.itemsize
                         + B * H * W * Cout * jnp.dtype(x.dtype).itemsize
                         + sum(a.size * a.dtype.itemsize for a in args[3:]))

    return pl.pallas_call(
        _make_bottleneck_kernel(TH, H, W, Cin, Cw, Cout, has_down, cd),
        out_shape=jax.ShapeDtypeStruct((B, H, W, Cout), x.dtype),
        grid=(B, nH),
        in_specs=in_specs,
        out_specs=out_specs,
        scratch_shapes=scratch,
        compiler_params=pltpu.CompilerParams(
            dimension_semantics=("parallel", "parallel"),
            vmem_limit_bytes=_vmem_limit_bytes()),
        cost_estimate=pl.CostEstimate(flops=int(flops), transcendentals=0,
                                      bytes_accessed=bytes_accessed),
    )(*args)


def basic_block_forward(x, p, *, compute_dtype=jnp.bfloat16):
    B, H, W, Cin = x.shape
    Cp = p['w1'].shape[-1]                             # expansion = 1
    has_down = 'wd' in p
    if not has_down:
        assert Cin == Cp, (Cin, Cp)
    cd = jnp.dtype(compute_dtype)
    TH = _pick_row_tile(H, W, max(Cin, Cp))
    nH = pl.cdiv(H, TH)
    HB = min(8, H)

    w1 = (p['w1'] * p['s1']).astype(cd)                # (3, 3, Cin, Cp)
    w2 = (p['w2'] * p['s2']).astype(cd)                # (3, 3, Cp, Cp)
    args = [x, x, x, w1, p['b1'], w2, p['b2']]
    if has_down:
        args += [(p['wd'] * p['sd']).astype(cd), p['bd']]

    in_specs = _x_specs(H, W, Cin, TH, HB) + [_const_spec(a) for a in args[3:]]
    out_specs = pl.BlockSpec((1, TH, W, Cp), lambda b, i: (b, i, 0, 0))
    scratch = [pltpu.VMEM((TH + 4, W, Cin), jnp.float32),
               pltpu.VMEM((TH + 2, W, Cp), jnp.float32)]

    flops = 2 * B * H * W * (9 * Cin * Cp + 9 * Cp * Cp
                             + (Cin * Cp if has_down else 0))
    bytes_accessed = int(x.size * x.dtype.itemsize
                         + B * H * W * Cp * jnp.dtype(x.dtype).itemsize
                         + sum(a.size * a.dtype.itemsize for a in args[3:]))

    return pl.pallas_call(
        _make_basic_kernel(TH, H, W, Cin, Cp, has_down, cd),
        out_shape=jax.ShapeDtypeStruct((B, H, W, Cp), x.dtype),
        grid=(B, nH),
        in_specs=in_specs,
        out_specs=out_specs,
        scratch_shapes=scratch,
        compiler_params=pltpu.CompilerParams(
            dimension_semantics=("parallel", "parallel"),
            vmem_limit_bytes=_vmem_limit_bytes()),
        cost_estimate=pl.CostEstimate(flops=int(flops), transcendentals=0,
                                      bytes_accessed=bytes_accessed),
    )(*args)


def resnet_stage_forward(x_nchw, params, block, compute_dtype=jnp.bfloat16):
    out_dtype = x_nchw.dtype
    cd = jnp.dtype(compute_dtype)
    x = jnp.transpose(x_nchw, (0, 2, 3, 1))            # NCHW -> NHWC (channels on lanes)
    carry = cd if cd == jnp.dtype(jnp.bfloat16) else x.dtype
    x = x.astype(carry)                                 # bf16 inter-block HBM carry
    fwd = basic_block_forward if block == 'BASIC' else bottleneck_block_forward
    for p in params:
        x = fwd(x, p, compute_dtype=cd)
    return jnp.transpose(x, (0, 3, 1, 2)).astype(out_dtype)


# ----------------------------------------------------------------------------
# Deterministic parameter construction (mirrors ResNetStage.__init__ shapes)
# ----------------------------------------------------------------------------
def _init_conv(key, kh, kw, cin, cout):
    fan_in = kh * kw * cin
    return jax.random.normal(key, (kh, kw, cin, cout), jnp.float32) / math.sqrt(fan_in)


def _init_bn_folded(key, c):
    k1, k2, k3, k4 = jax.random.split(key, 4)
    gamma = 1.0 + 0.1 * jax.random.normal(k1, (c,), jnp.float32)
    beta = 0.1 * jax.random.normal(k2, (c,), jnp.float32)
    mean = 0.1 * jax.random.normal(k3, (c,), jnp.float32)
    var = 0.5 + jax.random.uniform(k4, (c,), jnp.float32)
    scale = gamma / jnp.sqrt(var + _EPS)
    bias = beta - mean * scale
    return scale.reshape(1, c), bias.reshape(1, c)


def make_stage_params(key, cfg, inplanes):
    block = cfg['BLOCK']
    planes = cfg['NUM_CHANNELS'][0]
    num_blocks = cfg['NUM_BLOCKS'][0]
    expansion = 1 if block == 'BASIC' else 4
    params = []
    in_c = inplanes
    for _ in range(num_blocks):
        key, *ks = jax.random.split(key, 9)
        p = {}
        if block == 'BASIC':
            out_c = planes * expansion
            p['w1'] = _init_conv(ks[0], 3, 3, in_c, planes)
            p['s1'], p['b1'] = _init_bn_folded(ks[1], planes)
            p['w2'] = _init_conv(ks[2], 3, 3, planes, planes)
            p['s2'], p['b2'] = _init_bn_folded(ks[3], planes)
        else:  # BOTTLENECK
            width = planes  # base_width=64, groups=1
            out_c = planes * expansion
            p['w1'] = _init_conv(ks[0], 1, 1, in_c, width).reshape(in_c, width)
            p['s1'], p['b1'] = _init_bn_folded(ks[1], width)
            p['w2'] = _init_conv(ks[2], 3, 3, width, width)
            p['s2'], p['b2'] = _init_bn_folded(ks[3], width)
            p['w3'] = _init_conv(ks[4], 1, 1, width, out_c).reshape(width, out_c)
            p['s3'], p['b3'] = _init_bn_folded(ks[5], out_c)
        if in_c != out_c:  # downsample branch (stride=1 here)
            p['wd'] = _init_conv(ks[6], 1, 1, in_c, out_c).reshape(in_c, out_c)
            p['sd'], p['bd'] = _init_bn_folded(ks[7], out_c)
        params.append(p)
        in_c = out_c
    return params, in_c


# ----------------------------------------------------------------------------
# Pure-JAX reference (for correctness checks)
# ----------------------------------------------------------------------------
def _ref_conv3x3(x, w):
    return lax.conv_general_dilated(
        x, w, window_strides=(1, 1), padding=((1, 1), (1, 1)),
        dimension_numbers=('NHWC', 'HWIO', 'NHWC'))


def _ref_conv1x1(x, w):
    return jnp.einsum('bhwc,cd->bhwd', x, w)


def _ref_basic(x, p):
    out = jnp.maximum(_ref_conv3x3(x, p['w1']) * p['s1'] + p['b1'], 0.0)
    identity = x
    if 'wd' in p:
        identity = _ref_conv1x1(x, p['wd']) * p['sd'] + p['bd']
    out = _ref_conv3x3(out, p['w2']) * p['s2'] + p['b2']
    return jnp.maximum(out + identity, 0.0)


def _ref_bottleneck(x, p):
    out = jnp.maximum(_ref_conv1x1(x, p['w1']) * p['s1'] + p['b1'], 0.0)
    out = jnp.maximum(_ref_conv3x3(out, p['w2']) * p['s2'] + p['b2'], 0.0)
    identity = x
    if 'wd' in p:
        identity = _ref_conv1x1(x, p['wd']) * p['sd'] + p['bd']
    out = _ref_conv1x1(out, p['w3']) * p['s3'] + p['b3']
    return jnp.maximum(out + identity, 0.0)


def ref_stage_forward(x_nchw, params, block):
    x = jnp.transpose(x_nchw, (0, 2, 3, 1))
    fwd = _ref_basic if block == 'BASIC' else _ref_bottleneck
    for p in params:
        x = fwd(x, p)
    return jnp.transpose(x, (0, 3, 1, 2))


# ----------------------------------------------------------------------------
if __name__ == "__main__":
    key = jax.random.PRNGKey(0)
    B, H, W = 2, 16, 16

    # --- BOTTLENECK stage (HRNet stage-1 style) ---
    kx, kp, key = jax.random.split(key, 3)
    cfg = {'BLOCK': 'BOTTLENECK', 'NUM_CHANNELS': [8], 'NUM_BLOCKS': [2]}
    inplanes = 4
    x = jax.random.normal(kx, (B, inplanes, H, W), jnp.float32)  # NCHW, like PyTorch
    params, out_channels = make_stage_params(kp, cfg, inplanes)
    ref = ref_stage_forward(x, params, cfg['BLOCK'])

    # tight check: f32 compute path
    fwd32 = jax.jit(partial(resnet_stage_forward, block=cfg['BLOCK'],
                            compute_dtype=jnp.float32))
    out32 = jax.block_until_ready(fwd32(x, params))
    assert out32.shape == (B, out_channels, H, W), out32.shape
    assert jnp.allclose(out32, ref, atol=1e-3, rtol=1e-3), \
        float(jnp.max(jnp.abs(out32 - ref)))

    # default fast path: bf16 compute + bf16 inter-block carry (loose check)
    fwd16 = jax.jit(partial(resnet_stage_forward, block=cfg['BLOCK'],
                            compute_dtype=jnp.bfloat16))
    out16 = jax.block_until_ready(fwd16(x, params))
    rel = float(jnp.max(jnp.abs(out16 - ref)) / (jnp.max(jnp.abs(ref)) + 1e-6))
    assert rel < 0.1, rel

    # --- BASIC stage ---
    kx2, kp2, key = jax.random.split(key, 3)
    cfg_b = {'BLOCK': 'BASIC', 'NUM_CHANNELS': [16], 'NUM_BLOCKS': [2]}
    inplanes_b = 8
    xb = jax.random.normal(kx2, (B, inplanes_b, H, W), jnp.float32)
    params_b, out_channels_b = make_stage_params(kp2, cfg_b, inplanes_b)
    ref_b = ref_stage_forward(xb, params_b, cfg_b['BLOCK'])

    fwd32_b = jax.jit(partial(resnet_stage_forward, block=cfg_b['BLOCK'],
                              compute_dtype=jnp.float32))
    out32_b = jax.block_until_ready(fwd32_b(xb, params_b))
    assert out32_b.shape == (B, out_channels_b, H, W), out32_b.shape
    assert jnp.allclose(out32_b, ref_b, atol=1e-3, rtol=1e-3), \
        float(jnp.max(jnp.abs(out32_b - ref_b)))

    fwd16_b = jax.jit(partial(resnet_stage_forward, block=cfg_b['BLOCK'],
                              compute_dtype=jnp.bfloat16))
    out16_b = jax.block_until_ready(fwd16_b(xb, params_b))
    rel_b = float(jnp.max(jnp.abs(out16_b - ref_b)) / (jnp.max(jnp.abs(ref_b)) + 1e-6))
    assert rel_b < 0.1, rel_b

    print("KERNEL_OK")
</pallas_src>

<mosaic_0001>
module attributes {stable_mosaic.version = 11 : i64} {
  func.func @kernel(%arg0: i32, %arg1: i32, %arg2: memref<1x16x16x4xf32, #tpu.memory_space<vmem>>, %arg3: memref<1x8x16x4xf32, #tpu.memory_space<vmem>>, %arg4: memref<1x8x16x4xf32, #tpu.memory_space<vmem>>, %arg5: memref<4x8xf32, #tpu.memory_space<vmem>>, %arg6: memref<1x8xf32, #tpu.memory_space<vmem>>, %arg7: memref<3x3x8x8xf32, #tpu.memory_space<vmem>>, %arg8: memref<1x8xf32, #tpu.memory_space<vmem>>, %arg9: memref<8x32xf32, #tpu.memory_space<vmem>>, %arg10: memref<1x32xf32, #tpu.memory_space<vmem>>, %arg11: memref<4x32xf32, #tpu.memory_space<vmem>>, %arg12: memref<1x32xf32, #tpu.memory_space<vmem>>, %arg13: memref<1x16x16x32xf32, #tpu.memory_space<vmem>>, %arg14: memref<18x16x8xf32, #tpu.memory_space<vmem>>) attributes {dimension_semantics = [#tpu.dimension_semantics<parallel>, #tpu.dimension_semantics<parallel>], iteration_bounds = array<i64: 2, 1>, scalar_prefetch = 0 : i64, scratch_operands = 1 : i64, tpu.core_type = #tpu.core_type<tc>, window_params = [{transform_indices = @transform_0, window_bounds = array<i64: 1, 16, 16, 4>}, {transform_indices = @transform_1, window_bounds = array<i64: 1, 8, 16, 4>}, {transform_indices = @transform_2, window_bounds = array<i64: 1, 8, 16, 4>}, {pipeline_mode = #tpu.pipeline_mode<synchronous>, transform_indices = @transform_3, window_bounds = array<i64: 4, 8>}, {pipeline_mode = #tpu.pipeline_mode<synchronous>, transform_indices = @transform_4, window_bounds = array<i64: 1, 8>}, {pipeline_mode = #tpu.pipeline_mode<synchronous>, transform_indices = @transform_5, window_bounds = array<i64: 3, 3, 8, 8>}, {pipeline_mode = #tpu.pipeline_mode<synchronous>, transform_indices = @transform_6, window_bounds = array<i64: 1, 8>}, {pipeline_mode = #tpu.pipeline_mode<synchronous>, transform_indices = @transform_7, window_bounds = array<i64: 8, 32>}, {pipeline_mode = #tpu.pipeline_mode<synchronous>, transform_indices = @transform_8, window_bounds = array<i64: 1, 32>}, {pipeline_mode = #tpu.pipeline_mode<synchronous>, transform_indices = @transform_9, window_bounds = array<i64: 4, 32>}, {pipeline_mode = #tpu.pipeline_mode<synchronous>, transform_indices = @transform_10, window_bounds = array<i64: 1, 32>}, {transform_indices = @transform_11, window_bounds = array<i64: 1, 16, 16, 32>}]} {
    %c16_i32 = arith.constant 16 : i32
    %0 = arith.muli %arg1, %c16_i32 : i32
    %c0_i32 = arith.constant 0 : i32
    %1 = arith.cmpi sgt, %0, %c0_i32 : i32
    %c16_i32_0 = arith.constant 16 : i32
    %2 = arith.addi %0, %c16_i32_0 : i32
    %c16_i32_1 = arith.constant 16 : i32
    %3 = arith.cmpi slt, %2, %c16_i32_1 : i32
    %c0 = arith.constant 0 : index
    %c0_2 = arith.constant 0 : index
    %c0_3 = arith.constant 0 : index
    %c0_4 = arith.constant 0 : index
    %4 = vector.load %arg2[%c0, %c0_2, %c0_3, %c0_4] : memref<1x16x16x4xf32, #tpu.memory_space<vmem>>, vector<1x16x16x4xf32>
    %5 = vector.shape_cast %4 : vector<1x16x16x4xf32> to vector<16x16x4xf32>
    %6 = vector.shape_cast %5 : vector<16x16x4xf32> to vector<256x4xf32>
    %c0_5 = arith.constant 0 : index
    %c0_6 = arith.constant 0 : index
    %7 = vector.load %arg5[%c0_5, %c0_6] : memref<4x8xf32, #tpu.memory_space<vmem>>, vector<4x8xf32>
    %cst = arith.constant dense<0.000000e+00> : vector<256x8xf32>
    %8 = tpu.matmul %6, %7, %cst {dimension_numbers = #tpu.dot_dimension_numbers<[1], [0], [0], [1], [0, 0, 1, 1], [], []>} : vector<256x4xf32>, vector<4x8xf32>, vector<256x8xf32> -> vector<256x8xf32>
    %c0_7 = arith.constant 0 : index
    %c0_8 = arith.constant 0 : index
    %9 = vector.load %arg6[%c0_7, %c0_8] : memref<1x8xf32, #tpu.memory_space<vmem>>, vector<1x8xf32>
    %10 = vector.broadcast %9 : vector<1x8xf32> to vector<256x8xf32>
    %11 = arith.addf %8, %10 : vector<256x8xf32>
    %cst_9 = arith.constant 0.000000e+00 : f32
    %12 = vector.broadcast %cst_9 : f32 to vector<256x8xf32>
    %13 = arith.maximumf %11, %12 : vector<256x8xf32>
    %14 = vector.shape_cast %13 : vector<256x8xf32> to vector<16x16x8xf32>
    %c1 = arith.constant 1 : index
    %c0_10 = arith.constant 0 : index
    %c0_11 = arith.constant 0 : index
    %15 = vector.load %arg14[%c1, %c0_10, %c0_11] : memref<18x16x8xf32, #tpu.memory_space<vmem>>, vector<16x16x8xf32>
    tpu.vector_store %arg14[%c1, %c0_10, %c0_11], %14 {strides = array<i32>} : memref<18x16x8xf32, #tpu.memory_space<vmem>>, vector<16x16x8xf32>,
    %c0_12 = arith.constant 0 : index
    %c7 = arith.constant 7 : index
    %c0_13 = arith.constant 0 : index
    %c0_14 = arith.constant 0 : index
    %16 = vector.load %arg3[%c0_12, %c7, %c0_13, %c0_14] : memref<1x8x16x4xf32, #tpu.memory_space<vmem>>, vector<1x1x16x4xf32>
    %17 = vector.shape_cast %16 : vector<1x1x16x4xf32> to vector<1x16x4xf32>
    %18 = vector.shape_cast %17 : vector<1x16x4xf32> to vector<16x4xf32>
    %c0_15 = arith.constant 0 : index
    %c0_16 = arith.constant 0 : index
    %19 = vector.load %arg5[%c0_15, %c0_16] : memref<4x8xf32, #tpu.memory_space<vmem>>, vector<4x8xf32>
    %cst_17 = arith.constant dense<0.000000e+00> : vector<16x8xf32>
    %20 = tpu.matmul %18, %19, %cst_17 {dimension_numbers = #tpu.dot_dimension_numbers<[1], [0], [0], [1], [0, 0, 1, 1], [], []>} : vector<16x4xf32>, vector<4x8xf32>, vector<16x8xf32> -> vector<16x8xf32>
    %c0_18 = arith.constant 0 : index
    %c0_19 = arith.constant 0 : index
    %21 = vector.load %arg6[%c0_18, %c0_19] : memref<1x8xf32, #tpu.memory_space<vmem>>, vector<1x8xf32>
    %22 = vector.broadcast %21 : vector<1x8xf32> to vector<16x8xf32>
    %23 = arith.addf %20, %22 : vector<16x8xf32>
    %cst_20 = arith.constant 0.000000e+00 : f32
    %24 = vector.broadcast %cst_20 : f32 to vector<16x8xf32>
    %25 = arith.maximumf %23, %24 : vector<16x8xf32>
    %cst_21 = arith.constant 0.000000e+00 : f32
    %26 = vector.broadcast %cst_21 : f32 to vector<16x8xf32>
    %27 = arith.select %1, %25, %26 : vector<16x8xf32>
    %28 = vector.shape_cast %27 : vector<16x8xf32> to vector<1x16x8xf32>
    %c0_22 = arith.constant 0 : index
    %c0_23 = arith.constant 0 : index
    %c0_24 = arith.constant 0 : index
    %29 = vector.load %arg14[%c0_22, %c0_23, %c0_24] : memref<18x16x8xf32, #tpu.memory_space<vmem>>, vector<1x16x8xf32>
    tpu.vector_store %arg14[%c0_22, %c0_23, %c0_24], %28 {strides = array<i32>} : memref<18x16x8xf32, #tpu.memory_space<vmem>>, vector<1x16x8xf32>,
    %c0_25 = arith.constant 0 : index
    %c0_26 = arith.constant 0 : index
    %c0_27 = arith.constant 0 : index
    %c0_28 = arith.constant 0 : index
    %30 = vector.load %arg4[%c0_25, %c0_26, %c0_27, %c0_28] : memref<1x8x16x4xf32, #tpu.memory_space<vmem>>, vector<1x1x16x4xf32>
    %31 = vector.shape_cast %30 : vector<1x1x16x4xf32> to vector<1x16x4xf32>
    %32 = vector.shape_cast %31 : vector<1x16x4xf32> to vector<16x4xf32>
    %c0_29 = arith.constant 0 : index
    %c0_30 = arith.constant 0 : index
    %33 = vector.load %arg5[%c0_29, %c0_30] : memref<4x8xf32, #tpu.memory_space<vmem>>, vector<4x8xf32>
    %cst_31 = arith.constant dense<0.000000e+00> : vector<16x8xf32>
    %34 = tpu.matmul %32, %33, %cst_31 {dimension_numbers = #tpu.dot_dimension_numbers<[1], [0], [0], [1], [0, 0, 1, 1], [], []>} : vector<16x4xf32>, vector<4x8xf32>, vector<16x8xf32> -> vector<16x8xf32>
    %c0_32 = arith.constant 0 : index
    %c0_33 = arith.constant 0 : index
    %35 = vector.load %arg6[%c0_32, %c0_33] : memref<1x8xf32, #tpu.memory_space<vmem>>, vector<1x8xf32>
    %36 = vector.broadcast %35 : vector<1x8xf32> to vector<16x8xf32>
    %37 = arith.addf %34, %36 : vector<16x8xf32>
    %cst_34 = arith.constant 0.000000e+00 : f32
    %38 = vector.broadcast %cst_34 : f32 to vector<16x8xf32>
    %39 = arith.maximumf %37, %38 : vector<16x8xf32>
    %cst_35 = arith.constant 0.000000e+00 : f32
    %40 = vector.broadcast %cst_35 : f32 to vector<16x8xf32>
    %41 = arith.select %3, %39, %40 : vector<16x8xf32>
    %42 = vector.shape_cast %41 : vector<16x8xf32> to vector<1x16x8xf32>
    %c17 = arith.constant 17 : index
    %c0_36 = arith.constant 0 : index
    %c0_37 = arith.constant 0 : index
    %43 = vector.load %arg14[%c17, %c0_36, %c0_37] : memref<18x16x8xf32, #tpu.memory_space<vmem>>, vector<1x16x8xf32>
    tpu.vector_store %arg14[%c17, %c0_36, %c0_37], %42 {strides = array<i32>} : memref<18x16x8xf32, #tpu.memory_space<vmem>>, vector<1x16x8xf32>,
    %cst_38 = arith.constant 0.000000e+00 : f32
    %44 = vector.broadcast %cst_38 : f32 to vector<256x8xf32>
    %c0_39 = arith.constant 0 : index
    %c0_40 = arith.constant 0 : index
    %c0_41 = arith.constant 0 : index
    %45 = vector.load %arg14[%c0_39, %c0_40, %c0_41] : memref<18x16x8xf32, #tpu.memory_space<vmem>>, vector<16x16x8xf32>
    %46 = tpu.iota {dimensions = array<i32: 1>} : vector<1x16x1xi32>
    %c0_i32_42 = arith.constant 0 : i32
    %47 = vector.broadcast %c0_i32_42 : i32 to vector<1x16x1xi32>
    %48 = arith.cmpi sgt, %46, %47 : vector<1x16x1xi32>
    %c1_i32 = arith.constant 1 : i32
    %49 = tpu.dynamic_rotate %45 by %c1_i32 dim 1 : vector<16x16x8xf32>, i32 -> vector<16x16x8xf32>
    %cst_43 = arith.constant 0.000000e+00 : f32
    %50 = vector.shape_cast %48 : vector<1x16x1xi1> to vector<1x16x1xi1>
    %51 = vector.broadcast %50 : vector<1x16x1xi1> to vector<16x16x8xi1>
    %52 = vector.broadcast %cst_43 : f32 to vector<16x16x8xf32>
    %53 = arith.select %51, %49, %52 : vector<16x16x8xi1>, vector<16x16x8xf32>
    %c15_i32 = arith.constant 15 : i32
    %54 = vector.broadcast %c15_i32 : i32 to vector<1x16x1xi32>
    %55 = arith.cmpi slt, %46, %54 : vector<1x16x1xi32>
    %c15_i32_44 = arith.constant 15 : i32
    %56 = tpu.dynamic_rotate %45 by %c15_i32_44 dim 1 : vector<16x16x8xf32>, i32 -> vector<16x16x8xf32>
    %cst_45 = arith.constant 0.000000e+00 : f32
    %57 = vector.shape_cast %55 : vector<1x16x1xi1> to vector<1x16x1xi1>
    %58 = vector.broadcast %57 : vector<1x16x1xi1> to vector<16x16x8xi1>
    %59 = vector.broadcast %cst_45 : f32 to vector<16x16x8xf32>
    %60 = arith.select %58, %56, %59 : vector<16x16x8xi1>, vector<16x16x8xf32>
    %61 = vector.shape_cast %53 : vector<16x16x8xf32> to vector<256x8xf32>
    %c0_46 = arith.constant 0 : index
    %c0_47 = arith.constant 0 : index
    %c0_48 = arith.constant 0 : index
    %c0_49 = arith.constant 0 : index
    %62 = vector.load %arg7[%c0_46, %c0_47, %c0_48, %c0_49] : memref<3x3x8x8xf32, #tpu.memory_space<vmem>>, vector<1x1x8x8xf32>
    %63 = vector.shape_cast %62 : vector<1x1x8x8xf32> to vector<8x8xf32>
    %cst_50 = arith.constant dense<0.000000e+00> : vector<256x8xf32>
    %64 = tpu.matmul %61, %63, %cst_50 {dimension_numbers = #tpu.dot_dimension_numbers<[1], [0], [0], [1], [0, 0, 1, 1], [], []>} : vector<256x8xf32>, vector<8x8xf32>, vector<256x8xf32> -> vector<256x8xf32>
    %65 = arith.addf %44, %64 : vector<256x8xf32>
    %66 = vector.shape_cast %45 : vector<16x16x8xf32> to vector<256x8xf32>
    %c0_51 = arith.constant 0 : index
    %c1_52 = arith.constant 1 : index
    %c0_53 = arith.constant 0 : index
    %c0_54 = arith.constant 0 : index
    %67 = vector.load %arg7[%c0_51, %c1_52, %c0_53, %c0_54] : memref<3x3x8x8xf32, #tpu.memory_space<vmem>>, vector<1x1x8x8xf32>
    %68 = vector.shape_cast %67 : vector<1x1x8x8xf32> to vector<8x8xf32>
    %cst_55 = arith.constant dense<0.000000e+00> : vector<256x8xf32>
    %69 = tpu.matmul %66, %68, %cst_55 {dimension_numbers = #tpu.dot_dimension_numbers<[1], [0], [0], [1], [0, 0, 1, 1], [], []>} : vector<256x8xf32>, vector<8x8xf32>, vector<256x8xf32> -> vector<256x8xf32>
    %70 = arith.addf %65, %69 : vector<256x8xf32>
    %71 = vector.shape_cast %60 : vector<16x16x8xf32> to vector<256x8xf32>
    %c0_56 = arith.constant 0 : index
    %c2 = arith.constant 2 : index
    %c0_57 = arith.constant 0 : index
    %c0_58 = arith.constant 0 : index
    %72 = vector.load %arg7[%c0_56, %c2, %c0_57, %c0_58] : memref<3x3x8x8xf32, #tpu.memory_space<vmem>>, vector<1x1x8x8xf32>
    %73 = vector.shape_cast %72 : vector<1x1x8x8xf32> to vector<8x8xf32>
    %cst_59 = arith.constant dense<0.000000e+00> : vector<256x8xf32>
    %74 = tpu.matmul %71, %73, %cst_59 {dimension_numbers = #tpu.dot_dimension_numbers<[1], [0], [0], [1], [0, 0, 1, 1], [], []>} : vector<256x8xf32>, vector<8x8xf32>, vector<256x8xf32> -> vector<256x8xf32>
    %75 = arith.addf %70, %74 : vector<256x8xf32>
    %c1_60 = arith.constant 1 : index
    %c0_61 = arith.constant 0 : index
    %c0_62 = arith.constant 0 : index
    %76 = vector.load %arg14[%c1_60, %c0_61, %c0_62] : memref<18x16x8xf32, #tpu.memory_space<vmem>>, vector<16x16x8xf32>
    %77 = tpu.iota {dimensions = array<i32: 1>} : vector<1x16x1xi32>
    %c0_i32_63 = arith.constant 0 : i32
    %78 = vector.broadcast %c0_i32_63 : i32 to vector<1x16x1xi32>
    %79 = arith.cmpi sgt, %77, %78 : vector<1x16x1xi32>
    %c1_i32_64 = arith.constant 1 : i32
    %80 = tpu.dynamic_rotate %76 by %c1_i32_64 dim 1 : vector<16x16x8xf32>, i32 -> vector<16x16x8xf32>
    %cst_65 = arith.constant 0.000000e+00 : f32
    %81 = vector.shape_cast %79 : vector<1x16x1xi1> to vector<1x16x1xi1>
    %82 = vector.broadcast %81 : vector<1x16x1xi1> to vector<16x16x8xi1>
    %83 = vector.broadcast %cst_65 : f32 to vector<16x16x8xf32>
    %84 = arith.select %82, %80, %83 : vector<16x16x8xi1>, vector<16x16x8xf32>
    %c15_i32_66 = arith.constant 15 : i32
    %85 = vector.broadcast %c15_i32_66 : i32 to vector<1x16x1xi32>
    %86 = arith.cmpi slt, %77, %85 : vector<1x16x1xi32>
    %c15_i32_67 = arith.constant 15 : i32
    %87 = tpu.dynamic_rotate %76 by %c15_i32_67 dim 1 : vector<16x16x8xf32>, i32 -> vector<16x16x8xf32>
    %cst_68 = arith.constant 0.000000e+00 : f32
    %88 = vector.shape_cast %86 : vector<1x16x1xi1> to vector<1x16x1xi1>
    %89 = vector.broadcast %88 : vector<1x16x1xi1> to vector<16x16x8xi1>
    %90 = vector.broadcast %cst_68 : f32 to vector<16x16x8xf32>
    %91 = arith.select %89, %87, %90 : vector<16x16x8xi1>, vector<16x16x8xf32>
    %92 = vector.shape_cast %84 : vector<16x16x8xf32> to vector<256x8xf32>
    %c1_69 = arith.constant 1 : index
    %c0_70 = arith.constant 0 : index
    %c0_71 = arith.constant 0 : index
    %c0_72 = arith.constant 0 : index
    %93 = vector.load %arg7[%c1_69, %c0_70, %c0_71, %c0_72] : memref<3x3x8x8xf32, #tpu.memory_space<vmem>>, vector<1x1x8x8xf32>
    %94 = vector.shape_cast %93 : vector<1x1x8x8xf32> to vector<8x8xf32>
    %cst_73 = arith.constant dense<0.000000e+00> : vector<256x8xf32>
    %95 = tpu.matmul %92, %94, %cst_73 {dimension_numbers = #tpu.dot_dimension_numbers<[1], [0], [0], [1], [0, 0, 1, 1], [], []>} : vector<256x8xf32>, vector<8x8xf32>, vector<256x8xf32> -> vector<256x8xf32>
    %96 = arith.addf %75, %95 : vector<256x8xf32>
    %97 = vector.shape_cast %76 : vector<16x16x8xf32> to vector<256x8xf32>
    %c1_74 = arith.constant 1 : index
    %c1_75 = arith.constant 1 : index
    %c0_76 = arith.constant 0 : index
    %c0_77 = arith.constant 0 : index
    %98 = vector.load %arg7[%c1_74, %c1_75, %c0_76, %c0_77] : memref<3x3x8x8xf32, #tpu.memory_space<vmem>>, vector<1x1x8x8xf32>
    %99 = vector.shape_cast %98 : vector<1x1x8x8xf32> to vector<8x8xf32>
    %cst_78 = arith.constant dense<0.000000e+00> : vector<256x8xf32>
    %100 = tpu.matmul %97, %99, %cst_78 {dimension_numbers = #tpu.dot_dimension_numbers<[1], [0], [0], [1], [0, 0, 1, 1], [], []>} : vector<256x8xf32>, vector<8x8xf32>, vector<256x8xf32> -> vector<256x8xf32>
    %101 = arith.addf %96, %100 : vector<256x8xf32>
    %102 = vector.shape_cast %91 : vector<16x16x8xf32> to vector<256x8xf32>
    %c1_79 = arith.constant 1 : index
    %c2_80 = arith.constant 2 : index
    %c0_81 = arith.constant 0 : index
    %c0_82 = arith.constant 0 : index
    %103 = vector.load %arg7[%c1_79, %c2_80, %c0_81, %c0_82] : memref<3x3x8x8xf32, #tpu.memory_space<vmem>>, vector<1x1x8x8xf32>
    %104 = vector.shape_cast %103 : vector<1x1x8x8xf32> to vector<8x8xf32>
    %cst_83 = arith.constant dense<0.000000e+00> : vector<256x8xf32>
    %105 = tpu.matmul %102, %104, %cst_83 {dimension_numbers = #tpu.dot_dimension_numbers<[1], [0], [0], [1], [0, 0, 1, 1], [], []>} : vector<256x8xf32>, vector<8x8xf32>, vector<256x8xf32> -> vector<256x8xf32>
    %106 = arith.addf %101, %105 : vector<256x8xf32>
    %c2_84 = arith.constant 2 : index
    %c0_85 = arith.constant 0 : index
    %c0_86 = arith.constant 0 : index
    %107 = vector.load %arg14[%c2_84, %c0_85, %c0_86] : memref<18x16x8xf32, #tpu.memory_space<vmem>>, vector<16x16x8xf32>
    %108 = tpu.iota {dimensions = array<i32: 1>} : vector<1x16x1xi32>
    %c0_i32_87 = arith.constant 0 : i32
    %109 = vector.broadcast %c0_i32_87 : i32 to vector<1x16x1xi32>
    %110 = arith.cmpi sgt, %108, %109 : vector<1x16x1xi32>
    %c1_i32_88 = arith.constant 1 : i32
    %111 = tpu.dynamic_rotate %107 by %c1_i32_88 dim 1 : vector<16x16x8xf32>, i32 -> vector<16x16x8xf32>
    %cst_89 = arith.constant 0.000000e+00 : f32
    %112 = vector.shape_cast %110 : vector<1x16x1xi1> to vector<1x16x1xi1>
    %113 = vector.broadcast %112 : vector<1x16x1xi1> to vector<16x16x8xi1>
    %114 = vector.broadcast %cst_89 : f32 to vector<16x16x8xf32>
    %115 = arith.select %113, %111, %114 : vector<16x16x8xi1>, vector<16x16x8xf32>
    %c15_i32_90 = arith.constant 15 : i32
    %116 = vector.broadcast %c15_i32_90 : i32 to vector<1x16x1xi32>
    %117 = arith.cmpi slt, %108, %116 : vector<1x16x1xi32>
    %c15_i32_91 = arith.constant 15 : i32
    %118 = tpu.dynamic_rotate %107 by %c15_i32_91 dim 1 : vector<16x16x8xf32>, i32 -> vector<16x16x8xf32>
    %cst_92 = arith.constant 0.000000e+00 : f32
    %119 = vector.shape_cast %117 : vector<1x16x1xi1> to vector<1x16x1xi1>
    %120 = vector.broadcast %119 : vector<1x16x1xi1> to vector<16x16x8xi1>
    %121 = vector.broadcast %cst_92 : f32 to vector<16x16x8xf32>
    %122 = arith.select %120, %118, %121 : vector<16x16x8xi1>, vector<16x16x8xf32>
    %123 = vector.shape_cast %115 : vector<16x16x8xf32> to vector<256x8xf32>
    %c2_93 = arith.constant 2 : index
    %c0_94 = arith.constant 0 : index
    %c0_95 = arith.constant 0 : index
    %c0_96 = arith.constant 0 : index
    %124 = vector.load %arg7[%c2_93, %c0_94, %c0_95, %c0_96] : memref<3x3x8x8xf32, #tpu.memory_space<vmem>>, vector<1x1x8x8xf32>
    %125 = vector.shape_cast %124 : vector<1x1x8x8xf32> to vector<8x8xf32>
    %cst_97 = arith.constant dense<0.000000e+00> : vector<256x8xf32>
    %126 = tpu.matmul %123, %125, %cst_97 {dimension_numbers = #tpu.dot_dimension_numbers<[1], [0], [0], [1], [0, 0, 1, 1], [], []>} : vector<256x8xf32>, vector<8x8xf32>, vector<256x8xf32> -> vector<256x8xf32>
    %127 = arith.addf %106, %126 : vector<256x8xf32>
    %128 = vector.shape_cast %107 : vector<16x16x8xf32> to vector<256x8xf32>
    %c2_98 = arith.constant 2 : index
    %c1_99 = arith.constant 1 : index
    %c0_100 = arith.constant 0 : index
    %c0_101 = arith.constant 0 : index
    %129 = vector.load %arg7[%c2_98, %c1_99, %c0_100, %c0_101] : memref<3x3x8x8xf32, #tpu.memory_space<vmem>>, vector<1x1x8x8xf32>
    %130 = vector.shape_cast %129 : vector<1x1x8x8xf32> to vector<8x8xf32>
    %cst_102 = arith.constant dense<0.000000e+00> : vector<256x8xf32>
    %131 = tpu.matmul %128, %130, %cst_102 {dimension_numbers = #tpu.dot_dimension_numbers<[1], [0], [0], [1], [0, 0, 1, 1], [], []>} : vector<256x8xf32>, vector<8x8xf32>, vector<256x8xf32> -> vector<256x8xf32>
    %132 = arith.addf %127, %131 : vector<256x8xf32>
    %133 = vector.shape_cast %122 : vector<16x16x8xf32> to vector<256x8xf32>
    %c2_103 = arith.constant 2 : index
    %c2_104 = arith.constant 2 : index
    %c0_105 = arith.constant 0 : index
    %c0_106 = arith.constant 0 : index
    %134 = vector.load %arg7[%c2_103, %c2_104, %c0_105, %c0_106] : memref<3x3x8x8xf32, #tpu.memory_space<vmem>>, vector<1x1x8x8xf32>
    %135 = vector.shape_cast %134 : vector<1x1x8x8xf32> to vector<8x8xf32>
    %cst_107 = arith.constant dense<0.000000e+00> : vector<256x8xf32>
    %136 = tpu.matmul %133, %135, %cst_107 {dimension_numbers = #tpu.dot_dimension_numbers<[1], [0], [0], [1], [0, 0, 1, 1], [], []>} : vector<256x8xf32>, vector<8x8xf32>, vector<256x8xf32> -> vector<256x8xf32>
    %137 = arith.addf %132, %136 : vector<256x8xf32>
    %c0_108 = arith.constant 0 : index
    %c0_109 = arith.constant 0 : index
    %138 = vector.load %arg8[%c0_108, %c0_109] : memref<1x8xf32, #tpu.memory_space<vmem>>, vector<1x8xf32>
    %139 = vector.broadcast %138 : vector<1x8xf32> to vector<256x8xf32>
    %140 = arith.addf %137, %139 : vector<256x8xf32>
    %cst_110 = arith.constant 0.000000e+00 : f32
    %141 = vector.broadcast %cst_110 : f32 to vector<256x8xf32>
    %142 = arith.maximumf %140, %141 : vector<256x8xf32>
    %c0_111 = arith.constant 0 : index
    %c0_112 = arith.constant 0 : index
    %143 = vector.load %arg9[%c0_111, %c0_112] : memref<8x32xf32, #tpu.memory_space<vmem>>, vector<8x32xf32>
    %cst_113 = arith.constant dense<0.000000e+00> : vector<256x32xf32>
    %144 = tpu.matmul %142, %143, %cst_113 {dimension_numbers = #tpu.dot_dimension_numbers<[1], [0], [0], [1], [0, 0, 1, 1], [], []>} : vector<256x8xf32>, vector<8x32xf32>, vector<256x32xf32> -> vector<256x32xf32>
    %c0_114 = arith.constant 0 : index
    %c0_115 = arith.constant 0 : index
    %145 = vector.load %arg10[%c0_114, %c0_115] : memref<1x32xf32, #tpu.memory_space<vmem>>, vector<1x32xf32>
    %146 = vector.broadcast %145 : vector<1x32xf32> to vector<256x32xf32>
    %147 = arith.addf %144, %146 : vector<256x32xf32>
    %c0_116 = arith.constant 0 : index
    %c0_117 = arith.constant 0 : index
    %c0_118 = arith.constant 0 : index
    %c0_119 = arith.constant 0 : index
    %148 = vector.load %arg2[%c0_116, %c0_117, %c0_118, %c0_119] : memref<1x16x16x4xf32, #tpu.memory_space<vmem>>, vector<1x16x16x4xf32>
    %149 = vector.shape_cast %148 : vector<1x16x16x4xf32> to vector<16x16x4xf32>
    %150 = vector.shape_cast %149 : vector<16x16x4xf32> to vector<256x4xf32>
    %c0_120 = arith.constant 0 : index
    %c0_121 = arith.constant 0 : index
    %151 = vector.load %arg11[%c0_120, %c0_121] : memref<4x32xf32, #tpu.memory_space<vmem>>, vector<4x32xf32>
    %cst_122 = arith.constant dense<0.000000e+00> : vector<256x32xf32>
    %152 = tpu.matmul %150, %151, %cst_122 {dimension_numbers = #tpu.dot_dimension_numbers<[1], [0], [0], [1], [0, 0, 1, 1], [], []>} : vector<256x4xf32>, vector<4x32xf32>, vector<256x32xf32> -> vector<256x32xf32>
    %c0_123 = arith.constant 0 : index
    %c0_124 = arith.constant 0 : index
    %153 = vector.load %arg12[%c0_123, %c0_124] : memref<1x32xf32, #tpu.memory_space<vmem>>, vector<1x32xf32>
    %154 = vector.broadcast %153 : vector<1x32xf32> to vector<256x32xf32>
    %155 = arith.addf %152, %154 : vector<256x32xf32>
    %156 = arith.addf %147, %155 : vector<256x32xf32>
    %cst_125 = arith.constant 0.000000e+00 : f32
    %157 = vector.broadcast %cst_125 : f32 to vector<256x32xf32>
    %158 = arith.maximumf %156, %157 : vector<256x32xf32>
    %159 = vector.shape_cast %158 : vector<256x32xf32> to vector<1x16x16x32xf32>
    %c0_126 = arith.constant 0 : index
    %c0_127 = arith.constant 0 : index
    %c0_128 = arith.constant 0 : index
    %c0_129 = arith.constant 0 : index
    %160 = vector.load %arg13[%c0_126, %c0_127, %c0_128, %c0_129] : memref<1x16x16x32xf32, #tpu.memory_space<vmem>>, vector<1x16x16x32xf32>
    tpu.vector_store %arg13[%c0_126, %c0_127, %c0_128, %c0_129], %159 {strides = array<i32>} : memref<1x16x16x32xf32, #tpu.memory_space<vmem>>, vector<1x16x16x32xf32>,
    return
  }
  func.func @transform_0(%arg0: i32, %arg1: i32) -> (i32, i32, i32, i32) {
    %c0_i32 = arith.constant 0 : i32
    %c0_i32_0 = arith.constant 0 : i32
    %c0_i32_1 = arith.constant 0 : i32
    return %arg0, %arg1, %c0_i32, %c0_i32_0 : i32, i32, i32, i32
  }
  func.func @transform_1(%arg0: i32, %arg1: i32) -> (i32, i32, i32, i32) {
    %c2_i32 = arith.constant 2 : i32
    %0 = arith.muli %arg1, %c2_i32 : i32
    %c1_i32 = arith.constant 1 : i32
    %1 = arith.subi %0, %c1_i32 : i32
    %c0_i32 = arith.constant 0 : i32
    %2 = arith.maxsi %1, %c0_i32 : i32
    %c0_i32_0 = arith.constant 0 : i32
    %c0_i32_1 = arith.constant 0 : i32
    %c0_i32_2 = arith.constant 0 : i32
    return %arg0, %2, %c0_i32_0, %c0_i32_1 : i32, i32, i32, i32
  }
  func.func @transform_2(%arg0: i32, %arg1: i32) -> (i32, i32, i32, i32) {
    %c1_i32 = arith.constant 1 : i32
    %0 = arith.addi %arg1, %c1_i32 : i32
    %c2_i32 = arith.constant 2 : i32
    %1 = arith.muli %0, %c2_i32 : i32
    %c1_i32_0 = arith.constant 1 : i32
    %2 = arith.minsi %1, %c1_i32_0 : i32
    %c0_i32 = arith.constant 0 : i32
    %c0_i32_1 = arith.constant 0 : i32
    %c0_i32_2 = arith.constant 0 : i32
    return %arg0, %2, %c0_i32, %c0_i32_1 : i32, i32, i32, i32
  }
  func.func @transform_3(%arg0: i32, %arg1: i32) -> (i32, i32) {
    %c0_i32 = arith.constant 0 : i32
    %c0_i32_0 = arith.constant 0 : i32
    %c0_i32_1 = arith.constant 0 : i32
    return %c0_i32, %c0_i32_0 : i32, i32
  }
  func.func @transform_4(%arg0: i32, %arg1: i32) -> (i32, i32) {
    %c0_i32 = arith.constant 0 : i32
    %c0_i32_0 = arith.constant 0 : i32
    %c0_i32_1 = arith.constant 0 : i32
    return %c0_i32, %c0_i32_0 : i32, i32
  }
  func.func @transform_5(%arg0: i32, %arg1: i32) -> (i32, i32, i32, i32) {
    %c0_i32 = arith.constant 0 : i32
    %c0_i32_0 = arith.constant 0 : i32
    %c0_i32_1 = arith.constant 0 : i32
    %c0_i32_2 = arith.constant 0 : i32
    %c0_i32_3 = arith.constant 0 : i32
    return %c0_i32, %c0_i32_0, %c0_i32_1, %c0_i32_2 : i32, i32, i32, i32
  }
  func.func @transform_6(%arg0: i32, %arg1: i32) -> (i32, i32) {
    %c0_i32 = arith.constant 0 : i32
    %c0_i32_0 = arith.constant 0 : i32
    %c0_i32_1 = arith.constant 0 : i32
    return %c0_i32, %c0_i32_0 : i32, i32
  }
  func.func @transform_7(%arg0: i32, %arg1: i32) -> (i32, i32) {
    %c0_i32 = arith.constant 0 : i32
    %c0_i32_0 = arith.constant 0 : i32
    %c0_i32_1 = arith.constant 0 : i32
    return %c0_i32, %c0_i32_0 : i32, i32
  }
  func.func @transform_8(%arg0: i32, %arg1: i32) -> (i32, i32) {
    %c0_i32 = arith.constant 0 : i32
    %c0_i32_0 = arith.constant 0 : i32
    %c0_i32_1 = arith.constant 0 : i32
    return %c0_i32, %c0_i32_0 : i32, i32
  }
  func.func @transform_9(%arg0: i32, %arg1: i32) -> (i32, i32) {
    %c0_i32 = arith.constant 0 : i32
    %c0_i32_0 = arith.constant 0 : i32
    %c0_i32_1 = arith.constant 0 : i32
    return %c0_i32, %c0_i32_0 : i32, i32
  }
  func.func @transform_10(%arg0: i32, %arg1: i32) -> (i32, i32) {
    %c0_i32 = arith.constant 0 : i32
    %c0_i32_0 = arith.constant 0 : i32
    %c0_i32_1 = arith.constant 0 : i32
    return %c0_i32, %c0_i32_0 : i32, i32
  }
  func.func @transform_11(%arg0: i32, %arg1: i32) -> (i32, i32, i32, i32) {
    %c0_i32 = arith.constant 0 : i32
    %c0_i32_0 = arith.constant 0 : i32
    %c0_i32_1 = arith.constant 0 : i32
    return %arg0, %arg1, %c0_i32, %c0_i32_0 : i32, i32, i32, i32
  }
}

module attributes {stable_mosaic.version = 11 : i64} {
  func.func @kernel(%arg0: i32, %arg1: i32, %arg2: memref<1x16x16x32xf32, #tpu.memory_space<vmem>>, %arg3: memref<1x8x16x32xf32, #tpu.memory_space<vmem>>, %arg4: memref<1x8x16x32xf32, #tpu.memory_space<vmem>>, %arg5: memref<32x8xf32, #tpu.memory_space<vmem>>, %arg6: memref<1x8xf32, #tpu.memory_space<vmem>>, %arg7: memref<3x3x8x8xf32, #tpu.memory_space<vmem>>, %arg8: memref<1x8xf32, #tpu.memory_space<vmem>>, %arg9: memref<8x32xf32, #tpu.memory_space<vmem>>, %arg10: memref<1x32xf32, #tpu.memory_space<vmem>>, %arg11: memref<1x16x16x32xf32, #tpu.memory_space<vmem>>, %arg12: memref<18x16x8xf32, #tpu.memory_space<vmem>>) attributes {dimension_semantics = [#tpu.dimension_semantics<parallel>, #tpu.dimension_semantics<parallel>], iteration_bounds = array<i64: 2, 1>, scalar_prefetch = 0 : i64, scratch_operands = 1 : i64, tpu.core_type = #tpu.core_type<tc>, window_params = [{transform_indices = @transform_0, window_bounds = array<i64: 1, 16, 16, 32>}, {transform_indices = @transform_1, window_bounds = array<i64: 1, 8, 16, 32>}, {transform_indices = @transform_2, window_bounds = array<i64: 1, 8, 16, 32>}, {pipeline_mode = #tpu.pipeline_mode<synchronous>, transform_indices = @transform_3, window_bounds = array<i64: 32, 8>}, {pipeline_mode = #tpu.pipeline_mode<synchronous>, transform_indices = @transform_4, window_bounds = array<i64: 1, 8>}, {pipeline_mode = #tpu.pipeline_mode<synchronous>, transform_indices = @transform_5, window_bounds = array<i64: 3, 3, 8, 8>}, {pipeline_mode = #tpu.pipeline_mode<synchronous>, transform_indices = @transform_6, window_bounds = array<i64: 1, 8>}, {pipeline_mode = #tpu.pipeline_mode<synchronous>, transform_indices = @transform_7, window_bounds = array<i64: 8, 32>}, {pipeline_mode = #tpu.pipeline_mode<synchronous>, transform_indices = @transform_8, window_bounds = array<i64: 1, 32>}, {transform_indices = @transform_9, window_bounds = array<i64: 1, 16, 16, 32>}]} {
    %c16_i32 = arith.constant 16 : i32
    %0 = arith.muli %arg1, %c16_i32 : i32
    %c0_i32 = arith.constant 0 : i32
    %1 = arith.cmpi sgt, %0, %c0_i32 : i32
    %c16_i32_0 = arith.constant 16 : i32
    %2 = arith.addi %0, %c16_i32_0 : i32
    %c16_i32_1 = arith.constant 16 : i32
    %3 = arith.cmpi slt, %2, %c16_i32_1 : i32
    %c0 = arith.constant 0 : index
    %c0_2 = arith.constant 0 : index
    %c0_3 = arith.constant 0 : index
    %c0_4 = arith.constant 0 : index
    %4 = vector.load %arg2[%c0, %c0_2, %c0_3, %c0_4] : memref<1x16x16x32xf32, #tpu.memory_space<vmem>>, vector<1x16x16x32xf32>
    %5 = vector.shape_cast %4 : vector<1x16x16x32xf32> to vector<16x16x32xf32>
    %6 = vector.shape_cast %5 : vector<16x16x32xf32> to vector<256x32xf32>
    %c0_5 = arith.constant 0 : index
    %c0_6 = arith.constant 0 : index
    %7 = vector.load %arg5[%c0_5, %c0_6] : memref<32x8xf32, #tpu.memory_space<vmem>>, vector<32x8xf32>
    %cst = arith.constant dense<0.000000e+00> : vector<256x8xf32>
    %8 = tpu.matmul %6, %7, %cst {dimension_numbers = #tpu.dot_dimension_numbers<[1], [0], [0], [1], [0, 0, 1, 1], [], []>} : vector<256x32xf32>, vector<32x8xf32>, vector<256x8xf32> -> vector<256x8xf32>
    %c0_7 = arith.constant 0 : index
    %c0_8 = arith.constant 0 : index
    %9 = vector.load %arg6[%c0_7, %c0_8] : memref<1x8xf32, #tpu.memory_space<vmem>>, vector<1x8xf32>
    %10 = vector.broadcast %9 : vector<1x8xf32> to vector<256x8xf32>
    %11 = arith.addf %8, %10 : vector<256x8xf32>
    %cst_9 = arith.constant 0.000000e+00 : f32
    %12 = vector.broadcast %cst_9 : f32 to vector<256x8xf32>
    %13 = arith.maximumf %11, %12 : vector<256x8xf32>
    %14 = vector.shape_cast %13 : vector<256x8xf32> to vector<16x16x8xf32>
    %c1 = arith.constant 1 : index
    %c0_10 = arith.constant 0 : index
    %c0_11 = arith.constant 0 : index
    %15 = vector.load %arg12[%c1, %c0_10, %c0_11] : memref<18x16x8xf32, #tpu.memory_space<vmem>>, vector<16x16x8xf32>
    tpu.vector_store %arg12[%c1, %c0_10, %c0_11], %14 {strides = array<i32>} : memref<18x16x8xf32, #tpu.memory_space<vmem>>, vector<16x16x8xf32>,
    %c0_12 = arith.constant 0 : index
    %c7 = arith.constant 7 : index
    %c0_13 = arith.constant 0 : index
    %c0_14 = arith.constant 0 : index
    %16 = vector.load %arg3[%c0_12, %c7, %c0_13, %c0_14] : memref<1x8x16x32xf32, #tpu.memory_space<vmem>>, vector<1x1x16x32xf32>
    %17 = vector.shape_cast %16 : vector<1x1x16x32xf32> to vector<1x16x32xf32>
    %18 = vector.shape_cast %17 : vector<1x16x32xf32> to vector<16x32xf32>
    %c0_15 = arith.constant 0 : index
    %c0_16 = arith.constant 0 : index
    %19 = vector.load %arg5[%c0_15, %c0_16] : memref<32x8xf32, #tpu.memory_space<vmem>>, vector<32x8xf32>
    %cst_17 = arith.constant dense<0.000000e+00> : vector<16x8xf32>
    %20 = tpu.matmul %18, %19, %cst_17 {dimension_numbers = #tpu.dot_dimension_numbers<[1], [0], [0], [1], [0, 0, 1, 1], [], []>} : vector<16x32xf32>, vector<32x8xf32>, vector<16x8xf32> -> vector<16x8xf32>
    %c0_18 = arith.constant 0 : index
    %c0_19 = arith.constant 0 : index
    %21 = vector.load %arg6[%c0_18, %c0_19] : memref<1x8xf32, #tpu.memory_space<vmem>>, vector<1x8xf32>
    %22 = vector.broadcast %21 : vector<1x8xf32> to vector<16x8xf32>
    %23 = arith.addf %20, %22 : vector<16x8xf32>
    %cst_20 = arith.constant 0.000000e+00 : f32
    %24 = vector.broadcast %cst_20 : f32 to vector<16x8xf32>
    %25 = arith.maximumf %23, %24 : vector<16x8xf32>
    %cst_21 = arith.constant 0.000000e+00 : f32
    %26 = vector.broadcast %cst_21 : f32 to vector<16x8xf32>
    %27 = arith.select %1, %25, %26 : vector<16x8xf32>
    %28 = vector.shape_cast %27 : vector<16x8xf32> to vector<1x16x8xf32>
    %c0_22 = arith.constant 0 : index
    %c0_23 = arith.constant 0 : index
    %c0_24 = arith.constant 0 : index
    %29 = vector.load %arg12[%c0_22, %c0_23, %c0_24] : memref<18x16x8xf32, #tpu.memory_space<vmem>>, vector<1x16x8xf32>
    tpu.vector_store %arg12[%c0_22, %c0_23, %c0_24], %28 {strides = array<i32>} : memref<18x16x8xf32, #tpu.memory_space<vmem>>, vector<1x16x8xf32>,
    %c0_25 = arith.constant 0 : index
    %c0_26 = arith.constant 0 : index
    %c0_27 = arith.constant 0 : index
    %c0_28 = arith.constant 0 : index
    %30 = vector.load %arg4[%c0_25, %c0_26, %c0_27, %c0_28] : memref<1x8x16x32xf32, #tpu.memory_space<vmem>>, vector<1x1x16x32xf32>
    %31 = vector.shape_cast %30 : vector<1x1x16x32xf32> to vector<1x16x32xf32>
    %32 = vector.shape_cast %31 : vector<1x16x32xf32> to vector<16x32xf32>
    %c0_29 = arith.constant 0 : index
    %c0_30 = arith.constant 0 : index
    %33 = vector.load %arg5[%c0_29, %c0_30] : memref<32x8xf32, #tpu.memory_space<vmem>>, vector<32x8xf32>
    %cst_31 = arith.constant dense<0.000000e+00> : vector<16x8xf32>
    %34 = tpu.matmul %32, %33, %cst_31 {dimension_numbers = #tpu.dot_dimension_numbers<[1], [0], [0], [1], [0, 0, 1, 1], [], []>} : vector<16x32xf32>, vector<32x8xf32>, vector<16x8xf32> -> vector<16x8xf32>
    %c0_32 = arith.constant 0 : index
    %c0_33 = arith.constant 0 : index
    %35 = vector.load %arg6[%c0_32, %c0_33] : memref<1x8xf32, #tpu.memory_space<vmem>>, vector<1x8xf32>
    %36 = vector.broadcast %35 : vector<1x8xf32> to vector<16x8xf32>
    %37 = arith.addf %34, %36 : vector<16x8xf32>
    %cst_34 = arith.constant 0.000000e+00 : f32
    %38 = vector.broadcast %cst_34 : f32 to vector<16x8xf32>
    %39 = arith.maximumf %37, %38 : vector<16x8xf32>
    %cst_35 = arith.constant 0.000000e+00 : f32
    %40 = vector.broadcast %cst_35 : f32 to vector<16x8xf32>
    %41 = arith.select %3, %39, %40 : vector<16x8xf32>
    %42 = vector.shape_cast %41 : vector<16x8xf32> to vector<1x16x8xf32>
    %c17 = arith.constant 17 : index
    %c0_36 = arith.constant 0 : index
    %c0_37 = arith.constant 0 : index
    %43 = vector.load %arg12[%c17, %c0_36, %c0_37] : memref<18x16x8xf32, #tpu.memory_space<vmem>>, vector<1x16x8xf32>
    tpu.vector_store %arg12[%c17, %c0_36, %c0_37], %42 {strides = array<i32>} : memref<18x16x8xf32, #tpu.memory_space<vmem>>, vector<1x16x8xf32>,
    %cst_38 = arith.constant 0.000000e+00 : f32
    %44 = vector.broadcast %cst_38 : f32 to vector<256x8xf32>
    %c0_39 = arith.constant 0 : index
    %c0_40 = arith.constant 0 : index
    %c0_41 = arith.constant 0 : index
    %45 = vector.load %arg12[%c0_39, %c0_40, %c0_41] : memref<18x16x8xf32, #tpu.memory_space<vmem>>, vector<16x16x8xf32>
    %46 = tpu.iota {dimensions = array<i32: 1>} : vector<1x16x1xi32>
    %c0_i32_42 = arith.constant 0 : i32
    %47 = vector.broadcast %c0_i32_42 : i32 to vector<1x16x1xi32>
    %48 = arith.cmpi sgt, %46, %47 : vector<1x16x1xi32>
    %c1_i32 = arith.constant 1 : i32
    %49 = tpu.dynamic_rotate %45 by %c1_i32 dim 1 : vector<16x16x8xf32>, i32 -> vector<16x16x8xf32>
    %cst_43 = arith.constant 0.000000e+00 : f32
    %50 = vector.shape_cast %48 : vector<1x16x1xi1> to vector<1x16x1xi1>
    %51 = vector.broadcast %50 : vector<1x16x1xi1> to vector<16x16x8xi1>
    %52 = vector.broadcast %cst_43 : f32 to vector<16x16x8xf32>
    %53 = arith.select %51, %49, %52 : vector<16x16x8xi1>, vector<16x16x8xf32>
    %c15_i32 = arith.constant 15 : i32
    %54 = vector.broadcast %c15_i32 : i32 to vector<1x16x1xi32>
    %55 = arith.cmpi slt, %46, %54 : vector<1x16x1xi32>
    %c15_i32_44 = arith.constant 15 : i32
    %56 = tpu.dynamic_rotate %45 by %c15_i32_44 dim 1 : vector<16x16x8xf32>, i32 -> vector<16x16x8xf32>
    %cst_45 = arith.constant 0.000000e+00 : f32
    %57 = vector.shape_cast %55 : vector<1x16x1xi1> to vector<1x16x1xi1>
    %58 = vector.broadcast %57 : vector<1x16x1xi1> to vector<16x16x8xi1>
    %59 = vector.broadcast %cst_45 : f32 to vector<16x16x8xf32>
    %60 = arith.select %58, %56, %59 : vector<16x16x8xi1>, vector<16x16x8xf32>
    %61 = vector.shape_cast %53 : vector<16x16x8xf32> to vector<256x8xf32>
    %c0_46 = arith.constant 0 : index
    %c0_47 = arith.constant 0 : index
    %c0_48 = arith.constant 0 : index
    %c0_49 = arith.constant 0 : index
    %62 = vector.load %arg7[%c0_46, %c0_47, %c0_48, %c0_49] : memref<3x3x8x8xf32, #tpu.memory_space<vmem>>, vector<1x1x8x8xf32>
    %63 = vector.shape_cast %62 : vector<1x1x8x8xf32> to vector<8x8xf32>
    %cst_50 = arith.constant dense<0.000000e+00> : vector<256x8xf32>
    %64 = tpu.matmul %61, %63, %cst_50 {dimension_numbers = #tpu.dot_dimension_numbers<[1], [0], [0], [1], [0, 0, 1, 1], [], []>} : vector<256x8xf32>, vector<8x8xf32>, vector<256x8xf32> -> vector<256x8xf32>
    %65 = arith.addf %44, %64 : vector<256x8xf32>
    %66 = vector.shape_cast %45 : vector<16x16x8xf32> to vector<256x8xf32>
    %c0_51 = arith.constant 0 : index
    %c1_52 = arith.constant 1 : index
    %c0_53 = arith.constant 0 : index
    %c0_54 = arith.constant 0 : index
    %67 = vector.load %arg7[%c0_51, %c1_52, %c0_53, %c0_54] : memref<3x3x8x8xf32, #tpu.memory_space<vmem>>, vector<1x1x8x8xf32>
    %68 = vector.shape_cast %67 : vector<1x1x8x8xf32> to vector<8x8xf32>
    %cst_55 = arith.constant dense<0.000000e+00> : vector<256x8xf32>
    %69 = tpu.matmul %66, %68, %cst_55 {dimension_numbers = #tpu.dot_dimension_numbers<[1], [0], [0], [1], [0, 0, 1, 1], [], []>} : vector<256x8xf32>, vector<8x8xf32>, vector<256x8xf32> -> vector<256x8xf32>
    %70 = arith.addf %65, %69 : vector<256x8xf32>
    %71 = vector.shape_cast %60 : vector<16x16x8xf32> to vector<256x8xf32>
    %c0_56 = arith.constant 0 : index
    %c2 = arith.constant 2 : index
    %c0_57 = arith.constant 0 : index
    %c0_58 = arith.constant 0 : index
    %72 = vector.load %arg7[%c0_56, %c2, %c0_57, %c0_58] : memref<3x3x8x8xf32, #tpu.memory_space<vmem>>, vector<1x1x8x8xf32>
    %73 = vector.shape_cast %72 : vector<1x1x8x8xf32> to vector<8x8xf32>
    %cst_59 = arith.constant dense<0.000000e+00> : vector<256x8xf32>
    %74 = tpu.matmul %71, %73, %cst_59 {dimension_numbers = #tpu.dot_dimension_numbers<[1], [0], [0], [1], [0, 0, 1, 1], [], []>} : vector<256x8xf32>, vector<8x8xf32>, vector<256x8xf32> -> vector<256x8xf32>
    %75 = arith.addf %70, %74 : vector<256x8xf32>
    %c1_60 = arith.constant 1 : index
    %c0_61 = arith.constant 0 : index
    %c0_62 = arith.constant 0 : index
    %76 = vector.load %arg12[%c1_60, %c0_61, %c0_62] : memref<18x16x8xf32, #tpu.memory_space<vmem>>, vector<16x16x8xf32>
    %77 = tpu.iota {dimensions = array<i32: 1>} : vector<1x16x1xi32>
    %c0_i32_63 = arith.constant 0 : i32
    %78 = vector.broadcast %c0_i32_63 : i32 to vector<1x16x1xi32>
    %79 = arith.cmpi sgt, %77, %78 : vector<1x16x1xi32>
    %c1_i32_64 = arith.constant 1 : i32
    %80 = tpu.dynamic_rotate %76 by %c1_i32_64 dim 1 : vector<16x16x8xf32>, i32 -> vector<16x16x8xf32>
    %cst_65 = arith.constant 0.000000e+00 : f32
    %81 = vector.shape_cast %79 : vector<1x16x1xi1> to vector<1x16x1xi1>
    %82 = vector.broadcast %81 : vector<1x16x1xi1> to vector<16x16x8xi1>
    %83 = vector.broadcast %cst_65 : f32 to vector<16x16x8xf32>
    %84 = arith.select %82, %80, %83 : vector<16x16x8xi1>, vector<16x16x8xf32>
    %c15_i32_66 = arith.constant 15 : i32
    %85 = vector.broadcast %c15_i32_66 : i32 to vector<1x16x1xi32>
    %86 = arith.cmpi slt, %77, %85 : vector<1x16x1xi32>
    %c15_i32_67 = arith.constant 15 : i32
    %87 = tpu.dynamic_rotate %76 by %c15_i32_67 dim 1 : vector<16x16x8xf32>, i32 -> vector<16x16x8xf32>
    %cst_68 = arith.constant 0.000000e+00 : f32
    %88 = vector.shape_cast %86 : vector<1x16x1xi1> to vector<1x16x1xi1>
    %89 = vector.broadcast %88 : vector<1x16x1xi1> to vector<16x16x8xi1>
    %90 = vector.broadcast %cst_68 : f32 to vector<16x16x8xf32>
    %91 = arith.select %89, %87, %90 : vector<16x16x8xi1>, vector<16x16x8xf32>
    %92 = vector.shape_cast %84 : vector<16x16x8xf32> to vector<256x8xf32>
    %c1_69 = arith.constant 1 : index
    %c0_70 = arith.constant 0 : index
    %c0_71 = arith.constant 0 : index
    %c0_72 = arith.constant 0 : index
    %93 = vector.load %arg7[%c1_69, %c0_70, %c0_71, %c0_72] : memref<3x3x8x8xf32, #tpu.memory_space<vmem>>, vector<1x1x8x8xf32>
    %94 = vector.shape_cast %93 : vector<1x1x8x8xf32> to vector<8x8xf32>
    %cst_73 = arith.constant dense<0.000000e+00> : vector<256x8xf32>
    %95 = tpu.matmul %92, %94, %cst_73 {dimension_numbers = #tpu.dot_dimension_numbers<[1], [0], [0], [1], [0, 0, 1, 1], [], []>} : vector<256x8xf32>, vector<8x8xf32>, vector<256x8xf32> -> vector<256x8xf32>
    %96 = arith.addf %75, %95 : vector<256x8xf32>
    %97 = vector.shape_cast %76 : vector<16x16x8xf32> to vector<256x8xf32>
    %c1_74 = arith.constant 1 : index
    %c1_75 = arith.constant 1 : index
    %c0_76 = arith.constant 0 : index
    %c0_77 = arith.constant 0 : index
    %98 = vector.load %arg7[%c1_74, %c1_75, %c0_76, %c0_77] : memref<3x3x8x8xf32, #tpu.memory_space<vmem>>, vector<1x1x8x8xf32>
    %99 = vector.shape_cast %98 : vector<1x1x8x8xf32> to vector<8x8xf32>
    %cst_78 = arith.constant dense<0.000000e+00> : vector<256x8xf32>
    %100 = tpu.matmul %97, %99, %cst_78 {dimension_numbers = #tpu.dot_dimension_numbers<[1], [0], [0], [1], [0, 0, 1, 1], [], []>} : vector<256x8xf32>, vector<8x8xf32>, vector<256x8xf32> -> vector<256x8xf32>
    %101 = arith.addf %96, %100 : vector<256x8xf32>
    %102 = vector.shape_cast %91 : vector<16x16x8xf32> to vector<256x8xf32>
    %c1_79 = arith.constant 1 : index
    %c2_80 = arith.constant 2 : index
    %c0_81 = arith.constant 0 : index
    %c0_82 = arith.constant 0 : index
    %103 = vector.load %arg7[%c1_79, %c2_80, %c0_81, %c0_82] : memref<3x3x8x8xf32, #tpu.memory_space<vmem>>, vector<1x1x8x8xf32>
    %104 = vector.shape_cast %103 : vector<1x1x8x8xf32> to vector<8x8xf32>
    %cst_83 = arith.constant dense<0.000000e+00> : vector<256x8xf32>
    %105 = tpu.matmul %102, %104, %cst_83 {dimension_numbers = #tpu.dot_dimension_numbers<[1], [0], [0], [1], [0, 0, 1, 1], [], []>} : vector<256x8xf32>, vector<8x8xf32>, vector<256x8xf32> -> vector<256x8xf32>
    %106 = arith.addf %101, %105 : vector<256x8xf32>
    %c2_84 = arith.constant 2 : index
    %c0_85 = arith.constant 0 : index
    %c0_86 = arith.constant 0 : index
    %107 = vector.load %arg12[%c2_84, %c0_85, %c0_86] : memref<18x16x8xf32, #tpu.memory_space<vmem>>, vector<16x16x8xf32>
    %108 = tpu.iota {dimensions = array<i32: 1>} : vector<1x16x1xi32>
    %c0_i32_87 = arith.constant 0 : i32
    %109 = vector.broadcast %c0_i32_87 : i32 to vector<1x16x1xi32>
    %110 = arith.cmpi sgt, %108, %109 : vector<1x16x1xi32>
    %c1_i32_88 = arith.constant 1 : i32
    %111 = tpu.dynamic_rotate %107 by %c1_i32_88 dim 1 : vector<16x16x8xf32>, i32 -> vector<16x16x8xf32>
    %cst_89 = arith.constant 0.000000e+00 : f32
    %112 = vector.shape_cast %110 : vector<1x16x1xi1> to vector<1x16x1xi1>
    %113 = vector.broadcast %112 : vector<1x16x1xi1> to vector<16x16x8xi1>
    %114 = vector.broadcast %cst_89 : f32 to vector<16x16x8xf32>
    %115 = arith.select %113, %111, %114 : vector<16x16x8xi1>, vector<16x16x8xf32>
    %c15_i32_90 = arith.constant 15 : i32
    %116 = vector.broadcast %c15_i32_90 : i32 to vector<1x16x1xi32>
    %117 = arith.cmpi slt, %108, %116 : vector<1x16x1xi32>
    %c15_i32_91 = arith.constant 15 : i32
    %118 = tpu.dynamic_rotate %107 by %c15_i32_91 dim 1 : vector<16x16x8xf32>, i32 -> vector<16x16x8xf32>
    %cst_92 = arith.constant 0.000000e+00 : f32
    %119 = vector.shape_cast %117 : vector<1x16x1xi1> to vector<1x16x1xi1>
    %120 = vector.broadcast %119 : vector<1x16x1xi1> to vector<16x16x8xi1>
    %121 = vector.broadcast %cst_92 : f32 to vector<16x16x8xf32>
    %122 = arith.select %120, %118, %121 : vector<16x16x8xi1>, vector<16x16x8xf32>
    %123 = vector.shape_cast %115 : vector<16x16x8xf32> to vector<256x8xf32>
    %c2_93 = arith.constant 2 : index
    %c0_94 = arith.constant 0 : index
    %c0_95 = arith.constant 0 : index
    %c0_96 = arith.constant 0 : index
    %124 = vector.load %arg7[%c2_93, %c0_94, %c0_95, %c0_96] : memref<3x3x8x8xf32, #tpu.memory_space<vmem>>, vector<1x1x8x8xf32>
    %125 = vector.shape_cast %124 : vector<1x1x8x8xf32> to vector<8x8xf32>
    %cst_97 = arith.constant dense<0.000000e+00> : vector<256x8xf32>
    %126 = tpu.matmul %123, %125, %cst_97 {dimension_numbers = #tpu.dot_dimension_numbers<[1], [0], [0], [1], [0, 0, 1, 1], [], []>} : vector<256x8xf32>, vector<8x8xf32>, vector<256x8xf32> -> vector<256x8xf32>
    %127 = arith.addf %106, %126 : vector<256x8xf32>
    %128 = vector.shape_cast %107 : vector<16x16x8xf32> to vector<256x8xf32>
    %c2_98 = arith.constant 2 : index
    %c1_99 = arith.constant 1 : index
    %c0_100 = arith.constant 0 : index
    %c0_101 = arith.constant 0 : index
    %129 = vector.load %arg7[%c2_98, %c1_99, %c0_100, %c0_101] : memref<3x3x8x8xf32, #tpu.memory_space<vmem>>, vector<1x1x8x8xf32>
    %130 = vector.shape_cast %129 : vector<1x1x8x8xf32> to vector<8x8xf32>
    %cst_102 = arith.constant dense<0.000000e+00> : vector<256x8xf32>
    %131 = tpu.matmul %128, %130, %cst_102 {dimension_numbers = #tpu.dot_dimension_numbers<[1], [0], [0], [1], [0, 0, 1, 1], [], []>} : vector<256x8xf32>, vector<8x8xf32>, vector<256x8xf32> -> vector<256x8xf32>
    %132 = arith.addf %127, %131 : vector<256x8xf32>
    %133 = vector.shape_cast %122 : vector<16x16x8xf32> to vector<256x8xf32>
    %c2_103 = arith.constant 2 : index
    %c2_104 = arith.constant 2 : index
    %c0_105 = arith.constant 0 : index
    %c0_106 = arith.constant 0 : index
    %134 = vector.load %arg7[%c2_103, %c2_104, %c0_105, %c0_106] : memref<3x3x8x8xf32, #tpu.memory_space<vmem>>, vector<1x1x8x8xf32>
    %135 = vector.shape_cast %134 : vector<1x1x8x8xf32> to vector<8x8xf32>
    %cst_107 = arith.constant dense<0.000000e+00> : vector<256x8xf32>
    %136 = tpu.matmul %133, %135, %cst_107 {dimension_numbers = #tpu.dot_dimension_numbers<[1], [0], [0], [1], [0, 0, 1, 1], [], []>} : vector<256x8xf32>, vector<8x8xf32>, vector<256x8xf32> -> vector<256x8xf32>
    %137 = arith.addf %132, %136 : vector<256x8xf32>
    %c0_108 = arith.constant 0 : index
    %c0_109 = arith.constant 0 : index
    %138 = vector.load %arg8[%c0_108, %c0_109] : memref<1x8xf32, #tpu.memory_space<vmem>>, vector<1x8xf32>
    %139 = vector.broadcast %138 : vector<1x8xf32> to vector<256x8xf32>
    %140 = arith.addf %137, %139 : vector<256x8xf32>
    %cst_110 = arith.constant 0.000000e+00 : f32
    %141 = vector.broadcast %cst_110 : f32 to vector<256x8xf32>
    %142 = arith.maximumf %140, %141 : vector<256x8xf32>
    %c0_111 = arith.constant 0 : index
    %c0_112 = arith.constant 0 : index
    %143 = vector.load %arg9[%c0_111, %c0_112] : memref<8x32xf32, #tpu.memory_space<vmem>>, vector<8x32xf32>
    %cst_113 = arith.constant dense<0.000000e+00> : vector<256x32xf32>
    %144 = tpu.matmul %142, %143, %cst_113 {dimension_numbers = #tpu.dot_dimension_numbers<[1], [0], [0], [1], [0, 0, 1, 1], [], []>} : vector<256x8xf32>, vector<8x32xf32>, vector<256x32xf32> -> vector<256x32xf32>
    %c0_114 = arith.constant 0 : index
    %c0_115 = arith.constant 0 : index
    %145 = vector.load %arg10[%c0_114, %c0_115] : memref<1x32xf32, #tpu.memory_space<vmem>>, vector<1x32xf32>
    %146 = vector.broadcast %145 : vector<1x32xf32> to vector<256x32xf32>
    %147 = arith.addf %144, %146 : vector<256x32xf32>
    %c0_116 = arith.constant 0 : index
    %c0_117 = arith.constant 0 : index
    %c0_118 = arith.constant 0 : index
    %c0_119 = arith.constant 0 : index
    %148 = vector.load %arg2[%c0_116, %c0_117, %c0_118, %c0_119] : memref<1x16x16x32xf32, #tpu.memory_space<vmem>>, vector<1x16x16x32xf32>
    %149 = vector.shape_cast %148 : vector<1x16x16x32xf32> to vector<16x16x32xf32>
    %150 = vector.shape_cast %149 : vector<16x16x32xf32> to vector<256x32xf32>
    %151 = arith.addf %147, %150 : vector<256x32xf32>
    %cst_120 = arith.constant 0.000000e+00 : f32
    %152 = vector.broadcast %cst_120 : f32 to vector<256x32xf32>
    %153 = arith.maximumf %151, %152 : vector<256x32xf32>
    %154 = vector.shape_cast %153 : vector<256x32xf32> to vector<1x16x16x32xf32>
    %c0_121 = arith.constant 0 : index
    %c0_122 = arith.constant 0 : index
    %c0_123 = arith.constant 0 : index
    %c0_124 = arith.constant 0 : index
    %155 = vector.load %arg11[%c0_121, %c0_122, %c0_123, %c0_124] : memref<1x16x16x32xf32, #tpu.memory_space<vmem>>, vector<1x16x16x32xf32>
    tpu.vector_store %arg11[%c0_121, %c0_122, %c0_123, %c0_124], %154 {strides = array<i32>} : memref<1x16x16x32xf32, #tpu.memory_space<vmem>>, vector<1x16x16x32xf32>,
    return
  }
  func.func @transform_0(%arg0: i32, %arg1: i32) -> (i32, i32, i32, i32) {
    %c0_i32 = arith.constant 0 : i32
    %c0_i32_0 = arith.constant 0 : i32
    %c0_i32_1 = arith.constant 0 : i32
    return %arg0, %arg1, %c0_i32, %c0_i32_0 : i32, i32, i32, i32
  }
  func.func @transform_1(%arg0: i32, %arg1: i32) -> (i32, i32, i32, i32) {
    %c2_i32 = arith.constant 2 : i32
    %0 = arith.muli %arg1, %c2_i32 : i32
    %c1_i32 = arith.constant 1 : i32
    %1 = arith.subi %0, %c1_i32 : i32
    %c0_i32 = arith.constant 0 : i32
    %2 = arith.maxsi %1, %c0_i32 : i32
    %c0_i32_0 = arith.constant 0 : i32
    %c0_i32_1 = arith.constant 0 : i32
    %c0_i32_2 = arith.constant 0 : i32
    return %arg0, %2, %c0_i32_0, %c0_i32_1 : i32, i32, i32, i32
  }
  func.func @transform_2(%arg0: i32, %arg1: i32) -> (i32, i32, i32, i32) {
    %c1_i32 = arith.constant 1 : i32
    %0 = arith.addi %arg1, %c1_i32 : i32
    %c2_i32 = arith.constant 2 : i32
    %1 = arith.muli %0, %c2_i32 : i32
    %c1_i32_0 = arith.constant 1 : i32
    %2 = arith.minsi %1, %c1_i32_0 : i32
    %c0_i32 = arith.constant 0 : i32
    %c0_i32_1 = arith.constant 0 : i32
    %c0_i32_2 = arith.constant 0 : i32
    return %arg0, %2, %c0_i32, %c0_i32_1 : i32, i32, i32, i32
  }
  func.func @transform_3(%arg0: i32, %arg1: i32) -> (i32, i32) {
    %c0_i32 = arith.constant 0 : i32
    %c0_i32_0 = arith.constant 0 : i32
    %c0_i32_1 = arith.constant 0 : i32
    return %c0_i32, %c0_i32_0 : i32, i32
  }
  func.func @transform_4(%arg0: i32, %arg1: i32) -> (i32, i32) {
    %c0_i32 = arith.constant 0 : i32
    %c0_i32_0 = arith.constant 0 : i32
    %c0_i32_1 = arith.constant 0 : i32
    return %c0_i32, %c0_i32_0 : i32, i32
  }
  func.func @transform_5(%arg0: i32, %arg1: i32) -> (i32, i32, i32, i32) {
    %c0_i32 = arith.constant 0 : i32
    %c0_i32_0 = arith.constant 0 : i32
    %c0_i32_1 = arith.constant 0 : i32
    %c0_i32_2 = arith.constant 0 : i32
    %c0_i32_3 = arith.constant 0 : i32
    return %c0_i32, %c0_i32_0, %c0_i32_1, %c0_i32_2 : i32, i32, i32, i32
  }
  func.func @transform_6(%arg0: i32, %arg1: i32) -> (i32, i32) {
    %c0_i32 = arith.constant 0 : i32
    %c0_i32_0 = arith.constant 0 : i32
    %c0_i32_1 = arith.constant 0 : i32
    return %c0_i32, %c0_i32_0 : i32, i32
  }
  func.func @transform_7(%arg0: i32, %arg1: i32) -> (i32, i32) {
    %c0_i32 = arith.constant 0 : i32
    %c0_i32_0 = arith.constant 0 : i32
    %c0_i32_1 = arith.constant 0 : i32
    return %c0_i32, %c0_i32_0 : i32, i32
  }
  func.func @transform_8(%arg0: i32, %arg1: i32) -> (i32, i32) {
    %c0_i32 = arith.constant 0 : i32
    %c0_i32_0 = arith.constant 0 : i32
    %c0_i32_1 = arith.constant 0 : i32
    return %c0_i32, %c0_i32_0 : i32, i32
  }
  func.func @transform_9(%arg0: i32, %arg1: i32) -> (i32, i32, i32, i32) {
    %c0_i32 = arith.constant 0 : i32
    %c0_i32_0 = arith.constant 0 : i32
    %c0_i32_1 = arith.constant 0 : i32
    return %arg0, %arg1, %c0_i32, %c0_i32_0 : i32, i32, i32, i32
  }
}

</mosaic_0001>

<bundles_post_ra>
// kernel: resnet_stage_forward.3
= control target key start
LH: loop header
LB: loop body
LE: loop exit
PB: predicated region body
PF: predicated region fallthrough
CT: control target
= control target key end

     0   :  { %14 = vsyncpa [#allocation4], 0  ;;  %s7212_s0 = inlined_call_operand.vmem [shape: f32[2,16,16,32], index: 0, kind: input, shape index: {}, may-alias: {0,1,2}]   ;;  %s7213_s1 = inlined_call_operand.vmem [shape: f32[2,16,16,32], index: 1, kind: input, shape index: {}, may-alias: {0,1,2}]   ;;  %s7214_s2 = inlined_call_operand.vmem [shape: f32[2,16,16,32], index: 2, kind: input, shape index: {}, may-alias: {0,1,2}]   ;;  %s7215_s3 = inlined_call_operand.vmem [shape: f32[32,8], index: 3, kind: input, shape index: {}]   ;;  %s7216_s4 = inlined_call_operand.vmem [shape: f32[1,8], index: 4, kind: input, shape index: {}]   ;;  %s7217_s5 = inlined_call_operand.vmem [shape: f32[3,3,8,8], index: 5, kind: input, shape index: {}]   ;;  %s7218_s6 = inlined_call_operand.vmem [shape: f32[1,8], index: 6, kind: input, shape index: {}]   ;;  %s7219_s7 = inlined_call_operand.vmem [shape: f32[8,32], index: 7, kind: input, shape index: {}]   ;;  %s7220_s8 = inlined_call_operand.vmem [shape: f32[1,32], index: 8, kind: input, shape index: {}]   ;;  %s7221_s9 = inlined_call_operand.hbm [shape: f32[2,16,16,32], index: 9, kind: output, shape index: {}]  }
   0x1   :  { %16 = vsyncpa [#allocation4 + $0x1], 0  ;;  %s4874_s30 = smov 0   ;;  %s4876_s10 = smov 0  }
   0x2   :  { %s4878_s11 = smov 0   ;;  %s4880_s12 = smov 0  }
   0x3   :  { %s4882_s13 = smov 0   ;;  %s4884_s14 = smov 0  }
   0x4 LB: > { %s4282_s15 = sadd.s32 4294967295, %s4819_s14   ;;  %s4283_s16 = sadd.s32 4294967294, %s4819_s14   ;;  %s4819_s14 = sphi %s4884_s14, %s22_s14   ;;  %s4815_s13 = sphi %s4882_s13, %s7472_s13   ;;  %s4811_s12 = sphi %s4880_s12, %s7471_s12   ;;  %s4807_s11 = sphi %s4878_s11, %s7470_s11   ;;  %s4803_s10 = sphi %s4876_s10, %s7469_s10   ;;  %s4799_s30 = sphi %s4874_s30, %s7468_s30  }
   0x5   : > { %s34_s17 = sadd.s32 1, %s4815_s13  ;;  %s269_s18 = sadd.s32 1, %s4807_s11 }
   0x6   : > { %p36_p0 = scmp.ge.s32.totalorder %s34_s17, 2  ;;  %p279_p1 = scmp.ne.s32.totalorder %s4807_s11, %s4803_s10 }
   0x7   : > { %p280_p2 = scmp.eq.s32.totalorder %s4282_s15, 1  ;;  %p285_p3 = scmp.ne.s32.totalorder %s4803_s10, %s4799_s30 }
   0x8   : > { %s7474_s17 = smov (%p36_p0, %s34_s17), 0  ;;  %p286_p5 = scmp.eq.s32.totalorder %s4283_s16, 1 }
   0x9   : > { %p4914_p4 = por %p280_p2, %p279_p1  ;;  %s264_s20 = ssub.s32 %s4815_s13, %s7474_s17 }
   0xa   : > { %p4286_p6 = scmp.ge.s32.totalorder %s4819_s14, 1  ;;  %p267_p7 = scmp.eq.s32.totalorder %s264_s20, 0 }
   0xb   : > { %p4921_p8 = por %p286_p5, %p285_p3  ;;  %p380_p9 = scmp.lt.s32.totalorder %s4819_s14, 3 }
   0xc   : > { %s4927_s22 = scalar_select %p267_p7, %s4807_s11, %s269_s18  }
   0xd   : > { %p381_p10 = pnand %p4286_p6, %p380_p9 }
   0xf   : > { %384 = sbr.rel (%p381_p10) target bundleno = 1200 (0x4b0), region = 56 }
  0x14   : > { %v538_v0 = vld [vmem:[%s7215_s3 + $0x18] sm:$0xff]  ;;  %v537_v1 = vld [vmem:[%s7215_s3 + $0x10] sm:$0xff]  ;;  %p450_p11 = scmp.lt.s32.totalorder %s4811_s12, 1  ;;  %v536_v2 = vld [vmem:[%s7215_s3 + $0x8] sm:$0xff]  ;;  %vm543_vm0 = vcmask 261120   ;;  %vm786_vm1 = vcmask 64512   ;;  %v949_v31 = vlaneseq }
  0x15   : > { %652 = vmatpush.msra.mxu0 %v538_v0  ;;  %4671 = vmatpush.msra.mxu2 %v538_v0  ;;  %v535_v3 = vld [vmem:[%s7215_s3] sm:$0xff]  ;;  %v4821_v25 = vmov 0.0   ;;  %v4332_v27 = vld [vmem:[%s7217_s5 + $0x8] sm:$0xff]  ;;  %s4669_s20 = sshll.u32 %s4811_s12, 8  ;;  %s4761_s23 = scalar_lea.hbm %s7221_s9, 512 }
  0x16   : > { %s451_s29 = scalar_select %p450_p11, %s4811_s12, 1  ;;  %848 = vmatpush.msra.mxu1 %v538_v0  ;;  %866 = vst.msk [vmem:[#allocation2] sm:$0xff] %vm786_vm1, %v4821_v25  ;;  %4675 = vmatpush.msra.mxu3 %v4332_v27  ;;  %v5017_v34 = vshrl.u32 %v949_v31, 7  ;;  %v1158_v36 = vld [vmem:[%s7217_s5] sm:$0xff] }
  0x17   : > { %653 = vmatpush.msra.mxu0 %v537_v1  ;;  %4672 = vmatpush.msra.mxu2 %v537_v1  ;;  %867 = vst.msk [vmem:[#allocation2 + $0x8] sm:$0xff] %vm786_vm1, %v4821_v25  ;;  %v5044_v43 = vld [vmem:[%s7216_s4] ss:$0 sm:$0xff]  ;;  %s4154_s26 = scalar_lea.hbm %s7221_s9, %s4669_s20 }
  0x18   : > { %s4943_s18 = sshll.u32 %s451_s29, 8  ;;  %849 = vmatpush.msra.mxu1 %v537_v1  ;;  %915 = vst.msk [vmem:[#allocation2 + $0x110] sm:$0xff] %vm786_vm1, %v4821_v25  ;;  %vm986_vm2 = vcmp.lt.s32.totalorder %v5017_v34, 1  ;;  %vm952_vm3 = vcmp.gt.s32.totalorder %v5017_v34, 0  ;;  %vm1089_vm4 = vcmp.lt.s32.totalorder %v5017_v34, 7 }
  0x19   : > { %654 = vmatpush.msra.mxu0 %v536_v2  ;;  %s4949_s24 = scalar_lea.vmem %s7212_s0, %s4943_s18  ;;  %4673 = vmatpush.msra.mxu2 %v536_v2  ;;  %s4668_s25 = sadd.s32 128, %s4943_s18  ;;  %916 = vst.msk [vmem:[#allocation2 + $0x118] sm:$0xff] %vm786_vm1, %v4821_v25 }
  0x1a   : > { %v503_v4 = vld [vmem:[%s4949_s24] sm:$0xff]  ;;  %850 = vmatpush.msra.mxu1 %v536_v2  ;;  %v504_v5 = vld [vmem:[%s4949_s24 + $0x8] sm:$0xff]  ;;  %v505_v6 = vld [vmem:[%s4949_s24 + $0x10] sm:$0xff]  ;;  %s492_s28 = scalar_lea.vmem %s7214_s2, %s4668_s25  ;;  %s473_s16 = scalar_lea.vmem %s7213_s1, %s4943_s18 }
  0x1b   : > { %655 = vmatpush.msra.mxu0 %v535_v3  ;;  %4674 = vmatpush.msra.mxu2 %v535_v3  ;;  %v528_v7 = vld [vmem:[%s4949_s24 + $0xc8] sm:$0xff]  ;;  %v506_v8 = vld [vmem:[%s4949_s24 + $0x18] sm:$0xff]  ;;  %v529_v9 = vld [vmem:[%s4949_s24 + $0xd0] sm:$0xff] }
  0x1c   : > { %4294 = vmatmul.msk.f32.vlgmr.msra.gmra.mxu0 %vm543_vm0, %v503_v4  ;;  %851 = vmatpush.msra.mxu1 %v535_v3  ;;  %v507_v10 = vld [vmem:[%s4949_s24 + $0x20] sm:$0xff]  ;;  %v530_v11 = vld [vmem:[%s4949_s24 + $0xd8] sm:$0xff]  ;;  %v508_v12 = vld [vmem:[%s4949_s24 + $0x28] sm:$0xff] }
  0x1d   : > { %896 = vmatpush.msrb.mxu2 %v538_v0  ;;  %v531_v13 = vld [vmem:[%s4949_s24 + $0xe0] sm:$0xff]  ;;  %v509_v14 = vld [vmem:[%s4949_s24 + $0x30] sm:$0xff]  ;;  %v532_v15 = vld [vmem:[%s4949_s24 + $0xe8] sm:$0xff] }
  0x1e   : > { %4319 = vmatmul.msk.f32.vlgmr.msra.gmra.mxu2 %vm543_vm0, %v528_v7  ;;  %v510_v16 = vld [vmem:[%s4949_s24 + $0x38] sm:$0xff]  ;;  %v533_v17 = vld [vmem:[%s4949_s24 + $0xf0] sm:$0xff]  ;;  %v511_v18 = vld [vmem:[%s4949_s24 + $0x40] sm:$0xff]  ;;  %1481 = vmatpush.msrb.mxu1 %v1158_v36 }
  0x1f   : > { %897 = vmatpush.msrb.mxu2 %v537_v1  ;;  %v534_v19 = vld [vmem:[%s4949_s24 + $0xf8] sm:$0xff]  ;;  %v512_v20 = vld [vmem:[%s4949_s24 + $0x48] sm:$0xff]  ;;  %v868_v21 = vld [vmem:[%s492_s28] sm:$0xff] }
  0x20   : > { %v513_v22 = vld [vmem:[%s4949_s24 + $0x50] sm:$0xff]  ;;  %v869_v23 = vld [vmem:[%s492_s28 + $0x8] sm:$0xff]  ;;  %v514_v26 = vld [vmem:[%s4949_s24 + $0x58] sm:$0xff]  ;;  %s446_s28 = sand.u32 1, %s4803_s10  }
  0x21   : > { %898 = vmatpush.msrb.mxu2 %v536_v2  ;;  %v4326_v24 = vld [vmem:[%s473_s16 + $0x70] sm:$0xff]  ;;  %v5007_v28 = vld [vmem:[#allocation2] sm:$0xff]  ;;  %v4327_v30 = vld [vmem:[%s473_s16 + $0x78] sm:$0xff]  ;;  %s4287_s29 = sshll.u32 %s446_s28, 8  ;;  %s4140_s12 = scalar_lea.sflag [#allocation4], %s446_s28 }
  0x22   : > { %4328 = vmatmul.msk.f32.vlgmr.msra.gmra.mxu1 %vm543_vm0, %v4326_v24  ;;  %v515_v29 = vld [vmem:[%s4949_s24 + $0x60] sm:$0xff]  ;;  %v954_v32 = vrot.slane %v5007_v28, 7  ;;  %v5015_v33 = vld [vmem:[#allocation2 + $0x8] sm:$0xff]  ;;  %v517_v40 = vld [vmem:[%s4949_s24 + $0x70] sm:$0xff]  ;;  %s6974_s15 = scalar_lea.vmem [#allocation3], %s4287_s29  ;;  %s4157_s29 = sshll.u32 %s4154_s26, 4  ;;  %s4158_s29 = int_to_ptr.hbm [resolvable:$true] %s4157_s29 }
  0x23   : > { %899 = vmatpush.msrb.mxu2 %v535_v3  ;;  %v970_v35 = vrot.slane %v5015_v33, 7  ;;  %v516_v38 = vld [vmem:[%s4949_s24 + $0x68] sm:$0xff]  ;;  %v518_v42 = vld [vmem:[%s4949_s24 + $0x78] sm:$0xff]  ;;  %v519_v45 = vld [vmem:[%s4949_s24 + $0x80] sm:$0xff]  ;;  %s4155_s27 = sshll.u32 %s6974_s15, 4  ;;  %s4755_s16 = sshra.s32 %s4158_s29, 4  ;;  %s4156_s27 = int_to_ptr.vmem [resolvable:$true] %s4155_s27  ;;  %s4756_s16 = int_to_ptr.hbm [resolvable:$true] %s4755_s16 }
  0x24   : > { %4295 = vmatmul.msk.f32.gmra.mxu0 %vm543_vm0, %v504_v5  ;;  %v520_v49 = vld [vmem:[%s4949_s24 + $0x88] sm:$0xff]  ;;  %v521_v54 = vld [vmem:[%s4949_s24 + $0x90] sm:$0xff]  ;;  %v522_v3 = vld [vmem:[%s4949_s24 + $0x98] sm:$0xff]  ;;  %s4757_s18 = scalar_lea.hbm %s4756_s16, 256  ;;  %p4762_p1 = scmp.lt.s32.totalorder %s4756_s16, %s7221_s9 }
  0x25   : > { %1272 = vmatpush.msra.mxu2 %v4332_v27  ;;  %v1003_v37 = vsel %vm986_vm2, %v970_v35, %v954_v32  ;;  %v987_v41 = vsel %vm986_vm2, %v954_v32, %v970_v35  ;;  %v4463_v35 = vld [vmem:[%s7217_s5 + $0x20] sm:$0xff]  ;;  %p4758_p12 = scmp.ne.s32.totalorder %s4756_s16, %s4757_s18  ;;  %p4763_p2 = scmp.lt.s32.totalorder %s4761_s23, %s4757_s18 }
  0x26   : > { %4320 = vmatmul.msk.f32.gmra.mxu2 %vm543_vm0, %v529_v9  ;;  %v1023_v39 = vsel %vm952_vm3, %v1003_v37, 0.0  ;;  %v4430_v9 = vld [vmem:[%s7217_s5 + $0x18] sm:$0xff]  ;;  %2402 = vmatpush.msrb.mxu0 %v4463_v35 }
  0x27   : > { %2159 = vmatpush.msrb.mxu3 %v4430_v9  ;;  %p4759_p13 = pnand %p4758_p12, %p4914_p4  ;;  %p4764_p3 = por %p4763_p2, %p4762_p1 }
  0x29   : > { %p4760_p0 = pneg %p4759_p13 }
  0x2a   : > { %4329 = vmatmul.msk.f32.gmra.mxu1 %vm543_vm0, %v4327_v30 }
  0x2b   : > { %p4765_p5 = pnand %p4764_p3, %p4760_p0 }
  0x2c   : > { %4296 = vmatmul.msk.f32.gmra.mxu0 %vm543_vm0, %v505_v6 }
  0x2e   : > { %4321 = vmatmul.msk.f32.gmra.mxu2 %vm543_vm0, %v530_v11 }
  0x32   : > { %4365 = vmatmul.msk.f32.vlgmr.msrb.gmra.mxu1 %vm786_vm1, %v1023_v39 }
  0x34   : > { %4297 = vmatmul.msk.f32.gmra.mxu0 %vm543_vm0, %v506_v8 }
  0x36   : > { %4322 = vmatmul.msk.f32.gmra.mxu2 %vm543_vm0, %v531_v13  ;;  %v523_v13 = vld [vmem:[%s4949_s24 + $0xa0] sm:$0xff] }
  0x3a   : > { %4366 = vmatmul.msk.f32.gmra.mxu1 %vm786_vm1, %v987_v41 }
  0x3c   : > { %4298 = vmatmul.msk.f32.gmra.mxu0 %vm543_vm0, %v507_v10 }
  0x3e   : > { %4323 = vmatmul.msk.f32.gmra.mxu2 %vm543_vm0, %v532_v15 }
  0x44   : > { %4299 = vmatmul.msk.f32.gmra.mxu0 %vm543_vm0, %v508_v12 }
  0x46   : > { %4324 = vmatmul.msk.f32.gmra.mxu2 %vm543_vm0, %v533_v17 }
  0x4c   : > { %4300 = vmatmul.msk.f32.gmra.mxu0 %vm543_vm0, %v509_v14 }
  0x4e   : > { %4325 = vmatmul.msk.f32.gmra.mxu2 %vm543_vm0, %v534_v19 }
  0x54   : > { %4301 = vmatmul.msk.f32.gmra.mxu0 %vm543_vm0, %v510_v16 }
  0x56   : > { %4330 = vmatmul.msk.f32.vlgmr.msrb.gmra.mxu2 %vm543_vm0, %v868_v21 }
  0x57   : > { %4676 = vmatpush.msrb.mxu2 %v1158_v36 }
  0x5c   : > { %4302 = vmatmul.msk.f32.gmra.mxu0 %vm543_vm0, %v511_v18 }
  0x5e   : > { %4331 = vmatmul.msk.f32.gmra.mxu2 %vm543_vm0, %v869_v23 }
  0x64   : > { %4303 = vmatmul.msk.f32.gmra.mxu0 %vm543_vm0, %v512_v20 }
  0x66   : > { %4333 = vmatmul.msk.f32.vlgmr.msra.gmra.mxu2 %vm786_vm1, %v5007_v28 }
  0x6c   : > { %4304 = vmatmul.msk.f32.gmra.mxu0 %vm543_vm0, %v513_v22 }
  0x6e   : > { %4334 = vmatmul.msk.f32.gmra.mxu2 %vm786_vm1, %v5015_v33 }
  0x74   : > { %4305 = vmatmul.msk.f32.gmra.mxu0 %vm543_vm0, %v514_v26 }
  0x7c   : > { %4306 = vmatmul.msk.f32.gmra.mxu0 %vm543_vm0, %v515_v29  ;;  %v524_v29 = vld [vmem:[%s4949_s24 + $0xa8] sm:$0xff] }
  0x84   : > { %4307 = vmatmul.msk.f32.gmra.mxu0 %vm543_vm0, %v516_v38 }
  0x8c   : > { %4308 = vmatmul.msk.f32.gmra.mxu0 %vm543_vm0, %v517_v40 }
  0x94   : > { %4309 = vmatmul.msk.f32.gmra.mxu0 %vm543_vm0, %v518_v42  ;;  %v525_v42 = vld [vmem:[%s4949_s24 + $0xb0] sm:$0xff] }
  0x99   : > { %v657_v44 = vpop.f32.mrf.mxu0 }
  0x9a   : > { %v658_v46 = vadd.f32 %v5044_v43, %v657_v44 }
  0x9c   : > { %v753_v47 = vmax.f32 %v658_v46, 0.0  ;;  %4310 = vmatmul.msk.f32.gmra.mxu0 %vm543_vm0, %v519_v45 }
  0x9e   : > { %787 = vst.msk [vmem:[#allocation2 + $0x10] sm:$0xff] %vm786_vm1, %v753_v47 }
  0xa1   : > { %v660_v48 = vpop.f32.mrf.mxu0  ;;  %v732_v4 = vpop.f32.mrf.mxu2 }
  0xa2   : > { %v661_v50 = vadd.f32 %v5044_v43, %v660_v48  ;;  %v733_v8 = vadd.f32 %v5044_v43, %v732_v4 }
  0xa4   : > { %v754_v51 = vmax.f32 %v661_v50, 0.0  ;;  %4311 = vmatmul.msk.f32.gmra.mxu0 %vm543_vm0, %v520_v49  ;;  %v778_v10 = vmax.f32 %v733_v8, 0.0 }
  0xa5   : > { %v5053_v52 = vld [vmem:[#allocation2 + $0x10] sm:$0xff] }
  0xa6   : > { %788 = vst.msk [vmem:[#allocation2 + $0x18] sm:$0xff] %vm786_vm1, %v754_v51  ;;  %4335 = vmatmul.msk.f32.gmra.mxu2 %vm786_vm1, %v5053_v52  ;;  %v955_v58 = vrot.slane %v5053_v52, 7  ;;  %v1058_v59 = vrot.slane %v5053_v52, 1 }
  0xa7   : > { %812 = vst.msk [vmem:[#allocation2 + $0xd8] sm:$0xff] %vm786_vm1, %v778_v10  ;;  %v527_v10 = vld [vmem:[%s4949_s24 + $0xc0] sm:$0xff] }
  0xa9   : > { %v663_v53 = vpop.f32.mrf.mxu0  ;;  %v735_v14 = vpop.f32.mrf.mxu2 }
  0xaa   : > { %v664_v55 = vadd.f32 %v5044_v43, %v663_v53  ;;  %v736_v22 = vadd.f32 %v5044_v43, %v735_v14 }
  0xac   : > { %v755_v56 = vmax.f32 %v664_v55, 0.0  ;;  %4312 = vmatmul.msk.f32.gmra.mxu0 %vm543_vm0, %v521_v54  ;;  %v779_v24 = vmax.f32 %v736_v22, 0.0 }
  0xad   : > { %v5062_v57 = vld [vmem:[#allocation2 + $0x18] sm:$0xff] }
  0xae   : > { %789 = vst.msk [vmem:[#allocation2 + $0x20] sm:$0xff] %vm786_vm1, %v755_v56  ;;  %v971_v60 = vrot.slane %v5062_v57, 7  ;;  %v1074_v61 = vrot.slane %v5062_v57, 1  ;;  %4336 = vmatmul.msk.f32.gmra.mxu2 %vm786_vm1, %v5062_v57 }
  0xaf   : > { %813 = vst.msk [vmem:[#allocation2 + $0xe0] sm:$0xff] %vm786_vm1, %v779_v24 }
  0xb0   : > { %v1004_v62 = vsel %vm986_vm2, %v971_v60, %v955_v58  ;;  %v5075_v63 = vsel %vm1089_vm4, %v1058_v59, %v1074_v61  ;;  %v5079_v0 = vsel %vm1089_vm4, %v1074_v61, %v1058_v59  ;;  %v5101_v12 = vsel %vm986_vm2, %v955_v58, %v971_v60  ;;  %v526_v60 = vld [vmem:[%s4949_s24 + $0xb8] sm:$0xff] }
  0xb1   : > { %v666_v1 = vpop.f32.mrf.mxu0  ;;  %v5083_v2 = vsel %vm952_vm3, %v1004_v62, 0.0  ;;  %v738_v30 = vpop.f32.mrf.mxu2 }
  0xb2   : > { %v667_v5 = vadd.f32 %v5044_v43, %v666_v1  ;;  %4367 = vmatmul.msk.f32.gmra.mxu1 %vm786_vm1, %v5083_v2  ;;  %v739_v38 = vadd.f32 %v5044_v43, %v738_v30 }
  0xb4   : > { %v756_v6 = vmax.f32 %v667_v5, 0.0  ;;  %4313 = vmatmul.msk.f32.gmra.mxu0 %vm543_vm0, %v522_v3  ;;  %v780_v39 = vmax.f32 %v739_v38, 0.0 }
  0xb5   : > { %v5090_v7 = vld [vmem:[#allocation2 + $0x20] sm:$0xff] }
  0xb6   : > { %790 = vst.msk [vmem:[#allocation2 + $0x28] sm:$0xff] %vm786_vm1, %v756_v6  ;;  %4337 = vmatmul.msk.f32.gmra.mxu2 %vm786_vm1, %v5090_v7  ;;  %v956_v17 = vrot.slane %v5090_v7, 7  ;;  %v1059_v19 = vrot.slane %v5090_v7, 1 }
  0xb7   : > { %814 = vst.msk [vmem:[#allocation2 + $0xe8] sm:$0xff] %vm786_vm1, %v780_v39 }
  0xb9   : > { %v669_v11 = vpop.f32.mrf.mxu0  ;;  %v741_v44 = vpop.f32.mrf.mxu2 }
  0xba   : > { %v670_v15 = vadd.f32 %v5044_v43, %v669_v11  ;;  %4368 = vmatmul.msk.f32.gmra.mxu1 %vm786_vm1, %v5101_v12  ;;  %v742_v53 = vadd.f32 %v5044_v43, %v741_v44 }
  0xbc   : > { %v757_v16 = vmax.f32 %v670_v15, 0.0  ;;  %4314 = vmatmul.msk.f32.gmra.mxu0 %vm543_vm0, %v523_v13  ;;  %v781_v55 = vmax.f32 %v742_v53, 0.0 }
  0xbd   : > { %v5110_v18 = vld [vmem:[#allocation2 + $0x28] sm:$0xff] }
  0xbe   : > { %791 = vst.msk [vmem:[#allocation2 + $0x30] sm:$0xff] %vm786_vm1, %v757_v16  ;;  %v972_v20 = vrot.slane %v5110_v18, 7  ;;  %v1075_v21 = vrot.slane %v5110_v18, 1  ;;  %4338 = vmatmul.msk.f32.gmra.mxu2 %vm786_vm1, %v5110_v18 }
  0xbf   : > { %815 = vst.msk [vmem:[#allocation2 + $0xf0] sm:$0xff] %vm786_vm1, %v781_v55 }
  0xc0   : > { %v1005_v23 = vsel %vm986_vm2, %v972_v20, %v956_v17  ;;  %v5123_v25 = vsel %vm1089_vm4, %v1059_v19, %v1075_v21  ;;  %v5132_v31 = vsel %vm1089_vm4, %v1075_v21, %v1059_v19  ;;  %v5150_v41 = vsel %vm986_vm2, %v956_v17, %v972_v20 }
  0xc1   : > { %v672_v26 = vpop.f32.mrf.mxu0  ;;  %v5127_v27 = vsel %vm952_vm3, %v1005_v23, 0.0  ;;  %v744_v61 = vpop.f32.mrf.mxu2 }
  0xc2   : > { %v673_v32 = vadd.f32 %v5044_v43, %v672_v26  ;;  %4369 = vmatmul.msk.f32.gmra.mxu1 %vm786_vm1, %v5127_v27  ;;  %v745_v5 = vadd.f32 %v5044_v43, %v744_v61 }
  0xc4   : > { %v758_v36 = vmax.f32 %v673_v32, 0.0  ;;  %4315 = vmatmul.msk.f32.gmra.mxu0 %vm543_vm0, %v524_v29  ;;  %v782_v6 = vmax.f32 %v745_v5, 0.0 }
  0xc5   : > { %v5142_v37 = vld [vmem:[#allocation2 + $0x30] sm:$0xff] }
  0xc6   : > { %792 = vst.msk [vmem:[#allocation2 + $0x38] sm:$0xff] %vm786_vm1, %v758_v36  ;;  %4339 = vmatmul.msk.f32.vlgmr.msra.gmra.mxu3 %vm786_vm1, %v5142_v37  ;;  %v957_v47 = vrot.slane %v5142_v37, 7  ;;  %v1060_v49 = vrot.slane %v5142_v37, 1 }
  0xc7   : > { %816 = vst.msk [vmem:[#allocation2 + $0xf8] sm:$0xff] %vm786_vm1, %v782_v6 }
  0xc9   : > { %v675_v40 = vpop.f32.mrf.mxu0  ;;  %v747_v11 = vpop.f32.mrf.mxu2 }
  0xca   : > { %v676_v45 = vadd.f32 %v5044_v43, %v675_v40  ;;  %4370 = vmatmul.msk.f32.gmra.mxu1 %vm786_vm1, %v5150_v41  ;;  %v748_v21 = vadd.f32 %v5044_v43, %v747_v11 }
  0xcc   : > { %v759_v46 = vmax.f32 %v676_v45, 0.0  ;;  %4316 = vmatmul.msk.f32.gmra.mxu0 %vm543_vm0, %v525_v42  ;;  %v783_v23 = vmax.f32 %v748_v21, 0.0 }
  0xcd   : > { %v5159_v48 = vld [vmem:[#allocation2 + $0x38] sm:$0xff] }
  0xce   : > { %793 = vst.msk [vmem:[#allocation2 + $0x40] sm:$0xff] %vm786_vm1, %v759_v46  ;;  %v973_v50 = vrot.slane %v5159_v48, 7  ;;  %v1076_v51 = vrot.slane %v5159_v48, 1  ;;  %4340 = vmatmul.msk.f32.gmra.mxu3 %vm786_vm1, %v5159_v48 }
  0xcf   : > { %817 = vst.msk [vmem:[#allocation2 + $0x100] sm:$0xff] %vm786_vm1, %v783_v23 }
  0xd0   : > { %v1006_v54 = vsel %vm986_vm2, %v973_v50, %v957_v47  ;;  %v5172_v56 = vsel %vm1089_vm4, %v1060_v49, %v1076_v51  ;;  %v5181_v62 = vsel %vm1089_vm4, %v1076_v51, %v1060_v49  ;;  %v5196_v9 = vsel %vm986_vm2, %v957_v47, %v973_v50 }
  0xd1   : > { %v678_v58 = vpop.f32.mrf.mxu0  ;;  %v5176_v59 = vsel %vm952_vm3, %v1006_v54, 0.0  ;;  %v750_v30 = vpop.f32.mrf.mxu2 }
  0xd2   : > { %v679_v1 = vadd.f32 %v5044_v43, %v678_v58  ;;  %4371 = vmatmul.msk.f32.gmra.mxu1 %vm786_vm1, %v5176_v59  ;;  %v751_v39 = vadd.f32 %v5044_v43, %v750_v30 }
  0xd4   : > { %v760_v3 = vmax.f32 %v679_v1, 0.0  ;;  %4317 = vmatmul.msk.f32.gmra.mxu0 %vm543_vm0, %v526_v60  ;;  %v784_v40 = vmax.f32 %v751_v39, 0.0 }
  0xd5   : > { %v5188_v4 = vld [vmem:[#allocation2 + $0x40] sm:$0xff] }
  0xd6   : > { %794 = vst.msk [vmem:[#allocation2 + $0x48] sm:$0xff] %vm786_vm1, %v760_v3  ;;  %4341 = vmatmul.msk.f32.gmra.mxu3 %vm786_vm1, %v5188_v4  ;;  %v958_v15 = vrot.slane %v5188_v4, 7  ;;  %v1061_v17 = vrot.slane %v5188_v4, 1 }
  0xd7   : > { %818 = vst.msk [vmem:[#allocation2 + $0x108] sm:$0xff] %vm786_vm1, %v784_v40 }
  0xd9   : > { %v681_v8 = vpop.f32.mrf.mxu0  ;;  %v901_v45 = vpop.f32.mrf.mxu2 }
  0xda   : > { %v682_v13 = vadd.f32 %v5044_v43, %v681_v8  ;;  %4372 = vmatmul.msk.f32.gmra.mxu1 %vm786_vm1, %v5196_v9 }
  0xdc   : > { %v761_v14 = vmax.f32 %v682_v13, 0.0  ;;  %4318 = vmatmul.msk.f32.gmra.mxu0 %vm543_vm0, %v527_v10 }
  0xdd   : > { %v5205_v16 = vld [vmem:[#allocation2 + $0x48] sm:$0xff] }
  0xde   : > { %795 = vst.msk [vmem:[#allocation2 + $0x50] sm:$0xff] %vm786_vm1, %v761_v14  ;;  %v974_v19 = vrot.slane %v5205_v16, 7  ;;  %v1077_v20 = vrot.slane %v5205_v16, 1  ;;  %4342 = vmatmul.msk.f32.gmra.mxu3 %vm786_vm1, %v5205_v16 }
  0xe0   : > { %v1007_v22 = vsel %vm986_vm2, %v974_v19, %v958_v15  ;;  %v5218_v24 = vsel %vm1089_vm4, %v1061_v17, %v1077_v20  ;;  %v5226_v32 = vsel %vm1089_vm4, %v1077_v20, %v1061_v17  ;;  %v5242_v44 = vsel %vm986_vm2, %v958_v15, %v974_v19 }
  0xe1   : > { %v684_v26 = vpop.f32.mrf.mxu0  ;;  %v5222_v29 = vsel %vm952_vm3, %v1007_v22, 0.0  ;;  %v904_v1 = vpop.f32.mrf.mxu2 }
  0xe2   : > { %v685_v35 = vadd.f32 %v5044_v43, %v684_v26  ;;  %4373 = vmatmul.msk.f32.gmra.mxu1 %vm786_vm1, %v5222_v29 }
  0xe4   : > { %v762_v36 = vmax.f32 %v685_v35, 0.0  ;;  %4464 = vmatmul.msk.f32.vlgmr.msrb.gmra.mxu0 %vm786_vm1, %v5053_v52  ;;  %v853_v52 = vpop.f32.mrf.mxu1 }
  0xe5   : > { %v5234_v38 = vld [vmem:[#allocation2 + $0x50] sm:$0xff] }
  0xe6   : > { %796 = vst.msk [vmem:[#allocation2 + $0x58] sm:$0xff] %vm786_vm1, %v762_v36  ;;  %4343 = vmatmul.msk.f32.gmra.mxu3 %vm786_vm1, %v5234_v38  ;;  %v959_v50 = vrot.slane %v5234_v38, 7  ;;  %v1062_v51 = vrot.slane %v5234_v38, 1 }
  0xe9   : > { %v687_v42 = vpop.f32.mrf.mxu0 }
  0xea   : > { %v688_v46 = vadd.f32 %v5044_v43, %v687_v42  ;;  %4374 = vmatmul.msk.f32.gmra.mxu1 %vm786_vm1, %v5242_v44 }
  0xec   : > { %v763_v47 = vmax.f32 %v688_v46, 0.0  ;;  %4465 = vmatmul.msk.f32.gmra.mxu0 %vm786_vm1, %v5062_v57  ;;  %v856_v8 = vpop.f32.mrf.mxu1 }
  0xed   : > { %v5250_v49 = vld [vmem:[#allocation2 + $0x58] sm:$0xff] }
  0xee   : > { %797 = vst.msk [vmem:[#allocation2 + $0x60] sm:$0xff] %vm786_vm1, %v763_v47  ;;  %v975_v53 = vrot.slane %v5250_v49, 7  ;;  %v1078_v54 = vrot.slane %v5250_v49, 1  ;;  %4344 = vmatmul.msk.f32.gmra.mxu3 %vm786_vm1, %v5250_v49 }
  0xf0   : > { %v1008_v55 = vsel %vm986_vm2, %v975_v53, %v959_v50  ;;  %v5263_v57 = vsel %vm1089_vm4, %v1062_v51, %v1078_v54  ;;  %v5267_v58 = vsel %vm1089_vm4, %v1078_v54, %v1062_v51  ;;  %v5285_v11 = vsel %vm986_vm2, %v959_v50, %v975_v53 }
  0xf1   : > { %v690_v60 = vpop.f32.mrf.mxu0  ;;  %v5271_v61 = vsel %vm952_vm3, %v1008_v55, 0.0 }
  0xf2   : > { %v691_v3 = vadd.f32 %v5044_v43, %v690_v60  ;;  %4375 = vmatmul.msk.f32.gmra.mxu1 %vm786_vm1, %v5271_v61 }
  0xf4   : > { %v764_v5 = vmax.f32 %v691_v3, 0.0  ;;  %4466 = vmatmul.msk.f32.gmra.mxu0 %vm786_vm1, %v5090_v7 }
  0xf5   : > { %v5278_v6 = vld [vmem:[#allocation2 + $0x60] sm:$0xff] }
  0xf6   : > { %798 = vst.msk [vmem:[#allocation2 + $0x68] sm:$0xff] %vm786_vm1, %v764_v5  ;;  %4345 = vmatmul.msk.f32.gmra.mxu3 %vm786_vm1, %v5278_v6  ;;  %v960_v15 = vrot.slane %v5278_v6, 7  ;;  %v1063_v17 = vrot.slane %v5278_v6, 1 }
  0xf9   : > { %v693_v10 = vpop.f32.mrf.mxu0 }
  0xfa   : > { %v694_v13 = vadd.f32 %v5044_v43, %v693_v10  ;;  %4376 = vmatmul.msk.f32.gmra.mxu1 %vm786_vm1, %v5285_v11 }
  0xfc   : > { %v765_v14 = vmax.f32 %v694_v13, 0.0  ;;  %4467 = vmatmul.msk.f32.gmra.mxu0 %vm786_vm1, %v5110_v18 }
  0xfd   : > { %v5292_v7 = vld [vmem:[#allocation2 + $0x68] sm:$0xff] }
  0xfe   : > { %799 = vst.msk [vmem:[#allocation2 + $0x70] sm:$0xff] %vm786_vm1, %v765_v14  ;;  %v976_v19 = vrot.slane %v5292_v7, 7  ;;  %v1079_v20 = vrot.slane %v5292_v7, 1  ;;  %4346 = vmatmul.msk.f32.gmra.mxu3 %vm786_vm1, %v5292_v7 }
 0x100   : > { %v1009_v21 = vsel %vm986_vm2, %v976_v19, %v960_v15  ;;  %v5305_v18 = vsel %vm1089_vm4, %v1063_v17, %v1079_v20  ;;  %v5313_v26 = vsel %vm1089_vm4, %v1079_v20, %v1063_v17  ;;  %v5327_v40 = vsel %vm986_vm2, %v960_v15, %v976_v19 }
 0x101   : > { %v696_v22 = vpop.f32.mrf.mxu0  ;;  %v5309_v23 = vsel %vm952_vm3, %v1009_v21, 0.0 }
 0x102   : > { %v697_v30 = vadd.f32 %v5044_v43, %v696_v22  ;;  %4377 = vmatmul.msk.f32.gmra.mxu1 %vm786_vm1, %v5309_v23 }
 0x104   : > { %v766_v35 = vmax.f32 %v697_v30, 0.0  ;;  %4468 = vmatmul.msk.f32.gmra.mxu0 %vm786_vm1, %v5142_v37 }
 0x105   : > { %v5320_v36 = vld [vmem:[#allocation2 + $0x70] sm:$0xff] }
 0x106   : > { %800 = vst.msk [vmem:[#allocation2 + $0x78] sm:$0xff] %vm786_vm1, %v766_v35  ;;  %4347 = vmatmul.msk.f32.gmra.mxu3 %vm786_vm1, %v5320_v36  ;;  %v961_v46 = vrot.slane %v5320_v36, 7  ;;  %v1064_v52 = vrot.slane %v5320_v36, 1 }
 0x109   : > { %v699_v39 = vpop.f32.mrf.mxu0 }
 0x10a   : > { %v700_v42 = vadd.f32 %v5044_v43, %v699_v39  ;;  %4378 = vmatmul.msk.f32.gmra.mxu1 %vm786_vm1, %v5327_v40 }
 0x10c   : > { %v767_v45 = vmax.f32 %v700_v42, 0.0  ;;  %4469 = vmatmul.msk.f32.gmra.mxu0 %vm786_vm1, %v5159_v48 }
 0x10d   : > { %v5334_v37 = vld [vmem:[#allocation2 + $0x78] sm:$0xff] }
 0x10e   : > { %801 = vst.msk [vmem:[#allocation2 + $0x80] sm:$0xff] %vm786_vm1, %v767_v45  ;;  %v977_v47 = vrot.slane %v5334_v37, 7  ;;  %v1080_v50 = vrot.slane %v5334_v37, 1  ;;  %4348 = vmatmul.msk.f32.gmra.mxu3 %vm786_vm1, %v5334_v37  ;;  %v5406_v45 = vpop.f32.mrf.mxu1 }
 0x10f   : > { %7246 = vst [vmem:[#allocation8_spill] sm:$0xff] %v5406_v45 }
 0x110   : > { %v1010_v51 = vsel %vm986_vm2, %v977_v47, %v961_v46  ;;  %v5347_v48 = vsel %vm1089_vm4, %v1064_v52, %v1080_v50  ;;  %v5351_v53 = vsel %vm1089_vm4, %v1080_v50, %v1064_v52  ;;  %v5369_v8 = vsel %vm986_vm2, %v961_v46, %v977_v47 }
 0x111   : > { %v702_v54 = vpop.f32.mrf.mxu0  ;;  %v5355_v55 = vsel %vm952_vm3, %v1010_v51, 0.0  ;;  %7244 = vst [vmem:[#allocation6_spill] sm:$0xff] %v5369_v8 }
 0x112   : > { %v703_v60 = vadd.f32 %v5044_v43, %v702_v54  ;;  %4379 = vmatmul.msk.f32.gmra.mxu1 %vm786_vm1, %v5355_v55 }
 0x114   : > { %v768_v1 = vmax.f32 %v703_v60, 0.0  ;;  %4470 = vmatmul.msk.f32.gmra.mxu0 %vm786_vm1, %v5188_v4 }
 0x115   : > { %v5362_v3 = vld [vmem:[#allocation2 + $0x80] sm:$0xff] }
 0x116   : > { %802 = vst.msk [vmem:[#allocation2 + $0x88] sm:$0xff] %vm786_vm1, %v768_v1  ;;  %4349 = vmatmul.msk.f32.gmra.mxu3 %vm786_vm1, %v5362_v3  ;;  %v962_v14 = vrot.slane %v5362_v3, 7  ;;  %v1065_v15 = vrot.slane %v5362_v3, 1 }
 0x119   : > { %v705_v5 = vpop.f32.mrf.mxu0 }
 0x11a   : > { %v706_v10 = vadd.f32 %v5044_v43, %v705_v5  ;;  %4380 = vmatmul.msk.f32.gmra.mxu1 %vm786_vm1, %v5369_v8  ;;  %v5429_v5 = vpop.f32.mrf.mxu1 }
 0x11b   : > { %7248 = vst [vmem:[#allocation10_spill] sm:$0xff] %v5429_v5 }
 0x11c   : > { %v769_v13 = vmax.f32 %v706_v10, 0.0  ;;  %4471 = vmatmul.msk.f32.gmra.mxu0 %vm786_vm1, %v5205_v16 }
 0x11d   : > { %v5376_v4 = vld [vmem:[#allocation2 + $0x88] sm:$0xff] }
 0x11e   : > { %803 = vst.msk [vmem:[#allocation2 + $0x90] sm:$0xff] %vm786_vm1, %v769_v13  ;;  %v978_v17 = vrot.slane %v5376_v4, 7  ;;  %v1081_v19 = vrot.slane %v5376_v4, 1  ;;  %4350 = vmatmul.msk.f32.gmra.mxu3 %vm786_vm1, %v5376_v4 }
 0x120   : > { %v1011_v20 = vsel %vm986_vm2, %v978_v17, %v962_v14  ;;  %v5389_v16 = vsel %vm1089_vm4, %v1065_v15, %v1081_v19  ;;  %v5393_v21 = vsel %vm1089_vm4, %v1081_v19, %v1065_v15  ;;  %v5413_v52 = vsel %vm986_vm2, %v962_v14, %v978_v17 }
 0x121   : > { %v708_v22 = vpop.f32.mrf.mxu0  ;;  %v5397_v30 = vsel %vm952_vm3, %v1011_v20, 0.0  ;;  %7247 = vst [vmem:[#allocation9_spill] sm:$0xff] %v5413_v52 }
 0x122   : > { %7245 = vst [vmem:[#allocation7_spill] sm:$0xff] %v5397_v30  ;;  %v709_v35 = vadd.f32 %v5044_v43, %v708_v22  ;;  %4381 = vmatmul.msk.f32.gmra.mxu1 %vm786_vm1, %v5397_v30  ;;  %v4496_v22 = vld [vmem:[%s7217_s5 + $0x28] sm:$0xff] }
 0x123   : > { %2645 = vmatpush.msra.mxu1 %v4496_v22 }
 0x124   : > { %v770_v39 = vmax.f32 %v709_v35, 0.0  ;;  %4472 = vmatmul.msk.f32.gmra.mxu0 %vm786_vm1, %v5234_v38 }
 0x125   : > { %v5404_v42 = vld [vmem:[#allocation2 + $0x90] sm:$0xff] }
 0x126   : > { %804 = vst.msk [vmem:[#allocation2 + $0x98] sm:$0xff] %vm786_vm1, %v770_v39  ;;  %4351 = vmatmul.msk.f32.gmra.mxu3 %vm786_vm1, %v5404_v42  ;;  %v963_v51 = vrot.slane %v5404_v42, 7  ;;  %v1066_v54 = vrot.slane %v5404_v42, 1 }
 0x129   : > { %v711_v46 = vpop.f32.mrf.mxu0 }
 0x12a   : > { %v712_v47 = vadd.f32 %v5044_v43, %v711_v46  ;;  %4382 = vmatmul.msk.f32.gmra.mxu1 %vm786_vm1, %v5413_v52 }
 0x12c   : > { %v771_v38 = vmax.f32 %v712_v47, 0.0  ;;  %4473 = vmatmul.msk.f32.gmra.mxu0 %vm786_vm1, %v5250_v49 }
 0x12d   : > { %v5420_v50 = vld [vmem:[#allocation2 + $0x98] sm:$0xff] }
 0x12e   : > { %805 = vst.msk [vmem:[#allocation2 + $0xa0] sm:$0xff] %vm786_vm1, %v771_v38  ;;  %v979_v60 = vrot.slane %v5420_v50, 7  ;;  %v1082_v1 = vrot.slane %v5420_v50, 1  ;;  %4352 = vmatmul.msk.f32.gmra.mxu3 %vm786_vm1, %v5420_v50 }
 0x12f   : > { %v5462_v46 = vpop.f32.mrf.mxu1 }
 0x130   : > { %v1012_v49 = vsel %vm986_vm2, %v979_v60, %v963_v51  ;;  %v5435_v10 = vsel %vm1089_vm4, %v1066_v54, %v1082_v1  ;;  %v5443_v15 = vsel %vm1089_vm4, %v1082_v1, %v1066_v54  ;;  %v5460_v39 = vsel %vm986_vm2, %v963_v51, %v979_v60  ;;  %7251 = vst [vmem:[#allocation13_spill] sm:$0xff] %v5462_v46 }
 0x131   : > { %v714_v13 = vpop.f32.mrf.mxu0  ;;  %v5439_v14 = vsel %vm952_vm3, %v1012_v49, 0.0  ;;  %7250 = vst [vmem:[#allocation12_spill] sm:$0xff] %v5460_v39  ;;  %v4397_v49 = vld [vmem:[%s7217_s5 + $0x10] sm:$0xff] }
 0x132   : > { %7249 = vst [vmem:[#allocation11_spill] sm:$0xff] %v5439_v14  ;;  %v715_v17 = vadd.f32 %v5044_v43, %v714_v13  ;;  %4383 = vmatmul.msk.f32.gmra.mxu1 %vm786_vm1, %v5439_v14  ;;  %1692 = vmatpush.msra.mxu2 %v4397_v49 }
 0x134   : > { %v772_v19 = vmax.f32 %v715_v17, 0.0  ;;  %4474 = vmatmul.msk.f32.gmra.mxu0 %vm786_vm1, %v5278_v6 }
 0x135   : > { %v5450_v20 = vld [vmem:[#allocation2 + $0xa0] sm:$0xff] }
 0x136   : > { %806 = vst.msk [vmem:[#allocation2 + $0xa8] sm:$0xff] %vm786_vm1, %v772_v19  ;;  %4353 = vmatmul.msk.f32.gmra.mxu3 %vm786_vm1, %v5450_v20  ;;  %v964_v54 = vrot.slane %v5450_v20, 7  ;;  %v1067_v1 = vrot.slane %v5450_v20, 1 }
 0x139   : > { %v717_v35 = vpop.f32.mrf.mxu0 }
 0x13a   : > { %v718_v6 = vadd.f32 %v5044_v43, %v717_v35  ;;  %4384 = vmatmul.msk.f32.gmra.mxu1 %vm786_vm1, %v5460_v39 }
 0x13c   : > { %v773_v47 = vmax.f32 %v718_v6, 0.0  ;;  %4475 = vmatmul.msk.f32.gmra.mxu0 %vm786_vm1, %v5292_v7  ;;  %v5498_v6 = vpop.f32.mrf.mxu1 }
 0x13d   : > { %v5469_v38 = vld [vmem:[#allocation2 + $0xa8] sm:$0xff]  ;;  %7253 = vst [vmem:[#allocation15_spill] sm:$0xff] %v5498_v6 }
 0x13e   : > { %807 = vst.msk [vmem:[#allocation2 + $0xb0] sm:$0xff] %vm786_vm1, %v773_v47  ;;  %v980_v51 = vrot.slane %v5469_v38, 7  ;;  %v1083_v60 = vrot.slane %v5469_v38, 1  ;;  %4354 = vmatmul.msk.f32.gmra.mxu3 %vm786_vm1, %v5469_v38 }
 0x140   : > { %v1013_v7 = vsel %vm986_vm2, %v980_v51, %v964_v54  ;;  %v5485_v13 = vsel %vm1089_vm4, %v1067_v1, %v1083_v60  ;;  %v5493_v22 = vsel %vm1089_vm4, %v1083_v60, %v1067_v1 }
 0x141   : > { %v720_v17 = vpop.f32.mrf.mxu0  ;;  %v5489_v19 = vsel %vm952_vm3, %v1013_v7, 0.0  ;;  %v5511_v7 = vsel %vm986_vm2, %v964_v54, %v980_v51 }
 0x142   : > { %7252 = vst [vmem:[#allocation14_spill] sm:$0xff] %v5489_v19  ;;  %v721_v35 = vadd.f32 %v5044_v43, %v720_v17  ;;  %4385 = vmatmul.msk.f32.gmra.mxu1 %vm786_vm1, %v5489_v19 }
 0x143   : > { %7255 = vst [vmem:[#allocation17_spill] sm:$0xff] %v5511_v7 }
 0x144   : > { %v774_v47 = vmax.f32 %v721_v35, 0.0  ;;  %4476 = vmatmul.msk.f32.gmra.mxu0 %vm786_vm1, %v5320_v36 }
 0x145   : > { %v5502_v49 = vld [vmem:[#allocation2 + $0xb0] sm:$0xff] }
 0x146   : > { %808 = vst.msk [vmem:[#allocation2 + $0xb8] sm:$0xff] %vm786_vm1, %v774_v47  ;;  %4355 = vmatmul.msk.f32.gmra.mxu3 %vm786_vm1, %v5502_v49  ;;  %v5520_v47 = vpop.f32.mrf.mxu1  ;;  %v965_v6 = vrot.slane %v5502_v49, 7 }
 0x147   : > { %7256 = vst [vmem:[#allocation18_spill] sm:$0xff] %v5520_v47 }
 0x149   : > { %v723_v1 = vpop.f32.mrf.mxu0  ;;  %v5507_v60 = vpop.f32.mrf.mxu3 }
 0x14a   : > { %7254 = vst [vmem:[#allocation16_spill] sm:$0xff] %v5507_v60  ;;  %v724_v17 = vadd.f32 %v5044_v43, %v723_v1  ;;  %4386 = vmatmul.msk.f32.gmra.mxu1 %vm786_vm1, %v5511_v7  ;;  %v1068_v60 = vrot.slane %v5502_v49, 1 }
 0x14c   : > { %v775_v36 = vmax.f32 %v724_v17, 0.0  ;;  %4477 = vmatmul.msk.f32.gmra.mxu0 %vm786_vm1, %v5334_v37 }
 0x14d   : > { %v5518_v35 = vld [vmem:[#allocation2 + $0xb8] sm:$0xff] }
 0x14e   : > { %809 = vst.msk [vmem:[#allocation2 + $0xc0] sm:$0xff] %vm786_vm1, %v775_v36  ;;  %v981_v54 = vrot.slane %v5518_v35, 7  ;;  %v1084_v51 = vrot.slane %v5518_v35, 1  ;;  %4356 = vmatmul.msk.f32.gmra.mxu3 %vm786_vm1, %v5518_v35 }
 0x150   : > { %v5531_v37 = vsel %vm986_vm2, %v965_v6, %v981_v54  ;;  %v1014_v1 = vsel %vm986_vm2, %v981_v54, %v965_v6  ;;  %v5537_v17 = vsel %vm1089_vm4, %v1068_v60, %v1084_v51  ;;  %v5549_v7 = vsel %vm1089_vm4, %v1084_v51, %v1068_v60  ;;  %v5563_v60 = vld [vmem:[#allocation2 + $0xe8] sm:$0xff] }
 0x151   : > { %7257 = vst [vmem:[#allocation19_spill] sm:$0xff] %v5531_v37  ;;  %v726_v47 = vpop.f32.mrf.mxu0  ;;  %v5539_v36 = vpop.f32.mrf.mxu3  ;;  %4388 = vmatmul.msk.f32.vlgmr.msrb.gmra.mxu2 %vm786_vm1, %v5531_v37  ;;  %v5545_v46 = vsel %vm952_vm3, %v1014_v1, 0.0  ;;  %v1087_v51 = vrot.slane %v5563_v60, 1 }
 0x152   : > { %7258 = vst [vmem:[#allocation20_spill] sm:$0xff] %v5539_v36  ;;  %v727_v6 = vadd.f32 %v5044_v43, %v726_v47  ;;  %4387 = vmatmul.msk.f32.gmra.mxu1 %vm786_vm1, %v5545_v46  ;;  %v5556_v36 = vld [vmem:[#allocation2 + $0xe0] sm:$0xff]  ;;  %v5567_v1 = vpop.f32.mrf.mxu1 }
 0x153   : > { %7259 = vst [vmem:[#allocation21_spill] sm:$0xff] %v5545_v46  ;;  %v1071_v47 = vrot.slane %v5556_v36, 1 }
 0x154   : > { %7260 = vst [vmem:[#allocation22_spill] sm:$0xff] %v5549_v7  ;;  %v776_v54 = vmax.f32 %v727_v6, 0.0  ;;  %4478 = vmatmul.msk.f32.gmra.mxu0 %vm786_vm1, %v5362_v3  ;;  %v5572_v3 = vadd.s32 8, %v5017_v34 }
 0x155   : > { %v5558_v37 = vld [vmem:[#allocation2 + $0xc0] sm:$0xff]  ;;  %7261 = vst [vmem:[#allocation23_spill] sm:$0xff] %v5567_v1  ;;  %v5583_v19 = vsel %vm1089_vm4, %v1087_v51, %v1071_v47 }
 0x156   : > { %810 = vst.msk [vmem:[#allocation2 + $0xc8] sm:$0xff] %vm786_vm1, %v776_v54  ;;  %4357 = vmatmul.msk.f32.gmra.mxu3 %vm786_vm1, %v5558_v37  ;;  %v5579_v54 = vsel %vm1089_vm4, %v1071_v47, %v1087_v51  ;;  %vm1056_vm5 = vcmp.lt.s32.totalorder %v5572_v3, 15 }
 0x157   : > { %7263 = vst [vmem:[#allocation25_spill] sm:$0xff] %v5579_v54 }
 0x158   : > { %7264 = vst [vmem:[#allocation26_spill] sm:$0xff] %v5583_v19 }
 0x159   : > { %v729_v6 = vpop.f32.mrf.mxu0  ;;  %v5569_v46 = vpop.f32.mrf.mxu3 }
 0x15a   : > { %7262 = vst [vmem:[#allocation24_spill] sm:$0xff] %v5569_v46  ;;  %v730_v5 = vadd.f32 %v5044_v43, %v729_v6  ;;  %4497 = vmatmul.msk.f32.vlgmr.msra.gmra.mxu1 %vm786_vm1, %v5075_v63  ;;  %v966_v43 = vrot.slane %v5558_v37, 7  ;;  %v1069_v6 = vrot.slane %v5558_v37, 1  ;;  %v5620_v14 = vpop.f32.mrf.mxu1 }
 0x15b   : > { %7270 = vst [vmem:[#allocation32_spill] sm:$0xff] %v5620_v14 }
 0x15c   : > { %v777_v1 = vmax.f32 %v730_v5, 0.0  ;;  %4479 = vmatmul.msk.f32.gmra.mxu0 %vm786_vm1, %v5376_v4  ;;  %v5602_v5 = vsel %vm1056_vm5, %v5079_v0, 0.0  ;;  %v5626_v0 = vld [vmem:[#allocation2 + $0xd8] sm:$0xff] }
 0x15d   : > { %v5587_v46 = vld [vmem:[#allocation2 + $0xc8] sm:$0xff] }
 0x15e   : > { %811 = vst.msk [vmem:[#allocation2 + $0xd0] sm:$0xff] %vm786_vm1, %v777_v1  ;;  %v982_v54 = vrot.slane %v5587_v46, 7  ;;  %v1085_v45 = vrot.slane %v5587_v46, 1  ;;  %4358 = vmatmul.msk.f32.gmra.mxu3 %vm786_vm1, %v5587_v46 }
 0x160   : > { %v1015_v4 = vsel %vm986_vm2, %v982_v54, %v966_v43  ;;  %v5606_v47 = vsel %vm1089_vm4, %v1069_v6, %v1085_v45  ;;  %v5618_v39 = vsel %vm1089_vm4, %v1085_v45, %v1069_v6  ;;  %v1086_v6 = vrot.slane %v5626_v0, 1 }
 0x161   : > { %7265 = vst [vmem:[#allocation27_spill] sm:$0xff] %v5606_v47  ;;  %v5608_v51 = vpop.f32.mrf.mxu3  ;;  %v5610_v1 = vpop.f32.mrf.mxu0  ;;  %v5614_v19 = vsel %vm952_vm3, %v1015_v4, 0.0  ;;  %v5650_v30 = vsel %vm986_vm2, %v966_v43, %v982_v54 }
 0x162   : > { %7266 = vst [vmem:[#allocation28_spill] sm:$0xff] %v5608_v51  ;;  %4389 = vmatmul.msk.f32.gmra.mxu2 %vm786_vm1, %v5614_v19  ;;  %4498 = vmatmul.msk.f32.gmra.mxu1 %vm786_vm1, %v5602_v5  ;;  %v5638_v51 = vld [vmem:[#allocation2 + $0xf8] sm:$0xff]  ;;  %v5668_v54 = vpop.f32.mrf.mxu1 }
 0x163   : > { %7267 = vst [vmem:[#allocation29_spill] sm:$0xff] %v5610_v1  ;;  %v5630_v1 = vld [vmem:[#allocation2 + $0xf0] sm:$0xff] }
 0x164   : > { %7268 = vst [vmem:[#allocation30_spill] sm:$0xff] %v5614_v19  ;;  %4480 = vmatmul.msk.f32.gmra.mxu0 %vm786_vm1, %v5404_v42  ;;  %v1072_v14 = vrot.slane %v5630_v1, 1  ;;  %v1088_v19 = vrot.slane %v5638_v51, 1  ;;  %v983_v42 = vrot.slane %v5626_v0, 7 }
 0x165   : > { %7269 = vst [vmem:[#allocation31_spill] sm:$0xff] %v5618_v39  ;;  %v5632_v4 = vld [vmem:[#allocation2 + $0xd0] sm:$0xff] }
 0x166   : > { %v1070_v45 = vrot.slane %v5632_v4, 1  ;;  %4359 = vmatmul.msk.f32.gmra.mxu3 %vm786_vm1, %v5632_v4  ;;  %v967_v39 = vrot.slane %v5632_v4, 7  ;;  %7273 = vst [vmem:[#allocation35_spill] sm:$0xff] %v5668_v54 }
 0x168   : > { %v5658_v7 = vsel %vm1089_vm4, %v1070_v45, %v1086_v6  ;;  %v5662_v8 = vsel %vm1089_vm4, %v1086_v6, %v1070_v45  ;;  %v1016_v43 = vsel %vm986_vm2, %v983_v42, %v967_v39 }
 0x169   : > { %v5644_v52 = vpop.f32.mrf.mxu3  ;;  %v5646_v47 = vpop.f32.mrf.mxu0  ;;  %v5682_v45 = vsel %vm952_vm3, %v1016_v43, 0.0 }
 0x16a   : > { %7271 = vst [vmem:[#allocation33_spill] sm:$0xff] %v5644_v52  ;;  %4390 = vmatmul.msk.f32.gmra.mxu2 %vm786_vm1, %v5650_v30  ;;  %4499 = vmatmul.msk.f32.gmra.mxu1 %vm786_vm1, %v5123_v25  ;;  %v5676_v52 = vsel %vm1089_vm4, %v1088_v19, %v1072_v14 }
 0x16b   : > { %7272 = vst [vmem:[#allocation34_spill] sm:$0xff] %v5646_v47  ;;  %v5666_v47 = vsel %vm1089_vm4, %v1072_v14, %v1088_v19  ;;  %v5699_v14 = vpop.f32.mrf.mxu1 }
 0x16c   : > { %4481 = vmatmul.msk.f32.gmra.mxu0 %vm786_vm1, %v5420_v50  ;;  %v5691_v50 = vsel %vm1056_vm5, %v5132_v31, 0.0  ;;  %7276 = vst [vmem:[#allocation38_spill] sm:$0xff] %v5699_v14  ;;  %v5709_v31 = vsel %vm986_vm2, %v967_v39, %v983_v42 }
 0x16e   : > { %4360 = vmatmul.msk.f32.gmra.mxu3 %vm786_vm1, %v5626_v0 }
 0x171   : > { %v5684_v6 = vpop.f32.mrf.mxu3  ;;  %v5686_v54 = vpop.f32.mrf.mxu0 }
 0x172   : > { %7274 = vst [vmem:[#allocation36_spill] sm:$0xff] %v5684_v6  ;;  %4391 = vmatmul.msk.f32.gmra.mxu2 %vm786_vm1, %v5682_v45  ;;  %4500 = vmatmul.msk.f32.gmra.mxu1 %vm786_vm1, %v5691_v50 }
 0x173   : > { %7275 = vst [vmem:[#allocation37_spill] sm:$0xff] %v5686_v54  ;;  %v968_v54 = vrot.slane %v5556_v36, 7  ;;  %v5725_v42 = vpop.f32.mrf.mxu1 }
 0x174   : > { %4482 = vmatmul.msk.f32.gmra.mxu0 %vm786_vm1, %v5450_v20  ;;  %v984_v20 = vrot.slane %v5563_v60, 7  ;;  %7279 = vst [vmem:[#allocation41_spill] sm:$0xff] %v5725_v42 }
 0x176   : > { %4361 = vmatmul.msk.f32.gmra.mxu3 %vm786_vm1, %v5556_v36  ;;  %v1017_v39 = vsel %vm986_vm2, %v984_v20, %v968_v54 }
 0x177   : > { %v5731_v14 = vsel %vm952_vm3, %v1017_v39, 0.0  ;;  %v4529_v39 = vld [vmem:[%s7217_s5 + $0x30] sm:$0xff] }
 0x178   : > { %3113 = vmatpush.msrb.mxu2 %v4529_v39 }
 0x179   : > { %v5703_v19 = vpop.f32.mrf.mxu3  ;;  %v5705_v43 = vpop.f32.mrf.mxu0 }
 0x17a   : > { %7277 = vst [vmem:[#allocation39_spill] sm:$0xff] %v5703_v19  ;;  %4392 = vmatmul.msk.f32.gmra.mxu2 %vm786_vm1, %v5709_v31  ;;  %4501 = vmatmul.msk.f32.gmra.mxu1 %vm786_vm1, %v5172_v56  ;;  %v1057_v19 = vrot.slane %v5007_v28, 1  ;;  %v5736_v28 = vsel %vm1056_vm5, %v5181_v62, 0.0  ;;  %v4562_v62 = vld [vmem:[%s7217_s5 + $0x38] sm:$0xff] }
 0x17b   : > { %7278 = vst [vmem:[#allocation40_spill] sm:$0xff] %v5705_v43  ;;  %v1073_v43 = vrot.slane %v5015_v33, 1  ;;  %3356 = vmatpush.msra.mxu3 %v4562_v62  ;;  %v5764_v42 = vpop.f32.mrf.mxu1  ;;  %v985_v62 = vrot.slane %v5638_v51, 7 }
 0x17c   : > { %4483 = vmatmul.msk.f32.gmra.mxu0 %vm786_vm1, %v5469_v38 }
 0x17d   : > { %v1090_v33 = vsel %vm1089_vm4, %v1057_v19, %v1073_v43  ;;  %v1106_v39 = vsel %vm1089_vm4, %v1073_v43, %v1057_v19 }
 0x17e   : > { %4362 = vmatmul.msk.f32.gmra.mxu3 %vm786_vm1, %v5563_v60 }
 0x181   : > { %v5727_v6 = vpop.f32.mrf.mxu3  ;;  %v5740_v38 = vpop.f32.mrf.mxu0 }
 0x182   : > { %7280 = vst [vmem:[#allocation42_spill] sm:$0xff] %v5727_v6  ;;  %4393 = vmatmul.msk.f32.gmra.mxu2 %vm786_vm1, %v5731_v14  ;;  %4502 = vmatmul.msk.f32.gmra.mxu1 %vm786_vm1, %v5736_v28  ;;  %v5760_v6 = vsel %vm986_vm2, %v968_v54, %v984_v20  ;;  %v4595_v54 = vld [vmem:[%s7217_s5 + $0x40] sm:$0xff] }
 0x183   : > { %7281 = vst [vmem:[#allocation43_spill] sm:$0xff] %v5740_v38  ;;  %3599 = vmatpush.msra.mxu0 %v4595_v54  ;;  %v5798_v54 = vpop.f32.mrf.mxu1 }
 0x184   : > { %4484 = vmatmul.msk.f32.gmra.mxu0 %vm786_vm1, %v5502_v49  ;;  %v969_v49 = vrot.slane %v5630_v1, 7 }
 0x186   : > { %4363 = vmatmul.msk.f32.gmra.mxu3 %vm786_vm1, %v5630_v1  ;;  %v1018_v19 = vsel %vm986_vm2, %v985_v62, %v969_v49 }
 0x187   : > { %v5787_v20 = vsel %vm952_vm3, %v1018_v19, 0.0 }
 0x189   : > { %v5756_v38 = vpop.f32.mrf.mxu3 }
 0x18a   : > { %7282 = vst [vmem:[#allocation44_spill] sm:$0xff] %v5756_v38  ;;  %4394 = vmatmul.msk.f32.gmra.mxu2 %vm786_vm1, %v5760_v6  ;;  %4503 = vmatmul.msk.f32.gmra.mxu1 %vm786_vm1, %v5218_v24  ;;  %v5772_v38 = vpop.f32.mrf.mxu0 }
 0x18b   : > { %7283 = vst [vmem:[#allocation45_spill] sm:$0xff] %v5772_v38 }
 0x18c   : > { %4485 = vmatmul.msk.f32.gmra.mxu0 %vm786_vm1, %v5518_v35  ;;  %v5792_v35 = vsel %vm1056_vm5, %v5226_v32, 0.0  ;;  %v5810_v32 = vsel %vm986_vm2, %v969_v49, %v985_v62  ;;  %v5829_v49 = vsel %vm1056_vm5, %v5267_v58, 0.0 }
 0x18e   : > { %4364 = vmatmul.msk.f32.gmra.mxu3 %vm786_vm1, %v5638_v51 }
 0x191   : > { %v5783_v43 = vpop.f32.mrf.mxu3 }
 0x192   : > { %4395 = vmatmul.msk.f32.gmra.mxu2 %vm786_vm1, %v5787_v20  ;;  %4504 = vmatmul.msk.f32.gmra.mxu1 %vm786_vm1, %v5792_v35  ;;  %v5802_v38 = vpop.f32.mrf.mxu0 }
 0x193   : > { %7284 = vst [vmem:[#allocation46_spill] sm:$0xff] %v5802_v38 }
 0x194   : > { %4486 = vmatmul.msk.f32.gmra.mxu0 %vm786_vm1, %v5558_v37  ;;  %v5818_v37 = vpop.f32.mrf.mxu1 }
 0x196   : > { %4431 = vmatmul.msk.f32.vlgmr.msrb.gmra.mxu3 %vm786_vm1, %v5083_v2 }
 0x199   : > { %v5806_v19 = vpop.f32.mrf.mxu3 }
 0x19a   : > { %4396 = vmatmul.msk.f32.gmra.mxu2 %vm786_vm1, %v5810_v32  ;;  %4505 = vmatmul.msk.f32.gmra.mxu1 %vm786_vm1, %v5263_v57  ;;  %v5822_v2 = vpop.f32.mrf.mxu0 }
 0x19b   : > { %7285 = vst [vmem:[#allocation47_spill] sm:$0xff] %v5822_v2 }
 0x19c   : > { %4487 = vmatmul.msk.f32.gmra.mxu0 %vm786_vm1, %v5587_v46  ;;  %v5834_v46 = vpop.f32.mrf.mxu2  ;;  %v5842_v62 = vpop.f32.mrf.mxu1 }
 0x19e   : > { %4432 = vmatmul.msk.f32.gmra.mxu3 %vm786_vm1, %v5101_v12  ;;  %v1127_v12 = vsel %vm1056_vm5, %v1106_v39, 0.0 }
 0x1a1   : > { %v5824_v38 = vpop.f32.mrf.mxu3 }
 0x1a2   : > { %4398 = vmatmul.msk.f32.vlgmr.msra.gmra.mxu2 %vm786_vm1, %v1090_v33  ;;  %4506 = vmatmul.msk.f32.gmra.mxu1 %vm786_vm1, %v5829_v49  ;;  %v5846_v2 = vpop.f32.mrf.mxu0  ;;  %v5862_v33 = vsel %vm1056_vm5, %v5313_v26, 0.0 }
 0x1a3   : > { %7286 = vst [vmem:[#allocation48_spill] sm:$0xff] %v5846_v2 }
 0x1a4   : > { %4488 = vmatmul.msk.f32.gmra.mxu0 %vm786_vm1, %v5632_v4  ;;  %v5853_v4 = vpop.f32.mrf.mxu2  ;;  %v5864_v39 = vpop.f32.mrf.mxu1 }
 0x1a6   : > { %4433 = vmatmul.msk.f32.gmra.mxu3 %vm786_vm1, %v5127_v27 }
 0x1a9   : > { %v5844_v58 = vpop.f32.mrf.mxu3 }
 0x1aa   : > { %4399 = vmatmul.msk.f32.gmra.mxu2 %vm786_vm1, %v1127_v12  ;;  %4507 = vmatmul.msk.f32.gmra.mxu1 %vm786_vm1, %v5305_v18 }
 0x1ac   : > { %4489 = vmatmul.msk.f32.gmra.mxu0 %vm786_vm1, %v5626_v0  ;;  %v5870_v0 = vpop.f32.mrf.mxu0 }
 0x1ad   : > { %7288 = vst [vmem:[#allocation50_spill] sm:$0xff] %v5870_v0  ;;  %v5960_v0 = vld [vmem:[#allocation2 + $0x28] sm:$0xff] }
 0x1ae   : > { %4434 = vmatmul.msk.f32.gmra.mxu3 %vm786_vm1, %v5150_v41  ;;  %v5876_v41 = vpop.f32.mrf.mxu2 }
 0x1b1   : > { %v5857_v27 = vpop.f32.mrf.mxu3 }
 0x1b2   : > { %7287 = vst [vmem:[#allocation49_spill] sm:$0xff] %v5857_v27  ;;  %4400 = vmatmul.msk.f32.gmra.mxu2 %vm786_vm1, %v5075_v63  ;;  %4508 = vmatmul.msk.f32.gmra.mxu1 %vm786_vm1, %v5862_v33  ;;  %v5884_v63 = vpop.f32.mrf.mxu1 }
 0x1b4   : > { %4490 = vmatmul.msk.f32.gmra.mxu0 %vm786_vm1, %v5556_v36  ;;  %v5888_v12 = vpop.f32.mrf.mxu0 }
 0x1b5   : > { %7290 = vst [vmem:[#allocation52_spill] sm:$0xff] %v5888_v12 }
 0x1b6   : > { %4435 = vmatmul.msk.f32.gmra.mxu3 %vm786_vm1, %v5176_v59  ;;  %v5892_v59 = vpop.f32.mrf.mxu2 }
 0x1b9   : > { %v5878_v26 = vpop.f32.mrf.mxu3 }
 0x1ba   : > { %7289 = vst [vmem:[#allocation51_spill] sm:$0xff] %v5878_v26  ;;  %4401 = vmatmul.msk.f32.gmra.mxu2 %vm786_vm1, %v5602_v5  ;;  %4509 = vmatmul.msk.f32.gmra.mxu1 %vm786_vm1, %v5347_v48  ;;  %v5899_v5 = vsel %vm1056_vm5, %v5351_v53, 0.0 }
 0x1bc   : > { %4491 = vmatmul.msk.f32.gmra.mxu0 %vm786_vm1, %v5563_v60  ;;  %v5907_v60 = vpop.f32.mrf.mxu1 }
 0x1be   : > { %4436 = vmatmul.msk.f32.gmra.mxu3 %vm786_vm1, %v5196_v9  ;;  %v5911_v9 = vpop.f32.mrf.mxu0 }
 0x1bf   : > { %7292 = vst [vmem:[#allocation54_spill] sm:$0xff] %v5911_v9 }
 0x1c1   : > { %v5894_v36 = vpop.f32.mrf.mxu3 }
 0x1c2   : > { %7291 = vst [vmem:[#allocation53_spill] sm:$0xff] %v5894_v36  ;;  %4402 = vmatmul.msk.f32.gmra.mxu2 %vm786_vm1, %v5123_v25  ;;  %4510 = vmatmul.msk.f32.gmra.mxu1 %vm786_vm1, %v5899_v5  ;;  %v5919_v25 = vpop.f32.mrf.mxu2 }
 0x1c4   : > { %4492 = vmatmul.msk.f32.gmra.mxu0 %vm786_vm1, %v5630_v1  ;;  %v5925_v53 = vpop.f32.mrf.mxu1  ;;  %v5932_v1 = vsel %vm1056_vm5, %v5393_v21, 0.0 }
 0x1c6   : > { %4437 = vmatmul.msk.f32.gmra.mxu3 %vm786_vm1, %v5222_v29 }
 0x1c9   : > { %v5913_v12 = vpop.f32.mrf.mxu3 }
 0x1ca   : > { %7293 = vst [vmem:[#allocation55_spill] sm:$0xff] %v5913_v12  ;;  %4403 = vmatmul.msk.f32.gmra.mxu2 %vm786_vm1, %v5691_v50  ;;  %4511 = vmatmul.msk.f32.gmra.mxu1 %vm786_vm1, %v5389_v16  ;;  %v5934_v50 = vpop.f32.mrf.mxu0  ;;  %v5972_v12 = vsel %vm1056_vm5, %v5443_v15, 0.0 }
 0x1cb   : > { %7295 = vst [vmem:[#allocation57_spill] sm:$0xff] %v5934_v50 }
 0x1cc   : > { %4493 = vmatmul.msk.f32.gmra.mxu0 %vm786_vm1, %v5638_v51  ;;  %v5940_v51 = vld [vmem:[#allocation2 + $0x100] sm:$0xff]  ;;  %v5948_v9 = vpop.f32.mrf.mxu1 }
 0x1ce   : > { %4438 = vmatmul.msk.f32.gmra.mxu3 %vm786_vm1, %v5242_v44  ;;  %v5944_v44 = vpop.f32.mrf.mxu2 }
 0x1d1   : > { %v5927_v29 = vpop.f32.mrf.mxu3 }
 0x1d2   : > { %7294 = vst [vmem:[#allocation56_spill] sm:$0xff] %v5927_v29  ;;  %4404 = vmatmul.msk.f32.gmra.mxu2 %vm786_vm1, %v5172_v56  ;;  %4512 = vmatmul.msk.f32.gmra.mxu1 %vm786_vm1, %v5932_v1  ;;  %v5954_v56 = vld [vmem:[#allocation2 + $0x108] sm:$0xff]  ;;  %v5956_v50 = vpop.f32.mrf.mxu0 }
 0x1d3   : > { %7296 = vst [vmem:[#allocation58_spill] sm:$0xff] %v5956_v50 }
 0x1d4   : > { %4494 = vmatmul.msk.f32.gmra.mxu0 %vm786_vm1, %v5940_v51 }
 0x1d6   : > { %4439 = vmatmul.msk.f32.gmra.mxu3 %vm786_vm1, %v5271_v61  ;;  %v5962_v2 = vpop.f32.mrf.mxu2  ;;  %v5966_v61 = vld [vmem:[#allocation2 + $0x20] sm:$0xff] }
 0x1d7   : > { %7297 = vst [vmem:[#allocation59_spill] sm:$0xff] %v5962_v2  ;;  %v2904_v50 = vrot.slane %v5966_v61, 1  ;;  %v5981_v2 = vpop.f32.mrf.mxu1 }
 0x1d8   : > { %7298 = vst [vmem:[#allocation60_spill] sm:$0xff] %v5981_v2 }
 0x1d9   : > { %v1346_v21 = vpop.f32.mrf.mxu3 }
 0x1da   : > { %4405 = vmatmul.msk.f32.gmra.mxu2 %vm786_vm1, %v5736_v28  ;;  %4513 = vmatmul.msk.f32.gmra.mxu1 %vm786_vm1, %v5435_v10  ;;  %v2920_v28 = vrot.slane %v5960_v0, 1  ;;  %v5984_v26 = vpop.f32.mrf.mxu0 }
 0x1db   : > { %7299 = vst [vmem:[#allocation61_spill] sm:$0xff] %v5984_v26 }
 0x1dc   : > { %4495 = vmatmul.msk.f32.gmra.mxu0 %vm786_vm1, %v5954_v56 }
 0x1de   : > { %4440 = vmatmul.msk.f32.gmra.mxu3 %vm786_vm1, %v5285_v11  ;;  %v2936_v11 = vsel %vm1089_vm4, %v2904_v50, %v2920_v28 }
 0x1df   : > { %v6001_v26 = vpop.f32.mrf.mxu1 }
 0x1e0   : > { %7301 = vst [vmem:[#allocation63_spill] sm:$0xff] %v6001_v26  ;;  %v7314_v26 = vld [vmem:[#allocation27_spill] sm:$0xff] }
 0x1e1   : > { %v1349_v29 = vpop.f32.mrf.mxu3 }
 0x1e2   : > { %4406 = vmatmul.msk.f32.gmra.mxu2 %vm786_vm1, %v5218_v24  ;;  %4514 = vmatmul.msk.f32.gmra.mxu1 %vm786_vm1, %v5972_v12  ;;  %v2952_v24 = vsel %vm1089_vm4, %v2920_v28, %v2904_v50  ;;  %v6007_v50 = vld [vmem:[#allocation2 + $0x30] sm:$0xff]  ;;  %v6010_v28 = vpop.f32.mrf.mxu0 }
 0x1e3   : > { %7303 = vst [vmem:[#allocation65_spill] sm:$0xff] %v6010_v28 }
 0x1e4   : > { %4596 = vmatmul.msk.f32.vlgmr.msra.gmra.mxu0 %vm786_vm1, %v2936_v11  ;;  %v2969_v11 = vsel %vm1056_vm5, %v2952_v24, 0.0  ;;  %v6015_v24 = vsel %vm1056_vm5, %v5493_v22, 0.0 }
 0x1e5   : > { %v1555_v36 = vpop.f32.mrf.mxu2 }
 0x1e6   : > { %v5986_v15 = vadd.f32 %v1555_v36, %v1346_v21  ;;  %4441 = vmatmul.msk.f32.gmra.mxu3 %vm786_vm1, %v5309_v23  ;;  %v5999_v36 = vld [vmem:[#allocation2 + $0x38] sm:$0xff] }
 0x1e7   : > { %v6029_v22 = vpop.f32.mrf.mxu1 }
 0x1e8   : > { %7300 = vst [vmem:[#allocation62_spill] sm:$0xff] %v5986_v15 }
 0x1e9   : > { %v1352_v27 = vpop.f32.mrf.mxu3  ;;  %7305 = vst [vmem:[#allocation67_spill] sm:$0xff] %v6029_v22 }
 0x1ea   : > { %4407 = vmatmul.msk.f32.gmra.mxu2 %vm786_vm1, %v5792_v35  ;;  %4515 = vmatmul.msk.f32.gmra.mxu1 %vm786_vm1, %v5485_v13  ;;  %v2921_v35 = vrot.slane %v5999_v36, 1 }
 0x1ec   : > { %4597 = vmatmul.msk.f32.gmra.mxu0 %vm786_vm1, %v2969_v11  ;;  %v2905_v11 = vrot.slane %v6007_v50, 1 }
 0x1ed   : > { %v1558_v21 = vpop.f32.mrf.mxu2 }
 0x1ee   : > { %v6003_v23 = vadd.f32 %v1558_v21, %v1349_v29  ;;  %4442 = vmatmul.msk.f32.gmra.mxu3 %vm786_vm1, %v5327_v40  ;;  %v2937_v40 = vsel %vm1089_vm4, %v2905_v11, %v2921_v35  ;;  %v2953_v28 = vsel %vm1089_vm4, %v2921_v35, %v2905_v11  ;;  %v7308_v35 = vld [vmem:[#allocation6_spill] sm:$0xff] }
 0x1ef   : > { %v6048_v11 = vld [vmem:[#allocation2 + $0x40] sm:$0xff] }
 0x1f0   : > { %7302 = vst [vmem:[#allocation64_spill] sm:$0xff] %v6003_v23  ;;  %v6033_v23 = vpop.f32.mrf.mxu0 }
 0x1f1   : > { %v1355_v15 = vpop.f32.mrf.mxu3  ;;  %7306 = vst [vmem:[#allocation68_spill] sm:$0xff] %v6033_v23 }
 0x1f2   : > { %4408 = vmatmul.msk.f32.gmra.mxu2 %vm786_vm1, %v5263_v57  ;;  %4516 = vmatmul.msk.f32.gmra.mxu1 %vm786_vm1, %v6015_v24 }
 0x1f4   : > { %4598 = vmatmul.msk.f32.gmra.mxu0 %vm786_vm1, %v2937_v40 }
 0x1f5   : > { %v1561_v29 = vpop.f32.mrf.mxu2 }
 0x1f6   : > { %v6025_v21 = vadd.f32 %v1561_v29, %v1352_v27  ;;  %4443 = vmatmul.msk.f32.gmra.mxu3 %vm786_vm1, %v5355_v55  ;;  %v2971_v27 = vsel %vm1056_vm5, %v2953_v28, 0.0  ;;  %v6042_v55 = vld [vmem:[#allocation2 + $0x48] sm:$0xff]  ;;  %v2906_v28 = vrot.slane %v6048_v11, 1 }
 0x1f8   : > { %7304 = vst [vmem:[#allocation66_spill] sm:$0xff] %v6025_v21  ;;  %v7309_v21 = vld [vmem:[#allocation22_spill] sm:$0xff] }
 0x1f9   : > { %v1358_v57 = vpop.f32.mrf.mxu3  ;;  %v6054_v22 = vsel %vm1056_vm5, %v7309_v21, 0.0 }
 0x1fa   : > { %4409 = vmatmul.msk.f32.gmra.mxu2 %vm786_vm1, %v5829_v49  ;;  %4517 = vmatmul.msk.f32.gmra.mxu1 %vm786_vm1, %v5537_v17  ;;  %v2922_v49 = vrot.slane %v6042_v55, 1 }
 0x1fc   : > { %4599 = vmatmul.msk.f32.gmra.mxu0 %vm786_vm1, %v2971_v27  ;;  %v6057_v27 = vpop.f32.mrf.mxu1 }
 0x1fd   : > { %v1564_v40 = vpop.f32.mrf.mxu2  ;;  %7310 = vst [vmem:[#allocation6_spill] sm:$0xff] %v6057_v27  ;;  %v2954_v27 = vsel %vm1089_vm4, %v2922_v49, %v2906_v28 }
 0x1fe   : > { %v6044_v29 = vadd.f32 %v1564_v40, %v1355_v15  ;;  %4444 = vmatmul.msk.f32.gmra.mxu3 %vm786_vm1, %v7308_v35  ;;  %v2938_v15 = vsel %vm1089_vm4, %v2906_v28, %v2922_v49  ;;  %v6065_v40 = vpop.f32.mrf.mxu0  ;;  %v7319_v28 = vld [vmem:[#allocation9_spill] sm:$0xff] }
 0x1ff   : > { %7311 = vst [vmem:[#allocation22_spill] sm:$0xff] %v6065_v40  ;;  %v2973_v40 = vsel %vm1056_vm5, %v2954_v27, 0.0  ;;  %v3797_v27 = vld [vmem:[%s7219_s7] sm:$0xff] }
 0x200   : > { %7307 = vst [vmem:[#allocation69_spill] sm:$0xff] %v6044_v29  ;;  %v7313_v29 = vld [vmem:[#allocation7_spill] sm:$0xff]  ;;  %3913 = vmatpush.msrb.mxu1 %v3797_v27 }
 0x201   : > { %v1361_v23 = vpop.f32.mrf.mxu3 }
 0x202   : > { %4410 = vmatmul.msk.f32.gmra.mxu2 %vm786_vm1, %v5305_v18  ;;  %4518 = vmatmul.msk.f32.gmra.mxu1 %vm786_vm1, %v6054_v22 }
 0x204   : > { %4600 = vmatmul.msk.f32.gmra.mxu0 %vm786_vm1, %v2938_v15  ;;  %v6080_v15 = vpop.f32.mrf.mxu1 }
 0x205   : > { %v1567_v35 = vpop.f32.mrf.mxu2  ;;  %7315 = vst [vmem:[#allocation7_spill] sm:$0xff] %v6080_v15 }
 0x206   : > { %v6068_v21 = vadd.f32 %v1567_v35, %v1358_v57  ;;  %4445 = vmatmul.msk.f32.gmra.mxu3 %vm786_vm1, %v7313_v29  ;;  %v6083_v57 = vld [vmem:[#allocation2 + $0x58] sm:$0xff]  ;;  %v6085_v35 = vpop.f32.mrf.mxu0 }
 0x207   : > { %7316 = vst [vmem:[#allocation27_spill] sm:$0xff] %v6083_v57 }
 0x208   : > { %7312 = vst [vmem:[#allocation70_spill] sm:$0xff] %v6068_v21  ;;  %v2923_v21 = vrot.slane %v6083_v57, 1 }
 0x209   : > { %v1364_v18 = vpop.f32.mrf.mxu3  ;;  %7317 = vst [vmem:[#allocation71_spill] sm:$0xff] %v6085_v35 }
 0x20a   : > { %4411 = vmatmul.msk.f32.gmra.mxu2 %vm786_vm1, %v5862_v33  ;;  %4519 = vmatmul.msk.f32.gmra.mxu1 %vm786_vm1, %v7314_v26  ;;  %v6091_v33 = vld [vmem:[#allocation2 + $0x50] sm:$0xff] }
 0x20b   : > { %7320 = vst [vmem:[#allocation9_spill] sm:$0xff] %v6091_v33 }
 0x20c   : > { %4601 = vmatmul.msk.f32.gmra.mxu0 %vm786_vm1, %v2973_v40  ;;  %v7321_v40 = vld [vmem:[#allocation31_spill] sm:$0xff]  ;;  %v6110_v35 = vpop.f32.mrf.mxu1 }
 0x20d   : > { %v1570_v29 = vpop.f32.mrf.mxu2  ;;  %v6100_v2 = vsel %vm1056_vm5, %v7321_v40, 0.0  ;;  %7322 = vst [vmem:[#allocation31_spill] sm:$0xff] %v6110_v35  ;;  %v7324_v40 = vld [vmem:[#allocation11_spill] sm:$0xff] }
 0x20e   : > { %v6087_v49 = vadd.f32 %v1570_v29, %v1361_v23  ;;  %4446 = vmatmul.msk.f32.gmra.mxu3 %vm786_vm1, %v7319_v28  ;;  %v2907_v23 = vrot.slane %v6091_v33, 1  ;;  %v6116_v27 = vpop.f32.mrf.mxu0  ;;  %v7336_v33 = vld [vmem:[#allocation25_spill] sm:$0xff] }
 0x20f   : > { %7325 = vst [vmem:[#allocation11_spill] sm:$0xff] %v6116_v27  ;;  %v7328_v27 = vld [vmem:[#allocation12_spill] sm:$0xff] }
 0x210   : > { %7318 = vst [vmem:[#allocation72_spill] sm:$0xff] %v6087_v49  ;;  %v2939_v29 = vsel %vm1089_vm4, %v2907_v23, %v2923_v21 }
 0x211   : > { %v1367_v15 = vpop.f32.mrf.mxu3 }
 0x212   : > { %4412 = vmatmul.msk.f32.gmra.mxu2 %vm786_vm1, %v5347_v48  ;;  %4520 = vmatmul.msk.f32.gmra.mxu1 %vm786_vm1, %v6100_v2  ;;  %v2955_v48 = vsel %vm1089_vm4, %v2923_v21, %v2907_v23  ;;  %v6133_v21 = vld [vmem:[#allocation2 + $0x60] sm:$0xff] }
 0x213   : > { %7329 = vst [vmem:[#allocation12_spill] sm:$0xff] %v6133_v21 }
 0x214   : > { %4602 = vmatmul.msk.f32.gmra.mxu0 %vm786_vm1, %v2939_v29  ;;  %v2975_v29 = vsel %vm1056_vm5, %v2955_v48, 0.0  ;;  %v6136_v23 = vpop.f32.mrf.mxu1  ;;  %v6141_v48 = vsel %vm1056_vm5, %v5662_v8, 0.0 }
 0x215   : > { %v1573_v28 = vpop.f32.mrf.mxu2  ;;  %7330 = vst [vmem:[#allocation76_spill] sm:$0xff] %v6136_v23 }
 0x216   : > { %v6112_v49 = vadd.f32 %v1573_v28, %v1364_v18  ;;  %4447 = vmatmul.msk.f32.gmra.mxu3 %vm786_vm1, %v7324_v40  ;;  %v6127_v18 = vld [vmem:[#allocation2 + $0x68] sm:$0xff] }
 0x217   : > { %7326 = vst [vmem:[#allocation74_spill] sm:$0xff] %v6127_v18 }
 0x218   : > { %7323 = vst [vmem:[#allocation73_spill] sm:$0xff] %v6112_v49  ;;  %v6144_v49 = vpop.f32.mrf.mxu0 }
 0x219   : > { %v2161_v57 = vpop.f32.mrf.mxu3  ;;  %7331 = vst [vmem:[#allocation77_spill] sm:$0xff] %v6144_v49 }
 0x21a   : > { %4413 = vmatmul.msk.f32.gmra.mxu2 %vm786_vm1, %v5899_v5  ;;  %4521 = vmatmul.msk.f32.gmra.mxu1 %vm786_vm1, %v5658_v7  ;;  %v2924_v5 = vrot.slane %v6127_v18, 1 }
 0x21c   : > { %4603 = vmatmul.msk.f32.gmra.mxu0 %vm786_vm1, %v2975_v29  ;;  %v2908_v29 = vrot.slane %v6133_v21, 1  ;;  %v6161_v21 = vpop.f32.mrf.mxu1 }
 0x21d   : > { %v1576_v28 = vpop.f32.mrf.mxu2 }
 0x21e   : > { %v6129_v40 = vadd.f32 %v1576_v28, %v1367_v15  ;;  %4448 = vmatmul.msk.f32.gmra.mxu3 %vm786_vm1, %v7328_v27  ;;  %v2940_v15 = vsel %vm1089_vm4, %v2908_v29, %v2924_v5  ;;  %v7332_v27 = vld [vmem:[#allocation8_spill] sm:$0xff] }
 0x21f   : > { %v1484_v28 = vadd.f32 %v7332_v27, %v5834_v46  ;;  %v7339_v27 = vld [vmem:[#allocation17_spill] sm:$0xff] }
 0x220   : > { %7327 = vst [vmem:[#allocation75_spill] sm:$0xff] %v6129_v40  ;;  %v7333_v40 = vld [vmem:[#allocation14_spill] sm:$0xff] }
 0x221   : > { %v2164_v35 = vpop.f32.mrf.mxu3  ;;  %7335 = vst [vmem:[#allocation14_spill] sm:$0xff] %v6161_v21  ;;  %v7341_v21 = vld [vmem:[#allocation26_spill] sm:$0xff] }
 0x222   : > { %4414 = vmatmul.msk.f32.gmra.mxu2 %vm786_vm1, %v5389_v16  ;;  %4522 = vmatmul.msk.f32.gmra.mxu1 %vm786_vm1, %v6141_v48  ;;  %v2956_v16 = vsel %vm1089_vm4, %v2924_v5, %v2908_v29  ;;  %v6174_v5 = vld [vmem:[#allocation2 + $0x78] sm:$0xff] }
 0x223   : > { %v2977_v46 = vsel %vm1056_vm5, %v2956_v16, 0.0 }
 0x224   : > { %4604 = vmatmul.msk.f32.gmra.mxu0 %vm786_vm1, %v2940_v15  ;;  %v7337_v15 = vld [vmem:[#allocation10_spill] sm:$0xff] }
 0x225   : > { %v1694_v8 = vpop.f32.mrf.mxu2 }
 0x226   : > { %v1790_v23 = vadd.f32 %v1694_v8, %v1484_v28  ;;  %4449 = vmatmul.msk.f32.gmra.mxu3 %vm786_vm1, %v7333_v40  ;;  %v1487_v40 = vadd.f32 %v7337_v15, %v5853_v4  ;;  %v2925_v28 = vrot.slane %v6174_v5, 1  ;;  %v6186_v4 = vsel %vm1056_vm5, %v7341_v21, 0.0 }
 0x228   : > { %v6157_v49 = vadd.f32 %v2161_v57, %v1790_v23  ;;  %v6171_v57 = vpop.f32.mrf.mxu0 }
 0x229   : > { %v2167_v18 = vpop.f32.mrf.mxu3  ;;  %7338 = vst [vmem:[#allocation25_spill] sm:$0xff] %v6171_v57  ;;  %v7345_v57 = vld [vmem:[#allocation21_spill] sm:$0xff] }
 0x22a   : > { %7334 = vst [vmem:[#allocation8_spill] sm:$0xff] %v6157_v49  ;;  %4415 = vmatmul.msk.f32.gmra.mxu2 %vm786_vm1, %v5932_v1  ;;  %4523 = vmatmul.msk.f32.gmra.mxu1 %vm786_vm1, %v7336_v33  ;;  %v6178_v1 = vld [vmem:[#allocation2 + $0x70] sm:$0xff] }
 0x22c   : > { %4605 = vmatmul.msk.f32.gmra.mxu0 %vm786_vm1, %v2977_v46  ;;  %v2909_v46 = vrot.slane %v6178_v1, 1 }
 0x22d   : > { %v1697_v23 = vpop.f32.mrf.mxu2 }
 0x22e   : > { %v1791_v29 = vadd.f32 %v1697_v23, %v1487_v40  ;;  %4450 = vmatmul.msk.f32.gmra.mxu3 %vm786_vm1, %v7339_v27  ;;  %v2941_v15 = vsel %vm1089_vm4, %v2909_v46, %v2925_v28  ;;  %v6197_v23 = vpop.f32.mrf.mxu1 }
 0x22f   : > { %7343 = vst [vmem:[#allocation17_spill] sm:$0xff] %v6197_v23 }
 0x230   : > { %v6181_v8 = vadd.f32 %v2164_v35, %v1791_v29  ;;  %v7342_v35 = vld [vmem:[#allocation13_spill] sm:$0xff]  ;;  %v6200_v29 = vpop.f32.mrf.mxu0 }
 0x231   : > { %v2170_v16 = vpop.f32.mrf.mxu3  ;;  %v1490_v40 = vadd.f32 %v7342_v35, %v5876_v41  ;;  %7344 = vst [vmem:[#allocation26_spill] sm:$0xff] %v6200_v29  ;;  %v7352_v29 = vld [vmem:[#allocation30_spill] sm:$0xff] }
 0x232   : > { %7340 = vst [vmem:[#allocation10_spill] sm:$0xff] %v6181_v8  ;;  %4416 = vmatmul.msk.f32.gmra.mxu2 %vm786_vm1, %v5435_v10  ;;  %4524 = vmatmul.msk.f32.gmra.mxu1 %vm786_vm1, %v6186_v4  ;;  %v2957_v8 = vsel %vm1089_vm4, %v2925_v28, %v2909_v46  ;;  %v7348_v46 = vld [vmem:[#allocation19_spill] sm:$0xff] }
 0x233   : > { %v2979_v41 = vsel %vm1056_vm5, %v2957_v8, 0.0 }
 0x234   : > { %4606 = vmatmul.msk.f32.gmra.mxu0 %vm786_vm1, %v2941_v15  ;;  %v7346_v15 = vld [vmem:[#allocation15_spill] sm:$0xff] }
 0x235   : > { %v1700_v21 = vpop.f32.mrf.mxu2  ;;  %v1493_v35 = vadd.f32 %v7346_v15, %v5892_v59 }
 0x236   : > { %v1792_v27 = vadd.f32 %v1700_v21, %v1490_v40  ;;  %4451 = vmatmul.msk.f32.gmra.mxu3 %vm786_vm1, %v7345_v57  ;;  %v6219_v40 = vpop.f32.mrf.mxu1 }
 0x237   : > { %7347 = vst [vmem:[#allocation13_spill] sm:$0xff] %v6219_v40 }
 0x238   : > { %v6204_v10 = vadd.f32 %v2167_v18, %v1792_v27  ;;  %v6217_v18 = vld [vmem:[#allocation2 + $0x88] sm:$0xff]  ;;  %v6226_v27 = vpop.f32.mrf.mxu0 }
 0x239   : > { %v2173_v49 = vpop.f32.mrf.mxu3  ;;  %v2926_v21 = vrot.slane %v6217_v18, 1  ;;  %7349 = vst [vmem:[#allocation21_spill] sm:$0xff] %v6226_v27 }
 0x23a   : > { %4417 = vmatmul.msk.f32.gmra.mxu2 %vm786_vm1, %v5972_v12  ;;  %4525 = vmatmul.msk.f32.gmra.mxu1 %vm786_vm1, %v5666_v47  ;;  %v6223_v12 = vld [vmem:[#allocation2 + $0x80] sm:$0xff] }
 0x23b   : > { %v2910_v15 = vrot.slane %v6223_v12, 1 }
 0x23c   : > { %4607 = vmatmul.msk.f32.gmra.mxu0 %vm786_vm1, %v2979_v41  ;;  %v6233_v41 = vsel %vm1056_vm5, %v5676_v52, 0.0  ;;  %v1981_v52 = vrot.slane %v5954_v56, 1 }
 0x23d   : > { %v1703_v57 = vpop.f32.mrf.mxu2  ;;  %v2958_v23 = vsel %vm1089_vm4, %v2926_v21, %v2910_v15 }
 0x23e   : > { %v1793_v28 = vadd.f32 %v1703_v57, %v1493_v35  ;;  %4452 = vmatmul.msk.f32.gmra.mxu3 %vm786_vm1, %v7348_v46  ;;  %v2942_v35 = vsel %vm1089_vm4, %v2910_v15, %v2926_v21  ;;  %v6270_v21 = vld [vmem:[#allocation2 + $0x98] sm:$0xff] }
 0x240   : > { %v6228_v8 = vadd.f32 %v2170_v16, %v1793_v28  ;;  %v7351_v16 = vld [vmem:[#allocation18_spill] sm:$0xff]  ;;  %v1965_v28 = vrot.slane %v5940_v51, 1 }
 0x241   : > { %v2176_v59 = vpop.f32.mrf.mxu3  ;;  %v1496_v57 = vadd.f32 %v7351_v16, %v5919_v25 }
 0x242   : > { %7350 = vst [vmem:[#allocation15_spill] sm:$0xff] %v6228_v8  ;;  %4418 = vmatmul.msk.f32.gmra.mxu2 %vm786_vm1, %v5485_v13  ;;  %4526 = vmatmul.msk.f32.gmra.mxu1 %vm786_vm1, %v6233_v41  ;;  %v6249_v13 = vpop.f32.mrf.mxu1  ;;  %v6257_v25 = vsel %vm1089_vm4, %v1965_v28, %v1981_v52 }
 0x244   : > { %4608 = vmatmul.msk.f32.gmra.mxu0 %vm786_vm1, %v2942_v35  ;;  %v6259_v35 = vpop.f32.mrf.mxu0 }
 0x245   : > { %v1706_v46 = vpop.f32.mrf.mxu2  ;;  %7353 = vst [vmem:[#allocation19_spill] sm:$0xff] %v6259_v35 }
 0x246   : > { %v1794_v27 = vadd.f32 %v1706_v46, %v1496_v57  ;;  %4453 = vmatmul.msk.f32.gmra.mxu3 %vm786_vm1, %v7352_v29  ;;  %v7354_v29 = vld [vmem:[#allocation23_spill] sm:$0xff]  ;;  %v6276_v57 = vld [vmem:[#allocation2 + $0x90] sm:$0xff]  ;;  %v2927_v46 = vrot.slane %v6270_v21, 1 }
 0x248   : > { %v6251_v40 = vadd.f32 %v2173_v49, %v1794_v27  ;;  %v2981_v49 = vsel %vm1056_vm5, %v2958_v23, 0.0  ;;  %v1499_v27 = vadd.f32 %v7354_v29, %v5944_v44 }
 0x249   : > { %v2179_v8 = vpop.f32.mrf.mxu3 }
 0x24a   : > { %4419 = vmatmul.msk.f32.gmra.mxu2 %vm786_vm1, %v6015_v24  ;;  %4527 = vmatmul.msk.f32.gmra.mxu1 %vm786_vm1, %v6257_v25  ;;  %v2013_v24 = vsel %vm1089_vm4, %v1981_v52, %v1965_v28  ;;  %v6286_v29 = vpop.f32.mrf.mxu1  ;;  %v7357_v28 = vld [vmem:[#allocation32_spill] sm:$0xff] }
 0x24b   : > { %v6283_v44 = vsel %vm1056_vm5, %v2013_v24, 0.0  ;;  %7355 = vst [vmem:[#allocation18_spill] sm:$0xff] %v6286_v29 }
 0x24c   : > { %4609 = vmatmul.msk.f32.gmra.mxu0 %vm786_vm1, %v2981_v49  ;;  %v2911_v49 = vrot.slane %v6276_v57, 1 }
 0x24d   : > { %v1709_v15 = vpop.f32.mrf.mxu2 }
 0x24e   : > { %v1795_v16 = vadd.f32 %v1709_v15, %v1499_v27  ;;  %4454 = vmatmul.msk.f32.gmra.mxu3 %vm786_vm1, %v5650_v30  ;;  %v2943_v30 = vsel %vm1089_vm4, %v2911_v49, %v2927_v46  ;;  %v6296_v27 = vpop.f32.mrf.mxu0 }
 0x24f   : > { %7358 = vst [vmem:[#allocation30_spill] sm:$0xff] %v6296_v27  ;;  %v7360_v27 = vld [vmem:[#allocation35_spill] sm:$0xff] }
 0x250   : > { %v6279_v23 = vadd.f32 %v2176_v59, %v1795_v16  ;;  %v7356_v59 = vld [vmem:[#allocation16_spill] sm:$0xff] }
 0x251   : > { %v2182_v35 = vpop.f32.mrf.mxu3  ;;  %v1502_v52 = vadd.f32 %v7357_v28, %v7356_v59  ;;  %v7359_v28 = vld [vmem:[#allocation20_spill] sm:$0xff] }
 0x252   : > { %4420 = vmatmul.msk.f32.gmra.mxu2 %vm786_vm1, %v5537_v17  ;;  %4528 = vmatmul.msk.f32.gmra.mxu1 %vm786_vm1, %v6283_v44  ;;  %v2959_v17 = vsel %vm1089_vm4, %v2927_v46, %v2911_v49  ;;  %v6318_v46 = vld [vmem:[#allocation2 + $0xa0] sm:$0xff] }
 0x253   : > { %v2983_v59 = vsel %vm1056_vm5, %v2959_v17, 0.0 }
 0x254   : > { %4610 = vmatmul.msk.f32.gmra.mxu0 %vm786_vm1, %v2943_v30  ;;  %v1505_v30 = vadd.f32 %v7360_v27, %v7359_v28  ;;  %v2912_v27 = vrot.slane %v6318_v46, 1  ;;  %v7363_v28 = vld [vmem:[#allocation38_spill] sm:$0xff] }
 0x255   : > { %v1712_v15 = vpop.f32.mrf.mxu2 }
 0x256   : > { %v1796_v16 = vadd.f32 %v1712_v15, %v1502_v52  ;;  %4455 = vmatmul.msk.f32.gmra.mxu3 %vm786_vm1, %v5682_v45  ;;  %v6312_v52 = vld [vmem:[#allocation2 + $0xa8] sm:$0xff] }
 0x258   : > { %v6301_v24 = vadd.f32 %v2179_v8, %v1796_v16  ;;  %v6314_v8 = vpop.f32.mrf.mxu0 }
 0x259   : > { %v2185_v29 = vpop.f32.mrf.mxu3  ;;  %7361 = vst [vmem:[#allocation23_spill] sm:$0xff] %v6314_v8 }
 0x25a   : > { %4421 = vmatmul.msk.f32.gmra.mxu2 %vm786_vm1, %v6054_v22  ;;  %v2928_v22 = vrot.slane %v6312_v52, 1 }
 0x25c   : > { %4611 = vmatmul.msk.f32.gmra.mxu0 %vm786_vm1, %v2983_v59  ;;  %v2944_v17 = vsel %vm1089_vm4, %v2912_v27, %v2928_v22  ;;  %v7362_v59 = vld [vmem:[#allocation24_spill] sm:$0xff] }
 0x25d   : > { %v1715_v45 = vpop.f32.mrf.mxu2 }
 0x25e   : > { %v1797_v15 = vadd.f32 %v1715_v45, %v1505_v30  ;;  %4456 = vmatmul.msk.f32.gmra.mxu3 %vm786_vm1, %v5709_v31  ;;  %v1508_v30 = vadd.f32 %v7363_v28, %v7362_v59  ;;  %v7366_v28 = vld [vmem:[#allocation41_spill] sm:$0xff] }
 0x260   : > { %v6321_v49 = vadd.f32 %v2182_v35, %v1797_v15  ;;  %v6333_v35 = vpop.f32.mrf.mxu0 }
 0x261   : > { %v2188_v16 = vpop.f32.mrf.mxu3  ;;  %7364 = vst [vmem:[#allocation16_spill] sm:$0xff] %v6333_v35 }
 0x262   : > { %4422 = vmatmul.msk.f32.gmra.mxu2 %vm786_vm1, %v7314_v26  ;;  %v2960_v26 = vsel %vm1089_vm4, %v2928_v22, %v2912_v27  ;;  %v6350_v22 = vld [vmem:[#allocation2 + $0xb0] sm:$0xff] }
 0x263   : > { %v2985_v59 = vsel %vm1056_vm5, %v2960_v26, 0.0  ;;  %v2913_v26 = vrot.slane %v6350_v22, 1 }
 0x264   : > { %4612 = vmatmul.msk.f32.gmra.mxu0 %vm786_vm1, %v2944_v17  ;;  %v7365_v17 = vld [vmem:[#allocation28_spill] sm:$0xff] }
 0x265   : > { %v1718_v31 = vpop.f32.mrf.mxu2 }
 0x266   : > { %v1798_v45 = vadd.f32 %v1718_v31, %v1508_v30  ;;  %4457 = vmatmul.msk.f32.gmra.mxu3 %vm786_vm1, %v5731_v14  ;;  %v1511_v30 = vadd.f32 %v7366_v28, %v7365_v17  ;;  %v6346_v14 = vld [vmem:[#allocation2 + $0xb8] sm:$0xff] }
 0x267   : > { %v2929_v27 = vrot.slane %v6346_v14, 1  ;;  %v7368_v17 = vld [vmem:[#allocation33_spill] sm:$0xff] }
 0x268   : > { %v6335_v15 = vadd.f32 %v2185_v29, %v1798_v45  ;;  %v6356_v35 = vpop.f32.mrf.mxu0 }
 0x269   : > { %v2191_v8 = vpop.f32.mrf.mxu3  ;;  %7367 = vst [vmem:[#allocation32_spill] sm:$0xff] %v6356_v35  ;;  %v7389_v35 = vld [vmem:[#allocation12_spill] sm:$0xff] }
 0x26a   : > { %4423 = vmatmul.msk.f32.gmra.mxu2 %vm786_vm1, %v6100_v2 }
 0x26c   : > { %4613 = vmatmul.msk.f32.gmra.mxu0 %vm786_vm1, %v2985_v59  ;;  %v2945_v59 = vsel %vm1089_vm4, %v2913_v26, %v2929_v27 }
 0x26d   : > { %v1721_v31 = vpop.f32.mrf.mxu2 }
 0x26e   : > { %v1799_v29 = vadd.f32 %v1721_v31, %v1511_v30  ;;  %4458 = vmatmul.msk.f32.gmra.mxu3 %vm786_vm1, %v5760_v6  ;;  %v1514_v6 = vadd.f32 %v5764_v42, %v7368_v17  ;;  %v2961_v31 = vsel %vm1089_vm4, %v2929_v27, %v2913_v26  ;;  %v7369_v42 = vld [vmem:[#allocation36_spill] sm:$0xff]  ;;  %v1885_v27 = vrot.slane %v5954_v56, 7 }
 0x270   : > { %v6353_v2 = vadd.f32 %v2188_v16, %v1799_v29  ;;  %v6377_v17 = vpop.f32.mrf.mxu0 }
 0x271   : > { %v2194_v45 = vpop.f32.mrf.mxu3  ;;  %7370 = vst [vmem:[#allocation20_spill] sm:$0xff] %v6377_v17 }
 0x272   : > { %4424 = vmatmul.msk.f32.gmra.mxu2 %vm786_vm1, %v5658_v7  ;;  %v2987_v7 = vsel %vm1056_vm5, %v2961_v31, 0.0 }
 0x274   : > { %4614 = vmatmul.msk.f32.gmra.mxu0 %vm786_vm1, %v2945_v59  ;;  %v1517_v59 = vadd.f32 %v5798_v54, %v7369_v42 }
 0x275   : > { %v1724_v28 = vpop.f32.mrf.mxu2 }
 0x276   : > { %v1800_v30 = vadd.f32 %v1724_v28, %v1514_v6  ;;  %4459 = vmatmul.msk.f32.gmra.mxu3 %vm786_vm1, %v5787_v20  ;;  %v6380_v20 = vld [vmem:[#allocation2 + $0xc8] sm:$0xff]  ;;  %v1869_v6 = vrot.slane %v5940_v51, 7 }
 0x277   : > { %v2930_v28 = vrot.slane %v6380_v20, 1 }
 0x278   : > { %v6367_v16 = vadd.f32 %v2191_v8, %v1800_v30  ;;  %v1917_v51 = vsel %vm986_vm2, %v1885_v27, %v1869_v6 }
 0x279   : > { %v2197_v29 = vpop.f32.mrf.mxu3 }
 0x27a   : > { %4425 = vmatmul.msk.f32.gmra.mxu2 %vm786_vm1, %v6141_v48  ;;  %v6386_v48 = vld [vmem:[#allocation2 + $0xc0] sm:$0xff] }
 0x27b   : > { %v2914_v31 = vrot.slane %v6386_v48, 1 }
 0x27c   : > { %4615 = vmatmul.msk.f32.gmra.mxu0 %vm786_vm1, %v2987_v7  ;;  %v7371_v7 = vld [vmem:[#allocation39_spill] sm:$0xff] }
 0x27d   : > { %v1727_v8 = vpop.f32.mrf.mxu2  ;;  %v2946_v56 = vsel %vm1089_vm4, %v2914_v31, %v2930_v28 }
 0x27e   : > { %v1801_v26 = vadd.f32 %v1727_v8, %v1517_v59  ;;  %4460 = vmatmul.msk.f32.gmra.mxu3 %vm786_vm1, %v5810_v32  ;;  %v1520_v32 = vadd.f32 %v5818_v37, %v7371_v7  ;;  %v6403_v59 = vpop.f32.mrf.mxu0  ;;  %v6417_v7 = vld [vmem:[#allocation2 + $0xd0] sm:$0xff] }
 0x27f   : > { %7372 = vst [vmem:[#allocation35_spill] sm:$0xff] %v6403_v59 }
 0x280   : > { %v6389_v54 = vadd.f32 %v2194_v45, %v1801_v26  ;;  %v1948_v45 = vsel %vm952_vm3, %v1917_v51, 0.0  ;;  %v2962_v26 = vsel %vm1089_vm4, %v2930_v28, %v2914_v31  ;;  %v1901_v28 = vsel %vm986_vm2, %v1869_v6, %v1885_v27 }
 0x281   : > { %v2200_v30 = vpop.f32.mrf.mxu3  ;;  %v2989_v37 = vsel %vm1056_vm5, %v2962_v26, 0.0 }
 0x282   : > { %4426 = vmatmul.msk.f32.gmra.mxu2 %vm786_vm1, %v7336_v33 }
 0x284   : > { %4616 = vmatmul.msk.f32.gmra.mxu0 %vm786_vm1, %v2946_v56  ;;  %v7373_v56 = vld [vmem:[#allocation42_spill] sm:$0xff] }
 0x285   : > { %v1730_v42 = vpop.f32.mrf.mxu2  ;;  %v1523_v51 = vadd.f32 %v5842_v62, %v7373_v56 }
 0x286   : > { %v1802_v8 = vadd.f32 %v1730_v42, %v1520_v32  ;;  %4461 = vmatmul.msk.f32.gmra.mxu3 %vm786_vm1, %v1948_v45  ;;  %v6419_v32 = vld [vmem:[#allocation2 + $0xd8] sm:$0xff]  ;;  %v6426_v45 = vpop.f32.mrf.mxu0 }
 0x287   : > { %v2931_v42 = vrot.slane %v6419_v32, 1  ;;  %7374 = vst [vmem:[#allocation24_spill] sm:$0xff] %v6426_v45  ;;  %v7385_v45 = vld [vmem:[#allocation67_spill] sm:$0xff] }
 0x288   : > { %v6406_v33 = vadd.f32 %v2197_v29, %v1802_v8 }
 0x289   : > { %v2203_v17 = vpop.f32.mrf.mxu3 }
 0x28a   : > { %4427 = vmatmul.msk.f32.gmra.mxu2 %vm786_vm1, %v6186_v4  ;;  %v2915_v4 = vrot.slane %v6417_v7, 1 }
 0x28c   : > { %4617 = vmatmul.msk.f32.gmra.mxu0 %vm786_vm1, %v2989_v37  ;;  %v2947_v26 = vsel %vm1089_vm4, %v2915_v4, %v2931_v42  ;;  %v7375_v37 = vld [vmem:[#allocation44_spill] sm:$0xff] }
 0x28d   : > { %v1733_v29 = vpop.f32.mrf.mxu2  ;;  %v1526_v6 = vadd.f32 %v5864_v39, %v7375_v37  ;;  %v2824_v39 = vrot.slane %v5960_v0, 7 }
 0x28e   : > { %v1803_v31 = vadd.f32 %v1733_v29, %v1523_v51  ;;  %4462 = vmatmul.msk.f32.gmra.mxu3 %vm786_vm1, %v1901_v28 }
 0x290   : > { %v6428_v62 = vadd.f32 %v2200_v30, %v1803_v31  ;;  %v2963_v30 = vsel %vm1089_vm4, %v2931_v42, %v2915_v4  ;;  %v1529_v31 = vadd.f32 %v5884_v63, %v5783_v43  ;;  %v6456_v4 = vld [vmem:[#allocation2 + $0xe8] sm:$0xff] }
 0x291   : > { %v2206_v8 = vpop.f32.mrf.mxu3  ;;  %v2991_v28 = vsel %vm1056_vm5, %v2963_v30, 0.0  ;;  %v2932_v43 = vrot.slane %v6456_v4, 1 }
 0x292   : > { %4428 = vmatmul.msk.f32.gmra.mxu2 %vm786_vm1, %v5666_v47  ;;  %v6443_v47 = vpop.f32.mrf.mxu0 }
 0x294   : > { %4618 = vmatmul.msk.f32.gmra.mxu0 %vm786_vm1, %v2947_v26  ;;  %v6454_v26 = vld [vmem:[#allocation2 + $0xe0] sm:$0xff] }
 0x295   : > { %v1736_v27 = vpop.f32.mrf.mxu2 }
 0x296   : > { %v1804_v56 = vadd.f32 %v1736_v27, %v1526_v6  ;;  %4563 = vmatmul.msk.f32.vlgmr.msra.gmra.mxu3 %vm786_vm1, %v5966_v61  ;;  %v2916_v6 = vrot.slane %v6454_v26, 1 }
 0x298   : > { %v6439_v51 = vadd.f32 %v2203_v17, %v1804_v56  ;;  %v2808_v17 = vrot.slane %v5966_v61, 7  ;;  %v2948_v56 = vsel %vm1089_vm4, %v2916_v6, %v2932_v43 }
 0x299   : > { %v2209_v29 = vpop.f32.mrf.mxu3 }
 0x29a   : > { %4429 = vmatmul.msk.f32.gmra.mxu2 %vm786_vm1, %v6233_v41  ;;  %v2856_v41 = vsel %vm986_vm2, %v2824_v39, %v2808_v17  ;;  %v6473_v30 = vpop.f32.mrf.mxu0 }
 0x29b   : > { %v2872_v61 = vsel %vm952_vm3, %v2856_v41, 0.0  ;;  %v2840_v41 = vsel %vm986_vm2, %v2808_v17, %v2824_v39 }
 0x29c   : > { %4619 = vmatmul.msk.f32.gmra.mxu0 %vm786_vm1, %v2991_v28 }
 0x29d   : > { %v1739_v42 = vpop.f32.mrf.mxu2 }
 0x29e   : > { %v1805_v37 = vadd.f32 %v1739_v42, %v1529_v31  ;;  %4564 = vmatmul.msk.f32.gmra.mxu3 %vm786_vm1, %v5960_v0  ;;  %v1532_v0 = vadd.f32 %v5907_v60, %v5806_v19  ;;  %v2964_v42 = vsel %vm1089_vm4, %v2932_v43, %v2916_v6  ;;  %v2825_v19 = vrot.slane %v5999_v36, 7  ;;  %v6494_v6 = vld [vmem:[#allocation2 + $0xf8] sm:$0xff] }
 0x29f   : > { %v2993_v60 = vsel %vm1056_vm5, %v2964_v42, 0.0 }
 0x2a0   : > { %v6464_v63 = vadd.f32 %v2206_v8, %v1805_v37 }
 0x2a1   : > { %v2212_v27 = vpop.f32.mrf.mxu3 }
 0x2a2   : > { %4530 = vmatmul.msk.f32.vlgmr.msrb.gmra.mxu2 %vm786_vm1, %v2872_v61  ;;  %v1535_v61 = vadd.f32 %v5925_v53, %v5824_v38  ;;  %v6496_v39 = vpop.f32.mrf.mxu0  ;;  %v2933_v53 = vrot.slane %v6494_v6, 1 }
 0x2a4   : > { %4620 = vmatmul.msk.f32.gmra.mxu0 %vm786_vm1, %v2948_v56  ;;  %v6492_v56 = vld [vmem:[#allocation2 + $0xf0] sm:$0xff] }
 0x2a5   : > { %v1742_v28 = vpop.f32.mrf.mxu2  ;;  %v2917_v38 = vrot.slane %v6492_v56, 1 }
 0x2a6   : > { %v1806_v31 = vadd.f32 %v1742_v28, %v1532_v0  ;;  %4565 = vmatmul.msk.f32.gmra.mxu3 %vm786_vm1, %v6007_v50 }
 0x2a7   : > { %v2949_v42 = vsel %vm1089_vm4, %v2917_v38, %v2933_v53 }
 0x2a8   : > { %v6478_v8 = vadd.f32 %v2209_v29, %v1806_v31  ;;  %v2809_v29 = vrot.slane %v6007_v50, 7 }
 0x2a9   : > { %v2215_v37 = vpop.f32.mrf.mxu3 }
 0x2aa   : > { %4531 = vmatmul.msk.f32.gmra.mxu2 %vm786_vm1, %v2840_v41  ;;  %v2857_v0 = vsel %vm986_vm2, %v2825_v19, %v2809_v29 }
 0x2ab   : > { %v2874_v31 = vsel %vm952_vm3, %v2857_v0, 0.0  ;;  %v2841_v0 = vsel %vm986_vm2, %v2809_v29, %v2825_v19  ;;  %v6536_v29 = vpop.f32.mrf.mxu1 }
 0x2ac   : > { %4621 = vmatmul.msk.f32.gmra.mxu0 %vm786_vm1, %v2993_v60 }
 0x2ad   : > { %v1745_v43 = vpop.f32.mrf.mxu2 }
 0x2ae   : > { %v1807_v17 = vadd.f32 %v1745_v43, %v1535_v61  ;;  %4566 = vmatmul.msk.f32.gmra.mxu3 %vm786_vm1, %v5999_v36  ;;  %v1538_v36 = vadd.f32 %v5948_v9, %v5844_v58  ;;  %v2965_v43 = vsel %vm1089_vm4, %v2933_v53, %v2917_v38  ;;  %v2826_v58 = vrot.slane %v6042_v55, 7 }
 0x2af   : > { %v2995_v9 = vsel %vm1056_vm5, %v2965_v43, 0.0 }
 0x2b0   : > { %v6504_v28 = vadd.f32 %v2212_v27, %v1807_v17  ;;  %v6516_v27 = vpop.f32.mrf.mxu0 }
 0x2b1   : > { %v2218_v50 = vpop.f32.mrf.mxu3 }
 0x2b2   : > { %4532 = vmatmul.msk.f32.gmra.mxu2 %vm786_vm1, %v2874_v31  ;;  %v7376_v31 = vld [vmem:[#allocation49_spill] sm:$0xff] }
 0x2b4   : > { %4622 = vmatmul.msk.f32.gmra.mxu0 %vm786_vm1, %v2949_v42  ;;  %v7377_v42 = vld [vmem:[#allocation60_spill] sm:$0xff] }
 0x2b5   : > { %v1748_v41 = vpop.f32.mrf.mxu2 }
 0x2b6   : > { %v1808_v60 = vadd.f32 %v1748_v41, %v1538_v36  ;;  %4567 = vmatmul.msk.f32.gmra.mxu3 %vm786_vm1, %v6048_v11  ;;  %v1541_v36 = vadd.f32 %v7377_v42, %v7376_v31 }
 0x2b8   : > { %v6518_v61 = vadd.f32 %v2215_v37, %v1808_v60  ;;  %v2810_v37 = vrot.slane %v6048_v11, 7  ;;  %v7379_v11 = vld [vmem:[#allocation51_spill] sm:$0xff] }
 0x2b9   : > { %v2221_v17 = vpop.f32.mrf.mxu3 }
 0x2ba   : > { %4533 = vmatmul.msk.f32.gmra.mxu2 %vm786_vm1, %v2841_v0  ;;  %v2858_v19 = vsel %vm986_vm2, %v2826_v58, %v2810_v37  ;;  %v6542_v0 = vpop.f32.mrf.mxu0 }
 0x2bb   : > { %v2876_v43 = vsel %vm952_vm3, %v2858_v19, 0.0  ;;  %v2842_v19 = vsel %vm986_vm2, %v2810_v37, %v2826_v58 }
 0x2bc   : > { %4623 = vmatmul.msk.f32.gmra.mxu0 %vm786_vm1, %v2995_v9  ;;  %v7380_v9 = vld [vmem:[#allocation63_spill] sm:$0xff] }
 0x2bd   : > { %v1751_v41 = vpop.f32.mrf.mxu2  ;;  %v1544_v31 = vadd.f32 %v7380_v9, %v7379_v11  ;;  %v7384_v9 = vld [vmem:[#allocation53_spill] sm:$0xff] }
 0x2be   : > { %v1809_v38 = vadd.f32 %v1751_v41, %v1541_v36  ;;  %4568 = vmatmul.msk.f32.gmra.mxu3 %vm786_vm1, %v6042_v55  ;;  %v7381_v36 = vld [vmem:[#allocation9_spill] sm:$0xff]  ;;  %v6553_v41 = vpop.f32.mrf.mxu1 }
 0x2c0   : > { %v6538_v53 = vadd.f32 %v2218_v50, %v1809_v38 }
 0x2c1   : > { %v2224_v60 = vpop.f32.mrf.mxu3 }
 0x2c2   : > { %7378 = vst [vmem:[#allocation38_spill] sm:$0xff] %v6538_v53  ;;  %4534 = vmatmul.msk.f32.gmra.mxu2 %vm786_vm1, %v2876_v43  ;;  %v7383_v43 = vld [vmem:[#allocation27_spill] sm:$0xff]  ;;  %v6561_v59 = vpop.f32.mrf.mxu0 }
 0x2c3   : > { %v2827_v11 = vrot.slane %v7383_v43, 7 }
 0x2c4   : > { %4624 = vmatmul.msk.f32.gmra.mxu0 %vm786_vm1, %v6257_v25  ;;  %v1547_v25 = vadd.f32 %v7385_v45, %v7384_v9 }
 0x2c5   : > { %v1754_v55 = vpop.f32.mrf.mxu2 }
 0x2c6   : > { %v1810_v42 = vadd.f32 %v1754_v55, %v1544_v31  ;;  %4569 = vmatmul.msk.f32.gmra.mxu3 %vm786_vm1, %v7381_v36 }
 0x2c8   : > { %v6551_v50 = vadd.f32 %v2221_v17, %v1810_v42  ;;  %v2811_v17 = vrot.slane %v7381_v36, 7  ;;  %v7388_v36 = vld [vmem:[#allocation6_spill] sm:$0xff] }
 0x2c9   : > { %v2227_v38 = vpop.f32.mrf.mxu3 }
 0x2ca   : > { %7382 = vst [vmem:[#allocation28_spill] sm:$0xff] %v6551_v50  ;;  %4535 = vmatmul.msk.f32.gmra.mxu2 %vm786_vm1, %v2842_v19  ;;  %v2859_v58 = vsel %vm986_vm2, %v2827_v11, %v2811_v17  ;;  %v6575_v19 = vpop.f32.mrf.mxu1  ;;  %v7393_v50 = vld [vmem:[#allocation59_spill] sm:$0xff] }
 0x2cb   : > { %v2878_v45 = vsel %vm952_vm3, %v2859_v58, 0.0  ;;  %v7391_v58 = vld [vmem:[#allocation74_spill] sm:$0xff] }
 0x2cc   : > { %4625 = vmatmul.msk.f32.gmra.mxu0 %vm786_vm1, %v6283_v44  ;;  %v7387_v44 = vld [vmem:[#allocation55_spill] sm:$0xff] }
 0x2cd   : > { %v1757_v31 = vpop.f32.mrf.mxu2  ;;  %v1550_v9 = vadd.f32 %v7388_v36, %v7387_v44  ;;  %v2812_v44 = vrot.slane %v7389_v35, 7 }
 0x2ce   : > { %v1811_v55 = vadd.f32 %v1757_v31, %v1547_v25  ;;  %4570 = vmatmul.msk.f32.gmra.mxu3 %vm786_vm1, %v7383_v43 }
 0x2d0   : > { %v6570_v37 = vadd.f32 %v2224_v60, %v1811_v55  ;;  %v2843_v55 = vsel %vm986_vm2, %v2811_v17, %v2827_v11 }
 0x2d1   : > { %v2230_v42 = vpop.f32.mrf.mxu3 }
 0x2d2   : > { %7386 = vst [vmem:[#allocation41_spill] sm:$0xff] %v6570_v37  ;;  %4536 = vmatmul.msk.f32.gmra.mxu2 %vm786_vm1, %v2878_v45  ;;  %v2828_v45 = vrot.slane %v7391_v58, 7  ;;  %v7392_v37 = vld [vmem:[#allocation56_spill] sm:$0xff]  ;;  %v6590_v36 = vpop.f32.mrf.mxu1 }
 0x2d3   : > { %v1553_v53 = vadd.f32 %v7393_v50, %v7392_v37 }
 0x2d5   : > { %v1760_v25 = vpop.f32.mrf.mxu2 }
 0x2d6   : > { %v1812_v31 = vadd.f32 %v1760_v25, %v1550_v9  ;;  %4571 = vmatmul.msk.f32.gmra.mxu3 %vm786_vm1, %v7389_v35  ;;  %v7395_v35 = vld [vmem:[#allocation62_spill] sm:$0xff] }
 0x2d8   : > { %v6581_v43 = vadd.f32 %v2227_v38, %v1812_v31  ;;  %v2860_v38 = vsel %vm986_vm2, %v2828_v45, %v2812_v44 }
 0x2d9   : > { %v2233_v60 = vpop.f32.mrf.mxu3  ;;  %v2880_v31 = vsel %vm952_vm3, %v2860_v38, 0.0 }
 0x2da   : > { %7390 = vst [vmem:[#allocation33_spill] sm:$0xff] %v6581_v43  ;;  %4537 = vmatmul.msk.f32.gmra.mxu2 %vm786_vm1, %v2843_v55 }
 0x2dd   : > { %v1763_v9 = vpop.f32.mrf.mxu2 }
 0x2de   : > { %v1813_v25 = vadd.f32 %v1763_v9, %v1553_v53  ;;  %4572 = vmatmul.msk.f32.gmra.mxu3 %vm786_vm1, %v7391_v58  ;;  %v6604_v53 = vpop.f32.mrf.mxu1  ;;  %v2829_v9 = vrot.slane %v6174_v5, 7 }
 0x2e0   : > { %v6596_v11 = vadd.f32 %v2230_v42, %v1813_v25  ;;  %v2844_v42 = vsel %vm986_vm2, %v2812_v44, %v2828_v45  ;;  %v2813_v25 = vrot.slane %v6178_v1, 7 }
 0x2e1   : > { %v2236_v17 = vpop.f32.mrf.mxu3 }
 0x2e2   : > { %7394 = vst [vmem:[#allocation36_spill] sm:$0xff] %v6596_v11  ;;  %4538 = vmatmul.msk.f32.gmra.mxu2 %vm786_vm1, %v2880_v31  ;;  %v7397_v31 = vld [vmem:[#allocation64_spill] sm:$0xff] }
 0x2e5   : > { %v1766_v50 = vpop.f32.mrf.mxu2 }
 0x2e6   : > { %v1814_v37 = vadd.f32 %v1766_v50, %v7395_v35  ;;  %4573 = vmatmul.msk.f32.gmra.mxu3 %vm786_vm1, %v6178_v1 }
 0x2e8   : > { %v6606_v55 = vadd.f32 %v2233_v60, %v1814_v37  ;;  %v2861_v60 = vsel %vm986_vm2, %v2829_v9, %v2813_v25  ;;  %v6620_v37 = vpop.f32.mrf.mxu1 }
 0x2e9   : > { %v2239_v58 = vpop.f32.mrf.mxu3  ;;  %v2882_v44 = vsel %vm952_vm3, %v2861_v60, 0.0  ;;  %v2814_v60 = vrot.slane %v6223_v12, 7 }
 0x2ea   : > { %7396 = vst [vmem:[#allocation39_spill] sm:$0xff] %v6606_v55  ;;  %4539 = vmatmul.msk.f32.gmra.mxu2 %vm786_vm1, %v2844_v42  ;;  %v7399_v42 = vld [vmem:[#allocation66_spill] sm:$0xff] }
 0x2ed   : > { %v1769_v38 = vpop.f32.mrf.mxu2 }
 0x2ee   : > { %v1815_v50 = vadd.f32 %v1769_v38, %v7397_v31  ;;  %4574 = vmatmul.msk.f32.gmra.mxu3 %vm786_vm1, %v6174_v5  ;;  %v2830_v31 = vrot.slane %v6217_v18, 7 }
 0x2f0   : > { %v6618_v35 = vadd.f32 %v2236_v17, %v1815_v50  ;;  %v2845_v17 = vsel %vm986_vm2, %v2813_v25, %v2829_v9  ;;  %v6634_v50 = vpop.f32.mrf.mxu1 }
 0x2f1   : > { %v2242_v45 = vpop.f32.mrf.mxu3 }
 0x2f2   : > { %7398 = vst [vmem:[#allocation42_spill] sm:$0xff] %v6618_v35  ;;  %4540 = vmatmul.msk.f32.gmra.mxu2 %vm786_vm1, %v2882_v44  ;;  %v7401_v35 = vld [vmem:[#allocation69_spill] sm:$0xff] }
 0x2f5   : > { %v1772_v1 = vpop.f32.mrf.mxu2 }
 0x2f6   : > { %v1816_v55 = vadd.f32 %v1772_v1, %v7399_v42  ;;  %4575 = vmatmul.msk.f32.gmra.mxu3 %vm786_vm1, %v6223_v12 }
 0x2f8   : > { %v6628_v5 = vadd.f32 %v2239_v58, %v1816_v55  ;;  %v2862_v55 = vsel %vm986_vm2, %v2830_v31, %v2814_v60  ;;  %v6647_v42 = vpop.f32.mrf.mxu1 }
 0x2f9   : > { %v2245_v38 = vpop.f32.mrf.mxu3  ;;  %v2884_v25 = vsel %vm952_vm3, %v2862_v55, 0.0 }
 0x2fa   : > { %7400 = vst [vmem:[#allocation44_spill] sm:$0xff] %v6628_v5  ;;  %4541 = vmatmul.msk.f32.gmra.mxu2 %vm786_vm1, %v2845_v17  ;;  %v7403_v17 = vld [vmem:[#allocation70_spill] sm:$0xff] }
 0x2fd   : > { %v1775_v44 = vpop.f32.mrf.mxu2 }
 0x2fe   : > { %v1817_v1 = vadd.f32 %v1775_v44, %v7401_v35  ;;  %4576 = vmatmul.msk.f32.gmra.mxu3 %vm786_vm1, %v6217_v18  ;;  %v2831_v44 = vrot.slane %v6270_v21, 7 }
 0x300   : > { %v6642_v58 = vadd.f32 %v2242_v45, %v1817_v1  ;;  %v2846_v45 = vsel %vm986_vm2, %v2814_v60, %v2830_v31  ;;  %v2815_v1 = vrot.slane %v6276_v57, 7 }
 0x301   : > { %v2248_v9 = vpop.f32.mrf.mxu3 }
 0x302   : > { %7402 = vst [vmem:[#allocation49_spill] sm:$0xff] %v6642_v58  ;;  %4542 = vmatmul.msk.f32.gmra.mxu2 %vm786_vm1, %v2884_v25  ;;  %v7405_v25 = vld [vmem:[#allocation72_spill] sm:$0xff] }
 0x305   : > { %v1778_v12 = vpop.f32.mrf.mxu2 }
 0x306   : > { %v1818_v5 = vadd.f32 %v1778_v12, %v7403_v17  ;;  %4577 = vmatmul.msk.f32.gmra.mxu3 %vm786_vm1, %v6276_v57  ;;  %v7407_v17 = vld [vmem:[#allocation73_spill] sm:$0xff] }
 0x308   : > { %v6652_v18 = vadd.f32 %v2245_v38, %v1818_v5  ;;  %v2863_v5 = vsel %vm986_vm2, %v2831_v44, %v2815_v1  ;;  %v6664_v38 = vpop.f32.mrf.mxu1 }
 0x309   : > { %v2251_v35 = vpop.f32.mrf.mxu3  ;;  %v2886_v60 = vsel %vm952_vm3, %v2863_v5, 0.0  ;;  %v2816_v5 = vrot.slane %v6318_v46, 7 }
 0x30a   : > { %7404 = vst [vmem:[#allocation60_spill] sm:$0xff] %v6652_v18  ;;  %4543 = vmatmul.msk.f32.gmra.mxu2 %vm786_vm1, %v2846_v45 }
 0x30d   : > { %v1781_v55 = vpop.f32.mrf.mxu2 }
 0x30e   : > { %v1819_v58 = vadd.f32 %v1781_v55, %v7405_v25  ;;  %4578 = vmatmul.msk.f32.gmra.mxu3 %vm786_vm1, %v6270_v21 }
 0x310   : > { %v6666_v12 = vadd.f32 %v2248_v9, %v1819_v58  ;;  %v6676_v55 = vpop.f32.mrf.mxu1  ;;  %v2847_v58 = vsel %vm986_vm2, %v2815_v1, %v2831_v44  ;;  %v2832_v9 = vrot.slane %v6312_v52, 7 }
 0x311   : > { %v2254_v31 = vpop.f32.mrf.mxu3 }
 0x312   : > { %7406 = vst [vmem:[#allocation51_spill] sm:$0xff] %v6666_v12  ;;  %4544 = vmatmul.msk.f32.gmra.mxu2 %vm786_vm1, %v2886_v60  ;;  %v7409_v12 = vld [vmem:[#allocation75_spill] sm:$0xff] }
 0x315   : > { %v1784_v57 = vpop.f32.mrf.mxu2 }
 0x316   : > { %v1820_v45 = vadd.f32 %v1784_v57, %v7407_v17  ;;  %4579 = vmatmul.msk.f32.gmra.mxu3 %vm786_vm1, %v6318_v46 }
 0x318   : > { %v6674_v21 = vadd.f32 %v2251_v35, %v1820_v45  ;;  %v2864_v35 = vsel %vm986_vm2, %v2832_v9, %v2816_v5  ;;  %v7411_v45 = vld [vmem:[#allocation8_spill] sm:$0xff]  ;;  %v6695_v46 = vpop.f32.mrf.mxu1 }
 0x319   : > { %v3358_v25 = vpop.f32.mrf.mxu3  ;;  %7413 = vst [vmem:[#allocation27_spill] sm:$0xff] %v6695_v46 }
 0x31a   : > { %7408 = vst [vmem:[#allocation63_spill] sm:$0xff] %v6674_v21  ;;  %4545 = vmatmul.msk.f32.gmra.mxu2 %vm786_vm1, %v2847_v58  ;;  %v7412_v21 = vld [vmem:[#allocation29_spill] sm:$0xff]  ;;  %v2888_v58 = vsel %vm952_vm3, %v2864_v35, 0.0  ;;  %v7416_v35 = vld [vmem:[#allocation34_spill] sm:$0xff] }
 0x31b   : > { %v2500_v44 = vadd.f32 %v7412_v21, %v7411_v45  ;;  %v6705_v21 = vld [vmem:[%s7218_s6] ss:$0 sm:$0xff] }
 0x31d   : > { %v1787_v60 = vpop.f32.mrf.mxu2 }
 0x31e   : > { %v1821_v57 = vadd.f32 %v1787_v60, %v7409_v12  ;;  %4580 = vmatmul.msk.f32.gmra.mxu3 %vm786_vm1, %v6312_v52  ;;  %v7414_v12 = vld [vmem:[#allocation7_spill] sm:$0xff]  ;;  %v6698_v52 = vpop.f32.mrf.mxu0 }
 0x31f   : > { %v2743_v60 = vadd.f32 %v7414_v12, %v2500_v44  ;;  %v2848_v44 = vsel %vm986_vm2, %v2816_v5, %v2832_v9 }
 0x320   : > { %v6688_v17 = vadd.f32 %v2254_v31, %v1821_v57  ;;  %v7415_v57 = vld [vmem:[#allocation10_spill] sm:$0xff]  ;;  %v6717_v43 = vpop.f32.mrf.mxu1 }
 0x321   : > { %v3361_v1 = vpop.f32.mrf.mxu3  ;;  %v2501_v45 = vadd.f32 %v7416_v35, %v7415_v57 }
 0x322   : > { %7410 = vst [vmem:[#allocation9_spill] sm:$0xff] %v6688_v17  ;;  %4546 = vmatmul.msk.f32.gmra.mxu2 %vm786_vm1, %v2888_v58  ;;  %v2817_v17 = vrot.slane %v6350_v22, 7 }
 0x325   : > { %v3115_v18 = vpop.f32.mrf.mxu2 }
 0x326   : > { %v3211_v11 = vadd.f32 %v3115_v18, %v2743_v60  ;;  %4581 = vmatmul.msk.f32.gmra.mxu3 %vm786_vm1, %v6350_v22  ;;  %v2833_v18 = vrot.slane %v6346_v14, 7  ;;  %v6723_v9 = vpop.f32.mrf.mxu0 }
 0x328   : > { %v3454_v31 = vadd.f32 %v3358_v25, %v3211_v11  ;;  %v7417_v25 = vld [vmem:[#allocation31_spill] sm:$0xff] }
 0x329   : > { %v3364_v58 = vpop.f32.mrf.mxu3  ;;  %v2744_v60 = vadd.f32 %v7417_v25, %v2501_v45 }
 0x32a   : > { %v3697_v12 = vadd.f32 %v6443_v47, %v3454_v31  ;;  %4547 = vmatmul.msk.f32.gmra.mxu2 %vm786_vm1, %v2848_v44  ;;  %v2865_v47 = vsel %vm986_vm2, %v2833_v18, %v2817_v17  ;;  %v7418_v31 = vld [vmem:[#allocation37_spill] sm:$0xff] }
 0x32b   : > { %v2502_v45 = vadd.f32 %v7418_v31, %v6204_v10  ;;  %v2890_v44 = vsel %vm952_vm3, %v2865_v47, 0.0  ;;  %v7421_v47 = vld [vmem:[#allocation40_spill] sm:$0xff]  ;;  %v2849_v31 = vsel %vm986_vm2, %v2817_v17, %v2833_v18 }
 0x32c   : > { %v3733_v11 = vadd.f32 %v6705_v21, %v3697_v12  ;;  %v7419_v12 = vld [vmem:[#allocation76_spill] sm:$0xff] }
 0x32d   : > { %v3118_v46 = vpop.f32.mrf.mxu2 }
 0x32e   : > { %v3765_v57 = vmax.f32 %v3733_v11, 0.0  ;;  %v3212_v35 = vadd.f32 %v3118_v46, %v2744_v60  ;;  %4582 = vmatmul.msk.f32.gmra.mxu3 %vm786_vm1, %v6346_v14  ;;  %v2745_v11 = vadd.f32 %v7419_v12, %v2502_v45 }
 0x330   : > { %v3455_v5 = vadd.f32 %v3361_v1, %v3212_v35  ;;  %4628 = vmatmul.msk.f32.vlgmr.msrb.gmra.mxu1 %vm786_vm1, %v3765_v57  ;;  %v6736_v57 = vpop.f32.mrf.mxu1  ;;  %v7420_v35 = vld [vmem:[#allocation15_spill] sm:$0xff] }
 0x331   : > { %v3367_v22 = vpop.f32.mrf.mxu3 }
 0x332   : > { %v3698_v46 = vadd.f32 %v6473_v30, %v3455_v5  ;;  %4548 = vmatmul.msk.f32.gmra.mxu2 %vm786_vm1, %v2890_v44  ;;  %v2503_v30 = vadd.f32 %v7421_v47, %v7420_v35  ;;  %v6743_v44 = vpop.f32.mrf.mxu0 }
 0x334   : > { %v3734_v14 = vadd.f32 %v6705_v21, %v3698_v46  ;;  %v2834_v46 = vrot.slane %v6380_v20, 7 }
 0x335   : > { %v3121_v25 = vpop.f32.mrf.mxu2 }
 0x336   : > { %v3213_v60 = vadd.f32 %v3121_v25, %v2745_v11  ;;  %4583 = vmatmul.msk.f32.gmra.mxu3 %vm786_vm1, %v6386_v48  ;;  %v3766_v1 = vmax.f32 %v3734_v14, 0.0  ;;  %v2818_v11 = vrot.slane %v6386_v48, 7 }
 0x338   : > { %v3456_v10 = vadd.f32 %v3364_v58, %v3213_v60  ;;  %4629 = vmatmul.msk.f32.gmra.mxu1 %vm786_vm1, %v3766_v1  ;;  %v7422_v58 = vld [vmem:[#allocation14_spill] sm:$0xff]  ;;  %v2866_v18 = vsel %vm986_vm2, %v2834_v46, %v2818_v11  ;;  %v7423_v1 = vld [vmem:[#allocation43_spill] sm:$0xff]  ;;  %v6758_v35 = vpop.f32.mrf.mxu1 }
 0x339   : > { %v3370_v5 = vpop.f32.mrf.mxu3  ;;  %v2746_v12 = vadd.f32 %v7422_v58, %v2503_v30  ;;  %v2892_v48 = vsel %vm952_vm3, %v2866_v18, 0.0 }
 0x33a   : > { %v3699_v45 = vadd.f32 %v6496_v39, %v3456_v10  ;;  %4549 = vmatmul.msk.f32.gmra.mxu2 %vm786_vm1, %v2849_v31  ;;  %v2504_v10 = vadd.f32 %v7423_v1, %v6251_v40  ;;  %v2835_v1 = vrot.slane %v6419_v32, 7 }
 0x33c   : > { %v3735_v14 = vadd.f32 %v6705_v21, %v3699_v45 }
 0x33d   : > { %v3124_v25 = vpop.f32.mrf.mxu2 }
 0x33e   : > { %v3214_v60 = vadd.f32 %v3124_v25, %v2746_v12  ;;  %4584 = vmatmul.msk.f32.gmra.mxu3 %vm786_vm1, %v6380_v20  ;;  %v3767_v17 = vmax.f32 %v3735_v14, 0.0  ;;  %v6764_v20 = vpop.f32.mrf.mxu0  ;;  %v7425_v25 = vld [vmem:[#allocation45_spill] sm:$0xff] }
 0x340   : > { %v3457_v39 = vadd.f32 %v3367_v22, %v3214_v60  ;;  %4630 = vmatmul.msk.f32.gmra.mxu1 %vm786_vm1, %v3767_v17  ;;  %v7424_v22 = vld [vmem:[#allocation17_spill] sm:$0xff]  ;;  %v2850_v17 = vsel %vm986_vm2, %v2818_v11, %v2834_v46  ;;  %v7427_v11 = vld [vmem:[#allocation46_spill] sm:$0xff] }
 0x341   : > { %v3373_v47 = vpop.f32.mrf.mxu3  ;;  %v2747_v45 = vadd.f32 %v7424_v22, %v2504_v10  ;;  %v6779_v10 = vpop.f32.mrf.mxu1 }
 0x342   : > { %v3700_v30 = vadd.f32 %v6516_v27, %v3457_v39  ;;  %4550 = vmatmul.msk.f32.gmra.mxu2 %vm786_vm1, %v2892_v48  ;;  %v2505_v27 = vadd.f32 %v7425_v25, %v6279_v23  ;;  %v2819_v39 = vrot.slane %v6417_v7, 7  ;;  %v7426_v48 = vld [vmem:[#allocation13_spill] sm:$0xff] }
 0x344   : > { %v3736_v31 = vadd.f32 %v6705_v21, %v3700_v30  ;;  %v2748_v30 = vadd.f32 %v7426_v48, %v2505_v27  ;;  %v2867_v46 = vsel %vm986_vm2, %v2835_v1, %v2819_v39 }
 0x345   : > { %v3127_v14 = vpop.f32.mrf.mxu2 }
 0x346   : > { %v3215_v58 = vadd.f32 %v3127_v14, %v2747_v45  ;;  %4585 = vmatmul.msk.f32.gmra.mxu3 %vm786_vm1, %v6417_v7  ;;  %v3768_v40 = vmax.f32 %v3736_v31, 0.0  ;;  %v6783_v23 = vpop.f32.mrf.mxu0  ;;  %v2506_v45 = vadd.f32 %v7427_v11, %v6301_v24 }
 0x348   : > { %v3458_v12 = vadd.f32 %v3370_v5, %v3215_v58  ;;  %4631 = vmatmul.msk.f32.gmra.mxu1 %vm786_vm1, %v3768_v40  ;;  %v2894_v58 = vsel %vm952_vm3, %v2867_v46, 0.0 }
 0x349   : > { %v3376_v60 = vpop.f32.mrf.mxu3  ;;  %v6798_v25 = vpop.f32.mrf.mxu1 }
 0x34a   : > { %v3701_v18 = vadd.f32 %v6542_v0, %v3458_v12  ;;  %4551 = vmatmul.msk.f32.gmra.mxu2 %vm786_vm1, %v2850_v17  ;;  %v2749_v12 = vadd.f32 %v6249_v13, %v2506_v45  ;;  %v2851_v13 = vsel %vm986_vm2, %v2819_v39, %v2835_v1 }
 0x34c   : > { %v3737_v5 = vadd.f32 %v6705_v21, %v3701_v18 }
 0x34d   : > { %v3130_v31 = vpop.f32.mrf.mxu2 }
 0x34e   : > { %v3216_v22 = vadd.f32 %v3130_v31, %v2748_v30  ;;  %4586 = vmatmul.msk.f32.gmra.mxu3 %vm786_vm1, %v6419_v32  ;;  %v3769_v0 = vmax.f32 %v3737_v5, 0.0  ;;  %v6802_v17 = vpop.f32.mrf.mxu0  ;;  %v2820_v31 = vrot.slane %v6454_v26, 7 }
 0x350   : > { %v3459_v7 = vadd.f32 %v3373_v47, %v3216_v22  ;;  %4632 = vmatmul.msk.f32.gmra.mxu1 %vm786_vm1, %v3769_v0  ;;  %v2836_v22 = vrot.slane %v6456_v4, 7 }
 0x351   : > { %v3379_v14 = vpop.f32.mrf.mxu3 }
 0x352   : > { %v3702_v40 = vadd.f32 %v6561_v59, %v3459_v7  ;;  %4552 = vmatmul.msk.f32.gmra.mxu2 %vm786_vm1, %v2894_v58  ;;  %v7428_v59 = vld [vmem:[#allocation47_spill] sm:$0xff]  ;;  %v2868_v39 = vsel %vm986_vm2, %v2836_v22, %v2820_v31 }
 0x353   : > { %v2507_v5 = vadd.f32 %v7428_v59, %v6321_v49 }
 0x354   : > { %v3738_v32 = vadd.f32 %v6705_v21, %v3702_v40  ;;  %v2896_v40 = vsel %vm952_vm3, %v2868_v39, 0.0 }
 0x355   : > { %v3133_v47 = vpop.f32.mrf.mxu2 }
 0x356   : > { %v3217_v27 = vadd.f32 %v3133_v47, %v2749_v12  ;;  %4587 = vmatmul.msk.f32.gmra.mxu3 %vm786_vm1, %v6454_v26  ;;  %v3770_v24 = vmax.f32 %v3738_v32, 0.0  ;;  %v7430_v26 = vld [vmem:[#allocation48_spill] sm:$0xff]  ;;  %v6826_v32 = vpop.f32.mrf.mxu0 }
 0x357   : > { %v2508_v45 = vadd.f32 %v7430_v26, %v6335_v15 }
 0x358   : > { %v3460_v18 = vadd.f32 %v3376_v60, %v3217_v27  ;;  %4633 = vmatmul.msk.f32.gmra.mxu1 %vm786_vm1, %v3770_v24  ;;  %v7429_v60 = vld [vmem:[#allocation18_spill] sm:$0xff] }
 0x359   : > { %v3382_v48 = vpop.f32.mrf.mxu3  ;;  %v2750_v46 = vadd.f32 %v7429_v60, %v2507_v5  ;;  %v2751_v47 = vadd.f32 %v6536_v29, %v2508_v45 }
 0x35a   : > { %v3703_v30 = vadd.f32 %v6698_v52, %v3460_v18  ;;  %4553 = vmatmul.msk.f32.gmra.mxu2 %vm786_vm1, %v2851_v13  ;;  %v6819_v52 = vpop.f32.mrf.mxu1  ;;  %v7431_v18 = vld [vmem:[#allocation50_spill] sm:$0xff]  ;;  %v2852_v13 = vsel %vm986_vm2, %v2820_v31, %v2836_v22 }
 0x35b   : > { %v2509_v59 = vadd.f32 %v7431_v18, %v6353_v2 }
 0x35c   : > { %v3739_v0 = vadd.f32 %v6705_v21, %v3703_v30  ;;  %v2821_v30 = vrot.slane %v6492_v56, 7 }
 0x35d   : > { %v3136_v7 = vpop.f32.mrf.mxu2  ;;  %v2752_v2 = vadd.f32 %v6553_v41, %v2509_v59  ;;  %v6874_v59 = vld [vmem:[#allocation2 + $0x110] sm:$0xff] }
 0x35e   : > { %v3218_v11 = vadd.f32 %v3136_v7, %v2750_v46  ;;  %4588 = vmatmul.msk.f32.gmra.mxu3 %vm786_vm1, %v6456_v4  ;;  %v3771_v49 = vmax.f32 %v3739_v0, 0.0  ;;  %v2837_v0 = vrot.slane %v6494_v6, 7 }
 0x360   : > { %v3461_v1 = vadd.f32 %v3379_v14, %v3218_v11  ;;  %4634 = vmatmul.msk.f32.gmra.mxu1 %vm786_vm1, %v3771_v49 }
 0x361   : > { %v3385_v58 = vpop.f32.mrf.mxu3 }
 0x362   : > { %v3704_v4 = vadd.f32 %v6723_v9, %v3461_v1  ;;  %4554 = vmatmul.msk.f32.gmra.mxu2 %vm786_vm1, %v2896_v40  ;;  %v6837_v5 = vpop.f32.mrf.mxu1 }
 0x364   : > { %v3740_v12 = vadd.f32 %v6705_v21, %v3704_v4 }
 0x365   : > { %v3139_v14 = vpop.f32.mrf.mxu2 }
 0x366   : > { %v3219_v27 = vadd.f32 %v3139_v14, %v2751_v47  ;;  %4589 = vmatmul.msk.f32.gmra.mxu3 %vm786_vm1, %v6492_v56  ;;  %v3772_v15 = vmax.f32 %v3740_v12, 0.0  ;;  %v7432_v56 = vld [vmem:[#allocation52_spill] sm:$0xff] }
 0x367   : > { %v2510_v22 = vadd.f32 %v7432_v56, %v6367_v16  ;;  %v4738_v16 = vld [vmem:[#allocation2 + $0x100] sm:$0xff] }
 0x368   : > { %v3462_v24 = vadd.f32 %v3382_v48, %v3219_v27  ;;  %4635 = vmatmul.msk.f32.gmra.mxu1 %vm786_vm1, %v3772_v15  ;;  %v6845_v48 = vpop.f32.mrf.mxu0  ;;  %v2853_v27 = vsel %vm986_vm2, %v2821_v30, %v2837_v0  ;;  %v2822_v15 = vrot.slane %v4738_v16, 7 }
 0x369   : > { %v3388_v9 = vpop.f32.mrf.mxu3  ;;  %v2753_v26 = vadd.f32 %v6575_v19, %v2510_v22 }
 0x36a   : > { %v3705_v29 = vadd.f32 %v6743_v44, %v3462_v24  ;;  %4555 = vmatmul.msk.f32.gmra.mxu2 %vm786_vm1, %v2852_v13  ;;  %v2869_v44 = vsel %vm986_vm2, %v2837_v0, %v2821_v30  ;;  %v6860_v1 = vpop.f32.mrf.mxu1  ;;  %v4739_v24 = vld [vmem:[#allocation2 + $0x108] sm:$0xff]  ;;  %v6876_v13 = vld [vmem:[#allocation2 + $0x118] sm:$0xff] }
 0x36b   : > { %v2898_v39 = vsel %vm952_vm3, %v2869_v44, 0.0  ;;  %v2838_v18 = vrot.slane %v4739_v24, 7  ;;  %v7434_v44 = vld [vmem:[#allocation57_spill] sm:$0xff] }
 0x36c   : > { %v3741_v60 = vadd.f32 %v6705_v21, %v3705_v29 }
 0x36d   : > { %v3142_v46 = vpop.f32.mrf.mxu2 }
 0x36e   : > { %v3773_v7 = vmax.f32 %v3741_v60, 0.0  ;;  %v3220_v11 = vadd.f32 %v3142_v46, %v2752_v2  ;;  %4590 = vmatmul.msk.f32.gmra.mxu3 %vm786_vm1, %v6494_v6  ;;  %v2935_v60 = vrot.slane %v6876_v13, 1  ;;  %v2870_v46 = vsel %vm986_vm2, %v2838_v18, %v2822_v15 }
 0x36f   : > { %v2900_v22 = vsel %vm952_vm3, %v2870_v46, 0.0 }
 0x370   : > { %v3463_v31 = vadd.f32 %v3385_v58, %v3220_v11  ;;  %4636 = vmatmul.msk.f32.gmra.mxu1 %vm786_vm1, %v3773_v7  ;;  %v6864_v58 = vpop.f32.mrf.mxu0 }
 0x371   : > { %v3391_v49 = vpop.f32.mrf.mxu3 }
 0x372   : > { %v3706_v41 = vadd.f32 %v6764_v20, %v3463_v31  ;;  %4556 = vmatmul.msk.f32.gmra.mxu2 %vm786_vm1, %v2898_v39  ;;  %v7433_v20 = vld [vmem:[#allocation54_spill] sm:$0xff]  ;;  %v6882_v30 = vpop.f32.mrf.mxu1  ;;  %v2512_v31 = vadd.f32 %v7434_v44, %v6406_v33 }
 0x373   : > { %v2511_v47 = vadd.f32 %v7433_v20, %v6389_v54  ;;  %v2919_v54 = vrot.slane %v6874_v59, 1  ;;  %v2839_v20 = vrot.slane %v6876_v13, 7 }
 0x374   : > { %v3742_v6 = vadd.f32 %v6705_v21, %v3706_v41 }
 0x375   : > { %v3145_v45 = vpop.f32.mrf.mxu2  ;;  %v2754_v29 = vadd.f32 %v6590_v36, %v2511_v47  ;;  %v2951_v7 = vsel %vm1089_vm4, %v2919_v54, %v2935_v60 }
 0x376   : > { %v3774_v40 = vmax.f32 %v3742_v6, 0.0  ;;  %v3221_v4 = vadd.f32 %v3145_v45, %v2753_v26  ;;  %4591 = vmatmul.msk.f32.gmra.mxu3 %vm786_vm1, %v4738_v16  ;;  %4626 = vmatmul.msk.f32.gmra.mxu0 %vm786_vm1, %v2951_v7  ;;  %v2755_v6 = vadd.f32 %v6604_v53, %v2512_v31  ;;  %v7435_v53 = vld [vmem:[#allocation58_spill] sm:$0xff] }
 0x377   : > { %v2513_v16 = vadd.f32 %v7435_v53, %v6428_v62 }
 0x378   : > { %v3464_v12 = vadd.f32 %v3388_v9, %v3221_v4  ;;  %4637 = vmatmul.msk.f32.gmra.mxu1 %vm786_vm1, %v3774_v40  ;;  %v6890_v36 = vpop.f32.mrf.mxu0 }
 0x379   : > { %v3394_v14 = vpop.f32.mrf.mxu3 }
 0x37a   : > { %v3707_v19 = vadd.f32 %v6783_v23, %v3464_v12  ;;  %4557 = vmatmul.msk.f32.gmra.mxu2 %vm786_vm1, %v2853_v27  ;;  %v6907_v4 = vpop.f32.mrf.mxu1  ;;  %v2823_v12 = vrot.slane %v6874_v59, 7  ;;  %v2854_v27 = vsel %vm986_vm2, %v2822_v15, %v2838_v18 }
 0x37c   : > { %v3743_v9 = vadd.f32 %v6705_v21, %v3707_v19  ;;  %v2871_v62 = vsel %vm986_vm2, %v2839_v20, %v2823_v12  ;;  %v2855_v44 = vsel %vm986_vm2, %v2823_v12, %v2839_v20 }
 0x37d   : > { %v3148_v23 = vpop.f32.mrf.mxu2  ;;  %v2902_v15 = vsel %vm952_vm3, %v2871_v62, 0.0 }
 0x37e   : > { %v3775_v0 = vmax.f32 %v3743_v9, 0.0  ;;  %v3222_v2 = vadd.f32 %v3148_v23, %v2754_v29  ;;  %4592 = vmatmul.msk.f32.gmra.mxu3 %vm786_vm1, %v4739_v24  ;;  %v2756_v24 = vadd.f32 %v6620_v37, %v2513_v16 }
 0x380   : > { %v3465_v11 = vadd.f32 %v3391_v49, %v3222_v2  ;;  %4638 = vmatmul.msk.f32.gmra.mxu1 %vm786_vm1, %v3775_v0  ;;  %v2967_v49 = vsel %vm1089_vm4, %v2935_v60, %v2919_v54  ;;  %v3649_v3 = vpop.f32.mrf.mxu0 }
 0x381   : > { %v3397_v56 = vpop.f32.mrf.mxu3  ;;  %v2999_v33 = vsel %vm1056_vm5, %v2967_v49, 0.0 }
 0x382   : > { %v3708_v39 = vadd.f32 %v6802_v17, %v3465_v11  ;;  %4558 = vmatmul.msk.f32.gmra.mxu2 %vm786_vm1, %v2900_v22  ;;  %4627 = vmatmul.msk.f32.gmra.mxu0 %vm786_vm1, %v2999_v33  ;;  %v6930_v60 = vpop.f32.mrf.mxu1 }
 0x384   : > { %v3744_v41 = vadd.f32 %v6705_v21, %v3708_v39 }
 0x385   : > { %v3151_v26 = vpop.f32.mrf.mxu2 }
 0x386   : > { %v3776_v45 = vmax.f32 %v3744_v41, 0.0  ;;  %v3223_v40 = vadd.f32 %v3151_v26, %v2755_v6  ;;  %4593 = vmatmul.msk.f32.gmra.mxu3 %vm786_vm1, %v6874_v59 }
 0x388   : > { %v3466_v17 = vadd.f32 %v3394_v14, %v3223_v40  ;;  %4639 = vmatmul.msk.f32.gmra.mxu1 %vm786_vm1, %v3776_v45  ;;  %v3652_v0 = vpop.f32.mrf.mxu0 }
 0x389   : > { %v3400_v47 = vpop.f32.mrf.mxu3 }
 0x38a   : > { %v3709_v19 = vadd.f32 %v6826_v32, %v3466_v17  ;;  %4559 = vmatmul.msk.f32.gmra.mxu2 %vm786_vm1, %v2854_v27  ;;  %v7436_v32 = vld [vmem:[#allocation61_spill] sm:$0xff]  ;;  %v6943_v39 = vpop.f32.mrf.mxu1 }
 0x38b   : > { %v2514_v54 = vadd.f32 %v7436_v32, %v6439_v51  ;;  %v7437_v51 = vld [vmem:[#allocation65_spill] sm:$0xff] }
 0x38c   : > { %v3745_v14 = vadd.f32 %v6705_v21, %v3709_v19 }
 0x38d   : > { %v3154_v9 = vpop.f32.mrf.mxu2 }
 0x38e   : > { %v3777_v59 = vmax.f32 %v3745_v14, 0.0  ;;  %v3224_v29 = vadd.f32 %v3154_v9, %v2756_v24  ;;  %4594 = vmatmul.msk.f32.gmra.mxu3 %vm786_vm1, %v6876_v13  ;;  %v2757_v13 = vadd.f32 %v6634_v50, %v2514_v54  ;;  %v7440_v54 = vld [vmem:[#allocation71_spill] sm:$0xff] }
 0x390   : > { %v3467_v18 = vadd.f32 %v3397_v56, %v3224_v29  ;;  %4640 = vmatmul.msk.f32.gmra.mxu1 %vm786_vm1, %v3777_v59  ;;  %v2515_v56 = vadd.f32 %v7437_v51, %v6464_v63  ;;  %v3655_v34 = vpop.f32.mrf.mxu0  ;;  %v7438_v63 = vld [vmem:[#allocation68_spill] sm:$0xff]  ;;  %v4011_v29 = vld [vmem:[%s4949_s24] sm:$0xff]  ;;  %v4012_v51 = vld [vmem:[%s4949_s24 + $0x8] sm:$0xff] }
 0x391   : > { %v3403_v37 = vpop.f32.mrf.mxu3  ;;  %v2516_v40 = vadd.f32 %v7438_v63, %v6478_v8  ;;  %v7439_v8 = vld [vmem:[#allocation22_spill] sm:$0xff] }
 0x392   : > { %v3710_v23 = vadd.f32 %v6845_v48, %v3467_v18  ;;  %4560 = vmatmul.msk.f32.gmra.mxu2 %vm786_vm1, %v2902_v15  ;;  %v2758_v41 = vadd.f32 %v6647_v42, %v2515_v56  ;;  %v6953_v16 = vpop.f32.mrf.mxu1  ;;  %v2517_v19 = vadd.f32 %v7439_v8, %v6504_v28 }
 0x393   : > { %v2759_v53 = vadd.f32 %v6664_v38, %v2516_v40  ;;  %v6961_v38 = vld [vmem:[%s7220_s8] ss:$0 sm:$0xff] }
 0x394   : > { %v3746_v2 = vadd.f32 %v6705_v21, %v3710_v23  ;;  %v2760_v62 = vadd.f32 %v6676_v55, %v2517_v19  ;;  %v7445_v19 = vld [vmem:[#allocation77_spill] sm:$0xff] }
 0x395   : > { %v3157_v46 = vpop.f32.mrf.mxu2 }
 0x396   : > { %v3778_v7 = vmax.f32 %v3746_v2, 0.0  ;;  %v3225_v11 = vadd.f32 %v3157_v46, %v2757_v13 }
 0x398   : > { %v3468_v31 = vadd.f32 %v3400_v47, %v3225_v11  ;;  %4641 = vmatmul.msk.f32.gmra.mxu1 %vm786_vm1, %v3778_v7  ;;  %v3658_v47 = vpop.f32.mrf.mxu0  ;;  %v7441_v7 = vld [vmem:[#allocation27_spill] sm:$0xff] }
 0x399   : > { %v3406_v48 = vpop.f32.mrf.mxu3 }
 0x39a   : > { %v3711_v22 = vadd.f32 %v6864_v58, %v3468_v31  ;;  %4561 = vmatmul.msk.f32.gmra.mxu2 %vm786_vm1, %v2855_v44 }
 0x39c   : > { %v3747_v50 = vadd.f32 %v6705_v21, %v3711_v22 }
 0x39d   : > { %v3160_v6 = vpop.f32.mrf.mxu2 }
 0x39e   : > { %v3779_v26 = vmax.f32 %v3747_v50, 0.0  ;;  %v3226_v49 = vadd.f32 %v3160_v6, %v2758_v41  ;;  %v7442_v50 = vld [vmem:[#allocation38_spill] sm:$0xff]  ;;  %v7443_v41 = vld [vmem:[#allocation11_spill] sm:$0xff] }
 0x39f   : > { %v2519_v6 = vadd.f32 %v7443_v41, %v7442_v50  ;;  %v7449_v41 = vld [vmem:[#allocation26_spill] sm:$0xff] }
 0x3a0   : > { %v3469_v45 = vadd.f32 %v3403_v37, %v3226_v49  ;;  %4642 = vmatmul.msk.f32.gmra.mxu1 %vm786_vm1, %v3779_v26  ;;  %v2518_v37 = vadd.f32 %v7440_v54, %v6518_v61  ;;  %v3661_v2 = vpop.f32.mrf.mxu0 }
 0x3a1   : > { %v3409_v58 = vpop.f32.mrf.mxu3 }
 0x3a2   : > { %v3712_v33 = vadd.f32 %v6890_v36, %v3469_v45  ;;  %v2761_v11 = vadd.f32 %v7441_v7, %v2518_v37 }
 0x3a4   : > { %v3748_v17 = vadd.f32 %v6705_v21, %v3712_v33 }
 0x3a5   : > { %v3163_v42 = vpop.f32.mrf.mxu2 }
 0x3a6   : > { %v3780_v12 = vmax.f32 %v3748_v17, 0.0  ;;  %v3227_v20 = vadd.f32 %v3163_v42, %v2759_v53  ;;  %v4013_v53 = vld [vmem:[%s4949_s24 + $0x10] sm:$0xff] }
 0x3a8   : > { %v3470_v27 = vadd.f32 %v3406_v48, %v3227_v20  ;;  %4643 = vmatmul.msk.f32.gmra.mxu1 %vm786_vm1, %v3780_v12  ;;  %v3664_v63 = vpop.f32.mrf.mxu0 }
 0x3a9   : > { %v3412_v14 = vpop.f32.mrf.mxu3 }
 0x3aa   : > { %v3713_v36 = vadd.f32 %v3649_v3, %v3470_v27 }
 0x3ac   : > { %v3749_v24 = vadd.f32 %v6705_v21, %v3713_v36 }
 0x3ad   : > { %v3166_v9 = vpop.f32.mrf.mxu2  ;;  %v3915_v59 = vpop.f32.mrf.mxu1 }
 0x3ae   : > { %v3781_v15 = vmax.f32 %v3749_v24, 0.0  ;;  %v3228_v18 = vadd.f32 %v3166_v9, %v2760_v62  ;;  %v3916_v28 = vadd.f32 %v6961_v38, %v3915_v59 }
 0x3b0   : > { %v3471_v3 = vadd.f32 %v3409_v58, %v3228_v18  ;;  %v4043_v32 = vadd.f32 %v4011_v29, %v3916_v28  ;;  %4644 = vmatmul.msk.f32.gmra.mxu1 %vm786_vm1, %v3781_v15  ;;  %v2762_v58 = vadd.f32 %v6717_v43, %v2519_v6  ;;  %v4014_v15 = vld [vmem:[%s4949_s24 + $0x18] sm:$0xff]  ;;  %v3667_v18 = vpop.f32.mrf.mxu0 }
 0x3b1   : > { %v3415_v23 = vpop.f32.mrf.mxu3 }
 0x3b2   : > { %v3714_v55 = vadd.f32 %v3652_v0, %v3471_v3  ;;  %v4075_v13 = vmax.f32 %v4043_v32, 0.0 }
 0x3b4   : > { %v3750_v46 = vadd.f32 %v6705_v21, %v3714_v55  ;;  %4107 = vst.msk [vmem:[%s6974_s15] sm:$0xff] %vm543_vm0, %v4075_v13 }
 0x3b5   : > { %v3169_v44 = vpop.f32.mrf.mxu2  ;;  %v3918_v31 = vpop.f32.mrf.mxu1 }
 0x3b6   : > { %v3782_v56 = vmax.f32 %v3750_v46, 0.0  ;;  %v3229_v61 = vadd.f32 %v3169_v44, %v2761_v11  ;;  %v3919_v48 = vadd.f32 %v6961_v38, %v3918_v31 }
 0x3b8   : > { %v3472_v0 = vadd.f32 %v3412_v14, %v3229_v61  ;;  %v4044_v22 = vadd.f32 %v4012_v51, %v3919_v48  ;;  %4645 = vmatmul.msk.f32.gmra.mxu1 %vm786_vm1, %v3782_v56  ;;  %v4015_v51 = vld [vmem:[%s4949_s24 + $0x20] sm:$0xff] }
 0x3b9   : > { %v3418_v26 = vpop.f32.mrf.mxu3 }
 0x3ba   : > { %v3715_v49 = vadd.f32 %v3655_v34, %v3472_v0  ;;  %v4076_v45 = vmax.f32 %v4044_v22, 0.0  ;;  %v7444_v34 = vld [vmem:[#allocation28_spill] sm:$0xff]  ;;  %v3670_v0 = vpop.f32.mrf.mxu0 }
 0x3bb   : > { %v2520_v14 = vadd.f32 %v7445_v19, %v7444_v34 }
 0x3bc   : > { %v3751_v40 = vadd.f32 %v6705_v21, %v3715_v49  ;;  %4108 = vst.msk [vmem:[%s6974_s15 + $0x8] sm:$0xff] %vm543_vm0, %v4076_v45 }
 0x3bd   : > { %v3172_v33 = vpop.f32.mrf.mxu2  ;;  %v3921_v17 = vpop.f32.mrf.mxu1  ;;  %v2763_v9 = vadd.f32 %v6736_v57, %v2520_v14 }
 0x3be   : > { %v3783_v42 = vmax.f32 %v3751_v40, 0.0  ;;  %v3230_v12 = vadd.f32 %v3172_v33, %v2762_v58  ;;  %v3922_v20 = vadd.f32 %v6961_v38, %v3921_v17  ;;  %v4016_v17 = vld [vmem:[%s4949_s24 + $0x28] sm:$0xff] }
 0x3c0   : > { %v3473_v27 = vadd.f32 %v3415_v23, %v3230_v12  ;;  %v4045_v8 = vadd.f32 %v4013_v53, %v3922_v20  ;;  %4646 = vmatmul.msk.f32.gmra.mxu1 %vm786_vm1, %v3783_v42  ;;  %v7447_v23 = vld [vmem:[#allocation25_spill] sm:$0xff] }
 0x3c1   : > { %v3421_v36 = vpop.f32.mrf.mxu3 }
 0x3c2   : > { %v3716_v24 = vadd.f32 %v3658_v47, %v3473_v27  ;;  %v4077_v62 = vmax.f32 %v4045_v8, 0.0  ;;  %v7446_v47 = vld [vmem:[#allocation41_spill] sm:$0xff]  ;;  %v3673_v14 = vpop.f32.mrf.mxu0 }
 0x3c3   : > { %v2521_v55 = vadd.f32 %v7447_v23, %v7446_v47  ;;  %v7451_v8 = vld [vmem:[#allocation21_spill] sm:$0xff] }
 0x3c4   : > { %v3752_v43 = vadd.f32 %v6705_v21, %v3716_v24  ;;  %4109 = vst.msk [vmem:[%s6974_s15 + $0x10] sm:$0xff] %vm543_vm0, %v4077_v62 }
 0x3c5   : > { %v3175_v59 = vpop.f32.mrf.mxu2  ;;  %v3924_v29 = vpop.f32.mrf.mxu1  ;;  %v2764_v11 = vadd.f32 %v6758_v35, %v2521_v55 }
 0x3c6   : > { %v3784_v28 = vmax.f32 %v3752_v43, 0.0  ;;  %v3231_v3 = vadd.f32 %v3175_v59, %v2763_v9  ;;  %v3925_v32 = vadd.f32 %v6961_v38, %v3924_v29  ;;  %v4017_v59 = vld [vmem:[%s4949_s24 + $0x30] sm:$0xff] }
 0x3c8   : > { %v3474_v54 = vadd.f32 %v3418_v26, %v3231_v3  ;;  %v4046_v37 = vadd.f32 %v4014_v15, %v3925_v32  ;;  %4647 = vmatmul.msk.f32.gmra.mxu1 %vm786_vm1, %v3784_v28 }
 0x3c9   : > { %v3424_v13 = vpop.f32.mrf.mxu3 }
 0x3ca   : > { %v3717_v46 = vadd.f32 %v3661_v2, %v3474_v54  ;;  %v4078_v57 = vmax.f32 %v4046_v37, 0.0  ;;  %v7448_v2 = vld [vmem:[#allocation33_spill] sm:$0xff]  ;;  %v7453_v54 = vld [vmem:[#allocation19_spill] sm:$0xff] }
 0x3cb   : > { %v2522_v6 = vadd.f32 %v7449_v41, %v7448_v2 }
 0x3cc   : > { %v3753_v7 = vadd.f32 %v6705_v21, %v3717_v46  ;;  %4110 = vst.msk [vmem:[%s6974_s15 + $0x18] sm:$0xff] %vm543_vm0, %v4078_v57 }
 0x3cd   : > { %v3178_v44 = vpop.f32.mrf.mxu2  ;;  %v3927_v31 = vpop.f32.mrf.mxu1  ;;  %v2765_v40 = vadd.f32 %v6779_v10, %v2522_v6 }
 0x3ce   : > { %v3785_v56 = vmax.f32 %v3753_v7, 0.0  ;;  %v3232_v61 = vadd.f32 %v3178_v44, %v2764_v11  ;;  %v3928_v48 = vadd.f32 %v6961_v38, %v3927_v31  ;;  %v4018_v11 = vld [vmem:[%s4949_s24 + $0x38] sm:$0xff] }
 0x3d0   : > { %v3475_v22 = vadd.f32 %v3421_v36, %v3232_v61  ;;  %v4047_v50 = vadd.f32 %v4015_v51, %v3928_v48  ;;  %4648 = vmatmul.msk.f32.gmra.mxu1 %vm786_vm1, %v3785_v56  ;;  %v7454_v48 = vld [vmem:[#allocation42_spill] sm:$0xff] }
 0x3d1   : > { %v3427_v26 = vpop.f32.mrf.mxu3 }
 0x3d2   : > { %v3718_v49 = vadd.f32 %v3664_v63, %v3475_v22  ;;  %v4079_v35 = vmax.f32 %v4047_v50, 0.0  ;;  %v7450_v63 = vld [vmem:[#allocation36_spill] sm:$0xff] }
 0x3d3   : > { %v2523_v34 = vadd.f32 %v7451_v8, %v7450_v63 }
 0x3d4   : > { %v3754_v45 = vadd.f32 %v6705_v21, %v3718_v49  ;;  %4111 = vst.msk [vmem:[%s6974_s15 + $0x20] sm:$0xff] %vm543_vm0, %v4079_v35  ;;  %v4019_v35 = vld [vmem:[%s4949_s24 + $0x40] sm:$0xff] }
 0x3d5   : > { %v3181_v58 = vpop.f32.mrf.mxu2  ;;  %v3930_v33 = vpop.f32.mrf.mxu1  ;;  %v2766_v62 = vadd.f32 %v6798_v25, %v2523_v34 }
 0x3d6   : > { %v3786_v53 = vmax.f32 %v3754_v45, 0.0  ;;  %v3233_v42 = vadd.f32 %v3181_v58, %v2765_v40  ;;  %v3931_v12 = vadd.f32 %v6961_v38, %v3930_v33  ;;  %v3676_v25 = vpop.f32.mrf.mxu0 }
 0x3d8   : > { %v3476_v20 = vadd.f32 %v3424_v13, %v3233_v42  ;;  %v4048_v27 = vadd.f32 %v4016_v17, %v3931_v12  ;;  %4649 = vmatmul.msk.f32.gmra.mxu1 %vm786_vm1, %v3786_v53  ;;  %v7456_v42 = vld [vmem:[#allocation44_spill] sm:$0xff]  ;;  %v7457_v12 = vld [vmem:[#allocation23_spill] sm:$0xff] }
 0x3d9   : > { %v3430_v19 = vpop.f32.mrf.mxu3 }
 0x3da   : > { %v3719_v36 = vadd.f32 %v3667_v18, %v3476_v20  ;;  %v4080_v10 = vmax.f32 %v4048_v27, 0.0  ;;  %v7452_v18 = vld [vmem:[#allocation39_spill] sm:$0xff]  ;;  %v2526_v20 = vadd.f32 %v7457_v12, %v7456_v42  ;;  %v4023_v12 = vld [vmem:[%s4949_s24 + $0x60] sm:$0xff] }
 0x3db   : > { %v2524_v37 = vadd.f32 %v7453_v54, %v7452_v18 }
 0x3dc   : > { %v3755_v24 = vadd.f32 %v6705_v21, %v3719_v36  ;;  %4112 = vst.msk [vmem:[%s6974_s15 + $0x28] sm:$0xff] %vm543_vm0, %v4080_v10  ;;  %v2769_v8 = vadd.f32 %v6860_v1, %v2526_v20 }
 0x3dd   : > { %v3184_v43 = vpop.f32.mrf.mxu2  ;;  %v3933_v9 = vpop.f32.mrf.mxu1  ;;  %v2767_v46 = vadd.f32 %v6819_v52, %v2524_v37 }
 0x3de   : > { %v3787_v29 = vmax.f32 %v3755_v24, 0.0  ;;  %v3234_v15 = vadd.f32 %v3184_v43, %v2766_v62  ;;  %v3934_v28 = vadd.f32 %v6961_v38, %v3933_v9  ;;  %v3679_v45 = vpop.f32.mrf.mxu0 }
 0x3e0   : > { %v3477_v3 = vadd.f32 %v3427_v26, %v3234_v15  ;;  %v4049_v32 = vadd.f32 %v4017_v59, %v3934_v28  ;;  %4650 = vmatmul.msk.f32.gmra.mxu1 %vm786_vm1, %v3787_v29  ;;  %v7458_v29 = vld [vmem:[#allocation49_spill] sm:$0xff]  ;;  %v7459_v15 = vld [vmem:[#allocation16_spill] sm:$0xff] }
 0x3e1   : > { %v3433_v55 = vpop.f32.mrf.mxu3  ;;  %v2527_v28 = vadd.f32 %v7459_v15, %v7458_v29  ;;  %v4024_v29 = vld [vmem:[%s4949_s24 + $0x68] sm:$0xff] }
 0x3e2   : > { %v3720_v47 = vadd.f32 %v3670_v0, %v3477_v3  ;;  %v4081_v23 = vmax.f32 %v4049_v32, 0.0  ;;  %v7455_v0 = vld [vmem:[#allocation30_spill] sm:$0xff] }
 0x3e3   : > { %v2525_v22 = vadd.f32 %v7455_v0, %v7454_v48  ;;  %v2770_v18 = vadd.f32 %v6882_v30, %v2527_v28 }
 0x3e4   : > { %v3756_v13 = vadd.f32 %v6705_v21, %v3720_v47  ;;  %4113 = vst.msk [vmem:[%s6974_s15 + $0x30] sm:$0xff] %vm543_vm0, %v4081_v23  ;;  %v4021_v47 = vld [vmem:[%s4949_s24 + $0x50] sm:$0xff] }
 0x3e5   : > { %v3187_v57 = vpop.f32.mrf.mxu2  ;;  %v3936_v7 = vpop.f32.mrf.mxu1  ;;  %v2768_v6 = vadd.f32 %v6837_v5, %v2525_v22  ;;  %v4022_v22 = vld [vmem:[%s4949_s24 + $0x58] sm:$0xff] }
 0x3e6   : > { %v3788_v44 = vmax.f32 %v3756_v13, 0.0  ;;  %v3235_v31 = vadd.f32 %v3187_v57, %v2767_v46  ;;  %v3937_v51 = vadd.f32 %v6961_v38, %v3936_v7  ;;  %v3682_v43 = vpop.f32.mrf.mxu0  ;;  %v7460_v7 = vld [vmem:[#allocation60_spill] sm:$0xff] }
 0x3e8   : > { %v3478_v56 = vadd.f32 %v3430_v19, %v3235_v31  ;;  %v4050_v61 = vadd.f32 %v4018_v11, %v3937_v51  ;;  %4651 = vmatmul.msk.f32.gmra.mxu1 %vm786_vm1, %v3788_v44  ;;  %v7461_v11 = vld [vmem:[#allocation32_spill] sm:$0xff] }
 0x3e9   : > { %v3436_v52 = vpop.f32.mrf.mxu3  ;;  %v2528_v44 = vadd.f32 %v7461_v11, %v7460_v7 }
 0x3ea   : > { %v3721_v50 = vadd.f32 %v3673_v14, %v3478_v56  ;;  %v4082_v2 = vmax.f32 %v4050_v61, 0.0  ;;  %v4020_v14 = vld [vmem:[%s4949_s24 + $0x48] sm:$0xff] }
 0x3eb   : > { %v2771_v61 = vadd.f32 %v6907_v4, %v2528_v44 }
 0x3ec   : > { %v3757_v41 = vadd.f32 %v6705_v21, %v3721_v50  ;;  %4114 = vst.msk [vmem:[%s6974_s15 + $0x38] sm:$0xff] %vm543_vm0, %v4082_v2 }
 0x3ed   : > { %v3190_v26 = vpop.f32.mrf.mxu2  ;;  %v3939_v49 = vpop.f32.mrf.mxu1 }
 0x3ee   : > { %v3789_v40 = vmax.f32 %v3757_v41, 0.0  ;;  %v3236_v58 = vadd.f32 %v3190_v26, %v2768_v6  ;;  %v3940_v33 = vadd.f32 %v6961_v38, %v3939_v49  ;;  %v3685_v31 = vpop.f32.mrf.mxu0  ;;  %v7462_v26 = vld [vmem:[#allocation51_spill] sm:$0xff]  ;;  %v7463_v49 = vld [vmem:[#allocation20_spill] sm:$0xff] }
 0x3f0   : > { %v3479_v17 = vadd.f32 %v3433_v55, %v3236_v58  ;;  %v4051_v53 = vadd.f32 %v4019_v35, %v3940_v33  ;;  %4652 = vmatmul.msk.f32.gmra.mxu1 %vm786_vm1, %v3789_v40  ;;  %v2529_v35 = vadd.f32 %v7463_v49, %v7462_v26 }
 0x3f1   : > { %v3439_v10 = vpop.f32.mrf.mxu3 }
 0x3f2   : > { %v3722_v27 = vadd.f32 %v3676_v25, %v3479_v17  ;;  %v4083_v63 = vmax.f32 %v4051_v53, 0.0  ;;  %v2772_v17 = vadd.f32 %v6930_v60, %v2529_v35 }
 0x3f4   : > { %v3758_v5 = vadd.f32 %v6705_v21, %v3722_v27  ;;  %4115 = vst.msk [vmem:[%s6974_s15 + $0x40] sm:$0xff] %vm543_vm0, %v4083_v63 }
 0x3f5   : > { %v3193_v34 = vpop.f32.mrf.mxu2  ;;  %v3942_v19 = vpop.f32.mrf.mxu1 }
 0x3f6   : > { %v3790_v36 = vmax.f32 %v3758_v5, 0.0  ;;  %v3237_v24 = vadd.f32 %v3193_v34, %v2769_v8  ;;  %v3943_v62 = vadd.f32 %v6961_v38, %v3942_v19  ;;  %v3688_v4 = vpop.f32.mrf.mxu0  ;;  %v7464_v34 = vld [vmem:[#allocation63_spill] sm:$0xff] }
 0x3f7   : > { %v7465_v19 = vld [vmem:[#allocation35_spill] sm:$0xff] }
 0x3f8   : > { %v3480_v9 = vadd.f32 %v3436_v52, %v3237_v24  ;;  %v4052_v59 = vadd.f32 %v4020_v14, %v3943_v62  ;;  %4653 = vmatmul.msk.f32.gmra.mxu1 %vm786_vm1, %v3790_v36  ;;  %v2530_v14 = vadd.f32 %v7465_v19, %v7464_v34 }
 0x3f9   : > { %v3442_v13 = vpop.f32.mrf.mxu3 }
 0x3fa   : > { %v3723_v3 = vadd.f32 %v3679_v45, %v3480_v9  ;;  %v4084_v1 = vmax.f32 %v4052_v59, 0.0  ;;  %v2773_v62 = vadd.f32 %v6943_v39, %v2530_v14  ;;  %v4031_v14 = vld [vmem:[%s4949_s24 + $0xa0] sm:$0xff] }
 0x3fc   : > { %v3759_v32 = vadd.f32 %v6705_v21, %v3723_v3  ;;  %4116 = vst.msk [vmem:[%s6974_s15 + $0x48] sm:$0xff] %vm543_vm0, %v4084_v1 }
 0x3fd   : > { %v3196_v54 = vpop.f32.mrf.mxu2  ;;  %v3945_v37 = vpop.f32.mrf.mxu1 }
 0x3fe   : > { %v3791_v23 = vmax.f32 %v3759_v32, 0.0  ;;  %v3238_v55 = vadd.f32 %v3196_v54, %v2770_v18  ;;  %v3946_v25 = vadd.f32 %v6961_v38, %v3945_v37  ;;  %v7466_v18 = vld [vmem:[#allocation9_spill] sm:$0xff]  ;;  %v7467_v54 = vld [vmem:[#allocation24_spill] sm:$0xff] }
 0x3ff   : > { %v2531_v37 = vadd.f32 %v7467_v54, %v7466_v18  ;;  %v4034_v18 = vld [vmem:[%s4949_s24 + $0xb8] sm:$0xff] }
 0x400   : > { %v3481_v46 = vadd.f32 %v3439_v10, %v3238_v55  ;;  %v4053_v57 = vadd.f32 %v4021_v47, %v3946_v25  ;;  %4654 = vmatmul.msk.f32.gmra.mxu1 %vm786_vm1, %v3791_v23 }
 0x401   : > { %v3445_v45 = vpop.f32.mrf.mxu3  ;;  %v2774_v55 = vadd.f32 %v6953_v16, %v2531_v37  ;;  %v4740_v16 = vld [vmem:[%s7218_s6] ss:$0 sm:$0xff] }
 0x402   : > { %v3724_v51 = vadd.f32 %v3682_v43, %v3481_v46  ;;  %v4085_v30 = vmax.f32 %v4053_v57, 0.0  ;;  %v3691_v43 = vpop.f32.mrf.mxu0  ;;  %v4025_v57 = vld [vmem:[%s4949_s24 + $0x70] sm:$0xff] }
 0x404   : > { %v3760_v56 = vadd.f32 %v6705_v21, %v3724_v51  ;;  %4117 = vst.msk [vmem:[%s6974_s15 + $0x50] sm:$0xff] %vm543_vm0, %v4085_v30 }
 0x405   : > { %v3199_v48 = vpop.f32.mrf.mxu2  ;;  %v3948_v0 = vpop.f32.mrf.mxu1 }
 0x406   : > { %v3792_v50 = vmax.f32 %v3760_v56, 0.0  ;;  %v3239_v2 = vadd.f32 %v3199_v48, %v2771_v61  ;;  %v3949_v41 = vadd.f32 %v6961_v38, %v3948_v0  ;;  %v4026_v0 = vld [vmem:[%s4949_s24 + $0x78] sm:$0xff] }
 0x408   : > { %v3482_v52 = vadd.f32 %v3442_v13, %v3239_v2  ;;  %v4054_v6 = vadd.f32 %v4022_v22, %v3949_v41  ;;  %4655 = vmatmul.msk.f32.gmra.mxu1 %vm786_vm1, %v3792_v50 }
 0x409   : > { %v3448_v24 = vpop.f32.mrf.mxu3 }
 0x40a   : > { %v3725_v40 = vadd.f32 %v3685_v31, %v3482_v52  ;;  %v4086_v58 = vmax.f32 %v4054_v6, 0.0  ;;  %v3694_v31 = vpop.f32.mrf.mxu0  ;;  %v4027_v6 = vld [vmem:[%s4949_s24 + $0x80] sm:$0xff] }
 0x40c   : > { %v3761_v33 = vadd.f32 %v6705_v21, %v3725_v40  ;;  %4118 = vst.msk [vmem:[%s6974_s15 + $0x58] sm:$0xff] %vm543_vm0, %v4086_v58  ;;  %v4028_v40 = vld [vmem:[%s4949_s24 + $0x88] sm:$0xff] }
 0x40d   : > { %v3202_v53 = vpop.f32.mrf.mxu2  ;;  %v3951_v42 = vpop.f32.mrf.mxu1 }
 0x40e   : > { %v3793_v20 = vmax.f32 %v3761_v33, 0.0  ;;  %v3240_v27 = vadd.f32 %v3202_v53, %v2772_v17  ;;  %v3952_v63 = vadd.f32 %v6961_v38, %v3951_v42  ;;  %v4029_v53 = vld [vmem:[%s4949_s24 + $0x90] sm:$0xff] }
 0x410   : > { %v3483_v5 = vadd.f32 %v3445_v45, %v3240_v27  ;;  %v4055_v8 = vadd.f32 %v4023_v12, %v3952_v63  ;;  %4656 = vmatmul.msk.f32.gmra.mxu1 %vm786_vm1, %v3793_v20  ;;  %v4030_v63 = vld [vmem:[%s4949_s24 + $0x98] sm:$0xff] }
 0x411   : > { %v3451_v25 = vpop.f32.mrf.mxu3 }
 0x412   : > { %v3726_v36 = vadd.f32 %v3688_v4, %v3483_v5  ;;  %v4087_v10 = vmax.f32 %v4055_v8, 0.0 }
 0x414   : > { %v3762_v60 = vadd.f32 %v6705_v21, %v3726_v36  ;;  %4119 = vst.msk [vmem:[%s6974_s15 + $0x60] sm:$0xff] %vm543_vm0, %v4087_v10 }
 0x415   : > { %v3205_v9 = vpop.f32.mrf.mxu2  ;;  %v3954_v59 = vpop.f32.mrf.mxu1 }
 0x416   : > { %v3794_v15 = vmax.f32 %v3762_v60, 0.0  ;;  %v3241_v28 = vadd.f32 %v3205_v9, %v2773_v62  ;;  %v3955_v3 = vadd.f32 %v6961_v38, %v3954_v59  ;;  %v4032_v62 = vld [vmem:[%s4949_s24 + $0xa8] sm:$0xff] }
 0x418   : > { %v4056_v1 = vadd.f32 %v4024_v29, %v3955_v3  ;;  %v3484_v32 = vadd.f32 %v3448_v24, %v3241_v28  ;;  %4657 = vmatmul.msk.f32.gmra.mxu1 %vm786_vm1, %v3794_v15  ;;  %v4033_v15 = vld [vmem:[%s4949_s24 + $0xb0] sm:$0xff] }
 0x41a   : > { %v4088_v47 = vmax.f32 %v4056_v1, 0.0  ;;  %v3727_v23 = vadd.f32 %v3691_v43, %v3484_v32 }
 0x41c   : > { %4120 = vst.msk [vmem:[%s6974_s15 + $0x68] sm:$0xff] %vm543_vm0, %v4088_v47  ;;  %v3763_v39 = vadd.f32 %v6705_v21, %v3727_v23 }
 0x41d   : > { %v3208_v13 = vpop.f32.mrf.mxu2  ;;  %v3957_v46 = vpop.f32.mrf.mxu1 }
 0x41e   : > { %v3795_v7 = vmax.f32 %v3763_v39, 0.0  ;;  %v3242_v11 = vadd.f32 %v3208_v13, %v2774_v55  ;;  %v3958_v44 = vadd.f32 %v6961_v38, %v3957_v46  ;;  %v4035_v39 = vld [vmem:[%s4949_s24 + $0xc0] sm:$0xff] }
 0x420   : > { %v4057_v51 = vadd.f32 %v4025_v57, %v3958_v44  ;;  %v3485_v30 = vadd.f32 %v3451_v25, %v3242_v11  ;;  %4658 = vmatmul.msk.f32.gmra.mxu1 %vm786_vm1, %v3795_v7  ;;  %v4036_v57 = vld [vmem:[%s4949_s24 + $0xc8] sm:$0xff] }
 0x422   : > { %v4089_v56 = vmax.f32 %v4057_v51, 0.0  ;;  %v3728_v21 = vadd.f32 %v3694_v31, %v3485_v30  ;;  %v4037_v51 = vld [vmem:[%s4949_s24 + $0xd0] sm:$0xff] }
 0x424   : > { %4121 = vst.msk [vmem:[%s6974_s15 + $0x70] sm:$0xff] %vm543_vm0, %v4089_v56  ;;  %v3764_v61 = vadd.f32 %v4740_v16, %v3728_v21 }
 0x425   : > { %v3960_v48 = vpop.f32.mrf.mxu1 }
 0x426   : > { %v3796_v22 = vmax.f32 %v3764_v61, 0.0  ;;  %v3961_v50 = vadd.f32 %v6961_v38, %v3960_v48  ;;  %v4038_v61 = vld [vmem:[%s4949_s24 + $0xd8] sm:$0xff] }
 0x428   : > { %v4058_v2 = vadd.f32 %v4026_v0, %v3961_v50  ;;  %4659 = vmatmul.msk.f32.gmra.mxu1 %vm786_vm1, %v3796_v22 }
 0x42a   : > { %v4090_v41 = vmax.f32 %v4058_v2, 0.0  ;;  %v4039_v2 = vld [vmem:[%s4949_s24 + $0xe0] sm:$0xff] }
 0x42c   : > { %4122 = vst.msk [vmem:[%s6974_s15 + $0x78] sm:$0xff] %vm543_vm0, %v4090_v41 }
 0x42d   : > { %v3963_v52 = vpop.f32.mrf.mxu1 }
 0x42e   : > { %v3964_v26 = vadd.f32 %v6961_v38, %v3963_v52 }
 0x430   : > { %v4059_v49 = vadd.f32 %v4027_v6, %v3964_v26 }
 0x432   : > { %v4091_v35 = vmax.f32 %v4059_v49, 0.0  ;;  %v4040_v49 = vld [vmem:[%s4949_s24 + $0xe8] sm:$0xff] }
 0x434   : > { %4123 = vst.msk [vmem:[%s6974_s15 + $0x80] sm:$0xff] %vm543_vm0, %v4091_v35 }
 0x435   : > { %v3966_v45 = vpop.f32.mrf.mxu1 }
 0x436   : > { %v3967_v58 = vadd.f32 %v6961_v38, %v3966_v45 }
 0x438   : > { %v4060_v4 = vadd.f32 %v4028_v40, %v3967_v58 }
 0x43a   : > { %v4092_v33 = vmax.f32 %v4060_v4, 0.0  ;;  %v4041_v4 = vld [vmem:[%s4949_s24 + $0xf0] sm:$0xff] }
 0x43c   : > { %4124 = vst.msk [vmem:[%s6974_s15 + $0x88] sm:$0xff] %vm543_vm0, %v4092_v33 }
 0x43d   : > { %v3969_v17 = vpop.f32.mrf.mxu1 }
 0x43e   : > { %v3970_v42 = vadd.f32 %v6961_v38, %v3969_v17 }
 0x440   : > { %v4061_v12 = vadd.f32 %v4029_v53, %v3970_v42 }
 0x442   : > { %v4093_v20 = vmax.f32 %v4061_v12, 0.0  ;;  %v4042_v12 = vld [vmem:[%s4949_s24 + $0xf8] sm:$0xff] }
 0x444   : > { %4125 = vst.msk [vmem:[%s6974_s15 + $0x90] sm:$0xff] %vm543_vm0, %v4093_v20 }
 0x445   : > { %v3972_v27 = vpop.f32.mrf.mxu1 }
 0x446   : > { %v3973_v5 = vadd.f32 %v6961_v38, %v3972_v27 }
 0x448   : > { %v4062_v8 = vadd.f32 %v4030_v63, %v3973_v5 }
 0x44a   : > { %v4094_v34 = vmax.f32 %v4062_v8, 0.0 }
 0x44c   : > { %4126 = vst.msk [vmem:[%s6974_s15 + $0x98] sm:$0xff] %vm543_vm0, %v4094_v34 }
 0x44d   : > { %v3975_v19 = vpop.f32.mrf.mxu1 }
 0x44e   : > { %v3976_v36 = vadd.f32 %v6961_v38, %v3975_v19 }
 0x450   : > { %v4063_v10 = vadd.f32 %v4031_v14, %v3976_v36 }
 0x452   : > { %v4095_v24 = vmax.f32 %v4063_v10, 0.0 }
 0x454   : > { %4127 = vst.msk [vmem:[%s6974_s15 + $0xa0] sm:$0xff] %vm543_vm0, %v4095_v24 }
 0x455   : > { %v3978_v60 = vpop.f32.mrf.mxu1 }
 0x456   : > { %v3979_v43 = vadd.f32 %v6961_v38, %v3978_v60 }
 0x458   : > { %v4064_v9 = vadd.f32 %v4032_v62, %v3979_v43 }
 0x45a   : > { %v4096_v59 = vmax.f32 %v4064_v9, 0.0 }
 0x45c   : > { %4128 = vst.msk [vmem:[%s6974_s15 + $0xa8] sm:$0xff] %vm543_vm0, %v4096_v59 }
 0x45d   : > { %v3981_v29 = vpop.f32.mrf.mxu1 }
 0x45e   : > { %v3982_v28 = vadd.f32 %v6961_v38, %v3981_v29 }
 0x460   : > { %v4065_v3 = vadd.f32 %v4033_v15, %v3982_v28 }
 0x462   : > { %v4097_v1 = vmax.f32 %v4065_v3, 0.0 }
 0x464   : > { %4129 = vst.msk [vmem:[%s6974_s15 + $0xb0] sm:$0xff] %vm543_vm0, %v4097_v1 }
 0x465   : > { %v3984_v32 = vpop.f32.mrf.mxu1 }
 0x466   : > { %v3985_v54 = vadd.f32 %v6961_v38, %v3984_v32 }
 0x468   : > { %v4066_v37 = vadd.f32 %v4034_v18, %v3985_v54 }
 0x46a   : > { %v4098_v47 = vmax.f32 %v4066_v37, 0.0 }
 0x46c   : > { %4130 = vst.msk [vmem:[%s6974_s15 + $0xb8] sm:$0xff] %vm543_vm0, %v4098_v47 }
 0x46d   : > { %v3987_v23 = vpop.f32.mrf.mxu1 }
 0x46e   : > { %v3988_v55 = vadd.f32 %v6961_v38, %v3987_v23 }
 0x470   : > { %v4067_v25 = vadd.f32 %v4035_v39, %v3988_v55 }
 0x472   : > { %v4099_v13 = vmax.f32 %v4067_v25, 0.0 }
 0x474   : > { %4131 = vst.msk [vmem:[%s6974_s15 + $0xc0] sm:$0xff] %vm543_vm0, %v4099_v13 }
 0x475   : > { %v3990_v46 = vpop.f32.mrf.mxu1 }
 0x476   : > { %v3991_v7 = vadd.f32 %v6961_v38, %v3990_v46 }
 0x478   : > { %v4068_v11 = vadd.f32 %v4036_v57, %v3991_v7 }
 0x47a   : > { %v4100_v44 = vmax.f32 %v4068_v11, 0.0 }
 0x47c   : > { %4132 = vst.msk [vmem:[%s6974_s15 + $0xc8] sm:$0xff] %vm543_vm0, %v4100_v44 }
 0x47d   : > { %v3993_v31 = vpop.f32.mrf.mxu1 }
 0x47e   : > { %v3994_v30 = vadd.f32 %v6961_v38, %v3993_v31 }
 0x480   : > { %v4069_v56 = vadd.f32 %v4037_v51, %v3994_v30 }
 0x482   : > { %v4101_v21 = vmax.f32 %v4069_v56, 0.0 }
 0x484   : > { %4133 = vst.msk [vmem:[%s6974_s15 + $0xd0] sm:$0xff] %vm543_vm0, %v4101_v21 }
 0x485   : > { %v3996_v16 = vpop.f32.mrf.mxu1 }
 0x486   : > { %v3997_v48 = vadd.f32 %v6961_v38, %v3996_v16 }
 0x488   : > { %v4070_v0 = vadd.f32 %v4038_v61, %v3997_v48 }
 0x48a   : > { %v4102_v22 = vmax.f32 %v4070_v0, 0.0 }
 0x48c   : > { %4134 = vst.msk [vmem:[%s6974_s15 + $0xd8] sm:$0xff] %vm543_vm0, %v4102_v22 }
 0x48d   : > { %v3999_v50 = vpop.f32.mrf.mxu1 }
 0x48e   : > { %v4000_v41 = vadd.f32 %v6961_v38, %v3999_v50 }
 0x490   : > { %v4071_v52 = vadd.f32 %v4039_v2, %v4000_v41 }
 0x492   : > { %v4103_v6 = vmax.f32 %v4071_v52, 0.0 }
 0x494   : > { %4135 = vst.msk [vmem:[%s6974_s15 + $0xe0] sm:$0xff] %vm543_vm0, %v4103_v6 }
 0x495   : > { %v4002_v26 = vpop.f32.mrf.mxu1 }
 0x496   : > { %v4003_v35 = vadd.f32 %v6961_v38, %v4002_v26 }
 0x498   : > { %v4072_v45 = vadd.f32 %v4040_v49, %v4003_v35 }
 0x49a   : > { %v4104_v40 = vmax.f32 %v4072_v45, 0.0 }
 0x49c   : > { %4136 = vst.msk [vmem:[%s6974_s15 + $0xe8] sm:$0xff] %vm543_vm0, %v4104_v40 }
 0x49d   : > { %v4005_v58 = vpop.f32.mrf.mxu1 }
 0x49e   : > { %v4006_v33 = vadd.f32 %v6961_v38, %v4005_v58 }
 0x4a0   : > { %v4073_v17 = vadd.f32 %v4041_v4, %v4006_v33 }
 0x4a2   : > { %v4105_v53 = vmax.f32 %v4073_v17, 0.0 }
 0x4a4   : > { %4137 = vst.msk [vmem:[%s6974_s15 + $0xf0] sm:$0xff] %vm543_vm0, %v4105_v53 }
 0x4a5   : > { %v4008_v42 = vpop.f32.mrf.mxu1 }
 0x4a6   : > { %v4009_v20 = vadd.f32 %v6961_v38, %v4008_v42 }
 0x4a8   : > { %v4074_v27 = vadd.f32 %v4042_v12, %v4009_v20 }
 0x4aa   : > { %v4106_v63 = vmax.f32 %v4074_v27, 0.0 }
 0x4ac   : > { %4138 = vst.msk [vmem:[%s6974_s15 + $0xf8] sm:$0xff] %vm543_vm0, %v4106_v63 }
 0x4ad   : > { %4768 = shalt.err (!%p4765_p5)
}
 0x4ae   : > { %s4822_s28 = smov 128   ;;  %s4823_s15 = smov 8  }
 0x4af   : > { %4677 = dma.vmem_to_hbm [thread:$0]  (%p4914_p4), %s4156_s27, 4096, %s4158_s29, %s4140_s12, %s4822_s28, %s4822_s28, %s4823_s15  }
 0x4b0 PF: > { %p4683_p6 = scmp.ge.s32.totalorder %s4819_s14, 2  ;;  %s4172_s24 = sand.u32 1, %s4799_s30  }
 0x4b1   : > { %s4173_s20 = scalar_lea.sflag [#allocation4], %s4172_s24 }
 0x4b2   : > { %p4680_p7 = pnand %p4683_p6, %p4921_p8 }
 0x4b4   : > { %p4681_p9 = pneg %p4680_p7 }
 0x4b6   : > { %4794 = dma.done.wait (%p4681_p9), %s4173_s20, 4096  }
 0x4b7   : > { %4796 = vsyncadd (%p4681_p9), %s4173_s20, 4294963200  ;;  %s22_s14 = sadd.s32 1, %s4819_s14   ;;  %s7468_s30 = smov %s4803_s10 }
 0x4b8   : > { %p19_p10 = scmp.ge.s32.totalorder %s22_s14, 4   ;;  %s7469_s10 = smov %s4807_s11 }
 0x4b9   : > { %s7470_s11 = smov %s4927_s22  ;;  %s7471_s12 = smov %s4815_s13 }
 0x4ba   : > { %s7472_s13 = smov %s7474_s17  ;;  %21 = sbr.rel (!%p19_p10) target bundleno = 4 (0x4), region = 109 }
 0x4bf   :  { %4179 = vsyncpa [#allocation4], 1 }
 0x4c0   :  { %4181 = vsyncpa [#allocation4 + $0x1], 1 }

// kernel: resnet_stage_forward.2
= control target key start
LH: loop header
LB: loop body
LE: loop exit
PB: predicated region body
PF: predicated region fallthrough
CT: control target
= control target key end

     0   :  { %s5133_s17 = smov 0   ;;  %s5135_s18 = smov 0   ;;  %s7225_s0 = inlined_call_operand.vmem [shape: f32[2,16,16,4], index: 0, kind: input, shape index: {}, may-alias: {0,1,2}]   ;;  %s7226_s1 = inlined_call_operand.vmem [shape: f32[2,16,16,4], index: 1, kind: input, shape index: {}, may-alias: {0,1,2}]   ;;  %s7227_s2 = inlined_call_operand.vmem [shape: f32[2,16,16,4], index: 2, kind: input, shape index: {}, may-alias: {0,1,2}]   ;;  %s7228_s3 = inlined_call_operand.vmem [shape: f32[4,8], index: 3, kind: input, shape index: {}]   ;;  %s7229_s4 = inlined_call_operand.vmem [shape: f32[1,8], index: 4, kind: input, shape index: {}]   ;;  %s7230_s5 = inlined_call_operand.vmem [shape: f32[3,3,8,8], index: 5, kind: input, shape index: {}]   ;;  %s7231_s6 = inlined_call_operand.vmem [shape: f32[1,8], index: 6, kind: input, shape index: {}]   ;;  %s7232_s7 = inlined_call_operand.vmem [shape: f32[8,32], index: 7, kind: input, shape index: {}]   ;;  %s7233_s8 = inlined_call_operand.vmem [shape: f32[1,32], index: 8, kind: input, shape index: {}]   ;;  %s7234_s9 = inlined_call_operand.vmem [shape: f32[4,32], index: 9, kind: input, shape index: {}]   ;;  %s7235_s10 = inlined_call_operand.vmem [shape: f32[1,32], index: 10, kind: input, shape index: {}]   ;;  %s7236_s11 = inlined_call_operand.vmem [shape: f32[2,16,16,32], index: 11, kind: output, shape index: {}]  }
   0x1   :  { %s5137_s19 = smov 0  }
   0x2 LB: > { %s33_s20 = sadd.s32 1, %s5066_s18  ;;  %p4566_p0 = scmp.ge.s32.totalorder %s5070_s19, 1  ;;  %s5070_s19 = sphi %s5137_s19, %s21_s19   ;;  %s5066_s18 = sphi %s5135_s18, %s7367_s18   ;;  %s5062_s17 = sphi %s5133_s17, %s7366_s17  }
   0x3   : > { %p35_p1 = scmp.ge.s32.totalorder %s33_s20, 2  ;;  %p427_p2 = scmp.lt.s32.totalorder %s5070_s19, 3 }
   0x5   : > { %s7369_s20 = smov (%p35_p1, %s33_s20), 0  ;;  %p428_p3 = pnand %p4566_p0, %p427_p2 }
   0x7   : > { %431 = sbr.rel (%p428_p3) target bundleno = 1171 (0x493), region = 64 }
   0xc   : > { %v601_v0 = vld [vmem:[%s7228_s3] sm:$0xf]  ;;  %vm703_vm0 = vcmask 1043456   ;;  %p506_p4 = scmp.lt.s32.totalorder %s5062_s17, 1  ;;  %vm606_vm1 = vcmask 31744   ;;  %v4616_v14 = vld [vmem:[%s7230_s5 + $0x8] sm:$0xff]  ;;  %v1016_v19 = vlaneseq }
   0xd   : > { %4575 = vmatpush.msk.msra.mxu0 %vm703_vm0, %v601_v0  ;;  %v937_v12 = vld [vmem:[%s7228_s3] sm:$0xf]  ;;  %vm853_vm2 = vcmask 64512   ;;  %v5072_v17 = vmov 0.0   ;;  %v4681_v25 = vld [vmem:[%s7230_s5 + $0x10] sm:$0xff]  ;;  %vm4391_vm7 = vcmask 261120  }
   0xe   : > { %s7371_s17 = smov (!%p506_p4, %s5062_s17), 1  ;;  %4986 = vmatpush.msk.msra.mxu3 %vm703_vm0, %v937_v12  ;;  %4613 = vmatpush.msk.msra.mxu2 %vm703_vm0, %v937_v12  ;;  %v889_v16 = vld [vmem:[%s7228_s3] sm:$0xf]  ;;  %933 = vst.msk [vmem:[#allocation2] sm:$0xff] %vm853_vm2, %v5072_v17  ;;  %v5221_v23 = vshrl.u32 %v1016_v19, 7 }
   0xf   : > { %s5155_s23 = sshll.u32 %s7371_s17, 8  ;;  %934 = vst.msk [vmem:[#allocation2 + $0x8] sm:$0xff] %vm853_vm2, %v5072_v17  ;;  %4610 = vmatpush.msk.msrb.mxu0 %vm703_vm0, %v889_v16  ;;  %4985 = vmatpush.msk.msra.mxu1 %vm703_vm0, %v889_v16  ;;  %v4747_v22 = vld [vmem:[%s7230_s5 + $0x20] sm:$0xff] }
  0x10   : > { %s5161_s26 = scalar_lea.vmem %s7225_s0, %s5155_s23  ;;  %s4982_s27 = sadd.s32 128, %s5155_s23  ;;  %1339 = vmatpush.msrb.mxu3 %v4616_v14  ;;  %982 = vst.msk [vmem:[#allocation2 + $0x110] sm:$0xff] %vm853_vm2, %v5072_v17  ;;  %1759 = vmatpush.msrb.mxu2 %v4681_v25  ;;  %vm1156_vm3 = vcmp.lt.s32.totalorder %v5221_v23, 7  ;;  %vm1053_vm4 = vcmp.lt.s32.totalorder %v5221_v23, 1  ;;  %v1225_v32 = vld [vmem:[%s7230_s5] sm:$0xff]  ;;  %vm1019_vm5 = vcmp.gt.s32.totalorder %v5221_v23, 0 }
  0x11   : > { %v569_v1 = vld [vmem:[%s5161_s26] sm:$0xff]  ;;  %v570_v2 = vld [vmem:[%s5161_s26 + $0x8] sm:$0xff]  ;;  %v571_v3 = vld [vmem:[%s5161_s26 + $0x10] sm:$0xff]  ;;  %s548_s30 = scalar_lea.vmem %s7227_s2, %s4982_s27  ;;  %s5211_s24 = scalar_lea.vmem %s7226_s1, %s5155_s23  ;;  %983 = vst.msk [vmem:[#allocation2 + $0x118] sm:$0xff] %vm853_vm2, %v5072_v17  ;;  %1548 = vmatpush.msrb.mxu1 %v1225_v32  ;;  %v5244_v35 = vadd.s32 8, %v5221_v23 }
  0x12   : > { %4576 = vmatmul.msk.f32.vlgmr.msra.gmra.mxu0 %vm606_vm1, %v569_v1  ;;  %v572_v4 = vld [vmem:[%s5161_s26 + $0x18] sm:$0xff]  ;;  %v573_v5 = vld [vmem:[%s5161_s26 + $0x20] sm:$0xff]  ;;  %v574_v6 = vld [vmem:[%s5161_s26 + $0x28] sm:$0xff] }
  0x13   : > { %v575_v7 = vld [vmem:[%s5161_s26 + $0x30] sm:$0xff]  ;;  %v576_v8 = vld [vmem:[%s5161_s26 + $0x38] sm:$0xff]  ;;  %v577_v9 = vld [vmem:[%s5161_s26 + $0x40] sm:$0xff]  ;;  %vm1123_vm6 = vcmp.lt.s32.totalorder %v5244_v35, 15 }
  0x14   : > { %v578_v10 = vld [vmem:[%s5161_s26 + $0x48] sm:$0xff]  ;;  %v579_v11 = vld [vmem:[%s5161_s26 + $0x50] sm:$0xff]  ;;  %v935_v15 = vld [vmem:[%s548_s30] sm:$0xff] }
  0x15   : > { %v936_v13 = vld [vmem:[%s548_s30 + $0x8] sm:$0xff]  ;;  %4614 = vmatmul.msk.f32.vlgmr.msra.gmra.mxu2 %vm606_vm1, %v935_v15  ;;  %v580_v18 = vld [vmem:[%s5161_s26 + $0x58] sm:$0xff]  ;;  %v984_v21 = vld [vmem:[#allocation2] sm:$0xff]  ;;  %s6994_s30 = scalar_lea.vmem %s7236_s11, %s5155_s23 }
  0x16   : > { %4615 = vmatmul.msk.f32.vlgmr.msra.gmra.mxu3 %vm606_vm1, %v936_v13  ;;  %v4609_v20 = vld [vmem:[%s5211_s24 + $0x78] sm:$0xff]  ;;  %v1124_v24 = vrot.slane %v984_v21, 1  ;;  %v985_v26 = vld [vmem:[#allocation2 + $0x8] sm:$0xff]  ;;  %v1021_v27 = vrot.slane %v984_v21, 7  ;;  %v581_v31 = vld [vmem:[%s5161_s26 + $0x60] sm:$0xff] }
  0x17   : > { %4612 = vmatmul.msk.f32.vlgmr.msra.gmra.mxu1 %vm606_vm1, %v4609_v20  ;;  %2469 = vmatpush.msra.mxu3 %v4747_v22  ;;  %v1140_v28 = vrot.slane %v985_v26, 1  ;;  %v1037_v30 = vrot.slane %v985_v26, 7  ;;  %v582_v38 = vld [vmem:[%s5161_s26 + $0x68] sm:$0xff]  ;;  %v583_v40 = vld [vmem:[%s5161_s26 + $0x70] sm:$0xff]  ;;  %v584_v41 = vld [vmem:[%s5161_s26 + $0x78] sm:$0xff] }
  0x18   : > { %v5265_v42 = vld [vmem:[%s7229_s4] ss:$0 sm:$0xff]  ;;  %v586_v48 = vld [vmem:[%s5161_s26 + $0x88] sm:$0xff]  ;;  %v587_v53 = vld [vmem:[%s5161_s26 + $0x90] sm:$0xff] }
  0x19   : > { %v1157_v29 = vsel %vm1156_vm3, %v1124_v24, %v1140_v28  ;;  %v1070_v33 = vsel %vm1053_vm4, %v1037_v30, %v1021_v27  ;;  %v1173_v36 = vsel %vm1156_vm3, %v1140_v28, %v1124_v24  ;;  %v1054_v39 = vsel %vm1053_vm4, %v1021_v27, %v1037_v30  ;;  %v585_v44 = vld [vmem:[%s5161_s26 + $0x80] sm:$0xff]  ;;  %v588_v1 = vld [vmem:[%s5161_s26 + $0x98] sm:$0xff]  ;;  %v591_v30 = vld [vmem:[%s5161_s26 + $0xb0] sm:$0xff] }
  0x1a   : > { %4577 = vmatmul.msk.f32.gmra.mxu0 %vm606_vm1, %v570_v2  ;;  %v1090_v34 = vsel %vm1019_vm5, %v1070_v33, 0.0  ;;  %v1194_v37 = vsel %vm1123_vm6, %v1173_v36, 0.0 }
  0x1d   : > { %4682 = vmatmul.msk.f32.vlgmr.msrb.gmra.mxu2 %vm853_vm2, %v1157_v29 }
  0x1e   : > { %4617 = vmatmul.msk.f32.vlgmr.msrb.gmra.mxu3 %vm853_vm2, %v984_v21  ;;  %v590_v21 = vld [vmem:[%s5161_s26 + $0xa8] sm:$0xff] }
  0x1f   : > { %4649 = vmatmul.msk.f32.vlgmr.msrb.gmra.mxu1 %vm853_vm2, %v1090_v34 }
  0x22   : > { %4578 = vmatmul.msk.f32.gmra.mxu0 %vm606_vm1, %v571_v3 }
  0x25   : > { %4683 = vmatmul.msk.f32.gmra.mxu2 %vm853_vm2, %v1194_v37 }
  0x26   : > { %4618 = vmatmul.msk.f32.gmra.mxu3 %vm853_vm2, %v985_v26 }
  0x27   : > { %4650 = vmatmul.msk.f32.gmra.mxu1 %vm853_vm2, %v1054_v39 }
  0x2a   : > { %4579 = vmatmul.msk.f32.gmra.mxu0 %vm606_vm1, %v572_v4 }
  0x32   : > { %4580 = vmatmul.msk.f32.gmra.mxu0 %vm606_vm1, %v573_v5 }
  0x3a   : > { %4581 = vmatmul.msk.f32.gmra.mxu0 %vm606_vm1, %v574_v6 }
  0x42   : > { %4582 = vmatmul.msk.f32.gmra.mxu0 %vm606_vm1, %v575_v7 }
  0x4a   : > { %4583 = vmatmul.msk.f32.gmra.mxu0 %vm606_vm1, %v576_v8 }
  0x52   : > { %4584 = vmatmul.msk.f32.gmra.mxu0 %vm606_vm1, %v577_v9  ;;  %v589_v9 = vld [vmem:[%s5161_s26 + $0xa0] sm:$0xff] }
  0x5a   : > { %4585 = vmatmul.msk.f32.gmra.mxu0 %vm606_vm1, %v578_v10 }
  0x62   : > { %4586 = vmatmul.msk.f32.gmra.mxu0 %vm606_vm1, %v579_v11 }
  0x6a   : > { %4587 = vmatmul.msk.f32.gmra.mxu0 %vm606_vm1, %v580_v18 }
  0x72   : > { %4588 = vmatmul.msk.f32.gmra.mxu0 %vm606_vm1, %v581_v31 }
  0x7a   : > { %4589 = vmatmul.msk.f32.gmra.mxu0 %vm606_vm1, %v582_v38 }
  0x82   : > { %4590 = vmatmul.msk.f32.gmra.mxu0 %vm606_vm1, %v583_v40 }
  0x8a   : > { %4591 = vmatmul.msk.f32.gmra.mxu0 %vm606_vm1, %v584_v41 }
  0x8f   : > { %v724_v43 = vpop.f32.mrf.mxu0 }
  0x90   : > { %v725_v45 = vadd.f32 %v5265_v42, %v724_v43 }
  0x92   : > { %v820_v46 = vmax.f32 %v725_v45, 0.0  ;;  %4592 = vmatmul.msk.f32.gmra.mxu0 %vm606_vm1, %v585_v44  ;;  %v592_v44 = vld [vmem:[%s5161_s26 + $0xb8] sm:$0xff] }
  0x94   : > { %854 = vst.msk [vmem:[#allocation2 + $0x10] sm:$0xff] %vm853_vm2, %v820_v46 }
  0x97   : > { %v727_v47 = vpop.f32.mrf.mxu0 }
  0x98   : > { %v728_v49 = vadd.f32 %v5265_v42, %v727_v47 }
  0x9a   : > { %v821_v50 = vmax.f32 %v728_v49, 0.0  ;;  %4593 = vmatmul.msk.f32.gmra.mxu0 %vm606_vm1, %v586_v48 }
  0x9b   : > { %v986_v51 = vld [vmem:[#allocation2 + $0x10] sm:$0xff] }
  0x9c   : > { %855 = vst.msk [vmem:[#allocation2 + $0x18] sm:$0xff] %vm853_vm2, %v821_v50  ;;  %4619 = vmatmul.msk.f32.gmra.mxu3 %vm853_vm2, %v986_v51  ;;  %v1022_v57 = vrot.slane %v986_v51, 7  ;;  %v1125_v58 = vrot.slane %v986_v51, 1 }
  0x9f   : > { %v730_v52 = vpop.f32.mrf.mxu0 }
  0xa0   : > { %v731_v54 = vadd.f32 %v5265_v42, %v730_v52  ;;  %v593_v52 = vld [vmem:[%s5161_s26 + $0xc0] sm:$0xff] }
  0xa2   : > { %v822_v55 = vmax.f32 %v731_v54, 0.0  ;;  %4594 = vmatmul.msk.f32.gmra.mxu0 %vm606_vm1, %v587_v53 }
  0xa3   : > { %v987_v56 = vld [vmem:[#allocation2 + $0x18] sm:$0xff] }
  0xa4   : > { %856 = vst.msk [vmem:[#allocation2 + $0x20] sm:$0xff] %vm853_vm2, %v822_v55  ;;  %v1038_v59 = vrot.slane %v987_v56, 7  ;;  %v1141_v60 = vrot.slane %v987_v56, 1  ;;  %4620 = vmatmul.msk.f32.gmra.mxu3 %vm853_vm2, %v987_v56 }
  0xa6   : > { %v1158_v61 = vsel %vm1156_vm3, %v1125_v58, %v1141_v60  ;;  %v1071_v62 = vsel %vm1053_vm4, %v1038_v59, %v1022_v57  ;;  %v1174_v5 = vsel %vm1156_vm3, %v1141_v60, %v1125_v58  ;;  %v5304_v8 = vsel %vm1053_vm4, %v1022_v57, %v1038_v59 }
  0xa7   : > { %v733_v63 = vpop.f32.mrf.mxu0  ;;  %4684 = vmatmul.msk.f32.gmra.mxu2 %vm853_vm2, %v1158_v61  ;;  %v5288_v0 = vsel %vm1019_vm5, %v1071_v62, 0.0  ;;  %v1196_v6 = vsel %vm1123_vm6, %v1174_v5, 0.0 }
  0xa8   : > { %v734_v2 = vadd.f32 %v5265_v42, %v733_v63  ;;  %4651 = vmatmul.msk.f32.gmra.mxu1 %vm853_vm2, %v5288_v0 }
  0xaa   : > { %v823_v3 = vmax.f32 %v734_v2, 0.0  ;;  %4595 = vmatmul.msk.f32.gmra.mxu0 %vm606_vm1, %v588_v1  ;;  %v594_v1 = vld [vmem:[%s5161_s26 + $0xc8] sm:$0xff] }
  0xab   : > { %v988_v4 = vld [vmem:[#allocation2 + $0x20] sm:$0xff] }
  0xac   : > { %857 = vst.msk [vmem:[#allocation2 + $0x28] sm:$0xff] %vm853_vm2, %v823_v3  ;;  %4621 = vmatmul.msk.f32.gmra.mxu3 %vm853_vm2, %v988_v4  ;;  %v1023_v13 = vrot.slane %v988_v4, 7  ;;  %v1126_v14 = vrot.slane %v988_v4, 1 }
  0xaf   : > { %v736_v7 = vpop.f32.mrf.mxu0  ;;  %4685 = vmatmul.msk.f32.gmra.mxu2 %vm853_vm2, %v1196_v6 }
  0xb0   : > { %v737_v10 = vadd.f32 %v5265_v42, %v736_v7  ;;  %4652 = vmatmul.msk.f32.gmra.mxu1 %vm853_vm2, %v5304_v8 }
  0xb2   : > { %v824_v11 = vmax.f32 %v737_v10, 0.0  ;;  %4596 = vmatmul.msk.f32.gmra.mxu0 %vm606_vm1, %v589_v9  ;;  %v595_v10 = vld [vmem:[%s5161_s26 + $0xd0] sm:$0xff] }
  0xb3   : > { %v989_v12 = vld [vmem:[#allocation2 + $0x28] sm:$0xff] }
  0xb4   : > { %858 = vst.msk [vmem:[#allocation2 + $0x30] sm:$0xff] %vm853_vm2, %v824_v11  ;;  %v1039_v15 = vrot.slane %v989_v12, 7  ;;  %v1142_v16 = vrot.slane %v989_v12, 1  ;;  %4622 = vmatmul.msk.f32.gmra.mxu3 %vm853_vm2, %v989_v12 }
  0xb6   : > { %v1159_v17 = vsel %vm1156_vm3, %v1126_v14, %v1142_v16  ;;  %v1072_v18 = vsel %vm1053_vm4, %v1039_v15, %v1023_v13  ;;  %v1175_v26 = vsel %vm1156_vm3, %v1142_v16, %v1126_v14  ;;  %v5336_v29 = vsel %vm1053_vm4, %v1023_v13, %v1039_v15 }
  0xb7   : > { %v739_v19 = vpop.f32.mrf.mxu0  ;;  %4686 = vmatmul.msk.f32.gmra.mxu2 %vm853_vm2, %v1159_v17  ;;  %v5320_v20 = vsel %vm1019_vm5, %v1072_v18, 0.0  ;;  %v1198_v27 = vsel %vm1123_vm6, %v1175_v26, 0.0 }
  0xb8   : > { %v740_v22 = vadd.f32 %v5265_v42, %v739_v19  ;;  %4653 = vmatmul.msk.f32.gmra.mxu1 %vm853_vm2, %v5320_v20 }
  0xba   : > { %v825_v24 = vmax.f32 %v740_v22, 0.0  ;;  %4597 = vmatmul.msk.f32.gmra.mxu0 %vm606_vm1, %v590_v21 }
  0xbb   : > { %v990_v25 = vld [vmem:[#allocation2 + $0x30] sm:$0xff] }
  0xbc   : > { %859 = vst.msk [vmem:[#allocation2 + $0x38] sm:$0xff] %vm853_vm2, %v825_v24  ;;  %4623 = vmatmul.msk.f32.gmra.mxu3 %vm853_vm2, %v990_v25  ;;  %v1024_v34 = vrot.slane %v990_v25, 7  ;;  %v1127_v36 = vrot.slane %v990_v25, 1  ;;  %v596_v24 = vld [vmem:[%s5161_s26 + $0xd8] sm:$0xff]  ;;  %v923_v25 = vpop.f32.mrf.mxu1 }
  0xbd   : > { %v4608_v25 = vld [vmem:[%s5211_s24 + $0x70] sm:$0xff] }
  0xbf   : > { %v742_v28 = vpop.f32.mrf.mxu0  ;;  %4687 = vmatmul.msk.f32.gmra.mxu2 %vm853_vm2, %v1198_v27  ;;  %v971_v27 = vpop.f32.mrf.mxu3 }
  0xc0   : > { %v743_v31 = vadd.f32 %v5265_v42, %v742_v28  ;;  %4654 = vmatmul.msk.f32.gmra.mxu1 %vm853_vm2, %v5336_v29  ;;  %v968_v28 = vpop.f32.mrf.mxu2 }
  0xc2   : > { %v826_v32 = vmax.f32 %v743_v31, 0.0  ;;  %4598 = vmatmul.msk.f32.gmra.mxu0 %vm606_vm1, %v591_v30 }
  0xc3   : > { %v991_v33 = vld [vmem:[#allocation2 + $0x38] sm:$0xff] }
  0xc4   : > { %860 = vst.msk [vmem:[#allocation2 + $0x40] sm:$0xff] %vm853_vm2, %v826_v32  ;;  %v1040_v37 = vrot.slane %v991_v33, 7  ;;  %v1143_v38 = vrot.slane %v991_v33, 1  ;;  %4624 = vmatmul.msk.f32.gmra.mxu3 %vm853_vm2, %v991_v33 }
  0xc6   : > { %v1160_v39 = vsel %vm1156_vm3, %v1127_v36, %v1143_v38  ;;  %v1073_v40 = vsel %vm1053_vm4, %v1040_v37, %v1024_v34  ;;  %v1176_v48 = vsel %vm1156_vm3, %v1143_v38, %v1127_v36  ;;  %v5368_v51 = vsel %vm1053_vm4, %v1024_v34, %v1040_v37  ;;  %v597_v37 = vld [vmem:[%s5161_s26 + $0xe0] sm:$0xff] }
  0xc7   : > { %v745_v41 = vpop.f32.mrf.mxu0  ;;  %4688 = vmatmul.msk.f32.gmra.mxu2 %vm853_vm2, %v1160_v39  ;;  %v5352_v43 = vsel %vm1019_vm5, %v1073_v40, 0.0  ;;  %v1200_v49 = vsel %vm1123_vm6, %v1176_v48, 0.0  ;;  %v4780_v48 = vld [vmem:[%s7230_s5 + $0x28] sm:$0xff] }
  0xc8   : > { %v746_v45 = vadd.f32 %v5265_v42, %v745_v41  ;;  %4655 = vmatmul.msk.f32.gmra.mxu1 %vm853_vm2, %v5352_v43 }
  0xc9   : > { %2712 = vmatpush.msra.mxu1 %v4780_v48 }
  0xca   : > { %v827_v46 = vmax.f32 %v746_v45, 0.0  ;;  %4599 = vmatmul.msk.f32.gmra.mxu0 %vm606_vm1, %v592_v44 }
  0xcb   : > { %v992_v47 = vld [vmem:[#allocation2 + $0x40] sm:$0xff] }
  0xcc   : > { %861 = vst.msk [vmem:[#allocation2 + $0x48] sm:$0xff] %vm853_vm2, %v827_v46  ;;  %4625 = vmatmul.msk.f32.gmra.mxu3 %vm853_vm2, %v992_v47  ;;  %v1025_v56 = vrot.slane %v992_v47, 7  ;;  %v1128_v57 = vrot.slane %v992_v47, 1  ;;  %v4813_v47 = vld [vmem:[%s7230_s5 + $0x30] sm:$0xff] }
  0xcd   : > { %3180 = vmatpush.msra.mxu2 %v4813_v47 }
  0xcf   : > { %v748_v50 = vpop.f32.mrf.mxu0  ;;  %4689 = vmatmul.msk.f32.gmra.mxu2 %vm853_vm2, %v1200_v49 }
  0xd0   : > { %v749_v53 = vadd.f32 %v5265_v42, %v748_v50  ;;  %4656 = vmatmul.msk.f32.gmra.mxu1 %vm853_vm2, %v5368_v51 }
  0xd2   : > { %v828_v54 = vmax.f32 %v749_v53, 0.0  ;;  %4600 = vmatmul.msk.f32.gmra.mxu0 %vm606_vm1, %v593_v52 }
  0xd3   : > { %v993_v55 = vld [vmem:[#allocation2 + $0x48] sm:$0xff] }
  0xd4   : > { %862 = vst.msk [vmem:[#allocation2 + $0x50] sm:$0xff] %vm853_vm2, %v828_v54  ;;  %v1041_v58 = vrot.slane %v993_v55, 7  ;;  %v1144_v59 = vrot.slane %v993_v55, 1  ;;  %4626 = vmatmul.msk.f32.gmra.mxu3 %vm853_vm2, %v993_v55  ;;  %v598_v54 = vld [vmem:[%s5161_s26 + $0xe8] sm:$0xff] }
  0xd6   : > { %v1161_v60 = vsel %vm1156_vm3, %v1128_v57, %v1144_v59  ;;  %v1074_v61 = vsel %vm1053_vm4, %v1041_v58, %v1025_v56  ;;  %v1177_v5 = vsel %vm1156_vm3, %v1144_v59, %v1128_v57  ;;  %v5400_v9 = vsel %vm1053_vm4, %v1025_v56, %v1041_v58  ;;  %v4714_v56 = vld [vmem:[%s7230_s5 + $0x18] sm:$0xff] }
  0xd7   : > { %v751_v62 = vpop.f32.mrf.mxu0  ;;  %4690 = vmatmul.msk.f32.gmra.mxu2 %vm853_vm2, %v1161_v60  ;;  %v5384_v63 = vsel %vm1019_vm5, %v1074_v61, 0.0  ;;  %v1202_v6 = vsel %vm1123_vm6, %v1177_v5, 0.0  ;;  %2226 = vmatpush.msra.mxu0 %v4714_v56 }
  0xd8   : > { %v752_v2 = vadd.f32 %v5265_v42, %v751_v62  ;;  %4657 = vmatmul.msk.f32.gmra.mxu1 %vm853_vm2, %v5384_v63 }
  0xda   : > { %v829_v3 = vmax.f32 %v752_v2, 0.0  ;;  %4601 = vmatmul.msk.f32.gmra.mxu0 %vm606_vm1, %v594_v1  ;;  %v599_v1 = vld [vmem:[%s5161_s26 + $0xf0] sm:$0xff] }
  0xdb   : > { %v994_v4 = vld [vmem:[#allocation2 + $0x50] sm:$0xff] }
  0xdc   : > { %863 = vst.msk [vmem:[#allocation2 + $0x58] sm:$0xff] %vm853_vm2, %v829_v3  ;;  %4627 = vmatmul.msk.f32.gmra.mxu3 %vm853_vm2, %v994_v4  ;;  %v1026_v14 = vrot.slane %v994_v4, 7  ;;  %v1129_v15 = vrot.slane %v994_v4, 1 }
  0xdf   : > { %v754_v7 = vpop.f32.mrf.mxu0  ;;  %4691 = vmatmul.msk.f32.gmra.mxu2 %vm853_vm2, %v1202_v6 }
  0xe0   : > { %v755_v11 = vadd.f32 %v5265_v42, %v754_v7  ;;  %4658 = vmatmul.msk.f32.gmra.mxu1 %vm853_vm2, %v5400_v9 }
  0xe2   : > { %v830_v12 = vmax.f32 %v755_v11, 0.0  ;;  %4602 = vmatmul.msk.f32.gmra.mxu0 %vm606_vm1, %v595_v10 }
  0xe3   : > { %v995_v13 = vld [vmem:[#allocation2 + $0x58] sm:$0xff] }
  0xe4   : > { %864 = vst.msk [vmem:[#allocation2 + $0x60] sm:$0xff] %vm853_vm2, %v830_v12  ;;  %v1042_v16 = vrot.slane %v995_v13, 7  ;;  %v1145_v17 = vrot.slane %v995_v13, 1  ;;  %4628 = vmatmul.msk.f32.gmra.mxu3 %vm853_vm2, %v995_v13 }
  0xe6   : > { %v1162_v18 = vsel %vm1156_vm3, %v1129_v15, %v1145_v17  ;;  %v1075_v19 = vsel %vm1053_vm4, %v1042_v16, %v1026_v14  ;;  %v1178_v32 = vsel %vm1156_vm3, %v1145_v17, %v1129_v15  ;;  %v5432_v36 = vsel %vm1053_vm4, %v1026_v14, %v1042_v16  ;;  %v600_v15 = vld [vmem:[%s5161_s26 + $0xf8] sm:$0xff] }
  0xe7   : > { %v757_v21 = vpop.f32.mrf.mxu0  ;;  %4692 = vmatmul.msk.f32.gmra.mxu2 %vm853_vm2, %v1162_v18  ;;  %v5416_v22 = vsel %vm1019_vm5, %v1075_v19, 0.0  ;;  %v1204_v33 = vsel %vm1123_vm6, %v1178_v32, 0.0  ;;  %v5496_v19 = vpop.f32.mrf.mxu3 }
  0xe8   : > { %v758_v26 = vadd.f32 %v5265_v42, %v757_v21  ;;  %4659 = vmatmul.msk.f32.gmra.mxu1 %vm853_vm2, %v5416_v22 }
  0xea   : > { %v831_v30 = vmax.f32 %v758_v26, 0.0  ;;  %4603 = vmatmul.msk.f32.gmra.mxu0 %vm606_vm1, %v596_v24 }
  0xeb   : > { %v996_v31 = vld [vmem:[#allocation2 + $0x60] sm:$0xff] }
  0xec   : > { %865 = vst.msk [vmem:[#allocation2 + $0x68] sm:$0xff] %vm853_vm2, %v831_v30  ;;  %4629 = vmatmul.msk.f32.gmra.mxu3 %vm853_vm2, %v996_v31  ;;  %v1027_v40 = vrot.slane %v996_v31, 7  ;;  %v1130_v44 = vrot.slane %v996_v31, 1  ;;  %v5514_v31 = vpop.f32.mrf.mxu1 }
  0xef   : > { %v760_v34 = vpop.f32.mrf.mxu0  ;;  %4693 = vmatmul.msk.f32.gmra.mxu2 %vm853_vm2, %v1204_v33 }
  0xf0   : > { %v761_v38 = vadd.f32 %v5265_v42, %v760_v34  ;;  %4660 = vmatmul.msk.f32.gmra.mxu1 %vm853_vm2, %v5432_v36 }
  0xf2   : > { %v832_v39 = vmax.f32 %v761_v38, 0.0  ;;  %4604 = vmatmul.msk.f32.gmra.mxu0 %vm606_vm1, %v597_v37 }
  0xf3   : > { %v997_v41 = vld [vmem:[#allocation2 + $0x68] sm:$0xff] }
  0xf4   : > { %866 = vst.msk [vmem:[#allocation2 + $0x70] sm:$0xff] %vm853_vm2, %v832_v39  ;;  %v1043_v45 = vrot.slane %v997_v41, 7  ;;  %v1146_v46 = vrot.slane %v997_v41, 1  ;;  %4630 = vmatmul.msk.f32.gmra.mxu3 %vm853_vm2, %v997_v41  ;;  %v5518_v39 = vpop.f32.mrf.mxu3 }
  0xf6   : > { %v1163_v49 = vsel %vm1156_vm3, %v1130_v44, %v1146_v46  ;;  %v1076_v50 = vsel %vm1053_vm4, %v1043_v45, %v1027_v40  ;;  %v1179_v59 = vsel %vm1156_vm3, %v1146_v46, %v1130_v44  ;;  %v5473_v62 = vsel %vm1053_vm4, %v1027_v40, %v1043_v45  ;;  %v5529_v46 = vpop.f32.mrf.mxu2 }
  0xf7   : > { %v763_v52 = vpop.f32.mrf.mxu0  ;;  %4694 = vmatmul.msk.f32.gmra.mxu2 %vm853_vm2, %v1163_v49  ;;  %v5454_v53 = vsel %vm1019_vm5, %v1076_v50, 0.0  ;;  %v1206_v60 = vsel %vm1123_vm6, %v1179_v59, 0.0 }
  0xf8   : > { %v764_v55 = vadd.f32 %v5265_v42, %v763_v52  ;;  %4661 = vmatmul.msk.f32.gmra.mxu1 %vm853_vm2, %v5454_v53  ;;  %v5540_v52 = vpop.f32.mrf.mxu1 }
  0xfa   : > { %v833_v57 = vmax.f32 %v764_v55, 0.0  ;;  %4605 = vmatmul.msk.f32.gmra.mxu0 %vm606_vm1, %v598_v54 }
  0xfb   : > { %v998_v58 = vld [vmem:[#allocation2 + $0x70] sm:$0xff] }
  0xfc   : > { %867 = vst.msk [vmem:[#allocation2 + $0x78] sm:$0xff] %vm853_vm2, %v833_v57  ;;  %4631 = vmatmul.msk.f32.gmra.mxu3 %vm853_vm2, %v998_v58  ;;  %v1028_v5 = vrot.slane %v998_v58, 7  ;;  %v1131_v6 = vrot.slane %v998_v58, 1 }
  0xfe   : > { %v5552_v58 = vpop.f32.mrf.mxu2 }
  0xff   : > { %v766_v61 = vpop.f32.mrf.mxu0  ;;  %4695 = vmatmul.msk.f32.gmra.mxu2 %vm853_vm2, %v1206_v60 }
 0x100   : > { %v767_v2 = vadd.f32 %v5265_v42, %v766_v61  ;;  %4662 = vmatmul.msk.f32.gmra.mxu1 %vm853_vm2, %v5473_v62 }
 0x102   : > { %v834_v3 = vmax.f32 %v767_v2, 0.0  ;;  %4606 = vmatmul.msk.f32.gmra.mxu0 %vm606_vm1, %v599_v1 }
 0x103   : > { %v999_v4 = vld [vmem:[#allocation2 + $0x78] sm:$0xff] }
 0x104   : > { %868 = vst.msk [vmem:[#allocation2 + $0x80] sm:$0xff] %vm853_vm2, %v834_v3  ;;  %v1044_v7 = vrot.slane %v999_v4, 7  ;;  %v1147_v10 = vrot.slane %v999_v4, 1  ;;  %4632 = vmatmul.msk.f32.gmra.mxu3 %vm853_vm2, %v999_v4 }
 0x106   : > { %v1164_v11 = vsel %vm1156_vm3, %v1131_v6, %v1147_v10  ;;  %v1077_v12 = vsel %vm1053_vm4, %v1044_v7, %v1028_v5  ;;  %v1180_v21 = vsel %vm1156_vm3, %v1147_v10, %v1131_v6  ;;  %v5508_v27 = vsel %vm1053_vm4, %v1028_v5, %v1044_v7 }
 0x107   : > { %v769_v13 = vpop.f32.mrf.mxu0  ;;  %4696 = vmatmul.msk.f32.gmra.mxu2 %vm853_vm2, %v1164_v11  ;;  %v5489_v14 = vsel %vm1019_vm5, %v1077_v12, 0.0  ;;  %v1208_v24 = vsel %vm1123_vm6, %v1180_v21, 0.0 }
 0x108   : > { %v770_v16 = vadd.f32 %v5265_v42, %v769_v13  ;;  %4663 = vmatmul.msk.f32.gmra.mxu1 %vm853_vm2, %v5489_v14 }
 0x10a   : > { %v835_v17 = vmax.f32 %v770_v16, 0.0  ;;  %4607 = vmatmul.msk.f32.gmra.mxu0 %vm606_vm1, %v600_v15 }
 0x10b   : > { %v1000_v18 = vld [vmem:[#allocation2 + $0x80] sm:$0xff] }
 0x10c   : > { %869 = vst.msk [vmem:[#allocation2 + $0x88] sm:$0xff] %vm853_vm2, %v835_v17  ;;  %4633 = vmatmul.msk.f32.gmra.mxu3 %vm853_vm2, %v1000_v18  ;;  %v1029_v33 = vrot.slane %v1000_v18, 7  ;;  %v1132_v34 = vrot.slane %v1000_v18, 1 }
 0x10f   : > { %v772_v26 = vpop.f32.mrf.mxu0  ;;  %4697 = vmatmul.msk.f32.gmra.mxu2 %vm853_vm2, %v1208_v24 }
 0x110   : > { %v773_v28 = vadd.f32 %v5265_v42, %v772_v26  ;;  %4664 = vmatmul.msk.f32.gmra.mxu1 %vm853_vm2, %v5508_v27 }
 0x112   : > { %v836_v30 = vmax.f32 %v773_v28, 0.0  ;;  %4611 = vmatmul.msk.f32.vlgmr.msrb.gmra.mxu0 %vm606_vm1, %v4608_v25 }
 0x113   : > { %v1001_v32 = vld [vmem:[#allocation2 + $0x88] sm:$0xff] }
 0x114   : > { %870 = vst.msk [vmem:[#allocation2 + $0x90] sm:$0xff] %vm853_vm2, %v836_v30  ;;  %v1045_v37 = vrot.slane %v1001_v32, 7  ;;  %v1148_v38 = vrot.slane %v1001_v32, 1  ;;  %4634 = vmatmul.msk.f32.gmra.mxu3 %vm853_vm2, %v1001_v32 }
 0x116   : > { %v1165_v40 = vsel %vm1156_vm3, %v1132_v34, %v1148_v38  ;;  %v1078_v41 = vsel %vm1053_vm4, %v1045_v37, %v1029_v33  ;;  %v1181_v50 = vsel %vm1156_vm3, %v1148_v38, %v1132_v34 }
 0x117   : > { %v775_v44 = vpop.f32.mrf.mxu0  ;;  %4698 = vmatmul.msk.f32.gmra.mxu2 %vm853_vm2, %v1165_v40  ;;  %v5527_v45 = vsel %vm1019_vm5, %v1078_v41, 0.0  ;;  %v1210_v54 = vsel %vm1123_vm6, %v1181_v50, 0.0 }
 0x118   : > { %v776_v47 = vadd.f32 %v5265_v42, %v775_v44  ;;  %4665 = vmatmul.msk.f32.gmra.mxu1 %vm853_vm2, %v5527_v45 }
 0x11a   : > { %v837_v48 = vmax.f32 %v776_v47, 0.0  ;;  %4715 = vmatmul.msk.f32.vlgmr.msra.gmra.mxu0 %vm853_vm2, %v5288_v0  ;;  %v5547_v0 = vsel %vm1053_vm4, %v1029_v33, %v1045_v37 }
 0x11b   : > { %v1002_v49 = vld [vmem:[#allocation2 + $0x90] sm:$0xff] }
 0x11c   : > { %871 = vst.msk [vmem:[#allocation2 + $0x98] sm:$0xff] %vm853_vm2, %v837_v48  ;;  %4635 = vmatmul.msk.f32.gmra.mxu3 %vm853_vm2, %v1002_v49  ;;  %v1030_v61 = vrot.slane %v1002_v49, 7  ;;  %v1133_v1 = vrot.slane %v1002_v49, 1 }
 0x11f   : > { %v778_v55 = vpop.f32.mrf.mxu0  ;;  %v1347_v56 = vpop.f32.mrf.mxu3  ;;  %4699 = vmatmul.msk.f32.gmra.mxu2 %vm853_vm2, %v1210_v54 }
 0x120   : > { %v779_v57 = vadd.f32 %v5265_v42, %v778_v55  ;;  %4666 = vmatmul.msk.f32.gmra.mxu1 %vm853_vm2, %v5547_v0 }
 0x122   : > { %v838_v59 = vmax.f32 %v779_v57, 0.0  ;;  %4716 = vmatmul.msk.f32.gmra.mxu0 %vm853_vm2, %v5304_v8 }
 0x123   : > { %v1003_v60 = vld [vmem:[#allocation2 + $0x98] sm:$0xff] }
 0x124   : > { %872 = vst.msk [vmem:[#allocation2 + $0xa0] sm:$0xff] %vm853_vm2, %v838_v59  ;;  %v1046_v2 = vrot.slane %v1003_v60, 7  ;;  %v1149_v3 = vrot.slane %v1003_v60, 1  ;;  %4636 = vmatmul.msk.f32.gmra.mxu3 %vm853_vm2, %v1003_v60 }
 0x125   : > { %v1556_v4 = vpop.f32.mrf.mxu1 }
 0x126   : > { %v1166_v5 = vsel %vm1156_vm3, %v1133_v1, %v1149_v3  ;;  %v1079_v6 = vsel %vm1053_vm4, %v1046_v2, %v1030_v61  ;;  %v1557_v12 = vadd.f32 %v1556_v4, %v1347_v56  ;;  %v1182_v18 = vsel %vm1156_vm3, %v1149_v3, %v1133_v1 }
 0x127   : > { %v781_v7 = vpop.f32.mrf.mxu0  ;;  %v1350_v10 = vpop.f32.mrf.mxu3  ;;  %4700 = vmatmul.msk.f32.gmra.mxu2 %vm853_vm2, %v1166_v5  ;;  %v5565_v8 = vsel %vm1019_vm5, %v1079_v6, 0.0  ;;  %v1212_v24 = vsel %vm1123_vm6, %v1182_v18, 0.0 }
 0x128   : > { %v782_v11 = vadd.f32 %v5265_v42, %v781_v7  ;;  %4667 = vmatmul.msk.f32.gmra.mxu1 %vm853_vm2, %v5565_v8 }
 0x12a   : > { %v839_v13 = vmax.f32 %v782_v11, 0.0  ;;  %v1767_v15 = vpop.f32.mrf.mxu2  ;;  %4717 = vmatmul.msk.f32.gmra.mxu0 %vm853_vm2, %v5320_v20  ;;  %v5583_v20 = vsel %vm1053_vm4, %v1030_v61, %v1046_v2 }
 0x12b   : > { %v5572_v16 = vadd.f32 %v1767_v15, %v1557_v12  ;;  %v1004_v17 = vld [vmem:[#allocation2 + $0xa0] sm:$0xff] }
 0x12c   : > { %873 = vst.msk [vmem:[#allocation2 + $0xa8] sm:$0xff] %vm853_vm2, %v839_v13  ;;  %4637 = vmatmul.msk.f32.gmra.mxu3 %vm853_vm2, %v1004_v17  ;;  %v1031_v38 = vrot.slane %v1004_v17, 7  ;;  %v1134_v40 = vrot.slane %v1004_v17, 1 }
 0x12d   : > { %v1559_v21 = vpop.f32.mrf.mxu1 }
 0x12e   : > { %v1560_v30 = vadd.f32 %v1559_v21, %v1350_v10 }
 0x12f   : > { %v784_v25 = vpop.f32.mrf.mxu0  ;;  %v1353_v26 = vpop.f32.mrf.mxu3  ;;  %4701 = vmatmul.msk.f32.gmra.mxu2 %vm853_vm2, %v1212_v24 }
 0x130   : > { %v785_v28 = vadd.f32 %v5265_v42, %v784_v25  ;;  %4668 = vmatmul.msk.f32.gmra.mxu1 %vm853_vm2, %v5583_v20 }
 0x132   : > { %v840_v32 = vmax.f32 %v785_v28, 0.0  ;;  %v1770_v33 = vpop.f32.mrf.mxu2  ;;  %4718 = vmatmul.msk.f32.gmra.mxu0 %vm853_vm2, %v5336_v29 }
 0x133   : > { %v5590_v34 = vadd.f32 %v1770_v33, %v1560_v30  ;;  %v1005_v37 = vld [vmem:[#allocation2 + $0xa8] sm:$0xff] }
 0x134   : > { %874 = vst.msk [vmem:[#allocation2 + $0xb0] sm:$0xff] %vm853_vm2, %v840_v32  ;;  %v1047_v41 = vrot.slane %v1005_v37, 7  ;;  %v1150_v44 = vrot.slane %v1005_v37, 1  ;;  %4638 = vmatmul.msk.f32.gmra.mxu3 %vm853_vm2, %v1005_v37 }
 0x135   : > { %v1562_v47 = vpop.f32.mrf.mxu1 }
 0x136   : > { %v1167_v48 = vsel %vm1156_vm3, %v1134_v40, %v1150_v44  ;;  %v1080_v49 = vsel %vm1053_vm4, %v1047_v41, %v1031_v38  ;;  %v1563_v56 = vadd.f32 %v1562_v47, %v1353_v26  ;;  %v1183_v1 = vsel %vm1156_vm3, %v1150_v44, %v1134_v40 }
 0x137   : > { %v787_v50 = vpop.f32.mrf.mxu0  ;;  %v1356_v29 = vpop.f32.mrf.mxu3  ;;  %4702 = vmatmul.msk.f32.gmra.mxu2 %vm853_vm2, %v1167_v48  ;;  %v5601_v54 = vsel %vm1019_vm5, %v1080_v49, 0.0  ;;  %v1214_v3 = vsel %vm1123_vm6, %v1183_v1, 0.0 }
 0x138   : > { %v788_v55 = vadd.f32 %v5265_v42, %v787_v50  ;;  %4669 = vmatmul.msk.f32.gmra.mxu1 %vm853_vm2, %v5601_v54 }
 0x13a   : > { %v841_v57 = vmax.f32 %v788_v55, 0.0  ;;  %v1773_v59 = vpop.f32.mrf.mxu2  ;;  %4719 = vmatmul.msk.f32.gmra.mxu0 %vm853_vm2, %v5352_v43  ;;  %v5619_v43 = vsel %vm1053_vm4, %v1031_v38, %v1047_v41 }
 0x13b   : > { %v5608_v60 = vadd.f32 %v1773_v59, %v1563_v56  ;;  %v1006_v61 = vld [vmem:[#allocation2 + $0xb0] sm:$0xff] }
 0x13c   : > { %875 = vst.msk [vmem:[#allocation2 + $0xb8] sm:$0xff] %vm853_vm2, %v841_v57  ;;  %4639 = vmatmul.msk.f32.gmra.mxu3 %vm853_vm2, %v1006_v61  ;;  %v1032_v15 = vrot.slane %v1006_v61, 7  ;;  %v1135_v17 = vrot.slane %v1006_v61, 1 }
 0x13d   : > { %v1565_v2 = vpop.f32.mrf.mxu1 }
 0x13e   : > { %v1566_v7 = vadd.f32 %v1565_v2, %v1356_v29 }
 0x13f   : > { %v790_v4 = vpop.f32.mrf.mxu0  ;;  %v1359_v5 = vpop.f32.mrf.mxu3  ;;  %4703 = vmatmul.msk.f32.gmra.mxu2 %vm853_vm2, %v1214_v3 }
 0x140   : > { %v791_v6 = vadd.f32 %v5265_v42, %v790_v4  ;;  %4670 = vmatmul.msk.f32.gmra.mxu1 %vm853_vm2, %v5619_v43 }
 0x142   : > { %v842_v10 = vmax.f32 %v791_v6, 0.0  ;;  %v1776_v11 = vpop.f32.mrf.mxu2  ;;  %4720 = vmatmul.msk.f32.gmra.mxu0 %vm853_vm2, %v5368_v51 }
 0x143   : > { %v5626_v12 = vadd.f32 %v1776_v11, %v1566_v7  ;;  %v1007_v13 = vld [vmem:[#allocation2 + $0xb8] sm:$0xff] }
 0x144   : > { %876 = vst.msk [vmem:[#allocation2 + $0xc0] sm:$0xff] %vm853_vm2, %v842_v10  ;;  %v1048_v18 = vrot.slane %v1007_v13, 7  ;;  %v1151_v21 = vrot.slane %v1007_v13, 1  ;;  %4640 = vmatmul.msk.f32.gmra.mxu3 %vm853_vm2, %v1007_v13 }
 0x145   : > { %v1568_v24 = vpop.f32.mrf.mxu1 }
 0x146   : > { %v1168_v25 = vsel %vm1156_vm3, %v1135_v17, %v1151_v21  ;;  %v1081_v26 = vsel %vm1053_vm4, %v1048_v18, %v1032_v15  ;;  %v1569_v33 = vadd.f32 %v1568_v24, %v1359_v5  ;;  %v1184_v44 = vsel %vm1156_vm3, %v1151_v21, %v1135_v17 }
 0x147   : > { %v793_v28 = vpop.f32.mrf.mxu0  ;;  %v1362_v51 = vpop.f32.mrf.mxu3  ;;  %4704 = vmatmul.msk.f32.gmra.mxu2 %vm853_vm2, %v1168_v25  ;;  %v5637_v30 = vsel %vm1019_vm5, %v1081_v26, 0.0  ;;  %v1216_v48 = vsel %vm1123_vm6, %v1184_v44, 0.0 }
 0x148   : > { %v794_v32 = vadd.f32 %v5265_v42, %v793_v28  ;;  %4671 = vmatmul.msk.f32.gmra.mxu1 %vm853_vm2, %v5637_v30 }
 0x14a   : > { %v843_v37 = vmax.f32 %v794_v32, 0.0  ;;  %v1779_v38 = vpop.f32.mrf.mxu2  ;;  %4721 = vmatmul.msk.f32.gmra.mxu0 %vm853_vm2, %v5384_v63  ;;  %v5655_v63 = vsel %vm1053_vm4, %v1032_v15, %v1048_v18 }
 0x14b   : > { %v5644_v40 = vadd.f32 %v1779_v38, %v1569_v33  ;;  %v1008_v41 = vld [vmem:[#allocation2 + $0xc0] sm:$0xff] }
 0x14c   : > { %877 = vst.msk [vmem:[#allocation2 + $0xc8] sm:$0xff] %vm853_vm2, %v843_v37  ;;  %4641 = vmatmul.msk.f32.gmra.mxu3 %vm853_vm2, %v1008_v41  ;;  %v1033_v1 = vrot.slane %v1008_v41, 7  ;;  %v1136_v2 = vrot.slane %v1008_v41, 1 }
 0x14d   : > { %v1571_v47 = vpop.f32.mrf.mxu1 }
 0x14e   : > { %v1572_v55 = vadd.f32 %v1571_v47, %v1362_v51 }
 0x14f   : > { %v796_v49 = vpop.f32.mrf.mxu0  ;;  %v1365_v50 = vpop.f32.mrf.mxu3  ;;  %4705 = vmatmul.msk.f32.gmra.mxu2 %vm853_vm2, %v1216_v48 }
 0x150   : > { %v797_v29 = vadd.f32 %v5265_v42, %v796_v49  ;;  %4672 = vmatmul.msk.f32.gmra.mxu1 %vm853_vm2, %v5655_v63 }
 0x152   : > { %v844_v56 = vmax.f32 %v797_v29, 0.0  ;;  %v1782_v57 = vpop.f32.mrf.mxu2  ;;  %4722 = vmatmul.msk.f32.gmra.mxu0 %vm853_vm2, %v5400_v9 }
 0x153   : > { %v5662_v59 = vadd.f32 %v1782_v57, %v1572_v55  ;;  %v1009_v61 = vld [vmem:[#allocation2 + $0xc8] sm:$0xff] }
 0x154   : > { %878 = vst.msk [vmem:[#allocation2 + $0xd0] sm:$0xff] %vm853_vm2, %v844_v56  ;;  %v1049_v3 = vrot.slane %v1009_v61, 7  ;;  %v1152_v4 = vrot.slane %v1009_v61, 1  ;;  %4642 = vmatmul.msk.f32.gmra.mxu3 %vm853_vm2, %v1009_v61 }
 0x155   : > { %v1574_v5 = vpop.f32.mrf.mxu1 }
 0x156   : > { %v1169_v6 = vsel %vm1156_vm3, %v1136_v2, %v1152_v4  ;;  %v1082_v7 = vsel %vm1053_vm4, %v1049_v3, %v1033_v1  ;;  %v1575_v15 = vadd.f32 %v1574_v5, %v1365_v50  ;;  %v1185_v25 = vsel %vm1156_vm3, %v1152_v4, %v1136_v2 }
 0x157   : > { %v799_v10 = vpop.f32.mrf.mxu0  ;;  %v1368_v9 = vpop.f32.mrf.mxu3  ;;  %4706 = vmatmul.msk.f32.gmra.mxu2 %vm853_vm2, %v1169_v6  ;;  %v5673_v11 = vsel %vm1019_vm5, %v1082_v7, 0.0  ;;  %v1218_v28 = vsel %vm1123_vm6, %v1185_v25, 0.0  ;;  %v4846_v25 = vld [vmem:[%s7230_s5 + $0x38] sm:$0xff] }
 0x158   : > { %v800_v13 = vadd.f32 %v5265_v42, %v799_v10  ;;  %4673 = vmatmul.msk.f32.gmra.mxu1 %vm853_vm2, %v5673_v11  ;;  %3423 = vmatpush.msrb.mxu0 %v4846_v25 }
 0x15a   : > { %v845_v17 = vmax.f32 %v800_v13, 0.0  ;;  %v1785_v18 = vpop.f32.mrf.mxu2  ;;  %4723 = vmatmul.msk.f32.gmra.mxu0 %vm853_vm2, %v5416_v22  ;;  %v5691_v22 = vsel %vm1053_vm4, %v1033_v1, %v1049_v3 }
 0x15b   : > { %v5680_v21 = vadd.f32 %v1785_v18, %v1575_v15  ;;  %v1010_v24 = vld [vmem:[#allocation2 + $0xd0] sm:$0xff] }
 0x15c   : > { %879 = vst.msk [vmem:[#allocation2 + $0xd8] sm:$0xff] %vm853_vm2, %v845_v17  ;;  %4643 = vmatmul.msk.f32.gmra.mxu3 %vm853_vm2, %v1010_v24  ;;  %v1034_v48 = vrot.slane %v1010_v24, 7  ;;  %v1137_v49 = vrot.slane %v1010_v24, 1 }
 0x15d   : > { %v1577_v26 = vpop.f32.mrf.mxu1 }
 0x15e   : > { %v1578_v37 = vadd.f32 %v1577_v26, %v1368_v9  ;;  %v4879_v9 = vld [vmem:[%s7230_s5 + $0x40] sm:$0xff] }
 0x15f   : > { %v802_v51 = vpop.f32.mrf.mxu0  ;;  %v1371_v32 = vpop.f32.mrf.mxu3  ;;  %4707 = vmatmul.msk.f32.gmra.mxu2 %vm853_vm2, %v1218_v28  ;;  %3666 = vmatpush.msrb.mxu3 %v4879_v9 }
 0x160   : > { %v803_v33 = vadd.f32 %v5265_v42, %v802_v51  ;;  %4674 = vmatmul.msk.f32.gmra.mxu1 %vm853_vm2, %v5691_v22 }
 0x162   : > { %v846_v38 = vmax.f32 %v803_v33, 0.0  ;;  %v1788_v41 = vpop.f32.mrf.mxu2  ;;  %4724 = vmatmul.msk.f32.gmra.mxu0 %vm853_vm2, %v5432_v36 }
 0x163   : > { %v5698_v44 = vadd.f32 %v1788_v41, %v1578_v37  ;;  %v1011_v47 = vld [vmem:[#allocation2 + $0xd8] sm:$0xff] }
 0x164   : > { %880 = vst.msk [vmem:[#allocation2 + $0xe0] sm:$0xff] %vm853_vm2, %v846_v38  ;;  %v1050_v50 = vrot.slane %v1011_v47, 7  ;;  %v1153_v29 = vrot.slane %v1011_v47, 1  ;;  %4644 = vmatmul.msk.f32.gmra.mxu3 %vm853_vm2, %v1011_v47 }
 0x165   : > { %v1580_v55 = vpop.f32.mrf.mxu1 }
 0x166   : > { %v1170_v56 = vsel %vm1156_vm3, %v1137_v49, %v1153_v29  ;;  %v1083_v57 = vsel %vm1053_vm4, %v1050_v50, %v1034_v48  ;;  %v1581_v3 = vadd.f32 %v1580_v55, %v1371_v32  ;;  %v1186_v10 = vsel %vm1156_vm3, %v1153_v29, %v1137_v49 }
 0x167   : > { %v805_v61 = vpop.f32.mrf.mxu0  ;;  %v1374_v36 = vpop.f32.mrf.mxu3  ;;  %4708 = vmatmul.msk.f32.gmra.mxu2 %vm853_vm2, %v1170_v56  ;;  %v5709_v1 = vsel %vm1019_vm5, %v1083_v57, 0.0  ;;  %v1220_v15 = vsel %vm1123_vm6, %v1186_v10, 0.0  ;;  %v5730_v18 = vsel %vm1053_vm4, %v1034_v48, %v1050_v50 }
 0x168   : > { %v806_v2 = vadd.f32 %v5265_v42, %v805_v61  ;;  %4675 = vmatmul.msk.f32.gmra.mxu1 %vm853_vm2, %v5709_v1 }
 0x16a   : > { %v847_v4 = vmax.f32 %v806_v2, 0.0  ;;  %v1791_v5 = vpop.f32.mrf.mxu2  ;;  %4725 = vmatmul.msk.f32.gmra.mxu0 %vm853_vm2, %v5454_v53 }
 0x16b   : > { %v5716_v6 = vadd.f32 %v1791_v5, %v1581_v3  ;;  %v1012_v7 = vld [vmem:[#allocation2 + $0xe0] sm:$0xff] }
 0x16c   : > { %881 = vst.msk [vmem:[#allocation2 + $0xe8] sm:$0xff] %vm853_vm2, %v847_v4  ;;  %4645 = vmatmul.msk.f32.gmra.mxu3 %vm853_vm2, %v1012_v7  ;;  %v1035_v37 = vrot.slane %v1012_v7, 7  ;;  %v1138_v38 = vrot.slane %v1012_v7, 1 }
 0x16d   : > { %v1583_v13 = vpop.f32.mrf.mxu1 }
 0x16e   : > { %v1584_v26 = vadd.f32 %v1583_v13, %v1374_v36 }
 0x16f   : > { %v808_v53 = vpop.f32.mrf.mxu0  ;;  %v1377_v17 = vpop.f32.mrf.mxu3  ;;  %4709 = vmatmul.msk.f32.gmra.mxu2 %vm853_vm2, %v1220_v15 }
 0x170   : > { %v809_v24 = vadd.f32 %v5265_v42, %v808_v53  ;;  %4676 = vmatmul.msk.f32.gmra.mxu1 %vm853_vm2, %v5730_v18 }
 0x172   : > { %v848_v28 = vmax.f32 %v809_v24, 0.0  ;;  %v1794_v51 = vpop.f32.mrf.mxu2  ;;  %4726 = vmatmul.msk.f32.gmra.mxu0 %vm853_vm2, %v5473_v62 }
 0x173   : > { %v5740_v32 = vadd.f32 %v1794_v51, %v1584_v26  ;;  %v1013_v33 = vld [vmem:[#allocation2 + $0xe8] sm:$0xff] }
 0x174   : > { %882 = vst.msk [vmem:[#allocation2 + $0xf0] sm:$0xff] %vm853_vm2, %v848_v28  ;;  %v1051_v41 = vrot.slane %v1013_v33, 7  ;;  %v1154_v47 = vrot.slane %v1013_v33, 1  ;;  %4646 = vmatmul.msk.f32.gmra.mxu3 %vm853_vm2, %v1013_v33 }
 0x175   : > { %v1586_v48 = vpop.f32.mrf.mxu1 }
 0x176   : > { %v1171_v49 = vsel %vm1156_vm3, %v1138_v38, %v1154_v47  ;;  %v1084_v50 = vsel %vm1053_vm4, %v1051_v41, %v1035_v37  ;;  %v1587_v57 = vadd.f32 %v1586_v48, %v1377_v17  ;;  %v1187_v4 = vsel %vm1156_vm3, %v1154_v47, %v1138_v38  ;;  %v5016_v48 = vld [vmem:[%s7229_s4] ss:$0 sm:$0xff] }
 0x177   : > { %v811_v29 = vpop.f32.mrf.mxu0  ;;  %v1380_v62 = vpop.f32.mrf.mxu3  ;;  %4710 = vmatmul.msk.f32.gmra.mxu2 %vm853_vm2, %v1171_v49  ;;  %v5751_v55 = vsel %vm1019_vm5, %v1084_v50, 0.0  ;;  %v1222_v7 = vsel %vm1123_vm6, %v1187_v4, 0.0 }
 0x178   : > { %v812_v56 = vadd.f32 %v5265_v42, %v811_v29  ;;  %4677 = vmatmul.msk.f32.gmra.mxu1 %vm853_vm2, %v5751_v55 }
 0x17a   : > { %v849_v61 = vmax.f32 %v812_v56, 0.0  ;;  %v1797_v36 = vpop.f32.mrf.mxu2  ;;  %4727 = vmatmul.msk.f32.gmra.mxu0 %vm853_vm2, %v5489_v14  ;;  %v5772_v14 = vsel %vm1053_vm4, %v1035_v37, %v1051_v41 }
 0x17b   : > { %v5758_v2 = vadd.f32 %v1797_v36, %v1587_v57  ;;  %v5760_v3 = vld [vmem:[#allocation2 + $0xf0] sm:$0xff]  ;;  %v5816_v36 = vld [vmem:[#allocation2 + $0x28] sm:$0xff] }
 0x17c   : > { %883 = vst.msk [vmem:[#allocation2 + $0xf8] sm:$0xff] %vm853_vm2, %v849_v61  ;;  %4647 = vmatmul.msk.f32.gmra.mxu3 %vm853_vm2, %v5760_v3  ;;  %v1036_v26 = vrot.slane %v5760_v3, 7  ;;  %v1139_v28 = vrot.slane %v5760_v3, 1  ;;  %v5017_v61 = vld [vmem:[#allocation2 + $0x10] sm:$0xff] }
 0x17d   : > { %v1589_v5 = vpop.f32.mrf.mxu1 }
 0x17e   : > { %v1590_v15 = vadd.f32 %v1589_v5, %v1380_v62 }
 0x17f   : > { %v814_v10 = vpop.f32.mrf.mxu0  ;;  %v1383_v9 = vpop.f32.mrf.mxu3  ;;  %4711 = vmatmul.msk.f32.gmra.mxu2 %vm853_vm2, %v1222_v7  ;;  %v5820_v7 = vld [vmem:[#allocation2 + $0x20] sm:$0xff] }
 0x180   : > { %v815_v13 = vadd.f32 %v5265_v42, %v814_v10  ;;  %4678 = vmatmul.msk.f32.gmra.mxu1 %vm853_vm2, %v5772_v14 }
 0x182   : > { %v850_v53 = vmax.f32 %v815_v13, 0.0  ;;  %v1800_v17 = vpop.f32.mrf.mxu2  ;;  %4728 = vmatmul.msk.f32.gmra.mxu0 %vm853_vm2, %v5508_v27  ;;  %v2891_v13 = vrot.slane %v5816_v36, 7 }
 0x183   : > { %v5779_v24 = vadd.f32 %v1800_v17, %v1590_v15  ;;  %v5781_v25 = vld [vmem:[#allocation2 + $0xf8] sm:$0xff] }
 0x184   : > { %7257 = vst [vmem:[#allocation4_spill] sm:$0xff] %v5781_v25  ;;  %v1052_v42 = vrot.slane %v5781_v25, 7  ;;  %v5788_v51 = vrot.slane %v5781_v25, 1  ;;  %4648 = vmatmul.msk.f32.gmra.mxu3 %vm853_vm2, %v5781_v25 }
 0x185   : > { %7256 = vst [vmem:[#allocation3_spill] sm:$0xff] %v5779_v24  ;;  %v1592_v33 = vpop.f32.mrf.mxu1 }
 0x186   : > { %884 = vst.msk [vmem:[#allocation2 + $0x100] sm:$0xff] %vm853_vm2, %v850_v53  ;;  %v1172_v27 = vsel %vm1156_vm3, %v1139_v28, %v5788_v51  ;;  %v1085_v37 = vsel %vm1053_vm4, %v1052_v42, %v1036_v26  ;;  %v1593_v50 = vadd.f32 %v1592_v33, %v1383_v9  ;;  %v1188_v57 = vsel %vm1156_vm3, %v5788_v51, %v1139_v28 }
 0x187   : > { %7258 = vst [vmem:[#allocation5_spill] sm:$0xff] %v5788_v51  ;;  %v817_v38 = vpop.f32.mrf.mxu0  ;;  %v1386_v41 = vpop.f32.mrf.mxu3  ;;  %4712 = vmatmul.msk.f32.gmra.mxu2 %vm853_vm2, %v1172_v27  ;;  %v5800_v47 = vsel %vm1019_vm5, %v1085_v37, 0.0  ;;  %v1224_v5 = vsel %vm1123_vm6, %v1188_v57, 0.0  ;;  %v5825_v9 = vsel %vm1053_vm4, %v1036_v26, %v1052_v42  ;;  %v2875_v53 = vrot.slane %v5820_v7, 7  ;;  %v5018_v27 = vld [vmem:[#allocation2 + $0x18] sm:$0xff] }
 0x188   : > { %v818_v49 = vadd.f32 %v5016_v48, %v817_v38  ;;  %4679 = vmatmul.msk.f32.gmra.mxu1 %vm853_vm2, %v5800_v47  ;;  %v2033_v26 = vrot.slane %v5018_v27, 1  ;;  %v2017_v37 = vrot.slane %v5017_v61, 1 }
 0x189   : > { %v2923_v33 = vsel %vm1053_vm4, %v2891_v13, %v2875_v53 }
 0x18a   : > { %v851_v29 = vmax.f32 %v818_v49, 0.0  ;;  %v1803_v62 = vpop.f32.mrf.mxu2  ;;  %4729 = vmatmul.msk.f32.gmra.mxu0 %vm853_vm2, %v5527_v45  ;;  %v2939_v38 = vsel %vm1019_vm5, %v2923_v33, 0.0  ;;  %v2065_v57 = vsel %vm1156_vm3, %v2033_v26, %v2017_v37 }
 0x18b   : > { %v5809_v56 = vadd.f32 %v1803_v62, %v1593_v50  ;;  %v5019_v62 = vld [vmem:[#allocation2 + $0x20] sm:$0xff] }
 0x18c   : > { %885 = vst.msk [vmem:[#allocation2 + $0x108] sm:$0xff] %vm853_vm2, %v851_v29  ;;  %4748 = vmatmul.msk.f32.vlgmr.msra.gmra.mxu3 %vm853_vm2, %v5017_v61  ;;  %v5853_v61 = vld [vmem:[#allocation2 + $0x38] sm:$0xff] }
 0x18d   : > { %7259 = vst [vmem:[#allocation6_spill] sm:$0xff] %v5809_v56  ;;  %v1595_v4 = vpop.f32.mrf.mxu1 }
 0x18e   : > { %v1596_v15 = vadd.f32 %v1595_v4, %v1386_v41 }
 0x18f   : > { %v920_v45 = vpop.f32.mrf.mxu0  ;;  %v1389_v10 = vpop.f32.mrf.mxu3  ;;  %4713 = vmatmul.msk.f32.gmra.mxu2 %vm853_vm2, %v1224_v5  ;;  %v2907_v5 = vsel %vm1053_vm4, %v2875_v53, %v2891_v13 }
 0x190   : > { %4680 = vmatmul.msk.f32.gmra.mxu1 %vm853_vm2, %v5825_v9  ;;  %v5857_v45 = vld [vmem:[#allocation2 + $0x30] sm:$0xff] }
 0x192   : > { %v1806_v17 = vpop.f32.mrf.mxu2  ;;  %4730 = vmatmul.msk.f32.gmra.mxu0 %vm853_vm2, %v5547_v0  ;;  %v2049_v0 = vsel %vm1156_vm3, %v2017_v37, %v2033_v26 }
 0x193   : > { %v5833_v28 = vadd.f32 %v1806_v17, %v1596_v15  ;;  %v2892_v17 = vrot.slane %v5853_v61, 7 }
 0x194   : > { %4749 = vmatmul.msk.f32.gmra.mxu3 %vm853_vm2, %v5018_v27  ;;  %v2876_v27 = vrot.slane %v5857_v45, 7 }
 0x195   : > { %7260 = vst [vmem:[#allocation7_spill] sm:$0xff] %v5833_v28  ;;  %v1598_v42 = vpop.f32.mrf.mxu1 }
 0x196   : > { %v1599_v49 = vadd.f32 %v1598_v42, %v1389_v10  ;;  %v2924_v53 = vsel %vm1053_vm4, %v2892_v17, %v2876_v27  ;;  %v5020_v42 = vld [vmem:[#allocation2 + $0x28] sm:$0xff] }
 0x197   : > { %v1392_v41 = vpop.f32.mrf.mxu3  ;;  %v5840_v48 = vpop.f32.mrf.mxu0  ;;  %4814 = vmatmul.msk.f32.vlgmr.msra.gmra.mxu2 %vm853_vm2, %v2939_v38  ;;  %v2034_v37 = vrot.slane %v5020_v42, 1 }
 0x198   : > { %4781 = vmatmul.msk.f32.vlgmr.msra.gmra.mxu1 %vm853_vm2, %v2049_v0  ;;  %v2018_v0 = vrot.slane %v5019_v62, 1 }
 0x19a   : > { %v1809_v50 = vpop.f32.mrf.mxu2  ;;  %4731 = vmatmul.msk.f32.gmra.mxu0 %vm853_vm2, %v5565_v8  ;;  %v2082_v8 = vsel %vm1123_vm6, %v2065_v57, 0.0 }
 0x19b   : > { %v5848_v29 = vadd.f32 %v1809_v50, %v1599_v49 }
 0x19c   : > { %4750 = vmatmul.msk.f32.gmra.mxu3 %vm853_vm2, %v5019_v62  ;;  %v5021_v62 = vld [vmem:[#allocation2 + $0x30] sm:$0xff] }
 0x19d   : > { %7261 = vst [vmem:[#allocation8_spill] sm:$0xff] %v5848_v29  ;;  %v1601_v4 = vpop.f32.mrf.mxu1 }
 0x19e   : > { %v1602_v33 = vadd.f32 %v1601_v4, %v1392_v41  ;;  %v2941_v41 = vsel %vm1019_vm5, %v2924_v53, 0.0  ;;  %v2908_v53 = vsel %vm1053_vm4, %v2876_v27, %v2892_v17 }
 0x19f   : > { %v1395_v10 = vpop.f32.mrf.mxu3  ;;  %v5859_v15 = vpop.f32.mrf.mxu0  ;;  %4815 = vmatmul.msk.f32.gmra.mxu2 %vm853_vm2, %v2907_v5 }
 0x1a0   : > { %4782 = vmatmul.msk.f32.gmra.mxu1 %vm853_vm2, %v2082_v8  ;;  %v2066_v8 = vsel %vm1156_vm3, %v2034_v37, %v2018_v0 }
 0x1a2   : > { %v1812_v26 = vpop.f32.mrf.mxu2  ;;  %4732 = vmatmul.msk.f32.gmra.mxu0 %vm853_vm2, %v5583_v20  ;;  %v2050_v20 = vsel %vm1156_vm3, %v2018_v0, %v2034_v37 }
 0x1a3   : > { %v5869_v13 = vadd.f32 %v1812_v26, %v1602_v33  ;;  %v5889_v33 = vld [vmem:[#allocation2 + $0x48] sm:$0xff] }
 0x1a4   : > { %4751 = vmatmul.msk.f32.gmra.mxu3 %vm853_vm2, %v5020_v42  ;;  %v5893_v42 = vld [vmem:[#allocation2 + $0x40] sm:$0xff] }
 0x1a5   : > { %7262 = vst [vmem:[#allocation9_spill] sm:$0xff] %v5869_v13  ;;  %v1604_v38 = vpop.f32.mrf.mxu1  ;;  %v2877_v0 = vrot.slane %v5893_v42, 7 }
 0x1a6   : > { %v1605_v57 = vadd.f32 %v1604_v38, %v1395_v10 }
 0x1a7   : > { %v1398_v49 = vpop.f32.mrf.mxu3  ;;  %v5876_v50 = vpop.f32.mrf.mxu0  ;;  %4816 = vmatmul.msk.f32.gmra.mxu2 %vm853_vm2, %v2941_v41  ;;  %v2893_v41 = vrot.slane %v5889_v33, 7 }
 0x1a8   : > { %4783 = vmatmul.msk.f32.gmra.mxu1 %vm853_vm2, %v2050_v20 }
 0x1a9   : > { %v2925_v27 = vsel %vm1053_vm4, %v2893_v41, %v2877_v0 }
 0x1aa   : > { %v1815_v4 = vpop.f32.mrf.mxu2  ;;  %4733 = vmatmul.msk.f32.gmra.mxu0 %vm853_vm2, %v5601_v54  ;;  %v2084_v54 = vsel %vm1123_vm6, %v2066_v8, 0.0 }
 0x1ab   : > { %v5884_v5 = vadd.f32 %v1815_v4, %v1605_v57  ;;  %v5022_v57 = vld [vmem:[#allocation2 + $0x38] sm:$0xff] }
 0x1ac   : > { %4752 = vmatmul.msk.f32.gmra.mxu3 %vm853_vm2, %v5021_v62  ;;  %v2035_v4 = vrot.slane %v5022_v57, 1 }
 0x1ad   : > { %7263 = vst [vmem:[#allocation10_spill] sm:$0xff] %v5884_v5  ;;  %v1607_v26 = vpop.f32.mrf.mxu1  ;;  %v2909_v5 = vsel %vm1053_vm4, %v2877_v0, %v2893_v41 }
 0x1ae   : > { %v1608_v37 = vadd.f32 %v1607_v26, %v1398_v49  ;;  %v2943_v49 = vsel %vm1019_vm5, %v2925_v27, 0.0 }
 0x1af   : > { %v1401_v10 = vpop.f32.mrf.mxu3  ;;  %v5895_v38 = vpop.f32.mrf.mxu0  ;;  %4817 = vmatmul.msk.f32.gmra.mxu2 %vm853_vm2, %v2908_v53  ;;  %v2019_v53 = vrot.slane %v5021_v62, 1  ;;  %v5023_v62 = vld [vmem:[#allocation2 + $0x40] sm:$0xff] }
 0x1b0   : > { %4784 = vmatmul.msk.f32.gmra.mxu1 %vm853_vm2, %v2084_v54  ;;  %v2020_v13 = vrot.slane %v5023_v62, 1 }
 0x1b1   : > { %v2067_v27 = vsel %vm1156_vm3, %v2035_v4, %v2019_v53 }
 0x1b2   : > { %v1818_v20 = vpop.f32.mrf.mxu2  ;;  %4734 = vmatmul.msk.f32.gmra.mxu0 %vm853_vm2, %v5619_v43  ;;  %v2051_v43 = vsel %vm1156_vm3, %v2019_v53, %v2035_v4 }
 0x1b3   : > { %v5905_v17 = vadd.f32 %v1818_v20, %v1608_v37 }
 0x1b4   : > { %4753 = vmatmul.msk.f32.gmra.mxu3 %vm853_vm2, %v5022_v57 }
 0x1b5   : > { %7264 = vst [vmem:[#allocation11_spill] sm:$0xff] %v5905_v17  ;;  %v1610_v8 = vpop.f32.mrf.mxu1  ;;  %v5925_v17 = vld [vmem:[#allocation2 + $0x58] sm:$0xff] }
 0x1b6   : > { %v1611_v37 = vadd.f32 %v1610_v8, %v1401_v10 }
 0x1b7   : > { %v1404_v26 = vpop.f32.mrf.mxu3  ;;  %v5912_v54 = vpop.f32.mrf.mxu0  ;;  %4818 = vmatmul.msk.f32.gmra.mxu2 %vm853_vm2, %v2943_v49 }
 0x1b8   : > { %4785 = vmatmul.msk.f32.gmra.mxu1 %vm853_vm2, %v2051_v43  ;;  %v5929_v43 = vld [vmem:[#allocation2 + $0x50] sm:$0xff] }
 0x1b9   : > { %v2878_v53 = vrot.slane %v5929_v43, 7 }
 0x1ba   : > { %v1821_v20 = vpop.f32.mrf.mxu2  ;;  %4735 = vmatmul.msk.f32.gmra.mxu0 %vm853_vm2, %v5637_v30  ;;  %v2086_v30 = vsel %vm1123_vm6, %v2067_v27, 0.0 }
 0x1bb   : > { %v5920_v57 = vadd.f32 %v1821_v20, %v1611_v37  ;;  %v2894_v37 = vrot.slane %v5925_v17, 7 }
 0x1bc   : > { %4754 = vmatmul.msk.f32.gmra.mxu3 %vm853_vm2, %v5023_v62  ;;  %v5025_v62 = vld [vmem:[#allocation2 + $0x50] sm:$0xff] }
 0x1bd   : > { %7265 = vst [vmem:[#allocation12_spill] sm:$0xff] %v5920_v57  ;;  %v1613_v49 = vpop.f32.mrf.mxu1  ;;  %v2926_v0 = vsel %vm1053_vm4, %v2894_v37, %v2878_v53  ;;  %v2910_v29 = vsel %vm1053_vm4, %v2878_v53, %v2894_v37  ;;  %v5026_v53 = vld [vmem:[#allocation2 + $0x58] sm:$0xff] }
 0x1be   : > { %v1614_v4 = vadd.f32 %v1613_v49, %v1404_v26  ;;  %v2945_v26 = vsel %vm1019_vm5, %v2926_v0, 0.0 }
 0x1bf   : > { %v1407_v10 = vpop.f32.mrf.mxu3  ;;  %v5931_v8 = vpop.f32.mrf.mxu0  ;;  %4819 = vmatmul.msk.f32.gmra.mxu2 %vm853_vm2, %v2909_v5  ;;  %v5024_v5 = vld [vmem:[#allocation2 + $0x48] sm:$0xff] }
 0x1c0   : > { %4786 = vmatmul.msk.f32.gmra.mxu1 %vm853_vm2, %v2086_v30  ;;  %v2036_v57 = vrot.slane %v5024_v5, 1 }
 0x1c2   : > { %v1824_v20 = vpop.f32.mrf.mxu2  ;;  %4736 = vmatmul.msk.f32.gmra.mxu0 %vm853_vm2, %v5655_v63  ;;  %v2052_v63 = vsel %vm1156_vm3, %v2020_v13, %v2036_v57  ;;  %v2068_v0 = vsel %vm1156_vm3, %v2036_v57, %v2020_v13 }
 0x1c3   : > { %v5941_v41 = vadd.f32 %v1824_v20, %v1614_v4 }
 0x1c4   : > { %4755 = vmatmul.msk.f32.gmra.mxu3 %vm853_vm2, %v5024_v5 }
 0x1c5   : > { %7266 = vst [vmem:[#allocation13_spill] sm:$0xff] %v5941_v41  ;;  %v1616_v27 = vpop.f32.mrf.mxu1 }
 0x1c6   : > { %v1617_v4 = vadd.f32 %v1616_v27, %v1407_v10 }
 0x1c7   : > { %v1410_v49 = vpop.f32.mrf.mxu3  ;;  %4820 = vmatmul.msk.f32.gmra.mxu2 %vm853_vm2, %v2945_v26  ;;  %v5951_v30 = vpop.f32.mrf.mxu0  ;;  %v5961_v26 = vld [vmem:[#allocation2 + $0x68] sm:$0xff] }
 0x1c8   : > { %4787 = vmatmul.msk.f32.gmra.mxu1 %vm853_vm2, %v2052_v63  ;;  %v5965_v63 = vld [vmem:[#allocation2 + $0x60] sm:$0xff]  ;;  %v2895_v27 = vrot.slane %v5961_v26, 7 }
 0x1c9   : > { %v2879_v13 = vrot.slane %v5965_v63, 7 }
 0x1ca   : > { %v1827_v20 = vpop.f32.mrf.mxu2  ;;  %4737 = vmatmul.msk.f32.gmra.mxu0 %vm853_vm2, %v5673_v11  ;;  %v2088_v11 = vsel %vm1123_vm6, %v2068_v0, 0.0  ;;  %v2037_v0 = vrot.slane %v5026_v53, 1 }
 0x1cb   : > { %v5956_v5 = vadd.f32 %v1827_v20, %v1617_v4 }
 0x1cc   : > { %4756 = vmatmul.msk.f32.gmra.mxu3 %vm853_vm2, %v5025_v62 }
 0x1cd   : > { %7267 = vst [vmem:[#allocation14_spill] sm:$0xff] %v5956_v5  ;;  %v1619_v41 = vpop.f32.mrf.mxu1 }
 0x1ce   : > { %v1620_v4 = vadd.f32 %v1619_v41, %v1410_v49 }
 0x1cf   : > { %v1413_v10 = vpop.f32.mrf.mxu3  ;;  %4821 = vmatmul.msk.f32.gmra.mxu2 %vm853_vm2, %v2910_v29  ;;  %v5973_v57 = vpop.f32.mrf.mxu0  ;;  %v2927_v29 = vsel %vm1053_vm4, %v2895_v27, %v2879_v13 }
 0x1d0   : > { %4788 = vmatmul.msk.f32.gmra.mxu1 %vm853_vm2, %v2088_v11  ;;  %v2021_v11 = vrot.slane %v5025_v62, 1  ;;  %v2947_v41 = vsel %vm1019_vm5, %v2927_v29, 0.0  ;;  %v5027_v62 = vld [vmem:[#allocation2 + $0x60] sm:$0xff] }
 0x1d1   : > { %v2022_v56 = vrot.slane %v5027_v62, 1 }
 0x1d2   : > { %v1830_v20 = vpop.f32.mrf.mxu2  ;;  %4738 = vmatmul.msk.f32.gmra.mxu0 %vm853_vm2, %v5691_v22  ;;  %v2053_v22 = vsel %vm1156_vm3, %v2021_v11, %v2037_v0  ;;  %v2069_v29 = vsel %vm1156_vm3, %v2037_v0, %v2021_v11 }
 0x1d3   : > { %v5977_v37 = vadd.f32 %v1830_v20, %v1620_v4 }
 0x1d4   : > { %4757 = vmatmul.msk.f32.gmra.mxu3 %vm853_vm2, %v5026_v53 }
 0x1d5   : > { %7268 = vst [vmem:[#allocation15_spill] sm:$0xff] %v5977_v37  ;;  %v1622_v5 = vpop.f32.mrf.mxu1 }
 0x1d6   : > { %v1623_v4 = vadd.f32 %v1622_v5, %v1413_v10  ;;  %v2911_v5 = vsel %vm1053_vm4, %v2879_v13, %v2895_v27  ;;  %v6001_v10 = vld [vmem:[#allocation2 + $0x70] sm:$0xff] }
 0x1d7   : > { %v1416_v49 = vpop.f32.mrf.mxu3  ;;  %4822 = vmatmul.msk.f32.gmra.mxu2 %vm853_vm2, %v2947_v41  ;;  %v5992_v53 = vpop.f32.mrf.mxu0  ;;  %v5997_v41 = vld [vmem:[#allocation2 + $0x78] sm:$0xff]  ;;  %v2880_v0 = vrot.slane %v6001_v10, 7 }
 0x1d8   : > { %4789 = vmatmul.msk.f32.gmra.mxu1 %vm853_vm2, %v2053_v22 }
 0x1da   : > { %v1833_v20 = vpop.f32.mrf.mxu2  ;;  %4739 = vmatmul.msk.f32.gmra.mxu0 %vm853_vm2, %v5709_v1  ;;  %v2090_v1 = vsel %vm1123_vm6, %v2069_v29, 0.0 }
 0x1db   : > { %v5990_v37 = vadd.f32 %v1833_v20, %v1623_v4  ;;  %v2896_v4 = vrot.slane %v5997_v41, 7 }
 0x1dc   : > { %4758 = vmatmul.msk.f32.gmra.mxu3 %vm853_vm2, %v5027_v62  ;;  %v5029_v62 = vld [vmem:[#allocation2 + $0x70] sm:$0xff] }
 0x1dd   : > { %7269 = vst [vmem:[#allocation16_spill] sm:$0xff] %v5990_v37  ;;  %v1625_v28 = vpop.f32.mrf.mxu1  ;;  %v2928_v13 = vsel %vm1053_vm4, %v2896_v4, %v2880_v0 }
 0x1de   : > { %v1626_v20 = vadd.f32 %v1625_v28, %v1416_v49  ;;  %v2949_v28 = vsel %vm1019_vm5, %v2928_v13, 0.0 }
 0x1df   : > { %v1419_v22 = vpop.f32.mrf.mxu3  ;;  %4823 = vmatmul.msk.f32.gmra.mxu2 %vm853_vm2, %v2911_v5  ;;  %v5028_v5 = vld [vmem:[#allocation2 + $0x68] sm:$0xff]  ;;  %v6016_v51 = vpop.f32.mrf.mxu0 }
 0x1e0   : > { %4790 = vmatmul.msk.f32.gmra.mxu1 %vm853_vm2, %v2090_v1  ;;  %v2038_v37 = vrot.slane %v5028_v5, 1 }
 0x1e2   : > { %v1836_v11 = vpop.f32.mrf.mxu2  ;;  %4740 = vmatmul.msk.f32.gmra.mxu0 %vm853_vm2, %v5730_v18  ;;  %v2054_v18 = vsel %vm1156_vm3, %v2022_v56, %v2038_v37  ;;  %v2070_v13 = vsel %vm1156_vm3, %v2038_v37, %v2022_v56  ;;  %v4110_v56 = vld [vmem:[%s7234_s9] sm:$0xf] }
 0x1e3   : > { %v6011_v27 = vadd.f32 %v1836_v11, %v1626_v20  ;;  %4944 = vmatpush.msk.msrb.mxu2 %vm703_vm0, %v4110_v56 }
 0x1e4   : > { %4759 = vmatmul.msk.f32.gmra.mxu3 %vm853_vm2, %v5028_v5  ;;  %v6031_v5 = vld [vmem:[#allocation2 + $0x88] sm:$0xff] }
 0x1e5   : > { %7270 = vst [vmem:[#allocation17_spill] sm:$0xff] %v6011_v27  ;;  %v1628_v29 = vpop.f32.mrf.mxu1  ;;  %v2912_v27 = vsel %vm1053_vm4, %v2880_v0, %v2896_v4 }
 0x1e6   : > { %v1629_v1 = vadd.f32 %v1628_v29, %v1419_v22  ;;  %7272 = vst [vmem:[#allocation19_spill] sm:$0xff] %v6031_v5  ;;  %v2897_v29 = vrot.slane %v6031_v5, 7  ;;  %v2023_v5 = vrot.slane %v5029_v62, 1 }
 0x1e7   : > { %v1422_v49 = vpop.f32.mrf.mxu3  ;;  %4824 = vmatmul.msk.f32.gmra.mxu2 %vm853_vm2, %v2949_v28 }
 0x1e8   : > { %4791 = vmatmul.msk.f32.gmra.mxu1 %vm853_vm2, %v2054_v18  ;;  %v6035_v18 = vld [vmem:[#allocation2 + $0x80] sm:$0xff] }
 0x1e9   : > { %7273 = vst [vmem:[#allocation20_spill] sm:$0xff] %v6035_v18  ;;  %v2881_v4 = vrot.slane %v6035_v18, 7  ;;  %v5032_v18 = vld [vmem:[#allocation2 + $0x88] sm:$0xff] }
 0x1ea   : > { %v1839_v20 = vpop.f32.mrf.mxu2  ;;  %4741 = vmatmul.msk.f32.gmra.mxu0 %vm853_vm2, %v5751_v55  ;;  %v2092_v55 = vsel %vm1123_vm6, %v2070_v13, 0.0  ;;  %v5030_v13 = vld [vmem:[#allocation2 + $0x78] sm:$0xff]  ;;  %v2040_v24 = vrot.slane %v5032_v18, 1 }
 0x1eb   : > { %v6026_v11 = vadd.f32 %v1839_v20, %v1629_v1  ;;  %v6041_v1 = vpop.f32.mrf.mxu0  ;;  %v2929_v20 = vsel %vm1053_vm4, %v2897_v29, %v2881_v4 }
 0x1ec   : > { %4760 = vmatmul.msk.f32.gmra.mxu3 %vm853_vm2, %v5029_v62 }
 0x1ed   : > { %7271 = vst [vmem:[#allocation18_spill] sm:$0xff] %v6026_v11  ;;  %v1631_v28 = vpop.f32.mrf.mxu1 }
 0x1ee   : > { %v1632_v37 = vadd.f32 %v1631_v28, %v1422_v49  ;;  %v2951_v49 = vsel %vm1019_vm5, %v2929_v20, 0.0  ;;  %v3864_v28 = vld [vmem:[%s7232_s7] sm:$0xff] }
 0x1ef   : > { %v1425_v22 = vpop.f32.mrf.mxu3  ;;  %4825 = vmatmul.msk.f32.gmra.mxu2 %vm853_vm2, %v2912_v27  ;;  %3980 = vmatpush.msrb.mxu1 %v3864_v28 }
 0x1f0   : > { %4792 = vmatmul.msk.f32.gmra.mxu1 %vm853_vm2, %v2092_v55  ;;  %v2039_v55 = vrot.slane %v5030_v13, 1 }
 0x1f2   : > { %v1842_v0 = vpop.f32.mrf.mxu2  ;;  %4742 = vmatmul.msk.f32.gmra.mxu0 %vm853_vm2, %v5772_v14  ;;  %v2055_v14 = vsel %vm1156_vm3, %v2023_v5, %v2039_v55 }
 0x1f3   : > { %v6051_v27 = vadd.f32 %v1842_v0, %v1632_v37  ;;  %v6065_v0 = vpop.f32.mrf.mxu0 }
 0x1f4   : > { %4761 = vmatmul.msk.f32.gmra.mxu3 %vm853_vm2, %v5030_v13  ;;  %v5031_v13 = vld [vmem:[#allocation2 + $0x80] sm:$0xff] }
 0x1f5   : > { %7274 = vst [vmem:[#allocation21_spill] sm:$0xff] %v6051_v27  ;;  %v1634_v11 = vpop.f32.mrf.mxu1  ;;  %v6074_v27 = vld [vmem:[#allocation2 + $0x98] sm:$0xff] }
 0x1f6   : > { %v1635_v37 = vadd.f32 %v1634_v11, %v1425_v22  ;;  %7276 = vst [vmem:[#allocation23_spill] sm:$0xff] %v6074_v27  ;;  %v2913_v11 = vsel %vm1053_vm4, %v2881_v4, %v2897_v29  ;;  %v6078_v22 = vld [vmem:[#allocation2 + $0x90] sm:$0xff] }
 0x1f7   : > { %v1428_v56 = vpop.f32.mrf.mxu3  ;;  %4826 = vmatmul.msk.f32.gmra.mxu2 %vm853_vm2, %v2951_v49  ;;  %v2071_v49 = vsel %vm1156_vm3, %v2039_v55, %v2023_v5  ;;  %7277 = vst [vmem:[#allocation24_spill] sm:$0xff] %v6078_v22  ;;  %v2882_v55 = vrot.slane %v6078_v22, 7 }
 0x1f8   : > { %4793 = vmatmul.msk.f32.gmra.mxu1 %vm853_vm2, %v2055_v14 }
 0x1fa   : > { %v1845_v62 = vpop.f32.mrf.mxu2  ;;  %4743 = vmatmul.msk.f32.gmra.mxu0 %vm853_vm2, %v5800_v47  ;;  %v2094_v47 = vsel %vm1123_vm6, %v2071_v49, 0.0 }
 0x1fb   : > { %v6069_v20 = vadd.f32 %v1845_v62, %v1635_v37  ;;  %v2898_v37 = vrot.slane %v6074_v27, 7  ;;  %v6084_v62 = vld [vmem:[#allocation2 + $0x100] sm:$0xff]  ;;  %v6098_v25 = vpop.f32.mrf.mxu0 }
 0x1fc   : > { %4762 = vmatmul.msk.f32.gmra.mxu3 %vm853_vm2, %v5031_v13  ;;  %7278 = vst [vmem:[#allocation25_spill] sm:$0xff] %v6084_v62  ;;  %v1936_v4 = vrot.slane %v6084_v62, 7 }
 0x1fd   : > { %7275 = vst [vmem:[#allocation22_spill] sm:$0xff] %v6069_v20  ;;  %v1637_v28 = vpop.f32.mrf.mxu1  ;;  %v6086_v20 = vld [vmem:[#allocation2 + $0x108] sm:$0xff]  ;;  %v2930_v27 = vsel %vm1053_vm4, %v2898_v37, %v2882_v55 }
 0x1fe   : > { %7279 = vst [vmem:[#allocation26_spill] sm:$0xff] %v6086_v20  ;;  %v1638_v5 = vadd.f32 %v1637_v28, %v1428_v56  ;;  %v2024_v28 = vrot.slane %v5031_v13, 1 }
 0x1ff   : > { %v1431_v14 = vpop.f32.mrf.mxu3  ;;  %4827 = vmatmul.msk.f32.gmra.mxu2 %vm853_vm2, %v2913_v11  ;;  %v1952_v11 = vrot.slane %v6086_v20, 7  ;;  %v6120_v20 = vld [vmem:[#allocation2 + $0xa8] sm:$0xff] }
 0x200   : > { %4794 = vmatmul.msk.f32.gmra.mxu1 %vm853_vm2, %v2094_v47  ;;  %7282 = vst [vmem:[#allocation29_spill] sm:$0xff] %v6120_v20 }
 0x201   : > { %v1984_v47 = vsel %vm1053_vm4, %v1952_v11, %v1936_v4  ;;  %v6137_v62 = vsel %vm1053_vm4, %v1936_v4, %v1952_v11 }
 0x202   : > { %v1848_v29 = vpop.f32.mrf.mxu2  ;;  %4744 = vmatmul.msk.f32.gmra.mxu0 %vm853_vm2, %v5825_v9  ;;  %v2953_v9 = vsel %vm1019_vm5, %v2930_v27, 0.0 }
 0x203   : > { %v6094_v49 = vadd.f32 %v1848_v29, %v1638_v5  ;;  %v2056_v5 = vsel %vm1156_vm3, %v2024_v28, %v2040_v24 }
 0x204   : > { %4763 = vmatmul.msk.f32.gmra.mxu3 %vm853_vm2, %v5032_v18  ;;  %v6111_v18 = vsel %vm1019_vm5, %v1984_v47, 0.0  ;;  %v6126_v47 = vld [vmem:[#allocation2 + $0xa0] sm:$0xff] }
 0x205   : > { %7280 = vst [vmem:[#allocation27_spill] sm:$0xff] %v6094_v49  ;;  %v1640_v56 = vpop.f32.mrf.mxu1  ;;  %v5033_v49 = vld [vmem:[#allocation2 + $0x90] sm:$0xff] }
 0x206   : > { %v1641_v29 = vadd.f32 %v1640_v56, %v1431_v14  ;;  %v6122_v14 = vpop.f32.mrf.mxu0  ;;  %v2914_v56 = vsel %vm1053_vm4, %v2882_v55, %v2898_v37  ;;  %v2883_v37 = vrot.slane %v6126_v47, 7  ;;  %v2025_v11 = vrot.slane %v5033_v49, 1 }
 0x207   : > { %v1434_v22 = vpop.f32.mrf.mxu3  ;;  %4828 = vmatmul.msk.f32.gmra.mxu2 %vm853_vm2, %v2953_v9  ;;  %v2072_v9 = vsel %vm1156_vm3, %v2040_v24, %v2024_v28  ;;  %v2899_v24 = vrot.slane %v6120_v20, 7  ;;  %v1554_v20 = vadd.f32 %v5540_v52, %v5518_v39  ;;  %v5035_v39 = vld [vmem:[#allocation2 + $0xa0] sm:$0xff] }
 0x208   : > { %4795 = vmatmul.msk.f32.gmra.mxu1 %vm853_vm2, %v2056_v5 }
 0x20a   : > { %v1851_v13 = vpop.f32.mrf.mxu2  ;;  %4745 = vmatmul.msk.f32.gmra.mxu0 %vm853_vm2, %v6111_v18 }
 0x20b   : > { %v6115_v27 = vadd.f32 %v1851_v13, %v1641_v29  ;;  %v1551_v29 = vadd.f32 %v5514_v31, %v5496_v19 }
 0x20c   : > { %4764 = vmatmul.msk.f32.gmra.mxu3 %vm853_vm2, %v5033_v49  ;;  %v1858_v49 = vadd.f32 %v5552_v58, %v1554_v20  ;;  %v6174_v58 = vld [vmem:[#allocation2 + $0xb0] sm:$0xff] }
 0x20d   : > { %7281 = vst [vmem:[#allocation28_spill] sm:$0xff] %v6115_v27  ;;  %v1643_v5 = vpop.f32.mrf.mxu1  ;;  %v2096_v27 = vsel %vm1123_vm6, %v2072_v9, 0.0  ;;  %v1857_v19 = vadd.f32 %v5529_v46, %v1551_v29  ;;  %v2931_v9 = vsel %vm1053_vm4, %v2899_v24, %v2883_v37 }
 0x20e   : > { %v1644_v28 = vadd.f32 %v1643_v5, %v1434_v22  ;;  %v2955_v5 = vsel %vm1019_vm5, %v2931_v9, 0.0 }
 0x20f   : > { %v2471_v13 = vpop.f32.mrf.mxu3  ;;  %4829 = vmatmul.msk.f32.gmra.mxu2 %vm853_vm2, %v2914_v56  ;;  %v5034_v56 = vld [vmem:[#allocation2 + $0x98] sm:$0xff]  ;;  %v2324_v22 = vadd.f32 %v5840_v48, %v1857_v19 }
 0x210   : > { %4796 = vmatmul.msk.f32.gmra.mxu1 %vm853_vm2, %v2096_v27  ;;  %v2041_v27 = vrot.slane %v5034_v56, 1 }
 0x211   : > { %v2567_v46 = vadd.f32 %v2471_v13, %v2324_v22  ;;  %v6167_v13 = vld [vmem:[#allocation2 + $0xb8] sm:$0xff] }
 0x212   : > { %v1854_v55 = vpop.f32.mrf.mxu2  ;;  %4746 = vmatmul.msk.f32.gmra.mxu0 %vm853_vm2, %v6137_v62  ;;  %v2073_v52 = vsel %vm1156_vm3, %v2041_v27, %v2025_v11 }
 0x213   : > { %v6143_v31 = vadd.f32 %v1854_v55, %v1644_v28  ;;  %v2057_v28 = vsel %vm1156_vm3, %v2025_v11, %v2041_v27  ;;  %v6156_v55 = vpop.f32.mrf.mxu0  ;;  %v2098_v27 = vsel %vm1123_vm6, %v2073_v52, 0.0  ;;  %v2900_v11 = vrot.slane %v6167_v13, 7 }
 0x214   : > { %4765 = vmatmul.msk.f32.gmra.mxu3 %vm853_vm2, %v5034_v56  ;;  %v2325_v56 = vadd.f32 %v5859_v15, %v1858_v49  ;;  %v2026_v49 = vrot.slane %v5035_v39, 1  ;;  %v2327_v52 = vadd.f32 %v5895_v38, %v5590_v34  ;;  %v5037_v38 = vld [vmem:[#allocation2 + $0xb0] sm:$0xff] }
 0x215   : > { %v2714_v4 = vpop.f32.mrf.mxu1 }
 0x216   : > { %v2810_v48 = vadd.f32 %v2714_v4, %v2567_v46  ;;  %v2326_v4 = vadd.f32 %v5876_v50, %v5572_v16  ;;  %v2884_v16 = vrot.slane %v6174_v58, 7 }
 0x217   : > { %v2474_v29 = vpop.f32.mrf.mxu3  ;;  %4830 = vmatmul.msk.f32.gmra.mxu2 %vm853_vm2, %v2955_v5 }
 0x218   : > { %4797 = vmatmul.msk.f32.gmra.mxu1 %vm853_vm2, %v2057_v28  ;;  %v2568_v20 = vadd.f32 %v2474_v29, %v2325_v56  ;;  %v2932_v29 = vsel %vm1053_vm4, %v2900_v11, %v2884_v16  ;;  %v5036_v28 = vld [vmem:[#allocation2 + $0xa8] sm:$0xff] }
 0x219   : > { %v2957_v56 = vsel %vm1019_vm5, %v2932_v29, 0.0  ;;  %v6214_v29 = vld [vmem:[#allocation2 + $0xc0] sm:$0xff] }
 0x21a   : > { %v3182_v19 = vpop.f32.mrf.mxu2  ;;  %4847 = vmatmul.msk.f32.vlgmr.msrb.gmra.mxu0 %vm853_vm2, %v5820_v7  ;;  %v2915_v7 = vsel %vm1053_vm4, %v2883_v37, %v2899_v24 }
 0x21b   : > { %v6162_v9 = vadd.f32 %v3182_v19, %v2810_v48  ;;  %v6182_v50 = vpop.f32.mrf.mxu0  ;;  %v2042_v48 = vrot.slane %v5036_v28, 1 }
 0x21c   : > { %4766 = vmatmul.msk.f32.gmra.mxu3 %vm853_vm2, %v5035_v39 }
 0x21d   : > { %v2717_v22 = vpop.f32.mrf.mxu1 }
 0x21e   : > { %v2811_v15 = vadd.f32 %v2717_v22, %v2568_v20 }
 0x21f   : > { %v2477_v5 = vpop.f32.mrf.mxu3  ;;  %4831 = vmatmul.msk.f32.gmra.mxu2 %vm853_vm2, %v2915_v7 }
 0x220   : > { %v2569_v46 = vadd.f32 %v2477_v5, %v2326_v4  ;;  %4798 = vmatmul.msk.f32.gmra.mxu1 %vm853_vm2, %v2098_v27  ;;  %v2074_v5 = vsel %vm1156_vm3, %v2042_v48, %v2026_v49  ;;  %v6208_v27 = vld [vmem:[#allocation2 + $0xc8] sm:$0xff] }
 0x222   : > { %v3185_v24 = vpop.f32.mrf.mxu2  ;;  %4848 = vmatmul.msk.f32.gmra.mxu0 %vm853_vm2, %v5816_v36  ;;  %v2058_v36 = vsel %vm1156_vm3, %v2026_v49, %v2042_v48 }
 0x223   : > { %v6186_v37 = vadd.f32 %v3185_v24, %v2811_v15  ;;  %v6203_v34 = vpop.f32.mrf.mxu0  ;;  %v2916_v24 = vsel %vm1053_vm4, %v2884_v16, %v2900_v11  ;;  %v5038_v16 = vld [vmem:[#allocation2 + $0xb8] sm:$0xff] }
 0x224   : > { %4767 = vmatmul.msk.f32.gmra.mxu3 %vm853_vm2, %v5036_v28 }
 0x225   : > { %v2720_v19 = vpop.f32.mrf.mxu1 }
 0x226   : > { %v2812_v7 = vadd.f32 %v2720_v19, %v2569_v46  ;;  %v2328_v46 = vadd.f32 %v5912_v54, %v5608_v60  ;;  %v2100_v19 = vsel %vm1123_vm6, %v2074_v5, 0.0 }
 0x227   : > { %v2480_v22 = vpop.f32.mrf.mxu3  ;;  %4832 = vmatmul.msk.f32.gmra.mxu2 %vm853_vm2, %v2957_v56  ;;  %v2885_v56 = vrot.slane %v6214_v29, 7 }
 0x228   : > { %v2570_v4 = vadd.f32 %v2480_v22, %v2327_v52  ;;  %4799 = vmatmul.msk.f32.gmra.mxu1 %vm853_vm2, %v2058_v36  ;;  %v2901_v52 = vrot.slane %v6208_v27, 7  ;;  %v2043_v22 = vrot.slane %v5038_v16, 1 }
 0x22a   : > { %v3188_v20 = vpop.f32.mrf.mxu2  ;;  %4849 = vmatmul.msk.f32.gmra.mxu0 %vm853_vm2, %v5857_v45  ;;  %v2933_v11 = vsel %vm1053_vm4, %v2901_v52, %v2885_v56 }
 0x22b   : > { %v6201_v39 = vadd.f32 %v3188_v20, %v2812_v7  ;;  %v2027_v7 = vrot.slane %v5037_v38, 1  ;;  %v6231_v20 = vpop.f32.mrf.mxu0  ;;  %v2959_v5 = vsel %vm1019_vm5, %v2933_v11, 0.0  ;;  %v2330_v11 = vadd.f32 %v5951_v30, %v5644_v40 }
 0x22c   : > { %4768 = vmatmul.msk.f32.gmra.mxu3 %vm853_vm2, %v5037_v38 }
 0x22d   : > { %v2723_v15 = vpop.f32.mrf.mxu1  ;;  %v2075_v38 = vsel %vm1156_vm3, %v2043_v22, %v2027_v7 }
 0x22e   : > { %v2813_v49 = vadd.f32 %v2723_v15, %v2570_v4  ;;  %v2329_v4 = vadd.f32 %v5931_v8, %v5626_v12  ;;  %v5039_v8 = vld [vmem:[#allocation2 + $0xc0] sm:$0xff] }
 0x22f   : > { %v2483_v28 = vpop.f32.mrf.mxu3  ;;  %4833 = vmatmul.msk.f32.gmra.mxu2 %vm853_vm2, %v2916_v24 }
 0x230   : > { %v2571_v48 = vadd.f32 %v2483_v28, %v2328_v46  ;;  %4800 = vmatmul.msk.f32.gmra.mxu1 %vm853_vm2, %v2100_v19  ;;  %v2059_v46 = vsel %vm1156_vm3, %v2027_v7, %v2043_v22 }
 0x232   : > { %v3191_v60 = vpop.f32.mrf.mxu2  ;;  %4850 = vmatmul.msk.f32.gmra.mxu0 %vm853_vm2, %v5853_v61 }
 0x233   : > { %v6224_v54 = vadd.f32 %v3191_v60, %v2813_v49  ;;  %v6246_v49 = vld [vmem:[#allocation2 + $0xd8] sm:$0xff]  ;;  %v6258_v22 = vpop.f32.mrf.mxu0 }
 0x234   : > { %4769 = vmatmul.msk.f32.gmra.mxu3 %vm853_vm2, %v5038_v16  ;;  %v6252_v16 = vld [vmem:[#allocation2 + $0xd0] sm:$0xff] }
 0x235   : > { %v2726_v36 = vpop.f32.mrf.mxu1  ;;  %v2886_v40 = vrot.slane %v6252_v16, 7 }
 0x236   : > { %v2814_v28 = vadd.f32 %v2726_v36, %v2571_v48  ;;  %v2917_v48 = vsel %vm1053_vm4, %v2885_v56, %v2901_v52 }
 0x237   : > { %v2486_v15 = vpop.f32.mrf.mxu3  ;;  %4834 = vmatmul.msk.f32.gmra.mxu2 %vm853_vm2, %v2959_v5  ;;  %v2902_v5 = vrot.slane %v6246_v49, 7 }
 0x238   : > { %v2572_v24 = vadd.f32 %v2486_v15, %v2329_v4  ;;  %4801 = vmatmul.msk.f32.gmra.mxu1 %vm853_vm2, %v2059_v46  ;;  %v2102_v4 = vsel %vm1123_vm6, %v2075_v38, 0.0  ;;  %v5040_v46 = vld [vmem:[#allocation2 + $0xc8] sm:$0xff]  ;;  %v2028_v38 = vrot.slane %v5039_v8, 1 }
 0x239   : > { %v2934_v56 = vsel %vm1053_vm4, %v2902_v5, %v2886_v40 }
 0x23a   : > { %v3194_v19 = vpop.f32.mrf.mxu2  ;;  %4851 = vmatmul.msk.f32.gmra.mxu0 %vm853_vm2, %v5893_v42 }
 0x23b   : > { %v6241_v12 = vadd.f32 %v3194_v19, %v2814_v28  ;;  %v2044_v28 = vrot.slane %v5040_v46, 1 }
 0x23c   : > { %4770 = vmatmul.msk.f32.gmra.mxu3 %vm853_vm2, %v5039_v8 }
 0x23d   : > { %v2729_v60 = vpop.f32.mrf.mxu1  ;;  %v2076_v8 = vsel %vm1156_vm3, %v2044_v28, %v2028_v38 }
 0x23e   : > { %v2815_v15 = vadd.f32 %v2729_v60, %v2572_v24  ;;  %v2331_v24 = vadd.f32 %v5973_v57, %v5662_v59  ;;  %v2961_v60 = vsel %vm1019_vm5, %v2934_v56, 0.0  ;;  %v5041_v57 = vld [vmem:[#allocation2 + $0xd0] sm:$0xff]  ;;  %v6286_v56 = vld [vmem:[#allocation2 + $0xe8] sm:$0xff] }
 0x23f   : > { %v2489_v36 = vpop.f32.mrf.mxu3  ;;  %4835 = vmatmul.msk.f32.gmra.mxu2 %vm853_vm2, %v2917_v48  ;;  %v2060_v48 = vsel %vm1156_vm3, %v2028_v38, %v2044_v28 }
 0x240   : > { %v2573_v7 = vadd.f32 %v2489_v36, %v2330_v11  ;;  %4802 = vmatmul.msk.f32.gmra.mxu1 %vm853_vm2, %v2102_v4 }
 0x242   : > { %v3197_v30 = vpop.f32.mrf.mxu2  ;;  %4852 = vmatmul.msk.f32.gmra.mxu0 %vm853_vm2, %v5889_v33 }
 0x243   : > { %v6264_v52 = vadd.f32 %v3197_v30, %v2815_v15  ;;  %v6277_v15 = vpop.f32.mrf.mxu0 }
 0x244   : > { %4771 = vmatmul.msk.f32.gmra.mxu3 %vm853_vm2, %v5040_v46  ;;  %v2332_v46 = vadd.f32 %v5992_v53, %v5680_v21 }
 0x245   : > { %v2732_v19 = vpop.f32.mrf.mxu1 }
 0x246   : > { %v2816_v4 = vadd.f32 %v2732_v19, %v2573_v7  ;;  %v2918_v19 = vsel %vm1053_vm4, %v2886_v40, %v2902_v5 }
 0x247   : > { %v2492_v11 = vpop.f32.mrf.mxu3  ;;  %4836 = vmatmul.msk.f32.gmra.mxu2 %vm853_vm2, %v2961_v60 }
 0x248   : > { %v2574_v36 = vadd.f32 %v2492_v11, %v2331_v24  ;;  %4803 = vmatmul.msk.f32.gmra.mxu1 %vm853_vm2, %v2060_v48  ;;  %v6292_v24 = vld [vmem:[#allocation2 + $0xe0] sm:$0xff]  ;;  %v2104_v11 = vsel %vm1123_vm6, %v2076_v8, 0.0  ;;  %v2903_v48 = vrot.slane %v6286_v56, 7 }
 0x249   : > { %v2887_v21 = vrot.slane %v6292_v24, 7 }
 0x24a   : > { %v3200_v30 = vpop.f32.mrf.mxu2  ;;  %4853 = vmatmul.msk.f32.gmra.mxu0 %vm853_vm2, %v5929_v43 }
 0x24b   : > { %v6281_v59 = vadd.f32 %v3200_v30, %v2816_v4  ;;  %v2935_v40 = vsel %vm1053_vm4, %v2903_v48, %v2887_v21  ;;  %v5042_v4 = vld [vmem:[#allocation2 + $0xd8] sm:$0xff]  ;;  %v6308_v8 = vpop.f32.mrf.mxu0 }
 0x24c   : > { %4772 = vmatmul.msk.f32.gmra.mxu3 %vm853_vm2, %v5041_v57  ;;  %v2045_v30 = vrot.slane %v5042_v4, 1 }
 0x24d   : > { %v2735_v7 = vpop.f32.mrf.mxu1 }
 0x24e   : > { %v2817_v38 = vadd.f32 %v2735_v7, %v2574_v36  ;;  %v2333_v36 = vadd.f32 %v6016_v51, %v5698_v44  ;;  %v2963_v7 = vsel %vm1019_vm5, %v2935_v40, 0.0  ;;  %v6326_v51 = vld [vmem:[#allocation2 + $0xf8] sm:$0xff]  ;;  %v2919_v40 = vsel %vm1053_vm4, %v2887_v21, %v2903_v48  ;;  %v5044_v48 = vld [vmem:[#allocation2 + $0xe8] sm:$0xff] }
 0x24f   : > { %v2495_v60 = vpop.f32.mrf.mxu3  ;;  %4837 = vmatmul.msk.f32.gmra.mxu2 %vm853_vm2, %v2918_v19  ;;  %v2046_v21 = vrot.slane %v5044_v48, 1 }
 0x250   : > { %v6298_v28 = vadd.f32 %v2495_v60, %v2332_v46  ;;  %4804 = vmatmul.msk.f32.gmra.mxu1 %vm853_vm2, %v2104_v11  ;;  %v2029_v46 = vrot.slane %v5041_v57, 1  ;;  %v5043_v57 = vld [vmem:[#allocation2 + $0xe0] sm:$0xff] }
 0x252   : > { %7283 = vst [vmem:[#allocation30_spill] sm:$0xff] %v6298_v28  ;;  %v3203_v53 = vpop.f32.mrf.mxu2  ;;  %4854 = vmatmul.msk.f32.gmra.mxu0 %vm853_vm2, %v5925_v17  ;;  %v2061_v60 = vsel %vm1156_vm3, %v2029_v46, %v2045_v30  ;;  %v2077_v44 = vsel %vm1156_vm3, %v2045_v30, %v2029_v46  ;;  %v2904_v30 = vrot.slane %v6326_v51, 7 }
 0x253   : > { %v6304_v5 = vadd.f32 %v3203_v53, %v2817_v38  ;;  %v2334_v38 = vadd.f32 %v6041_v1, %v5716_v6  ;;  %v6330_v53 = vpop.f32.mrf.mxu0 }
 0x254   : > { %4773 = vmatmul.msk.f32.gmra.mxu3 %vm853_vm2, %v5042_v4  ;;  %v6334_v4 = vld [vmem:[#allocation2 + $0xf0] sm:$0xff] }
 0x255   : > { %v2888_v6 = vrot.slane %v6334_v4, 7 }
 0x257   : > { %v2498_v19 = vpop.f32.mrf.mxu3  ;;  %4838 = vmatmul.msk.f32.gmra.mxu2 %vm853_vm2, %v2963_v7  ;;  %v2106_v7 = vsel %vm1123_vm6, %v2077_v44, 0.0  ;;  %v2936_v1 = vsel %vm1053_vm4, %v2904_v30, %v2888_v6 }
 0x258   : > { %v6318_v11 = vadd.f32 %v2498_v19, %v2333_v36  ;;  %4805 = vmatmul.msk.f32.gmra.mxu1 %vm853_vm2, %v2061_v60  ;;  %v2030_v19 = vrot.slane %v5043_v57, 1  ;;  %v2335_v60 = vadd.f32 %v6065_v0, %v5740_v32  ;;  %v2965_v44 = vsel %vm1019_vm5, %v2936_v1, 0.0 }
 0x259   : > { %v2336_v0 = vadd.f32 %v6098_v25, %v5758_v2  ;;  %v5045_v2 = vld [vmem:[#allocation2 + $0xf0] sm:$0xff] }
 0x25a   : > { %7284 = vst [vmem:[#allocation31_spill] sm:$0xff] %v6318_v11  ;;  %4855 = vmatmul.msk.f32.gmra.mxu0 %vm853_vm2, %v5965_v63  ;;  %v2078_v32 = vsel %vm1156_vm3, %v2046_v21, %v2030_v19  ;;  %v2031_v25 = vrot.slane %v5045_v2, 1  ;;  %v7294_v2 = vld [vmem:[#allocation6_spill] sm:$0xff] }
 0x25c   : > { %4774 = vmatmul.msk.f32.gmra.mxu3 %vm853_vm2, %v5043_v57  ;;  %v2920_v57 = vsel %vm1053_vm4, %v2888_v6, %v2904_v30  ;;  %v7289_v30 = vld [vmem:[#allocation3_spill] sm:$0xff] }
 0x25d   : > { %v2337_v6 = vadd.f32 %v6122_v14, %v7289_v30  ;;  %v2338_v30 = vadd.f32 %v6156_v55, %v7294_v2  ;;  %v7297_v55 = vld [vmem:[#allocation26_spill] sm:$0xff] }
 0x25e   : > { %v2048_v2 = vrot.slane %v7297_v55, 1 }
 0x25f   : > { %v2501_v36 = vpop.f32.mrf.mxu3  ;;  %4839 = vmatmul.msk.f32.gmra.mxu2 %vm853_vm2, %v2919_v40  ;;  %v2062_v40 = vsel %vm1156_vm3, %v2030_v19, %v2046_v21  ;;  %v7288_v21 = vld [vmem:[#allocation4_spill] sm:$0xff] }
 0x260   : > { %v6340_v46 = vadd.f32 %v2501_v36, %v2334_v38  ;;  %4806 = vmatmul.msk.f32.gmra.mxu1 %vm853_vm2, %v2106_v7  ;;  %v6356_v36 = vpop.f32.mrf.mxu0 }
 0x262   : > { %7285 = vst [vmem:[#allocation32_spill] sm:$0xff] %v6340_v46  ;;  %4856 = vmatmul.msk.f32.gmra.mxu0 %vm853_vm2, %v5961_v26  ;;  %v6436_v46 = vpop.f32.mrf.mxu2 }
 0x264   : > { %4775 = vmatmul.msk.f32.gmra.mxu3 %vm853_vm2, %v5044_v48  ;;  %v2108_v48 = vsel %vm1123_vm6, %v2078_v32, 0.0  ;;  %v7292_v32 = vld [vmem:[#allocation20_spill] sm:$0xff] }
 0x265   : > { %7300 = vst [vmem:[#allocation20_spill] sm:$0xff] %v6436_v46 }
 0x267   : > { %v2504_v38 = vpop.f32.mrf.mxu3  ;;  %4840 = vmatmul.msk.f32.gmra.mxu2 %vm853_vm2, %v2965_v44  ;;  %v7290_v44 = vld [vmem:[#allocation5_spill] sm:$0xff] }
 0x268   : > { %v6358_v7 = vadd.f32 %v2504_v38, %v2335_v60  ;;  %4807 = vmatmul.msk.f32.gmra.mxu1 %vm853_vm2, %v2062_v40  ;;  %v2063_v38 = vsel %vm1156_vm3, %v2031_v25, %v7290_v44 }
 0x26a   : > { %7286 = vst [vmem:[#allocation33_spill] sm:$0xff] %v6358_v7  ;;  %4857 = vmatmul.msk.f32.gmra.mxu0 %vm853_vm2, %v6001_v10 }
 0x26c   : > { %4776 = vmatmul.msk.f32.gmra.mxu3 %vm853_vm2, %v5760_v3  ;;  %v6377_v3 = vpop.f32.mrf.mxu0 }
 0x26f   : > { %v2507_v1 = vpop.f32.mrf.mxu3  ;;  %4841 = vmatmul.msk.f32.gmra.mxu2 %vm853_vm2, %v2920_v57  ;;  %v6397_v57 = vld [vmem:[#allocation2 + $0x118] sm:$0xff] }
 0x270   : > { %v6374_v60 = vadd.f32 %v2507_v1, %v2336_v0  ;;  %4808 = vmatmul.msk.f32.gmra.mxu1 %vm853_vm2, %v2108_v48  ;;  %v6395_v0 = vld [vmem:[#allocation2 + $0x110] sm:$0xff] }
 0x271   : > { %v7293_v1 = vld [vmem:[#allocation25_spill] sm:$0xff]  ;;  %v2890_v48 = vrot.slane %v6395_v0, 7 }
 0x272   : > { %7287 = vst [vmem:[#allocation34_spill] sm:$0xff] %v6374_v60  ;;  %4858 = vmatmul.msk.f32.gmra.mxu0 %vm853_vm2, %v5997_v41  ;;  %v5046_v60 = vld [vmem:[#allocation2 + $0x28] sm:$0xff] }
 0x273   : > { %v2987_v7 = vrot.slane %v5046_v60, 1 }
 0x274   : > { %4777 = vmatmul.msk.f32.gmra.mxu3 %vm853_vm2, %v7288_v21  ;;  %v6399_v14 = vpop.f32.mrf.mxu0  ;;  %v2906_v21 = vrot.slane %v6397_v57, 7 }
 0x276   : > { %v2922_v60 = vsel %vm1053_vm4, %v2890_v48, %v2906_v21 }
 0x277   : > { %v2510_v19 = vpop.f32.mrf.mxu3  ;;  %4842 = vmatmul.msk.f32.gmra.mxu2 %vm853_vm2, %v6111_v18  ;;  %v2079_v18 = vsel %vm1156_vm3, %v7290_v44, %v2031_v25  ;;  %v2938_v25 = vsel %vm1053_vm4, %v2906_v21, %v2890_v48  ;;  %v7296_v44 = vld [vmem:[#allocation19_spill] sm:$0xff]  ;;  %v6466_v48 = vpop.f32.mrf.mxu2 }
 0x278   : > { %v6390_v40 = vadd.f32 %v2510_v19, %v2337_v6  ;;  %4809 = vmatmul.msk.f32.gmra.mxu1 %vm853_vm2, %v2063_v38  ;;  %v2110_v19 = vsel %vm1123_vm6, %v2079_v18, 0.0  ;;  %v7298_v18 = vld [vmem:[#allocation7_spill] sm:$0xff] }
 0x27a   : > { %7291 = vst [vmem:[#allocation4_spill] sm:$0xff] %v6390_v40  ;;  %4859 = vmatmul.msk.f32.gmra.mxu0 %vm853_vm2, %v7292_v32  ;;  %v2032_v40 = vrot.slane %v7293_v1, 1 }
 0x27c   : > { %4778 = vmatmul.msk.f32.gmra.mxu3 %vm853_vm2, %v7293_v1 }
 0x27f   : > { %v2513_v6 = vpop.f32.mrf.mxu3  ;;  %4843 = vmatmul.msk.f32.gmra.mxu2 %vm853_vm2, %v6137_v62  ;;  %v2969_v62 = vsel %vm1019_vm5, %v2938_v25, 0.0  ;;  %v5047_v25 = vld [vmem:[#allocation2 + $0x20] sm:$0xff] }
 0x280   : > { %v6414_v38 = vadd.f32 %v2513_v6, %v2338_v30  ;;  %4810 = vmatmul.msk.f32.gmra.mxu1 %vm853_vm2, %v2110_v19  ;;  %v2339_v30 = vadd.f32 %v6182_v50, %v7298_v18  ;;  %v6429_v6 = vpop.f32.mrf.mxu0  ;;  %v2971_v50 = vrot.slane %v5047_v25, 1  ;;  %v7302_v18 = vld [vmem:[#allocation24_spill] sm:$0xff] }
 0x282   : > { %7295 = vst [vmem:[#allocation3_spill] sm:$0xff] %v6414_v38  ;;  %4860 = vmatmul.msk.f32.gmra.mxu0 %vm853_vm2, %v7296_v44  ;;  %v6434_v38 = vsel %vm1156_vm3, %v2032_v40, %v2048_v2 }
 0x283   : > { %7299 = vst [vmem:[#allocation5_spill] sm:$0xff] %v6434_v38 }
 0x284   : > { %4779 = vmatmul.msk.f32.gmra.mxu3 %vm853_vm2, %v7297_v55 }
 0x287   : > { %v2516_v19 = vpop.f32.mrf.mxu3  ;;  %4844 = vmatmul.msk.f32.gmra.mxu2 %vm853_vm2, %v2969_v62  ;;  %v3003_v62 = vsel %vm1156_vm3, %v2971_v50, %v2987_v7 }
 0x288   : > { %v6438_v11 = vadd.f32 %v2516_v19, %v2339_v30  ;;  %4811 = vmatmul.msk.f32.gmra.mxu1 %vm853_vm2, %v6434_v38  ;;  %v2080_v30 = vsel %vm1156_vm3, %v2048_v2, %v2032_v40  ;;  %v7303_v19 = vld [vmem:[#allocation8_spill] sm:$0xff]  ;;  %v6458_v46 = vpop.f32.mrf.mxu0  ;;  %v3019_v40 = vsel %vm1156_vm3, %v2987_v7, %v2971_v50  ;;  %v7307_v2 = vld [vmem:[#allocation9_spill] sm:$0xff]  ;;  %v2972_v7 = vrot.slane %v5857_v45, 1 }
 0x289   : > { %v6456_v25 = vsel %vm1123_vm6, %v2080_v30, 0.0  ;;  %v3036_v21 = vsel %vm1123_vm6, %v3019_v40, 0.0 }
 0x28a   : > { %7301 = vst [vmem:[#allocation25_spill] sm:$0xff] %v6438_v11  ;;  %4861 = vmatmul.msk.f32.gmra.mxu0 %vm853_vm2, %v7302_v18  ;;  %v2340_v11 = vadd.f32 %v6203_v34, %v7303_v19  ;;  %v7306_v34 = vld [vmem:[#allocation23_spill] sm:$0xff]  ;;  %v6485_v19 = vpop.f32.mrf.mxu2 }
 0x28b   : > { %7304 = vst [vmem:[#allocation6_spill] sm:$0xff] %v6456_v25 }
 0x28c   : > { %4880 = vmatmul.msk.f32.vlgmr.msrb.gmra.mxu3 %vm853_vm2, %v3003_v62  ;;  %v2988_v62 = vrot.slane %v5853_v61, 1 }
 0x28e   : > { %v3004_v30 = vsel %vm1156_vm3, %v2972_v7, %v2988_v62  ;;  %v3020_v45 = vsel %vm1156_vm3, %v2988_v62, %v2972_v7  ;;  %v2989_v62 = vrot.slane %v5889_v33, 1 }
 0x28f   : > { %v2519_v38 = vpop.f32.mrf.mxu3  ;;  %4845 = vmatmul.msk.f32.gmra.mxu2 %vm853_vm2, %v2922_v60 }
 0x290   : > { %v6460_v28 = vadd.f32 %v2519_v38, %v2340_v11  ;;  %4812 = vmatmul.msk.f32.gmra.mxu1 %vm853_vm2, %v6456_v25  ;;  %v2341_v11 = vadd.f32 %v6231_v20, %v7307_v2  ;;  %v6479_v50 = vpop.f32.mrf.mxu0  ;;  %v7309_v20 = vld [vmem:[#allocation10_spill] sm:$0xff]  ;;  %v7311_v2 = vld [vmem:[#allocation29_spill] sm:$0xff] }
 0x291   : > { %v2342_v40 = vadd.f32 %v6258_v22, %v7309_v20 }
 0x292   : > { %7305 = vst [vmem:[#allocation19_spill] sm:$0xff] %v6460_v28  ;;  %4862 = vmatmul.msk.f32.gmra.mxu0 %vm853_vm2, %v7306_v34  ;;  %v6505_v20 = vpop.f32.mrf.mxu2  ;;  %v2990_v28 = vrot.slane %v5925_v17, 1 }
 0x294   : > { %4881 = vmatmul.msk.f32.gmra.mxu3 %vm853_vm2, %v3036_v21 }
 0x297   : > { %v2522_v38 = vpop.f32.mrf.mxu3 }
 0x298   : > { %v6476_v60 = vadd.f32 %v2522_v38, %v2341_v11  ;;  %v3038_v11 = vsel %vm1123_vm6, %v3020_v45, 0.0  ;;  %v6498_v38 = vpop.f32.mrf.mxu1 }
 0x29a   : > { %7308 = vst [vmem:[#allocation26_spill] sm:$0xff] %v6476_v60  ;;  %4863 = vmatmul.msk.f32.gmra.mxu0 %vm853_vm2, %v6126_v47  ;;  %v6500_v60 = vpop.f32.mrf.mxu0 }
 0x29c   : > { %4882 = vmatmul.msk.f32.gmra.mxu3 %vm853_vm2, %v3004_v30  ;;  %v7312_v30 = vld [vmem:[#allocation11_spill] sm:$0xff] }
 0x29d   : > { %v2343_v22 = vadd.f32 %v6277_v15, %v7312_v30 }
 0x29f   : > { %v2525_v61 = vpop.f32.mrf.mxu3 }
 0x2a0   : > { %v6490_v21 = vadd.f32 %v2525_v61, %v2342_v40  ;;  %v2973_v61 = vrot.slane %v5893_v42, 1  ;;  %v6518_v30 = vpop.f32.mrf.mxu1 }
 0x2a2   : > { %7310 = vst [vmem:[#allocation7_spill] sm:$0xff] %v6490_v21  ;;  %4864 = vmatmul.msk.f32.gmra.mxu0 %vm853_vm2, %v7311_v2  ;;  %v3005_v45 = vsel %vm1156_vm3, %v2973_v61, %v2989_v62  ;;  %v6520_v21 = vpop.f32.mrf.mxu0  ;;  %v3021_v42 = vsel %vm1156_vm3, %v2989_v62, %v2973_v61  ;;  %v2974_v62 = vrot.slane %v5929_v43, 1 }
 0x2a4   : > { %4883 = vmatmul.msk.f32.gmra.mxu3 %vm853_vm2, %v3038_v11  ;;  %v7314_v11 = vld [vmem:[#allocation12_spill] sm:$0xff] }
 0x2a5   : > { %v2344_v15 = vadd.f32 %v6308_v8, %v7314_v11  ;;  %v7316_v8 = vld [vmem:[#allocation13_spill] sm:$0xff] }
 0x2a6   : > { %v2345_v11 = vadd.f32 %v6330_v53, %v7316_v8  ;;  %v7318_v53 = vld [vmem:[#allocation14_spill] sm:$0xff] }
 0x2a7   : > { %v2528_v40 = vpop.f32.mrf.mxu3  ;;  %v2346_v17 = vadd.f32 %v6356_v36, %v7318_v53  ;;  %v7320_v36 = vld [vmem:[#allocation15_spill] sm:$0xff] }
 0x2a8   : > { %v6508_v7 = vadd.f32 %v2528_v40, %v2343_v22  ;;  %v6522_v22 = vpop.f32.mrf.mxu2  ;;  %v6536_v25 = vpop.f32.mrf.mxu1  ;;  %v2347_v53 = vadd.f32 %v6377_v3, %v7320_v36  ;;  %v7322_v3 = vld [vmem:[#allocation16_spill] sm:$0xff] }
 0x2aa   : > { %7313 = vst [vmem:[#allocation24_spill] sm:$0xff] %v6508_v7  ;;  %4865 = vmatmul.msk.f32.gmra.mxu0 %vm853_vm2, %v6174_v58 }
 0x2ac   : > { %4884 = vmatmul.msk.f32.gmra.mxu3 %vm853_vm2, %v3005_v45  ;;  %v3040_v45 = vsel %vm1123_vm6, %v3021_v42, 0.0  ;;  %v3006_v42 = vsel %vm1156_vm3, %v2974_v62, %v2990_v28 }
 0x2af   : > { %v2531_v33 = vpop.f32.mrf.mxu3 }
 0x2b0   : > { %v6524_v40 = vadd.f32 %v2531_v33, %v2344_v15  ;;  %v6538_v15 = vpop.f32.mrf.mxu0  ;;  %v6543_v61 = vpop.f32.mrf.mxu2 }
 0x2b1   : > { %v6556_v43 = vpop.f32.mrf.mxu1 }
 0x2b2   : > { %7315 = vst [vmem:[#allocation8_spill] sm:$0xff] %v6524_v40  ;;  %4866 = vmatmul.msk.f32.gmra.mxu0 %vm853_vm2, %v6167_v13 }
 0x2b4   : > { %4885 = vmatmul.msk.f32.gmra.mxu3 %vm853_vm2, %v3040_v45 }
 0x2b7   : > { %v2534_v7 = vpop.f32.mrf.mxu3 }
 0x2b8   : > { %v6540_v33 = vadd.f32 %v2534_v7, %v2345_v11  ;;  %v3022_v7 = vsel %vm1156_vm3, %v2990_v28, %v2974_v62  ;;  %v6558_v11 = vpop.f32.mrf.mxu0  ;;  %v2991_v28 = vrot.slane %v5961_v26, 1 }
 0x2ba   : > { %7317 = vst [vmem:[#allocation23_spill] sm:$0xff] %v6540_v33  ;;  %4867 = vmatmul.msk.f32.gmra.mxu0 %vm853_vm2, %v6214_v29  ;;  %v3042_v33 = vsel %vm1123_vm6, %v3022_v7, 0.0 }
 0x2bc   : > { %4886 = vmatmul.msk.f32.gmra.mxu3 %vm853_vm2, %v3006_v42  ;;  %v6564_v42 = vpop.f32.mrf.mxu2 }
 0x2bf   : > { %v2537_v45 = vpop.f32.mrf.mxu3 }
 0x2c0   : > { %v6552_v8 = vadd.f32 %v2537_v45, %v2346_v17  ;;  %v2975_v45 = vrot.slane %v5965_v63, 1  ;;  %v6579_v40 = vpop.f32.mrf.mxu0 }
 0x2c2   : > { %7319 = vst [vmem:[#allocation9_spill] sm:$0xff] %v6552_v8  ;;  %4868 = vmatmul.msk.f32.gmra.mxu0 %vm853_vm2, %v6208_v27  ;;  %v3007_v7 = vsel %vm1156_vm3, %v2975_v45, %v2991_v28  ;;  %v6577_v8 = vpop.f32.mrf.mxu1  ;;  %v3023_v63 = vsel %vm1156_vm3, %v2991_v28, %v2975_v45  ;;  %v2976_v45 = vrot.slane %v6001_v10, 1 }
 0x2c4   : > { %4887 = vmatmul.msk.f32.gmra.mxu3 %vm853_vm2, %v3042_v33  ;;  %v2348_v33 = vadd.f32 %v6399_v14, %v7322_v3  ;;  %v6584_v26 = vpop.f32.mrf.mxu2 }
 0x2c5   : > { %7323 = vst [vmem:[#allocation29_spill] sm:$0xff] %v6584_v26 }
 0x2c7   : > { %v2540_v17 = vpop.f32.mrf.mxu3 }
 0x2c8   : > { %v6570_v62 = vadd.f32 %v2540_v17, %v2347_v53  ;;  %v3044_v17 = vsel %vm1123_vm6, %v3023_v63, 0.0  ;;  %v6599_v3 = vpop.f32.mrf.mxu0 }
 0x2ca   : > { %7321 = vst [vmem:[#allocation10_spill] sm:$0xff] %v6570_v62  ;;  %4869 = vmatmul.msk.f32.gmra.mxu0 %vm853_vm2, %v6252_v16  ;;  %v6597_v14 = vpop.f32.mrf.mxu1 }
 0x2cc   : > { %4888 = vmatmul.msk.f32.gmra.mxu3 %vm853_vm2, %v3007_v7  ;;  %v7325_v7 = vld [vmem:[#allocation17_spill] sm:$0xff] }
 0x2cd   : > { %v2349_v62 = vadd.f32 %v6429_v6, %v7325_v7  ;;  %v7327_v6 = vld [vmem:[#allocation18_spill] sm:$0xff]  ;;  %v7349_v23 = vld [vmem:[#allocation29_spill] sm:$0xff] }
 0x2cf   : > { %v2543_v36 = vpop.f32.mrf.mxu3 }
 0x2d0   : > { %v6586_v53 = vadd.f32 %v2543_v36, %v2348_v33  ;;  %v2992_v36 = vrot.slane %v5997_v41, 1  ;;  %v6616_v41 = vpop.f32.mrf.mxu0 }
 0x2d2   : > { %7324 = vst [vmem:[#allocation11_spill] sm:$0xff] %v6586_v53  ;;  %4870 = vmatmul.msk.f32.gmra.mxu0 %vm853_vm2, %v6246_v49  ;;  %v6602_v53 = vpop.f32.mrf.mxu2  ;;  %v3008_v63 = vsel %vm1156_vm3, %v2976_v45, %v2992_v36  ;;  %v6614_v26 = vpop.f32.mrf.mxu1  ;;  %v3024_v10 = vsel %vm1156_vm3, %v2992_v36, %v2976_v45  ;;  %v2977_v36 = vrot.slane %v7292_v32, 1 }
 0x2d4   : > { %4889 = vmatmul.msk.f32.gmra.mxu3 %vm853_vm2, %v3044_v17  ;;  %v2350_v17 = vadd.f32 %v6458_v46, %v7327_v6  ;;  %v7329_v46 = vld [vmem:[#allocation21_spill] sm:$0xff] }
 0x2d5   : > { %v2351_v6 = vadd.f32 %v6479_v50, %v7329_v46  ;;  %v7332_v50 = vld [vmem:[#allocation22_spill] sm:$0xff] }
 0x2d7   : > { %v2546_v33 = vpop.f32.mrf.mxu3 }
 0x2d8   : > { %v6604_v28 = vadd.f32 %v2546_v33, %v2349_v62 }
 0x2da   : > { %7326 = vst [vmem:[#allocation12_spill] sm:$0xff] %v6604_v28  ;;  %4871 = vmatmul.msk.f32.gmra.mxu0 %vm853_vm2, %v6292_v24  ;;  %v6622_v33 = vpop.f32.mrf.mxu2  ;;  %v6635_v45 = vpop.f32.mrf.mxu1 }
 0x2dc   : > { %4890 = vmatmul.msk.f32.gmra.mxu3 %vm853_vm2, %v3008_v63  ;;  %v3046_v63 = vsel %vm1123_vm6, %v3024_v10, 0.0 }
 0x2df   : > { %v2549_v7 = vpop.f32.mrf.mxu3 }
 0x2e0   : > { %v6618_v62 = vadd.f32 %v2549_v7, %v2350_v17  ;;  %v2993_v17 = vrot.slane %v7296_v44, 1  ;;  %v2352_v44 = vadd.f32 %v6500_v60, %v7332_v50  ;;  %v7333_v60 = vld [vmem:[#allocation27_spill] sm:$0xff] }
 0x2e1   : > { %v2353_v50 = vadd.f32 %v6520_v21, %v7333_v60  ;;  %v7335_v21 = vld [vmem:[#allocation28_spill] sm:$0xff] }
 0x2e2   : > { %7328 = vst [vmem:[#allocation13_spill] sm:$0xff] %v6618_v62  ;;  %4872 = vmatmul.msk.f32.gmra.mxu0 %vm853_vm2, %v6286_v56  ;;  %v6637_v62 = vpop.f32.mrf.mxu0  ;;  %v3009_v10 = vsel %vm1156_vm3, %v2977_v36, %v2993_v17  ;;  %v3025_v32 = vsel %vm1156_vm3, %v2993_v17, %v2977_v36  ;;  %v2994_v36 = vrot.slane %v7306_v34, 1  ;;  %v2354_v60 = vadd.f32 %v6538_v15, %v7335_v21 }
 0x2e4   : > { %4891 = vmatmul.msk.f32.gmra.mxu3 %vm853_vm2, %v3046_v63  ;;  %v6643_v63 = vpop.f32.mrf.mxu2 }
 0x2e5   : > { %7331 = vst [vmem:[#allocation15_spill] sm:$0xff] %v6643_v63 }
 0x2e7   : > { %v2552_v28 = vpop.f32.mrf.mxu3 }
 0x2e8   : > { %v6632_v7 = vadd.f32 %v2552_v28, %v2351_v6  ;;  %v4078_v6 = vld [vmem:[%s5161_s26] sm:$0xff] }
 0x2e9   : > { %4945 = vmatmul.msk.f32.vlgmr.msrb.gmra.mxu2 %vm606_vm1, %v4078_v6  ;;  %v4079_v6 = vld [vmem:[%s5161_s26 + $0x8] sm:$0xff] }
 0x2ea   : > { %7330 = vst [vmem:[#allocation14_spill] sm:$0xff] %v6632_v7  ;;  %4873 = vmatmul.msk.f32.gmra.mxu0 %vm853_vm2, %v6334_v4  ;;  %v3048_v7 = vsel %vm1123_vm6, %v3025_v32, 0.0  ;;  %v6660_v63 = vpop.f32.mrf.mxu0  ;;  %v2978_v32 = vrot.slane %v7302_v18, 1 }
 0x2ec   : > { %4892 = vmatmul.msk.f32.gmra.mxu3 %vm853_vm2, %v3009_v10  ;;  %v6658_v10 = vpop.f32.mrf.mxu1 }
 0x2ef   : > { %v2555_v28 = vpop.f32.mrf.mxu3 }
 0x2f0   : > { %v6648_v46 = vadd.f32 %v2555_v28, %v2352_v44  ;;  %v6665_v44 = vpop.f32.mrf.mxu2 }
 0x2f1   : > { %4946 = vmatmul.msk.f32.gmra.mxu2 %vm606_vm1, %v4079_v6  ;;  %v4080_v6 = vld [vmem:[%s5161_s26 + $0x10] sm:$0xff] }
 0x2f2   : > { %4874 = vmatmul.msk.f32.gmra.mxu0 %vm853_vm2, %v6326_v51 }
 0x2f4   : > { %4893 = vmatmul.msk.f32.gmra.mxu3 %vm853_vm2, %v3048_v7  ;;  %v3010_v7 = vsel %vm1156_vm3, %v2978_v32, %v2994_v36  ;;  %v6680_v34 = vpop.f32.mrf.mxu1 }
 0x2f7   : > { %v2558_v17 = vpop.f32.mrf.mxu3 }
 0x2f8   : > { %v6668_v28 = vadd.f32 %v2558_v17, %v2353_v50  ;;  %v6682_v50 = vpop.f32.mrf.mxu0  ;;  %v6684_v18 = vpop.f32.mrf.mxu2 }
 0x2f9   : > { %4947 = vmatmul.msk.f32.gmra.mxu2 %vm606_vm1, %v4080_v6  ;;  %v4081_v6 = vld [vmem:[%s5161_s26 + $0x18] sm:$0xff] }
 0x2fa   : > { %7334 = vst [vmem:[#allocation16_spill] sm:$0xff] %v6668_v28  ;;  %4875 = vmatmul.msk.f32.gmra.mxu0 %vm853_vm2, %v7293_v1  ;;  %v3026_v1 = vsel %vm1156_vm3, %v2994_v36, %v2978_v32 }
 0x2fb   : > { %v3050_v15 = vsel %vm1123_vm6, %v3026_v1, 0.0 }
 0x2fc   : > { %4894 = vmatmul.msk.f32.gmra.mxu3 %vm853_vm2, %v3010_v7  ;;  %v2355_v7 = vadd.f32 %v6558_v11, %v6143_v31 }
 0x2ff   : > { %v2561_v17 = vpop.f32.mrf.mxu3 }
 0x300   : > { %v6686_v28 = vadd.f32 %v2561_v17, %v2354_v60  ;;  %v2995_v60 = vrot.slane %v7311_v2, 1  ;;  %v6700_v17 = vpop.f32.mrf.mxu1  ;;  %v6702_v36 = vpop.f32.mrf.mxu0  ;;  %v3521_v2 = vadd.f32 %v6579_v40, %v6162_v9  ;;  %v4082_v9 = vld [vmem:[%s5161_s26 + $0x20] sm:$0xff] }
 0x301   : > { %v6707_v1 = vpop.f32.mrf.mxu2  ;;  %4948 = vmatmul.msk.f32.gmra.mxu2 %vm606_vm1, %v4081_v6 }
 0x302   : > { %7336 = vst [vmem:[#allocation17_spill] sm:$0xff] %v6686_v28  ;;  %4876 = vmatmul.msk.f32.gmra.mxu0 %vm853_vm2, %v7297_v55  ;;  %v2979_v55 = vrot.slane %v6126_v47, 1  ;;  %v6721_v47 = vld [vmem:[%s7231_s6] ss:$0 sm:$0xff]  ;;  %v2980_v28 = vrot.slane %v6174_v58, 1 }
 0x304   : > { %4895 = vmatmul.msk.f32.gmra.mxu3 %vm853_vm2, %v3050_v15  ;;  %v3011_v31 = vsel %vm1156_vm3, %v2979_v55, %v2995_v60 }
 0x307   : > { %v2564_v21 = vpop.f32.mrf.mxu3 }
 0x308   : > { %v6704_v32 = vadd.f32 %v2564_v21, %v2355_v7  ;;  %v3027_v7 = vsel %vm1156_vm3, %v2995_v60, %v2979_v55  ;;  %v6725_v21 = vpop.f32.mrf.mxu1  ;;  %v3522_v60 = vadd.f32 %v6599_v3, %v6186_v37 }
 0x309   : > { %v3052_v40 = vsel %vm1123_vm6, %v3027_v7, 0.0  ;;  %4949 = vmatmul.msk.f32.gmra.mxu2 %vm606_vm1, %v4082_v9  ;;  %v4083_v9 = vld [vmem:[%s5161_s26 + $0x28] sm:$0xff] }
 0x30a   : > { %7337 = vst [vmem:[#allocation18_spill] sm:$0xff] %v6704_v32  ;;  %4877 = vmatmul.msk.f32.gmra.mxu0 %vm853_vm2, %v6395_v0  ;;  %v6727_v32 = vpop.f32.mrf.mxu0 }
 0x30c   : > { %4896 = vmatmul.msk.f32.gmra.mxu3 %vm853_vm2, %v3011_v31  ;;  %v6736_v31 = vpop.f32.mrf.mxu2 }
 0x30f   : > { %v3668_v11 = vpop.f32.mrf.mxu3 }
 0x310   : > { %v3764_v15 = vadd.f32 %v3668_v11, %v3521_v2  ;;  %v2996_v11 = vrot.slane %v6167_v13, 1  ;;  %v3523_v13 = vadd.f32 %v6616_v41, %v6201_v39  ;;  %v3524_v39 = vadd.f32 %v6637_v62, %v6224_v54 }
 0x311   : > { %4950 = vmatmul.msk.f32.gmra.mxu2 %vm606_vm1, %v4083_v9 }
 0x312   : > { %v3800_v6 = vadd.f32 %v6721_v47, %v3764_v15  ;;  %4878 = vmatmul.msk.f32.gmra.mxu0 %vm853_vm2, %v6397_v57  ;;  %v6752_v3 = vpop.f32.mrf.mxu0 }
 0x314   : > { %v3832_v2 = vmax.f32 %v3800_v6, 0.0  ;;  %4897 = vmatmul.msk.f32.gmra.mxu3 %vm853_vm2, %v3052_v40  ;;  %v3012_v6 = vsel %vm1156_vm3, %v2980_v28, %v2996_v11  ;;  %v6749_v40 = vpop.f32.mrf.mxu1  ;;  %v6756_v58 = vpop.f32.mrf.mxu2 }
 0x316   : > { %4912 = vmatmul.msk.f32.vlgmr.msrb.gmra.mxu1 %vm853_vm2, %v3832_v2 }
 0x317   : > { %v3671_v55 = vpop.f32.mrf.mxu3 }
 0x318   : > { %v3765_v15 = vadd.f32 %v3671_v55, %v3522_v60  ;;  %v3028_v55 = vsel %vm1156_vm3, %v2996_v11, %v2980_v28 }
 0x319   : > { %v3054_v9 = vsel %vm1123_vm6, %v3028_v55, 0.0 }
 0x31a   : > { %v3801_v7 = vadd.f32 %v6721_v47, %v3765_v15  ;;  %v6772_v28 = vpop.f32.mrf.mxu0 }
 0x31c   : > { %v3833_v37 = vmax.f32 %v3801_v7, 0.0  ;;  %4898 = vmatmul.msk.f32.gmra.mxu3 %vm853_vm2, %v3012_v6  ;;  %v4084_v7 = vld [vmem:[%s5161_s26 + $0x30] sm:$0xff]  ;;  %v6769_v41 = vpop.f32.mrf.mxu1 }
 0x31d   : > { %4951 = vmatmul.msk.f32.gmra.mxu2 %vm606_vm1, %v4084_v7 }
 0x31e   : > { %4913 = vmatmul.msk.f32.gmra.mxu1 %vm853_vm2, %v3833_v37  ;;  %v2997_v37 = vrot.slane %v6208_v27, 1  ;;  %v3525_v27 = vadd.f32 %v6660_v63, %v6241_v12 }
 0x31f   : > { %v3674_v2 = vpop.f32.mrf.mxu3 }
 0x320   : > { %v3766_v60 = vadd.f32 %v3674_v2, %v3523_v13  ;;  %v6775_v13 = vpop.f32.mrf.mxu2 }
 0x322   : > { %v3802_v15 = vadd.f32 %v6721_v47, %v3766_v60  ;;  %v2981_v60 = vrot.slane %v6214_v29, 1 }
 0x324   : > { %v3834_v6 = vmax.f32 %v3802_v15, 0.0  ;;  %4899 = vmatmul.msk.f32.gmra.mxu3 %vm853_vm2, %v3054_v9  ;;  %v4085_v15 = vld [vmem:[%s5161_s26 + $0x38] sm:$0xff]  ;;  %v3013_v54 = vsel %vm1156_vm3, %v2981_v60, %v2997_v37  ;;  %v6787_v9 = vpop.f32.mrf.mxu1 }
 0x325   : > { %4952 = vmatmul.msk.f32.gmra.mxu2 %vm606_vm1, %v4085_v15  ;;  %v3526_v15 = vadd.f32 %v6682_v50, %v6264_v52 }
 0x326   : > { %4914 = vmatmul.msk.f32.gmra.mxu1 %vm853_vm2, %v3834_v6  ;;  %v3029_v6 = vsel %vm1156_vm3, %v2997_v37, %v2981_v60  ;;  %v2998_v60 = vrot.slane %v6246_v49, 1  ;;  %v3527_v49 = vadd.f32 %v6702_v36, %v6281_v59  ;;  %v3528_v36 = vadd.f32 %v6727_v32, %v6304_v5  ;;  %v7339_v32 = vld [vmem:[#allocation20_spill] sm:$0xff] }
 0x327   : > { %v3677_v11 = vpop.f32.mrf.mxu3  ;;  %v3056_v12 = vsel %vm1123_vm6, %v3029_v6, 0.0 }
 0x328   : > { %v3767_v2 = vadd.f32 %v3677_v11, %v3524_v39  ;;  %v6791_v39 = vpop.f32.mrf.mxu0  ;;  %v6793_v11 = vpop.f32.mrf.mxu2 }
 0x32a   : > { %v3803_v55 = vadd.f32 %v6721_v47, %v3767_v2 }
 0x32c   : > { %v3835_v62 = vmax.f32 %v3803_v55, 0.0  ;;  %4900 = vmatmul.msk.f32.gmra.mxu3 %vm853_vm2, %v3013_v54  ;;  %v4086_v55 = vld [vmem:[%s5161_s26 + $0x40] sm:$0xff] }
 0x32d   : > { %4953 = vmatmul.msk.f32.gmra.mxu2 %vm606_vm1, %v4086_v55 }
 0x32e   : > { %4915 = vmatmul.msk.f32.gmra.mxu1 %vm853_vm2, %v3835_v62  ;;  %v2982_v62 = vrot.slane %v6252_v16, 1 }
 0x32f   : > { %v3680_v7 = vpop.f32.mrf.mxu3 }
 0x330   : > { %v3768_v29 = vadd.f32 %v3680_v7, %v3525_v27  ;;  %v6806_v27 = vpop.f32.mrf.mxu1  ;;  %v6810_v6 = vpop.f32.mrf.mxu0 }
 0x331   : > { %v6815_v52 = vpop.f32.mrf.mxu2 }
 0x332   : > { %v3804_v2 = vadd.f32 %v6721_v47, %v3768_v29  ;;  %v4087_v29 = vld [vmem:[%s5161_s26 + $0x48] sm:$0xff] }
 0x334   : > { %v3836_v63 = vmax.f32 %v3804_v2, 0.0  ;;  %4901 = vmatmul.msk.f32.gmra.mxu3 %vm853_vm2, %v3056_v12  ;;  %v3014_v2 = vsel %vm1156_vm3, %v2982_v62, %v2998_v60  ;;  %v3030_v12 = vsel %vm1156_vm3, %v2998_v60, %v2982_v62 }
 0x335   : > { %4954 = vmatmul.msk.f32.gmra.mxu2 %vm606_vm1, %v4087_v29  ;;  %v2999_v29 = vrot.slane %v6286_v56, 1 }
 0x336   : > { %4916 = vmatmul.msk.f32.gmra.mxu1 %vm853_vm2, %v3836_v63 }
 0x337   : > { %v3683_v37 = vpop.f32.mrf.mxu3 }
 0x338   : > { %v3769_v54 = vadd.f32 %v3683_v37, %v3526_v15  ;;  %v4088_v15 = vld [vmem:[%s5161_s26 + $0x50] sm:$0xff]  ;;  %v3058_v37 = vsel %vm1123_vm6, %v3030_v12, 0.0  ;;  %v6831_v59 = vpop.f32.mrf.mxu0  ;;  %v4089_v12 = vld [vmem:[%s5161_s26 + $0x58] sm:$0xff] }
 0x339   : > { %v6835_v60 = vpop.f32.mrf.mxu2 }
 0x33a   : > { %v3805_v7 = vadd.f32 %v6721_v47, %v3769_v54  ;;  %v6828_v54 = vpop.f32.mrf.mxu1 }
 0x33c   : > { %v3837_v50 = vmax.f32 %v3805_v7, 0.0  ;;  %4902 = vmatmul.msk.f32.gmra.mxu3 %vm853_vm2, %v3014_v2 }
 0x33d   : > { %4955 = vmatmul.msk.f32.gmra.mxu2 %vm606_vm1, %v4088_v15 }
 0x33e   : > { %4917 = vmatmul.msk.f32.gmra.mxu1 %vm853_vm2, %v3837_v50  ;;  %v2983_v50 = vrot.slane %v6292_v24, 1 }
 0x33f   : > { %v3686_v16 = vpop.f32.mrf.mxu3 }
 0x340   : > { %v3770_v55 = vadd.f32 %v3686_v16, %v3527_v49  ;;  %v7338_v49 = vld [vmem:[#allocation30_spill] sm:$0xff]  ;;  %v3015_v5 = vsel %vm1156_vm3, %v2983_v50, %v2999_v29 }
 0x341   : > { %v2818_v16 = vadd.f32 %v6498_v38, %v7338_v49  ;;  %v6853_v38 = vpop.f32.mrf.mxu0 }
 0x342   : > { %v3806_v63 = vadd.f32 %v6721_v47, %v3770_v55  ;;  %v6850_v24 = vpop.f32.mrf.mxu1 }
 0x344   : > { %v3838_v7 = vmax.f32 %v3806_v63, 0.0  ;;  %4903 = vmatmul.msk.f32.gmra.mxu3 %vm853_vm2, %v3058_v37  ;;  %v3286_v63 = vadd.f32 %v7339_v32, %v2818_v16 }
 0x345   : > { %4956 = vmatmul.msk.f32.gmra.mxu2 %vm606_vm1, %v4089_v12 }
 0x346   : > { %4918 = vmatmul.msk.f32.gmra.mxu1 %vm853_vm2, %v3838_v7  ;;  %v3529_v56 = vadd.f32 %v6752_v3, %v3286_v63  ;;  %v6855_v7 = vpop.f32.mrf.mxu2 }
 0x347   : > { %v3689_v62 = vpop.f32.mrf.mxu3 }
 0x348   : > { %v3771_v2 = vadd.f32 %v3689_v62, %v3528_v36  ;;  %v3031_v62 = vsel %vm1156_vm3, %v2999_v29, %v2983_v50 }
 0x349   : > { %v3060_v3 = vsel %vm1123_vm6, %v3031_v62, 0.0  ;;  %v4091_v62 = vld [vmem:[%s5161_s26 + $0x68] sm:$0xff] }
 0x34a   : > { %v3807_v55 = vadd.f32 %v6721_v47, %v3771_v2  ;;  %v7340_v2 = vld [vmem:[#allocation31_spill] sm:$0xff]  ;;  %v6871_v50 = vpop.f32.mrf.mxu1 }
 0x34b   : > { %v2819_v49 = vadd.f32 %v6518_v30, %v7340_v2  ;;  %v3000_v30 = vrot.slane %v6326_v51, 1 }
 0x34c   : > { %v3839_v15 = vmax.f32 %v3807_v55, 0.0  ;;  %4904 = vmatmul.msk.f32.gmra.mxu3 %vm853_vm2, %v3015_v5  ;;  %v4090_v55 = vld [vmem:[%s5161_s26 + $0x60] sm:$0xff] }
 0x34d   : > { %4957 = vmatmul.msk.f32.gmra.mxu2 %vm606_vm1, %v4090_v55  ;;  %v3287_v12 = vadd.f32 %v6466_v48, %v2819_v49 }
 0x34e   : > { %4919 = vmatmul.msk.f32.gmra.mxu1 %vm853_vm2, %v3839_v15  ;;  %v6873_v15 = vpop.f32.mrf.mxu0 }
 0x34f   : > { %v3692_v37 = vpop.f32.mrf.mxu3  ;;  %v3530_v32 = vadd.f32 %v6772_v28, %v3287_v12 }
 0x350   : > { %v3772_v36 = vadd.f32 %v3692_v37, %v3529_v56  ;;  %v2984_v56 = vrot.slane %v6334_v4, 1  ;;  %v7341_v37 = vld [vmem:[#allocation32_spill] sm:$0xff] }
 0x351   : > { %v2820_v48 = vadd.f32 %v6536_v25, %v7341_v37 }
 0x352   : > { %v3808_v16 = vadd.f32 %v6721_v47, %v3772_v36  ;;  %v6878_v36 = vpop.f32.mrf.mxu2  ;;  %v3016_v2 = vsel %vm1156_vm3, %v2984_v56, %v3000_v30  ;;  %v3032_v55 = vsel %vm1156_vm3, %v3000_v30, %v2984_v56 }
 0x353   : > { %v3288_v51 = vadd.f32 %v6485_v19, %v2820_v48 }
 0x354   : > { %v3840_v5 = vmax.f32 %v3808_v16, 0.0  ;;  %4905 = vmatmul.msk.f32.gmra.mxu3 %vm853_vm2, %v3060_v3  ;;  %v7342_v3 = vld [vmem:[#allocation33_spill] sm:$0xff] }
 0x355   : > { %4958 = vmatmul.msk.f32.gmra.mxu2 %vm606_vm1, %v4091_v62  ;;  %v3531_v4 = vadd.f32 %v6791_v39, %v3288_v51  ;;  %v2821_v12 = vadd.f32 %v6556_v43, %v7342_v3  ;;  %v3062_v39 = vsel %vm1123_vm6, %v3032_v55, 0.0  ;;  %v4093_v51 = vld [vmem:[%s5161_s26 + $0x78] sm:$0xff] }
 0x356   : > { %4920 = vmatmul.msk.f32.gmra.mxu1 %vm853_vm2, %v3840_v5  ;;  %v6893_v5 = vpop.f32.mrf.mxu1 }
 0x357   : > { %v3695_v29 = vpop.f32.mrf.mxu3 }
 0x358   : > { %v3773_v63 = vadd.f32 %v3695_v29, %v3530_v32  ;;  %v4092_v32 = vld [vmem:[%s5161_s26 + $0x70] sm:$0xff]  ;;  %v6897_v29 = vpop.f32.mrf.mxu0 }
 0x35a   : > { %v3809_v28 = vadd.f32 %v6721_v47, %v3773_v63  ;;  %v3289_v63 = vadd.f32 %v6505_v20, %v2821_v12  ;;  %v6903_v37 = vpop.f32.mrf.mxu2  ;;  %v7345_v12 = vld [vmem:[#allocation4_spill] sm:$0xff] }
 0x35c   : > { %v3841_v49 = vmax.f32 %v3809_v28, 0.0  ;;  %4906 = vmatmul.msk.f32.gmra.mxu3 %vm853_vm2, %v3016_v2  ;;  %v3532_v43 = vadd.f32 %v6810_v6, %v3289_v63  ;;  %v7343_v28 = vld [vmem:[#allocation34_spill] sm:$0xff] }
 0x35d   : > { %4959 = vmatmul.msk.f32.gmra.mxu2 %vm606_vm1, %v4092_v32  ;;  %v2822_v62 = vadd.f32 %v6577_v8, %v7343_v28  ;;  %v4094_v32 = vld [vmem:[%s5161_s26 + $0x80] sm:$0xff] }
 0x35e   : > { %4921 = vmatmul.msk.f32.gmra.mxu1 %vm853_vm2, %v3841_v49  ;;  %v6914_v49 = vpop.f32.mrf.mxu1 }
 0x35f   : > { %v3698_v25 = vpop.f32.mrf.mxu3  ;;  %v3290_v20 = vadd.f32 %v6522_v22, %v2822_v62 }
 0x360   : > { %v3774_v16 = vadd.f32 %v3698_v25, %v3531_v4  ;;  %v7344_v25 = vld [vmem:[#allocation5_spill] sm:$0xff]  ;;  %v3473_v6 = vpop.f32.mrf.mxu0 }
 0x362   : > { %v3810_v19 = vadd.f32 %v6721_v47, %v3774_v16  ;;  %v3533_v16 = vadd.f32 %v6831_v59, %v3290_v20  ;;  %v6919_v55 = vpop.f32.mrf.mxu2  ;;  %v2986_v59 = vrot.slane %v6395_v0, 1 }
 0x364   : > { %v3842_v30 = vmax.f32 %v3810_v19, 0.0  ;;  %4907 = vmatmul.msk.f32.gmra.mxu3 %vm853_vm2, %v3062_v39  ;;  %v2823_v19 = vadd.f32 %v6597_v14, %v7345_v12 }
 0x365   : > { %4960 = vmatmul.msk.f32.gmra.mxu2 %vm606_vm1, %v4093_v51  ;;  %v7347_v51 = vld [vmem:[#allocation3_spill] sm:$0xff] }
 0x366   : > { %4922 = vmatmul.msk.f32.gmra.mxu1 %vm853_vm2, %v3842_v30  ;;  %v3291_v39 = vadd.f32 %v6543_v61, %v2823_v19  ;;  %v7346_v30 = vld [vmem:[#allocation6_spill] sm:$0xff]  ;;  %v2824_v20 = vadd.f32 %v6614_v26, %v7347_v51 }
 0x367   : > { %v3701_v56 = vpop.f32.mrf.mxu3 }
 0x368   : > { %v3775_v48 = vadd.f32 %v3701_v56, %v3532_v43  ;;  %v3002_v43 = vrot.slane %v6397_v57, 1  ;;  %v6932_v56 = vpop.f32.mrf.mxu1  ;;  %v3534_v14 = vadd.f32 %v6853_v38, %v3291_v39  ;;  %v3476_v28 = vpop.f32.mrf.mxu0  ;;  %v3292_v57 = vadd.f32 %v6564_v42, %v2824_v20  ;;  %v4096_v39 = vld [vmem:[%s5161_s26 + $0x90] sm:$0xff] }
 0x36a   : > { %v3811_v2 = vadd.f32 %v6721_v47, %v3775_v48  ;;  %v3018_v61 = vsel %vm1156_vm3, %v2986_v59, %v3002_v43 }
 0x36c   : > { %v3843_v4 = vmax.f32 %v3811_v2, 0.0  ;;  %4908 = vmatmul.msk.f32.gmra.mxu3 %vm853_vm2, %v7344_v25  ;;  %v4231_v48 = vpop.f32.mrf.mxu2  ;;  %v3535_v25 = vadd.f32 %v6873_v15, %v3292_v57  ;;  %v6974_v57 = vld [vmem:[%s7235_s10] ss:$0 sm:$0xff] }
 0x36d   : > { %4961 = vmatmul.msk.f32.gmra.mxu2 %vm606_vm1, %v4094_v32 }
 0x36e   : > { %4923 = vmatmul.msk.f32.gmra.mxu1 %vm853_vm2, %v3843_v4  ;;  %v4095_v4 = vld [vmem:[%s5161_s26 + $0x88] sm:$0xff] }
 0x36f   : > { %v3704_v8 = vpop.f32.mrf.mxu3 }
 0x370   : > { %v3776_v3 = vadd.f32 %v3704_v8, %v3533_v16  ;;  %v3034_v16 = vsel %vm1156_vm3, %v3002_v43, %v2986_v59  ;;  %v6949_v12 = vpop.f32.mrf.mxu1  ;;  %v3479_v19 = vpop.f32.mrf.mxu0 }
 0x371   : > { %v3066_v42 = vsel %vm1123_vm6, %v3034_v16, 0.0  ;;  %v6979_v16 = vld [vmem:[%s7233_s8] ss:$0 sm:$0xff] }
 0x372   : > { %v3812_v22 = vadd.f32 %v6721_v47, %v3776_v3 }
 0x374   : > { %v3844_v63 = vmax.f32 %v3812_v22, 0.0  ;;  %4909 = vmatmul.msk.f32.gmra.mxu3 %vm853_vm2, %v7346_v30  ;;  %v4234_v8 = vpop.f32.mrf.mxu2  ;;  %v7348_v22 = vld [vmem:[#allocation25_spill] sm:$0xff] }
 0x375   : > { %4962 = vmatmul.msk.f32.gmra.mxu2 %vm606_vm1, %v4095_v4  ;;  %v2825_v32 = vadd.f32 %v6635_v45, %v7348_v22 }
 0x376   : > { %4924 = vmatmul.msk.f32.gmra.mxu1 %vm853_vm2, %v3844_v63 }
 0x377   : > { %v3707_v62 = vpop.f32.mrf.mxu3  ;;  %v3293_v63 = vadd.f32 %v7349_v23, %v2825_v32 }
 0x378   : > { %v3777_v2 = vadd.f32 %v3707_v62, %v3534_v14  ;;  %v7350_v62 = vld [vmem:[#allocation19_spill] sm:$0xff]  ;;  %v6966_v51 = vpop.f32.mrf.mxu1  ;;  %v3482_v20 = vpop.f32.mrf.mxu0 }
 0x379   : > { %v3536_v59 = vadd.f32 %v6897_v29, %v3293_v63  ;;  %v2826_v45 = vadd.f32 %v6658_v10, %v7350_v62  ;;  %v4235_v62 = vadd.f32 %v6974_v57, %v4234_v8 }
 0x37a   : > { %v3813_v0 = vadd.f32 %v6721_v47, %v3777_v2 }
 0x37c   : > { %v3845_v38 = vmax.f32 %v3813_v0, 0.0  ;;  %4910 = vmatmul.msk.f32.gmra.mxu3 %vm853_vm2, %v3018_v61  ;;  %v4237_v35 = vpop.f32.mrf.mxu2  ;;  %v4097_v61 = vld [vmem:[%s5161_s26 + $0x98] sm:$0xff]  ;;  %v3294_v0 = vadd.f32 %v6602_v53, %v2826_v45  ;;  %v4099_v45 = vld [vmem:[%s5161_s26 + $0xa8] sm:$0xff] }
 0x37d   : > { %4963 = vmatmul.msk.f32.gmra.mxu2 %vm606_vm1, %v4096_v39 }
 0x37e   : > { %4925 = vmatmul.msk.f32.gmra.mxu1 %vm853_vm2, %v3845_v38  ;;  %v3537_v4 = vadd.f32 %v3473_v6, %v3294_v0 }
 0x37f   : > { %v3710_v26 = vpop.f32.mrf.mxu3 }
 0x380   : > { %v3778_v3 = vadd.f32 %v3710_v26, %v3535_v25  ;;  %v7351_v26 = vld [vmem:[#allocation26_spill] sm:$0xff]  ;;  %v3485_v23 = vpop.f32.mrf.mxu0 }
 0x381   : > { %v2827_v53 = vadd.f32 %v6680_v34, %v7351_v26 }
 0x382   : > { %v3814_v15 = vadd.f32 %v6721_v47, %v3778_v3  ;;  %v4232_v3 = vadd.f32 %v6974_v57, %v4231_v48 }
 0x383   : > { %v3295_v32 = vadd.f32 %v6622_v33, %v2827_v53 }
 0x384   : > { %v3846_v30 = vmax.f32 %v3814_v15, 0.0  ;;  %4911 = vmatmul.msk.f32.gmra.mxu3 %vm853_vm2, %v3066_v42  ;;  %v4240_v10 = vpop.f32.mrf.mxu2  ;;  %v4098_v42 = vld [vmem:[%s5161_s26 + $0xa0] sm:$0xff] }
 0x385   : > { %4964 = vmatmul.msk.f32.gmra.mxu2 %vm606_vm1, %v4097_v61  ;;  %v3538_v63 = vadd.f32 %v3476_v28, %v3295_v32  ;;  %v7353_v61 = vld [vmem:[#allocation15_spill] sm:$0xff]  ;;  %v4238_v32 = vadd.f32 %v6974_v57, %v4237_v35 }
 0x386   : > { %4926 = vmatmul.msk.f32.gmra.mxu1 %vm853_vm2, %v3846_v30 }
 0x387   : > { %v3713_v43 = vpop.f32.mrf.mxu3 }
 0x388   : > { %v3779_v14 = vadd.f32 %v3713_v43, %v3536_v59  ;;  %v7352_v43 = vld [vmem:[#allocation7_spill] sm:$0xff]  ;;  %v3488_v26 = vpop.f32.mrf.mxu0 }
 0x38a   : > { %v3815_v2 = vadd.f32 %v6721_v47, %v3779_v14  ;;  %v2828_v14 = vadd.f32 %v6700_v17, %v7352_v43 }
 0x38c   : > { %v3847_v29 = vmax.f32 %v3815_v2, 0.0  ;;  %v4243_v34 = vpop.f32.mrf.mxu2  ;;  %v3296_v0 = vadd.f32 %v7353_v61, %v2828_v14 }
 0x38d   : > { %4965 = vmatmul.msk.f32.gmra.mxu2 %vm606_vm1, %v4098_v42 }
 0x38e   : > { %4927 = vmatmul.msk.f32.gmra.mxu1 %vm853_vm2, %v3847_v29 }
 0x38f   : > { %v3716_v38 = vpop.f32.mrf.mxu3 }
 0x390   : > { %v3780_v25 = vadd.f32 %v3716_v38, %v3537_v4  ;;  %v3539_v38 = vadd.f32 %v3479_v19, %v3296_v0  ;;  %v3491_v35 = vpop.f32.mrf.mxu0 }
 0x392   : > { %v3816_v6 = vadd.f32 %v6721_v47, %v3780_v25 }
 0x393   : > { %v3982_v22 = vpop.f32.mrf.mxu1 }
 0x394   : > { %v3848_v15 = vmax.f32 %v3816_v6, 0.0  ;;  %v3983_v39 = vadd.f32 %v6979_v16, %v3982_v22  ;;  %v4246_v17 = vpop.f32.mrf.mxu2 }
 0x395   : > { %4966 = vmatmul.msk.f32.gmra.mxu2 %vm606_vm1, %v4099_v45 }
 0x396   : > { %v4327_v30 = vadd.f32 %v4232_v3, %v3983_v39  ;;  %4928 = vmatmul.msk.f32.gmra.mxu1 %vm853_vm2, %v3848_v15  ;;  %v7354_v3 = vld [vmem:[#allocation24_spill] sm:$0xff]  ;;  %v4100_v15 = vld [vmem:[%s5161_s26 + $0xb0] sm:$0xff] }
 0x397   : > { %v3719_v48 = vpop.f32.mrf.mxu3  ;;  %v2829_v42 = vadd.f32 %v6725_v21, %v7354_v3 }
 0x398   : > { %v4359_v59 = vmax.f32 %v4327_v30, 0.0  ;;  %v3781_v33 = vadd.f32 %v3719_v48, %v3538_v63 }
 0x399   : > { %v3297_v39 = vadd.f32 %v6665_v44, %v2829_v42  ;;  %v4241_v44 = vadd.f32 %v6974_v57, %v4240_v10  ;;  %v4102_v42 = vld [vmem:[%s5161_s26 + $0xc0] sm:$0xff] }
 0x39a   : > { %4392 = vst.msk [vmem:[%s6994_s30] sm:$0xff] %vm4391_vm7, %v4359_v59  ;;  %v3817_v28 = vadd.f32 %v6721_v47, %v3781_v33 }
 0x39b   : > { %v3985_v2 = vpop.f32.mrf.mxu1  ;;  %v3540_v48 = vadd.f32 %v3482_v20, %v3297_v39 }
 0x39c   : > { %v3849_v29 = vmax.f32 %v3817_v28, 0.0  ;;  %v3986_v4 = vadd.f32 %v6979_v16, %v3985_v2  ;;  %v7355_v28 = vld [vmem:[#allocation8_spill] sm:$0xff]  ;;  %v4101_v2 = vld [vmem:[%s5161_s26 + $0xb8] sm:$0xff] }
 0x39d   : > { %4967 = vmatmul.msk.f32.gmra.mxu2 %vm606_vm1, %v4100_v15 }
 0x39e   : > { %v4328_v25 = vadd.f32 %v4235_v62, %v3986_v4  ;;  %4929 = vmatmul.msk.f32.gmra.mxu1 %vm853_vm2, %v3849_v29  ;;  %v2830_v62 = vadd.f32 %v6749_v40, %v7355_v28 }
 0x39f   : > { %v3722_v53 = vpop.f32.mrf.mxu3 }
 0x3a0   : > { %v4360_v6 = vmax.f32 %v4328_v25, 0.0  ;;  %v3782_v8 = vadd.f32 %v3722_v53, %v3539_v38  ;;  %v4249_v21 = vpop.f32.mrf.mxu2  ;;  %v3298_v61 = vadd.f32 %v6684_v18, %v2830_v62  ;;  %v4244_v18 = vadd.f32 %v6974_v57, %v4243_v34 }
 0x3a2   : > { %4393 = vst.msk [vmem:[%s6994_s30 + $0x8] sm:$0xff] %vm4391_vm7, %v4360_v6  ;;  %v3818_v22 = vadd.f32 %v6721_v47, %v3782_v8  ;;  %v3541_v4 = vadd.f32 %v3485_v23, %v3298_v61  ;;  %v7356_v8 = vld [vmem:[#allocation23_spill] sm:$0xff] }
 0x3a3   : > { %v3988_v19 = vpop.f32.mrf.mxu1  ;;  %v2831_v10 = vadd.f32 %v6769_v41, %v7356_v8 }
 0x3a4   : > { %v3850_v63 = vmax.f32 %v3818_v22, 0.0  ;;  %v3989_v30 = vadd.f32 %v6979_v16, %v3988_v19  ;;  %v3494_v22 = vpop.f32.mrf.mxu0 }
 0x3a5   : > { %4968 = vmatmul.msk.f32.gmra.mxu2 %vm606_vm1, %v4101_v2 }
 0x3a6   : > { %v4329_v59 = vadd.f32 %v4238_v32, %v3989_v30  ;;  %4930 = vmatmul.msk.f32.gmra.mxu1 %vm853_vm2, %v3850_v63  ;;  %v3299_v32 = vadd.f32 %v6707_v1, %v2831_v10  ;;  %v4247_v1 = vadd.f32 %v6974_v57, %v4246_v17 }
 0x3a7   : > { %v3725_v33 = vpop.f32.mrf.mxu3 }
 0x3a8   : > { %v4361_v43 = vmax.f32 %v4329_v59, 0.0  ;;  %v3783_v14 = vadd.f32 %v3725_v33, %v3540_v48  ;;  %v4252_v40 = vpop.f32.mrf.mxu2  ;;  %v3542_v39 = vadd.f32 %v3488_v26, %v3299_v32  ;;  %v7357_v59 = vld [vmem:[#allocation9_spill] sm:$0xff]  ;;  %v7359_v32 = vld [vmem:[#allocation11_spill] sm:$0xff] }
 0x3a9   : > { %v2832_v33 = vadd.f32 %v6787_v9, %v7357_v59 }
 0x3aa   : > { %4394 = vst.msk [vmem:[%s6994_s30 + $0x10] sm:$0xff] %vm4391_vm7, %v4361_v43  ;;  %v3819_v45 = vadd.f32 %v6721_v47, %v3783_v14  ;;  %v4103_v14 = vld [vmem:[%s5161_s26 + $0xc8] sm:$0xff] }
 0x3ab   : > { %v3991_v20 = vpop.f32.mrf.mxu1  ;;  %v3300_v26 = vadd.f32 %v6736_v31, %v2832_v33  ;;  %v4250_v31 = vadd.f32 %v6974_v57, %v4249_v21 }
 0x3ac   : > { %v3851_v0 = vmax.f32 %v3819_v45, 0.0  ;;  %v3992_v29 = vadd.f32 %v6979_v16, %v3991_v20 }
 0x3ad   : > { %4969 = vmatmul.msk.f32.gmra.mxu2 %vm606_vm1, %v4102_v42  ;;  %v3543_v2 = vadd.f32 %v3491_v35, %v3300_v26 }
 0x3ae   : > { %v4330_v38 = vadd.f32 %v4241_v44, %v3992_v29  ;;  %4931 = vmatmul.msk.f32.gmra.mxu1 %vm853_vm2, %v3851_v0  ;;  %v3497_v44 = vpop.f32.mrf.mxu0  ;;  %v7358_v29 = vld [vmem:[#allocation10_spill] sm:$0xff] }
 0x3af   : > { %v3728_v25 = vpop.f32.mrf.mxu3 }
 0x3b0   : > { %v4362_v53 = vmax.f32 %v4330_v38, 0.0  ;;  %v3784_v6 = vadd.f32 %v3728_v25, %v3541_v4  ;;  %v4255_v63 = vpop.f32.mrf.mxu2  ;;  %v2833_v4 = vadd.f32 %v6806_v27, %v7358_v29  ;;  %v4104_v25 = vld [vmem:[%s5161_s26 + $0xd0] sm:$0xff] }
 0x3b2   : > { %4395 = vst.msk [vmem:[%s6994_s30 + $0x18] sm:$0xff] %vm4391_vm7, %v4362_v53  ;;  %v3820_v3 = vadd.f32 %v6721_v47, %v3784_v6  ;;  %v3301_v35 = vadd.f32 %v6756_v58, %v2833_v4  ;;  %v4253_v58 = vadd.f32 %v6974_v57, %v4252_v40 }
 0x3b3   : > { %v3994_v23 = vpop.f32.mrf.mxu1 }
 0x3b4   : > { %v3852_v15 = vmax.f32 %v3820_v3, 0.0  ;;  %v3995_v19 = vadd.f32 %v6979_v16, %v3994_v23  ;;  %v3544_v10 = vadd.f32 %v3494_v22, %v3301_v35 }
 0x3b5   : > { %4970 = vmatmul.msk.f32.gmra.mxu2 %vm606_vm1, %v4103_v14  ;;  %v7360_v14 = vld [vmem:[#allocation12_spill] sm:$0xff] }
 0x3b6   : > { %v4331_v41 = vadd.f32 %v4244_v18, %v3995_v19  ;;  %4932 = vmatmul.msk.f32.gmra.mxu1 %vm853_vm2, %v3852_v15  ;;  %v3500_v18 = vpop.f32.mrf.mxu0  ;;  %v2834_v15 = vadd.f32 %v6828_v54, %v7359_v32 }
 0x3b7   : > { %v3731_v30 = vpop.f32.mrf.mxu3 }
 0x3b8   : > { %v4363_v48 = vmax.f32 %v4331_v41, 0.0  ;;  %v3785_v34 = vadd.f32 %v3731_v30, %v3542_v39  ;;  %v4258_v20 = vpop.f32.mrf.mxu2  ;;  %v4105_v39 = vld [vmem:[%s5161_s26 + $0xd8] sm:$0xff]  ;;  %v3302_v41 = vadd.f32 %v6775_v13, %v2834_v15  ;;  %v4256_v13 = vadd.f32 %v6974_v57, %v4255_v63 }
 0x3ba   : > { %4396 = vst.msk [vmem:[%s6994_s30 + $0x20] sm:$0xff] %vm4391_vm7, %v4363_v48  ;;  %v3821_v43 = vadd.f32 %v6721_v47, %v3785_v34  ;;  %v3545_v34 = vadd.f32 %v3497_v44, %v3302_v41 }
 0x3bb   : > { %v3997_v28 = vpop.f32.mrf.mxu1 }
 0x3bc   : > { %v3853_v62 = vmax.f32 %v3821_v43, 0.0  ;;  %v3998_v45 = vadd.f32 %v6979_v16, %v3997_v28  ;;  %v2835_v28 = vadd.f32 %v6850_v24, %v7360_v14 }
 0x3bd   : > { %4971 = vmatmul.msk.f32.gmra.mxu2 %vm606_vm1, %v4104_v25  ;;  %v4107_v25 = vld [vmem:[%s5161_s26 + $0xe8] sm:$0xff] }
 0x3be   : > { %v4332_v9 = vadd.f32 %v4247_v1, %v3998_v45  ;;  %4933 = vmatmul.msk.f32.gmra.mxu1 %vm853_vm2, %v3853_v62  ;;  %v3503_v40 = vpop.f32.mrf.mxu0  ;;  %v4106_v62 = vld [vmem:[%s5161_s26 + $0xe0] sm:$0xff]  ;;  %v3303_v44 = vadd.f32 %v6793_v11, %v2835_v28  ;;  %v4259_v11 = vadd.f32 %v6974_v57, %v4258_v20 }
 0x3bf   : > { %v3734_v61 = vpop.f32.mrf.mxu3 }
 0x3c0   : > { %v4364_v0 = vmax.f32 %v4332_v9, 0.0  ;;  %v3786_v17 = vadd.f32 %v3734_v61, %v3543_v2  ;;  %v4261_v27 = vpop.f32.mrf.mxu2  ;;  %v3546_v61 = vadd.f32 %v3500_v18, %v3303_v44 }
 0x3c2   : > { %4397 = vst.msk [vmem:[%s6994_s30 + $0x28] sm:$0xff] %vm4391_vm7, %v4364_v0  ;;  %v3822_v38 = vadd.f32 %v6721_v47, %v3786_v17 }
 0x3c3   : > { %v4000_v53 = vpop.f32.mrf.mxu1 }
 0x3c4   : > { %v3854_v6 = vmax.f32 %v3822_v38, 0.0  ;;  %v4001_v8 = vadd.f32 %v6979_v16, %v4000_v53  ;;  %v7361_v38 = vld [vmem:[#allocation13_spill] sm:$0xff] }
 0x3c5   : > { %4972 = vmatmul.msk.f32.gmra.mxu2 %vm606_vm1, %v4105_v39  ;;  %v2836_v63 = vadd.f32 %v6871_v50, %v7361_v38 }
 0x3c6   : > { %v4333_v3 = vadd.f32 %v4250_v31, %v4001_v8  ;;  %4934 = vmatmul.msk.f32.gmra.mxu1 %vm853_vm2, %v3854_v6  ;;  %v3506_v53 = vpop.f32.mrf.mxu0 }
 0x3c7   : > { %v3737_v42 = vpop.f32.mrf.mxu3  ;;  %v3304_v6 = vadd.f32 %v6815_v52, %v2836_v63  ;;  %v4262_v52 = vadd.f32 %v6974_v57, %v4261_v27 }
 0x3c8   : > { %v4365_v23 = vmax.f32 %v4333_v3, 0.0  ;;  %v3787_v21 = vadd.f32 %v3737_v42, %v3544_v10  ;;  %v4264_v54 = vpop.f32.mrf.mxu2 }
 0x3c9   : > { %v3547_v3 = vadd.f32 %v3503_v40, %v3304_v6  ;;  %v4109_v40 = vld [vmem:[%s5161_s26 + $0xf8] sm:$0xff]  ;;  %v7364_v6 = vld [vmem:[#allocation17_spill] sm:$0xff] }
 0x3ca   : > { %4398 = vst.msk [vmem:[%s6994_s30 + $0x30] sm:$0xff] %vm4391_vm7, %v4365_v23  ;;  %v3823_v19 = vadd.f32 %v6721_v47, %v3787_v21  ;;  %v7362_v21 = vld [vmem:[#allocation14_spill] sm:$0xff] }
 0x3cb   : > { %v4003_v22 = vpop.f32.mrf.mxu1  ;;  %v2837_v32 = vadd.f32 %v6893_v5, %v7362_v21 }
 0x3cc   : > { %v3855_v30 = vmax.f32 %v3823_v19, 0.0  ;;  %v4004_v48 = vadd.f32 %v6979_v16, %v4003_v22  ;;  %v4108_v19 = vld [vmem:[%s5161_s26 + $0xf0] sm:$0xff] }
 0x3cd   : > { %4973 = vmatmul.msk.f32.gmra.mxu2 %vm606_vm1, %v4106_v62  ;;  %v3305_v39 = vadd.f32 %v6835_v60, %v2837_v32  ;;  %v4265_v60 = vadd.f32 %v6974_v57, %v4264_v54  ;;  %v7363_v54 = vld [vmem:[#allocation16_spill] sm:$0xff] }
 0x3ce   : > { %v4334_v59 = vadd.f32 %v4253_v58, %v4004_v48  ;;  %4935 = vmatmul.msk.f32.gmra.mxu1 %vm853_vm2, %v3855_v30  ;;  %v3509_v30 = vpop.f32.mrf.mxu0 }
 0x3cf   : > { %v3740_v33 = vpop.f32.mrf.mxu3  ;;  %v3548_v48 = vadd.f32 %v3506_v53, %v3305_v39 }
 0x3d0   : > { %v4366_v43 = vmax.f32 %v4334_v59, 0.0  ;;  %v3788_v1 = vadd.f32 %v3740_v33, %v3545_v34  ;;  %v4267_v24 = vpop.f32.mrf.mxu2 }
 0x3d2   : > { %4399 = vst.msk [vmem:[%s6994_s30 + $0x38] sm:$0xff] %vm4391_vm7, %v4366_v43  ;;  %v3824_v26 = vadd.f32 %v6721_v47, %v3788_v1  ;;  %v2838_v43 = vadd.f32 %v6914_v49, %v6648_v46 }
 0x3d3   : > { %v4006_v45 = vpop.f32.mrf.mxu1 }
 0x3d4   : > { %v3856_v2 = vmax.f32 %v3824_v26, 0.0  ;;  %v4007_v9 = vadd.f32 %v6979_v16, %v4006_v45  ;;  %v3306_v28 = vadd.f32 %v6855_v7, %v2838_v43 }
 0x3d5   : > { %4974 = vmatmul.msk.f32.gmra.mxu2 %vm606_vm1, %v4107_v25 }
 0x3d6   : > { %v4335_v0 = vadd.f32 %v4256_v13, %v4007_v9  ;;  %4936 = vmatmul.msk.f32.gmra.mxu1 %vm853_vm2, %v3856_v2  ;;  %v3549_v62 = vadd.f32 %v3509_v30, %v3306_v28  ;;  %v3512_v49 = vpop.f32.mrf.mxu0 }
 0x3d7   : > { %v3743_v17 = vpop.f32.mrf.mxu3 }
 0x3d8   : > { %v4367_v29 = vmax.f32 %v4335_v0, 0.0  ;;  %v3789_v4 = vadd.f32 %v3743_v17, %v3546_v61  ;;  %v4270_v18 = vpop.f32.mrf.mxu2  ;;  %v2839_v61 = vadd.f32 %v6932_v56, %v7363_v54  ;;  %v4268_v0 = vadd.f32 %v6974_v57, %v4267_v24 }
 0x3d9   : > { %v4271_v24 = vadd.f32 %v6974_v57, %v4270_v18 }
 0x3da   : > { %4400 = vst.msk [vmem:[%s6994_s30 + $0x40] sm:$0xff] %vm4391_vm7, %v4367_v29  ;;  %v3825_v31 = vadd.f32 %v6721_v47, %v3789_v4  ;;  %v3307_v29 = vadd.f32 %v6878_v36, %v2839_v61 }
 0x3db   : > { %v4009_v35 = vpop.f32.mrf.mxu1 }
 0x3dc   : > { %v3857_v8 = vmax.f32 %v3825_v31, 0.0  ;;  %v4010_v10 = vadd.f32 %v6979_v16, %v4009_v35  ;;  %v3550_v63 = vadd.f32 %v3512_v49, %v3307_v29 }
 0x3dd   : > { %4975 = vmatmul.msk.f32.gmra.mxu2 %vm606_vm1, %v4108_v19 }
 0x3de   : > { %v4336_v50 = vadd.f32 %v4259_v11, %v4010_v10  ;;  %4937 = vmatmul.msk.f32.gmra.mxu1 %vm853_vm2, %v3857_v8  ;;  %v3515_v35 = vpop.f32.mrf.mxu0  ;;  %v2840_v8 = vadd.f32 %v6949_v12, %v7364_v6 }
 0x3df   : > { %v3746_v42 = vpop.f32.mrf.mxu3 }
 0x3e0   : > { %v4368_v23 = vmax.f32 %v4336_v50, 0.0  ;;  %v3790_v20 = vadd.f32 %v3746_v42, %v3547_v3  ;;  %v4273_v34 = vpop.f32.mrf.mxu2  ;;  %v3308_v3 = vadd.f32 %v6903_v37, %v2840_v8 }
 0x3e1   : > { %v4274_v37 = vadd.f32 %v6974_v57, %v4273_v34 }
 0x3e2   : > { %4401 = vst.msk [vmem:[%s6994_s30 + $0x48] sm:$0xff] %vm4391_vm7, %v4368_v23  ;;  %v3826_v15 = vadd.f32 %v6721_v47, %v3790_v20  ;;  %v3551_v23 = vadd.f32 %v3515_v35, %v3308_v3 }
 0x3e3   : > { %v4012_v58 = vpop.f32.mrf.mxu1 }
 0x3e4   : > { %v3858_v22 = vmax.f32 %v3826_v15, 0.0  ;;  %v4013_v41 = vadd.f32 %v6979_v16, %v4012_v58 }
 0x3e5   : > { %4976 = vmatmul.msk.f32.gmra.mxu2 %vm606_vm1, %v4109_v40 }
 0x3e6   : > { %v4337_v5 = vadd.f32 %v4262_v52, %v4013_v41  ;;  %4938 = vmatmul.msk.f32.gmra.mxu1 %vm853_vm2, %v3858_v22  ;;  %v7365_v52 = vld [vmem:[#allocation18_spill] sm:$0xff]  ;;  %v3518_v58 = vpop.f32.mrf.mxu0 }
 0x3e7   : > { %v3749_v59 = vpop.f32.mrf.mxu3  ;;  %v2841_v19 = vadd.f32 %v6966_v51, %v7365_v52 }
 0x3e8   : > { %v4369_v33 = vmax.f32 %v4337_v5, 0.0  ;;  %v3791_v27 = vadd.f32 %v3749_v59, %v3548_v48  ;;  %v4276_v46 = vpop.f32.mrf.mxu2 }
 0x3e9   : > { %v3309_v22 = vadd.f32 %v6919_v55, %v2841_v19  ;;  %v4277_v43 = vadd.f32 %v6974_v57, %v4276_v46 }
 0x3ea   : > { %4402 = vst.msk [vmem:[%s6994_s30 + $0x50] sm:$0xff] %vm4391_vm7, %v4369_v33  ;;  %v3827_v1 = vadd.f32 %v6721_v47, %v3791_v27 }
 0x3eb   : > { %v4015_v14 = vpop.f32.mrf.mxu1  ;;  %v3552_v48 = vadd.f32 %v3518_v58, %v3309_v22 }
 0x3ec   : > { %v3859_v26 = vmax.f32 %v3827_v1, 0.0  ;;  %v4016_v13 = vadd.f32 %v6979_v16, %v4015_v14 }
 0x3ee   : > { %v4338_v45 = vadd.f32 %v4265_v60, %v4016_v13  ;;  %4939 = vmatmul.msk.f32.gmra.mxu1 %vm853_vm2, %v3859_v26 }
 0x3ef   : > { %v3752_v44 = vpop.f32.mrf.mxu3 }
 0x3f0   : > { %v4370_v2 = vmax.f32 %v4338_v45, 0.0  ;;  %v3792_v9 = vadd.f32 %v3752_v44, %v3549_v62  ;;  %v4279_v11 = vpop.f32.mrf.mxu2 }
 0x3f1   : > { %v4280_v26 = vadd.f32 %v6974_v57, %v4279_v11 }
 0x3f2   : > { %4403 = vst.msk [vmem:[%s6994_s30 + $0x58] sm:$0xff] %vm4391_vm7, %v4370_v2  ;;  %v3828_v7 = vadd.f32 %v6721_v47, %v3792_v9 }
 0x3f3   : > { %v4018_v17 = vpop.f32.mrf.mxu1 }
 0x3f4   : > { %v3860_v4 = vmax.f32 %v3828_v7, 0.0  ;;  %v4019_v38 = vadd.f32 %v6979_v16, %v4018_v17 }
 0x3f6   : > { %v4339_v31 = vadd.f32 %v4268_v0, %v4019_v38  ;;  %4940 = vmatmul.msk.f32.gmra.mxu1 %vm853_vm2, %v3860_v4 }
 0x3f7   : > { %v3755_v25 = vpop.f32.mrf.mxu3 }
 0x3f8   : > { %v4371_v56 = vmax.f32 %v4339_v31, 0.0  ;;  %v3793_v53 = vadd.f32 %v3755_v25, %v3550_v63  ;;  %v4282_v21 = vpop.f32.mrf.mxu2 }
 0x3f9   : > { %v4283_v49 = vadd.f32 %v6974_v57, %v4282_v21 }
 0x3fa   : > { %4404 = vst.msk [vmem:[%s6994_s30 + $0x60] sm:$0xff] %vm4391_vm7, %v4371_v56  ;;  %v3829_v36 = vadd.f32 %v6721_v47, %v3793_v53 }
 0x3fb   : > { %v4021_v10 = vpop.f32.mrf.mxu1 }
 0x3fc   : > { %v3861_v50 = vmax.f32 %v3829_v36, 0.0  ;;  %v4022_v42 = vadd.f32 %v6979_v16, %v4021_v10 }
 0x3fe   : > { %v4340_v20 = vadd.f32 %v4271_v24, %v4022_v42  ;;  %4941 = vmatmul.msk.f32.gmra.mxu1 %vm853_vm2, %v3861_v50 }
 0x3ff   : > { %v3758_v32 = vpop.f32.mrf.mxu3 }
 0x400   : > { %v4372_v12 = vmax.f32 %v4340_v20, 0.0  ;;  %v3794_v15 = vadd.f32 %v3758_v32, %v3551_v23  ;;  %v4285_v51 = vpop.f32.mrf.mxu2 }
 0x401   : > { %v4286_v61 = vadd.f32 %v6974_v57, %v4285_v51 }
 0x402   : > { %4405 = vst.msk [vmem:[%s6994_s30 + $0x68] sm:$0xff] %vm4391_vm7, %v4372_v12  ;;  %v3830_v18 = vadd.f32 %v6721_v47, %v3794_v15 }
 0x403   : > { %v4024_v39 = vpop.f32.mrf.mxu1 }
 0x404   : > { %v3862_v41 = vmax.f32 %v3830_v18, 0.0  ;;  %v4025_v30 = vadd.f32 %v6979_v16, %v4024_v39 }
 0x406   : > { %v4341_v5 = vadd.f32 %v4274_v37, %v4025_v30  ;;  %4942 = vmatmul.msk.f32.gmra.mxu1 %vm853_vm2, %v3862_v41 }
 0x407   : > { %v3761_v59 = vpop.f32.mrf.mxu3 }
 0x408   : > { %v4373_v33 = vmax.f32 %v4341_v5, 0.0  ;;  %v3795_v27 = vadd.f32 %v3761_v59, %v3552_v48  ;;  %v4288_v14 = vpop.f32.mrf.mxu2 }
 0x409   : > { %v4289_v38 = vadd.f32 %v6974_v57, %v4288_v14 }
 0x40a   : > { %4406 = vst.msk [vmem:[%s6994_s30 + $0x70] sm:$0xff] %vm4391_vm7, %v4373_v33  ;;  %v3831_v34 = vadd.f32 %v6721_v47, %v3795_v27 }
 0x40b   : > { %v4027_v55 = vpop.f32.mrf.mxu1 }
 0x40c   : > { %v3863_v1 = vmax.f32 %v3831_v34, 0.0  ;;  %v4028_v60 = vadd.f32 %v6979_v16, %v4027_v55 }
 0x40e   : > { %v4342_v40 = vadd.f32 %v4277_v43, %v4028_v60  ;;  %4943 = vmatmul.msk.f32.gmra.mxu1 %vm853_vm2, %v3863_v1 }
 0x410   : > { %v4374_v28 = vmax.f32 %v4342_v40, 0.0  ;;  %v4291_v46 = vpop.f32.mrf.mxu2 }
 0x411   : > { %v4292_v53 = vadd.f32 %v6974_v57, %v4291_v46 }
 0x412   : > { %4407 = vst.msk [vmem:[%s6994_s30 + $0x78] sm:$0xff] %vm4391_vm7, %v4374_v28 }
 0x413   : > { %v4030_v13 = vpop.f32.mrf.mxu1 }
 0x414   : > { %v4031_v47 = vadd.f32 %v6979_v16, %v4030_v13 }
 0x416   : > { %v4343_v62 = vadd.f32 %v4280_v26, %v4031_v47 }
 0x418   : > { %v4375_v45 = vmax.f32 %v4343_v62, 0.0  ;;  %v4294_v0 = vpop.f32.mrf.mxu2 }
 0x419   : > { %v4295_v10 = vadd.f32 %v6974_v57, %v4294_v0 }
 0x41a   : > { %4408 = vst.msk [vmem:[%s6994_s30 + $0x80] sm:$0xff] %vm4391_vm7, %v4375_v45 }
 0x41b   : > { %v4033_v44 = vpop.f32.mrf.mxu1 }
 0x41c   : > { %v4034_v2 = vadd.f32 %v6979_v16, %v4033_v44 }
 0x41e   : > { %v4344_v9 = vadd.f32 %v4283_v49, %v4034_v2 }
 0x420   : > { %v4376_v54 = vmax.f32 %v4344_v9, 0.0  ;;  %v4297_v11 = vpop.f32.mrf.mxu2 }
 0x421   : > { %v4298_v21 = vadd.f32 %v6974_v57, %v4297_v11 }
 0x422   : > { %4409 = vst.msk [vmem:[%s6994_s30 + $0x88] sm:$0xff] %vm4391_vm7, %v4376_v54 }
 0x423   : > { %v4036_v7 = vpop.f32.mrf.mxu1 }
 0x424   : > { %v4037_v17 = vadd.f32 %v6979_v16, %v4036_v7 }
 0x426   : > { %v4345_v29 = vadd.f32 %v4286_v61, %v4037_v17 }
 0x428   : > { %v4377_v4 = vmax.f32 %v4345_v29, 0.0  ;;  %v4300_v36 = vpop.f32.mrf.mxu2 }
 0x429   : > { %v4301_v19 = vadd.f32 %v6974_v57, %v4300_v36 }
 0x42a   : > { %4410 = vst.msk [vmem:[%s6994_s30 + $0x90] sm:$0xff] %vm4391_vm7, %v4377_v4 }
 0x42b   : > { %v4039_v63 = vpop.f32.mrf.mxu1 }
 0x42c   : > { %v4040_v31 = vadd.f32 %v6979_v16, %v4039_v63 }
 0x42e   : > { %v4346_v25 = vadd.f32 %v4289_v38, %v4040_v31 }
 0x430   : > { %v4378_v56 = vmax.f32 %v4346_v25, 0.0  ;;  %v4303_v20 = vpop.f32.mrf.mxu2 }
 0x431   : > { %v4304_v41 = vadd.f32 %v6974_v57, %v4303_v20 }
 0x432   : > { %4411 = vst.msk [vmem:[%s6994_s30 + $0x98] sm:$0xff] %vm4391_vm7, %v4378_v56 }
 0x433   : > { %v4042_v35 = vpop.f32.mrf.mxu1 }
 0x434   : > { %v4043_v6 = vadd.f32 %v6979_v16, %v4042_v35 }
 0x436   : > { %v4347_v8 = vadd.f32 %v4292_v53, %v4043_v6 }
 0x438   : > { %v4379_v24 = vmax.f32 %v4347_v8, 0.0  ;;  %v4306_v37 = vpop.f32.mrf.mxu2 }
 0x439   : > { %v4307_v33 = vadd.f32 %v6974_v57, %v4306_v37 }
 0x43a   : > { %4412 = vst.msk [vmem:[%s6994_s30 + $0xa0] sm:$0xff] %vm4391_vm7, %v4379_v24 }
 0x43b   : > { %v4045_v3 = vpop.f32.mrf.mxu1 }
 0x43c   : > { %v4046_v50 = vadd.f32 %v6979_v16, %v4045_v3 }
 0x43e   : > { %v4348_v42 = vadd.f32 %v4295_v10, %v4046_v50 }
 0x440   : > { %v4380_v23 = vmax.f32 %v4348_v42, 0.0  ;;  %v4309_v5 = vpop.f32.mrf.mxu2 }
 0x441   : > { %v4310_v60 = vadd.f32 %v6974_v57, %v4309_v5 }
 0x442   : > { %4413 = vst.msk [vmem:[%s6994_s30 + $0xa8] sm:$0xff] %vm4391_vm7, %v4380_v23 }
 0x443   : > { %v4048_v32 = vpop.f32.mrf.mxu1 }
 0x444   : > { %v4049_v12 = vadd.f32 %v6979_v16, %v4048_v32 }
 0x446   : > { %v4349_v15 = vadd.f32 %v4298_v21, %v4049_v12 }
 0x448   : > { %v4381_v52 = vmax.f32 %v4349_v15, 0.0  ;;  %v4312_v55 = vpop.f32.mrf.mxu2 }
 0x449   : > { %v4313_v47 = vadd.f32 %v6974_v57, %v4312_v55 }
 0x44a   : > { %4414 = vst.msk [vmem:[%s6994_s30 + $0xb0] sm:$0xff] %vm4391_vm7, %v4381_v52 }
 0x44b   : > { %v4051_v18 = vpop.f32.mrf.mxu1 }
 0x44c   : > { %v4052_v58 = vadd.f32 %v6979_v16, %v4051_v18 }
 0x44e   : > { %v4350_v39 = vadd.f32 %v4301_v19, %v4052_v58 }
 0x450   : > { %v4382_v22 = vmax.f32 %v4350_v39, 0.0  ;;  %v4315_v13 = vpop.f32.mrf.mxu2 }
 0x451   : > { %v4316_v44 = vadd.f32 %v6974_v57, %v4315_v13 }
 0x452   : > { %4415 = vst.msk [vmem:[%s6994_s30 + $0xb8] sm:$0xff] %vm4391_vm7, %v4382_v22 }
 0x453   : > { %v4054_v30 = vpop.f32.mrf.mxu1 }
 0x454   : > { %v4055_v48 = vadd.f32 %v6979_v16, %v4054_v30 }
 0x456   : > { %v4351_v51 = vadd.f32 %v4304_v41, %v4055_v48 }
 0x458   : > { %v4383_v59 = vmax.f32 %v4351_v51, 0.0  ;;  %v4318_v9 = vpop.f32.mrf.mxu2 }
 0x459   : > { %v4319_v0 = vadd.f32 %v6974_v57, %v4318_v9 }
 0x45a   : > { %4416 = vst.msk [vmem:[%s6994_s30 + $0xc0] sm:$0xff] %vm4391_vm7, %v4383_v59 }
 0x45b   : > { %v4057_v27 = vpop.f32.mrf.mxu1 }
 0x45c   : > { %v4058_v34 = vadd.f32 %v6979_v16, %v4057_v27 }
 0x45e   : > { %v4352_v43 = vadd.f32 %v4307_v33, %v4058_v34 }
 0x460   : > { %v4384_v1 = vmax.f32 %v4352_v43, 0.0  ;;  %v4321_v4 = vpop.f32.mrf.mxu2 }
 0x461   : > { %v4322_v31 = vadd.f32 %v6974_v57, %v4321_v4 }
 0x462   : > { %4417 = vst.msk [vmem:[%s6994_s30 + $0xc8] sm:$0xff] %vm4391_vm7, %v4384_v1 }
 0x463   : > { %v4060_v40 = vpop.f32.mrf.mxu1 }
 0x464   : > { %v4061_v14 = vadd.f32 %v6979_v16, %v4060_v40 }
 0x466   : > { %v4353_v28 = vadd.f32 %v4310_v60, %v4061_v14 }
 0x468   : > { %v4385_v26 = vmax.f32 %v4353_v28, 0.0  ;;  %v4324_v53 = vpop.f32.mrf.mxu2 }
 0x469   : > { %v4325_v6 = vadd.f32 %v6974_v57, %v4324_v53 }
 0x46a   : > { %4418 = vst.msk [vmem:[%s6994_s30 + $0xd0] sm:$0xff] %vm4391_vm7, %v4385_v26 }
 0x46b   : > { %v4063_v62 = vpop.f32.mrf.mxu1 }
 0x46c   : > { %v4064_v45 = vadd.f32 %v6979_v16, %v4063_v62 }
 0x46e   : > { %v4354_v46 = vadd.f32 %v4313_v47, %v4064_v45 }
 0x470   : > { %v4386_v49 = vmax.f32 %v4354_v46, 0.0 }
 0x472   : > { %4419 = vst.msk [vmem:[%s6994_s30 + $0xd8] sm:$0xff] %vm4391_vm7, %v4386_v49 }
 0x473   : > { %v4066_v2 = vpop.f32.mrf.mxu1 }
 0x474   : > { %v4067_v54 = vadd.f32 %v6979_v16, %v4066_v2 }
 0x476   : > { %v4355_v61 = vadd.f32 %v4316_v44, %v4067_v54 }
 0x478   : > { %v4387_v7 = vmax.f32 %v4355_v61, 0.0 }
 0x47a   : > { %4420 = vst.msk [vmem:[%s6994_s30 + $0xe0] sm:$0xff] %vm4391_vm7, %v4387_v7 }
 0x47b   : > { %v4069_v17 = vpop.f32.mrf.mxu1 }
 0x47c   : > { %v4070_v29 = vadd.f32 %v6979_v16, %v4069_v17 }
 0x47e   : > { %v4356_v38 = vadd.f32 %v4319_v0, %v4070_v29 }
 0x480   : > { %v4388_v63 = vmax.f32 %v4356_v38, 0.0 }
 0x482   : > { %4421 = vst.msk [vmem:[%s6994_s30 + $0xe8] sm:$0xff] %vm4391_vm7, %v4388_v63 }
 0x483   : > { %v4072_v11 = vpop.f32.mrf.mxu1 }
 0x484   : > { %v4073_v25 = vadd.f32 %v6979_v16, %v4072_v11 }
 0x486   : > { %v4357_v56 = vadd.f32 %v4322_v31, %v4073_v25 }
 0x488   : > { %v4389_v35 = vmax.f32 %v4357_v56, 0.0 }
 0x48a   : > { %4422 = vst.msk [vmem:[%s6994_s30 + $0xf0] sm:$0xff] %vm4391_vm7, %v4389_v35 }
 0x48b   : > { %v4075_v8 = vpop.f32.mrf.mxu1 }
 0x48c   : > { %v4076_v36 = vadd.f32 %v6979_v16, %v4075_v8 }
 0x48e   : > { %v4358_v24 = vadd.f32 %v4325_v6, %v4076_v36 }
 0x490   : > { %v4390_v10 = vmax.f32 %v4358_v24, 0.0 }
 0x492   : > { %4423 = vst.msk [vmem:[%s6994_s30 + $0xf8] sm:$0xff] %vm4391_vm7, %v4390_v10 }
 0x493 PF: > { %s21_s19 = sadd.s32 1, %s5070_s19   ;;  %s7366_s17 = smov %s5066_s18 }
 0x494   : > { %p18_p5 = scmp.ge.s32.totalorder %s21_s19, 4   ;;  %s7367_s18 = smov %s7369_s20 }
 0x496   :  { %20 = sbr.rel (!%p18_p5) target bundleno = 2 (0x2), region = 112 }

</bundles_post_ra>
